<compile_context>
chip_gen: v6e
topology: v6e:2x2x1
jax: 0.10.0
libtpu: 0.0.40
codegen_flags: <defaults>
</compile_context>

<pallas_src>
from functools import partial

import jax
import jax.numpy as jnp
from jax import lax
from jax.experimental import pallas as pl
from jax.experimental.pallas import tpu as pltpu

BETA = 0.9
THRESHOLD = 1.0
LANE = 128


def _round_up(x, m):
    return (x + m - 1) // m * m


def _make_fused_kernel(K, dilation, pad, H, W, Ho1, Wo1, Ho2, Wo2, connect_f):
    if connect_f not in ('ADD', 'AND', 'IAND'):
        raise ValueError(f"unsupported connect_f: {connect_f!r}")
    d = dilation

    def direct_conv(src_s, w_ref, b_ref, acc_s, Ho, Wo):
        # Bias folded into the accumulator init; accumulation lives in VMEM scratch.
        acc_s[...] = jnp.broadcast_to(b_ref[...], acc_s.shape)
        for kh in range(K):
            for kw in range(K):
                patch = src_s[kh * d:kh * d + Ho, kw * d:kw * d + Wo, :]
                acc_s[...] += lax.dot_general(
                    patch, w_ref[kh, kw],
                    dimension_numbers=(((2,), (0,)), ((), ())),
                    preferred_element_type=jnp.float32)

    def leaky(syn, mem_old):
        # snnTorch fast_sigmoid forward is (x > 0), so spikes fire strictly above thr.
        reset = (mem_old > THRESHOLD).astype(jnp.float32)
        sub = reset if THRESHOLD == 1.0 else reset * THRESHOLD
        mem_new = BETA * mem_old + syn - sub
        spk = (mem_new > THRESHOLD).astype(jnp.float32)
        return spk, mem_new

    def kernel(x_ref, w1_ref, b1_ref, w2_ref, b2_ref, mem1_ref, mem2_ref,
               out_ref, mem1o_ref, mem2o_ref,
               xp_s, s1p_s, acc1_s, acc2_s):
        # ---- stage 1: conv1 + Leaky1 (zero-halo built in VMEM, no XLA pad pass) ----
        xp_s[...] = jnp.zeros(xp_s.shape, xp_s.dtype)
        xp_s[pad:pad + H, pad:pad + W, :] = x_ref[0]
        direct_conv(xp_s, w1_ref, b1_ref, acc1_s, Ho1, Wo1)
        spk1, mem1_new = leaky(acc1_s[...], mem1_ref[0])
        mem1o_ref[0] = mem1_new

        # ---- stage 2: conv2 + Leaky2 (spk1 kept in VMEM, never written to HBM) ----
        s1p_s[...] = jnp.zeros(s1p_s.shape, s1p_s.dtype)
        s1p_s[pad:pad + Ho1, pad:pad + Wo1, :] = spk1
        direct_conv(s1p_s, w2_ref, b2_ref, acc2_s, Ho2, Wo2)
        spk2, mem2_new = leaky(acc2_s[...], mem2_ref[0])
        mem2o_ref[0] = mem2_new

        # ---- SEW residual connect ----
        identity = x_ref[0]
        if connect_f == 'ADD':
            out = spk2 + identity
        elif connect_f == 'AND':
            out = spk2 * identity
        else:  # IAND
            out = spk2 * (1.0 - identity)
        out_ref[0] = out

    return kernel


def _forward_impl(x, mem1, mem2, w1, b1, w2, b2, *, kernel_size, dilation, connect_f):
    K = kernel_size
    N, Cin, H, W = x.shape
    Cout = w1.shape[0]
    pad = K // 2 + dilation - 1
    Ho1 = H + 2 * pad - dilation * (K - 1)
    Wo1 = W + 2 * pad - dilation * (K - 1)
    Ho2 = Ho1 + 2 * pad - dilation * (K - 1)
    Wo2 = Wo1 + 2 * pad - dilation * (K - 1)

    # The stride=1 residual connect requires matching channels/spatial shapes
    # (same requirement as the PyTorch module).
    assert Cin == Cout, "stride=1 residual path requires in_channels == out_channels"
    assert (Ho2, Wo2) == (H, W), "conv2 output must match x spatially for the residual"
    assert mem1.shape == (N, Cout, Ho1, Wo1)
    assert mem2.shape == (N, Cout, Ho2, Wo2)

    Cp = _round_up(max(Cin, Cout), LANE)     # lane-dense channel count

    to_nhwc = lambda a: jnp.transpose(a, (0, 2, 3, 1))

    def padc(a):
        return jnp.pad(a, ((0, 0),) * (a.ndim - 1) + ((0, Cp - a.shape[-1]),))

    # NCHW -> NHWC + channel pad (layout plumbing fused by XLA inside the jit;
    # at real SEW-ResNet widths 128/256/512 the channel pad is a no-op).
    x_p = padc(to_nhwc(x).astype(jnp.float32))
    m1_p = padc(to_nhwc(mem1).astype(jnp.float32))
    m2_p = padc(to_nhwc(mem2).astype(jnp.float32))

    def prep_w(w):                                          # OIHW -> HWIO, pad channels
        w = jnp.transpose(w, (2, 3, 1, 0)).astype(jnp.float32)
        return jnp.pad(w, ((0, 0), (0, 0),
                           (0, Cp - w.shape[2]), (0, Cp - w.shape[3])))

    w1_p, w2_p = prep_w(w1), prep_w(w2)
    b1_p = jnp.pad(b1.astype(jnp.float32), (0, Cp - Cout)).reshape(1, Cp)
    b2_p = jnp.pad(b2.astype(jnp.float32), (0, Cp - Cout)).reshape(1, Cp)

    kernel = _make_fused_kernel(K, dilation, pad, H, W, Ho1, Wo1, Ho2, Wo2, connect_f)

    in_specs = [
        pl.BlockSpec((1, H, W, Cp), lambda b: (b, 0, 0, 0)),        # x
        pl.BlockSpec((K, K, Cp, Cp), lambda b: (0, 0, 0, 0)),       # w1
        pl.BlockSpec((1, Cp), lambda b: (0, 0)),                    # b1
        pl.BlockSpec((K, K, Cp, Cp), lambda b: (0, 0, 0, 0)),       # w2
        pl.BlockSpec((1, Cp), lambda b: (0, 0)),                    # b2
        pl.BlockSpec((1, Ho1, Wo1, Cp), lambda b: (b, 0, 0, 0)),    # mem1
        pl.BlockSpec((1, Ho2, Wo2, Cp), lambda b: (b, 0, 0, 0)),    # mem2
    ]
    out_specs = (
        pl.BlockSpec((1, Ho2, Wo2, Cp), lambda b: (b, 0, 0, 0)),    # out
        pl.BlockSpec((1, Ho1, Wo1, Cp), lambda b: (b, 0, 0, 0)),    # mem1'
        pl.BlockSpec((1, Ho2, Wo2, Cp), lambda b: (b, 0, 0, 0)),    # mem2'
    )
    out_shape = (
        jax.ShapeDtypeStruct((N, Ho2, Wo2, Cp), jnp.float32),
        jax.ShapeDtypeStruct((N, Ho1, Wo1, Cp), jnp.float32),
        jax.ShapeDtypeStruct((N, Ho2, Wo2, Cp), jnp.float32),
    )
    scratch_shapes = [
        pltpu.VMEM((H + 2 * pad, W + 2 * pad, Cp), jnp.float32),       # padded x
        pltpu.VMEM((Ho1 + 2 * pad, Wo1 + 2 * pad, Cp), jnp.float32),   # padded spk1
        pltpu.VMEM((Ho1, Wo1, Cp), jnp.float32),                       # conv1 acc
        pltpu.VMEM((Ho2, Wo2, Cp), jnp.float32),                       # conv2 acc
    ]

    out_p, m1n_p, m2n_p = pl.pallas_call(
        kernel,
        grid=(N,),
        in_specs=in_specs,
        out_specs=out_specs,
        out_shape=out_shape,
        scratch_shapes=scratch_shapes,
        input_output_aliases={5: 1, 6: 2},          # mem1 -> mem1', mem2 -> mem2'
        compiler_params=pltpu.CompilerParams(dimension_semantics=("parallel",)),
    )(x_p, w1_p, b1_p, w2_p, b2_p, m1_p, m2_p)

    to_nchw = lambda a: jnp.transpose(a[..., :Cout], (0, 3, 1, 2))
    return to_nchw(out_p), to_nchw(m1n_p), to_nchw(m2n_p)


@partial(jax.jit, static_argnames=('kernel_size', 'dilation', 'connect_f'))
def sew_bottleneck_forward(x_nchw, mem_1, mem_2, params, mem_d=None, *,
                           kernel_size, dilation=1, connect_f='ADD'):
    """SEWBottleneck.forward, stride=1 path (downsample branch absent => mem_d is None)."""
    # TODO(synk): stride > 1 branch (downsample_conv + downsample_spike / mem_d) not implemented.
    assert connect_f in ('ADD', 'AND', 'IAND')
    out, m1, m2 = _forward_impl(x_nchw, mem_1, mem_2,
                                params['w1'], params['b1'],
                                params['w2'], params['b2'],
                                kernel_size=kernel_size, dilation=dilation,
                                connect_f=connect_f)
    return out, m1, m2, None


# ----------------------------- pure-JAX reference ----------------------------
def _ref_leaky(inp, mem):
    reset = (mem > THRESHOLD).astype(jnp.float32)
    mem_new = BETA * mem + inp - reset * THRESHOLD
    spk = (mem_new > THRESHOLD).astype(jnp.float32)
    return spk, mem_new


def _ref_forward(x, mem1, mem2, params, *, kernel_size, dilation, connect_f):
    pad = kernel_size // 2 + dilation - 1
    conv = lambda a, w, b: lax.conv_general_dilated(
        a, w, window_strides=(1, 1), padding=[(pad, pad), (pad, pad)],
        rhs_dilation=(dilation, dilation),
        dimension_numbers=('NCHW', 'OIHW', 'NCHW')) + b[None, :, None, None]
    y = conv(x, params['w1'], params['b1'])
    s1, m1 = _ref_leaky(y, mem1)
    y = conv(s1, params['w2'], params['b2'])
    s2, m2 = _ref_leaky(y, mem2)
    if connect_f == 'ADD':
        out = s2 + x
    elif connect_f == 'AND':
        out = s2 * x
    else:
        out = s2 * (1.0 - x)
    return out, m1, m2


if __name__ == "__main__":
    N, C, H, W, K = 2, 4, 16, 16, 3
    dilation = 1

    key = jax.random.PRNGKey(0)
    k1, k2, k3, k4, k5, k6, k7 = jax.random.split(key, 7)

    fan_in = C * K * K
    bound = 1.0 / jnp.sqrt(float(fan_in))
    params = {
        'w1': jax.random.uniform(k1, (C, C, K, K), jnp.float32, -bound, bound),
        'b1': jax.random.uniform(k2, (C,), jnp.float32, -bound, bound),
        'w2': jax.random.uniform(k3, (C, C, K, K), jnp.float32, -bound, bound),
        'b2': jax.random.uniform(k4, (C,), jnp.float32, -bound, bound),
    }

    x = jax.random.normal(k5, (N, C, H, W), jnp.float32) * 2.0
    mem1 = jax.random.uniform(k6, (N, C, H, W), jnp.float32, 0.0, 1.5)
    mem2 = jax.random.uniform(k7, (N, C, H, W), jnp.float32, 0.0, 1.5)

    for connect_f in ('ADD', 'AND', 'IAND'):
        out, m1, m2, m_d = jax.block_until_ready(
            sew_bottleneck_forward(x, mem1, mem2, params,
                                   kernel_size=K, dilation=dilation,
                                   connect_f=connect_f))
        ref_out, ref_m1, ref_m2 = _ref_forward(x, mem1, mem2, params,
                                               kernel_size=K, dilation=dilation,
                                               connect_f=connect_f)
        assert out.shape == (N, C, H, W)
        assert m1.shape == mem1.shape and m2.shape == mem2.shape and m_d is None
        assert jnp.allclose(out, ref_out, atol=1e-3), f"{connect_f}: output mismatch"
        assert jnp.allclose(m1, ref_m1, atol=1e-3), f"{connect_f}: mem_1 mismatch"
        assert jnp.allclose(m2, ref_m2, atol=1e-3), f"{connect_f}: mem_2 mismatch"

    print("KERNEL_OK")
</pallas_src>

<mosaic_0001>
module attributes {stable_mosaic.version = 11 : i64} {
  func.func @kernel(%arg0: i32, %arg1: memref<1x16x16x128xf32, #tpu.memory_space<vmem>>, %arg2: memref<3x3x128x128xf32, #tpu.memory_space<vmem>>, %arg3: memref<1x128xf32, #tpu.memory_space<vmem>>, %arg4: memref<3x3x128x128xf32, #tpu.memory_space<vmem>>, %arg5: memref<1x128xf32, #tpu.memory_space<vmem>>, %arg6: memref<1x16x16x128xf32, #tpu.memory_space<vmem>>, %arg7: memref<1x16x16x128xf32, #tpu.memory_space<vmem>>, %arg8: memref<1x16x16x128xf32, #tpu.memory_space<vmem>>, %arg9: memref<1x16x16x128xf32, #tpu.memory_space<vmem>>, %arg10: memref<1x16x16x128xf32, #tpu.memory_space<vmem>>, %arg11: memref<18x18x128xf32, #tpu.memory_space<vmem>>, %arg12: memref<18x18x128xf32, #tpu.memory_space<vmem>>, %arg13: memref<16x16x128xf32, #tpu.memory_space<vmem>>, %arg14: memref<16x16x128xf32, #tpu.memory_space<vmem>>) attributes {dimension_semantics = [#tpu.dimension_semantics<parallel>], iteration_bounds = array<i64: 2>, scalar_prefetch = 0 : i64, scratch_operands = 4 : i64, tpu.core_type = #tpu.core_type<tc>, window_params = [{transform_indices = @transform_0, window_bounds = array<i64: 1, 16, 16, 128>}, {pipeline_mode = #tpu.pipeline_mode<synchronous>, transform_indices = @transform_1, window_bounds = array<i64: 3, 3, 128, 128>}, {pipeline_mode = #tpu.pipeline_mode<synchronous>, transform_indices = @transform_2, window_bounds = array<i64: 1, 128>}, {pipeline_mode = #tpu.pipeline_mode<synchronous>, transform_indices = @transform_3, window_bounds = array<i64: 3, 3, 128, 128>}, {pipeline_mode = #tpu.pipeline_mode<synchronous>, transform_indices = @transform_4, window_bounds = array<i64: 1, 128>}, {transform_indices = @transform_5, window_bounds = array<i64: 1, 16, 16, 128>}, {transform_indices = @transform_6, window_bounds = array<i64: 1, 16, 16, 128>}, {transform_indices = @transform_7, window_bounds = array<i64: 1, 16, 16, 128>}, {transform_indices = @transform_8, window_bounds = array<i64: 1, 16, 16, 128>}, {transform_indices = @transform_9, window_bounds = array<i64: 1, 16, 16, 128>}]} {
    %cst = arith.constant 0.000000e+00 : f32
    %0 = vector.broadcast %cst : f32 to vector<18x18x128xf32>
    %c0 = arith.constant 0 : index
    %c0_0 = arith.constant 0 : index
    %c0_1 = arith.constant 0 : index
    %1 = vector.load %arg11[%c0, %c0_0, %c0_1] : memref<18x18x128xf32, #tpu.memory_space<vmem>>, vector<18x18x128xf32>
    tpu.vector_store %arg11[%c0, %c0_0, %c0_1], %0 {strides = array<i32>} : memref<18x18x128xf32, #tpu.memory_space<vmem>>, vector<18x18x128xf32>,
    %c0_2 = arith.constant 0 : index
    %c0_3 = arith.constant 0 : index
    %c0_4 = arith.constant 0 : index
    %c0_5 = arith.constant 0 : index
    %2 = vector.load %arg1[%c0_2, %c0_3, %c0_4, %c0_5] : memref<1x16x16x128xf32, #tpu.memory_space<vmem>>, vector<1x16x16x128xf32>
    %3 = vector.shape_cast %2 : vector<1x16x16x128xf32> to vector<16x16x128xf32>
    %c1 = arith.constant 1 : index
    %c1_6 = arith.constant 1 : index
    %c0_7 = arith.constant 0 : index
    %4 = vector.load %arg11[%c1, %c1_6, %c0_7] : memref<18x18x128xf32, #tpu.memory_space<vmem>>, vector<16x16x128xf32>
    tpu.vector_store %arg11[%c1, %c1_6, %c0_7], %3 {strides = array<i32>} : memref<18x18x128xf32, #tpu.memory_space<vmem>>, vector<16x16x128xf32>,
    %c0_8 = arith.constant 0 : index
    %c0_9 = arith.constant 0 : index
    %5 = vector.load %arg3[%c0_8, %c0_9] : memref<1x128xf32, #tpu.memory_space<vmem>>, vector<1x128xf32>
    %6 = vector.shape_cast %5 : vector<1x128xf32> to vector<1x1x128xf32>
    %7 = vector.broadcast %6 : vector<1x1x128xf32> to vector<16x16x128xf32>
    %c0_10 = arith.constant 0 : index
    %c0_11 = arith.constant 0 : index
    %c0_12 = arith.constant 0 : index
    %8 = vector.load %arg13[%c0_10, %c0_11, %c0_12] : memref<16x16x128xf32, #tpu.memory_space<vmem>>, vector<16x16x128xf32>
    tpu.vector_store %arg13[%c0_10, %c0_11, %c0_12], %7 {strides = array<i32>} : memref<16x16x128xf32, #tpu.memory_space<vmem>>, vector<16x16x128xf32>,
    %c0_13 = arith.constant 0 : index
    %c0_14 = arith.constant 0 : index
    %c0_15 = arith.constant 0 : index
    %9 = vector.load %arg11[%c0_13, %c0_14, %c0_15] : memref<18x18x128xf32, #tpu.memory_space<vmem>>, vector<16x16x128xf32>
    %c0_16 = arith.constant 0 : index
    %c0_17 = arith.constant 0 : index
    %c0_18 = arith.constant 0 : index
    %10 = vector.load %arg13[%c0_16, %c0_17, %c0_18] : memref<16x16x128xf32, #tpu.memory_space<vmem>>, vector<16x16x128xf32>
    %c0_19 = arith.constant 0 : index
    %c0_20 = arith.constant 0 : index
    %c0_21 = arith.constant 0 : index
    %c0_22 = arith.constant 0 : index
    %11 = vector.load %arg2[%c0_19, %c0_20, %c0_21, %c0_22] : memref<3x3x128x128xf32, #tpu.memory_space<vmem>>, vector<1x1x128x128xf32>
    %12 = vector.shape_cast %11 : vector<1x1x128x128xf32> to vector<128x128xf32>
    %cst_23 = arith.constant dense<0.000000e+00> : vector<16x16x128xf32>
    %13 = tpu.matmul %9, %12, %cst_23 {dimension_numbers = #tpu.dot_dimension_numbers<[2], [0], [0, 1], [1], [0, 0, 0, 1, 1, 1], [], []>} : vector<16x16x128xf32>, vector<128x128xf32>, vector<16x16x128xf32> -> vector<16x16x128xf32>
    %14 = arith.addf %10, %13 : vector<16x16x128xf32>
    %c0_24 = arith.constant 0 : index
    %c0_25 = arith.constant 0 : index
    %c0_26 = arith.constant 0 : index
    %15 = vector.load %arg13[%c0_24, %c0_25, %c0_26] : memref<16x16x128xf32, #tpu.memory_space<vmem>>, vector<16x16x128xf32>
    tpu.vector_store %arg13[%c0_24, %c0_25, %c0_26], %14 {strides = array<i32>} : memref<16x16x128xf32, #tpu.memory_space<vmem>>, vector<16x16x128xf32>,
    %c0_27 = arith.constant 0 : index
    %c1_28 = arith.constant 1 : index
    %c0_29 = arith.constant 0 : index
    %16 = vector.load %arg11[%c0_27, %c1_28, %c0_29] : memref<18x18x128xf32, #tpu.memory_space<vmem>>, vector<16x16x128xf32>
    %c0_30 = arith.constant 0 : index
    %c0_31 = arith.constant 0 : index
    %c0_32 = arith.constant 0 : index
    %17 = vector.load %arg13[%c0_30, %c0_31, %c0_32] : memref<16x16x128xf32, #tpu.memory_space<vmem>>, vector<16x16x128xf32>
    %c0_33 = arith.constant 0 : index
    %c1_34 = arith.constant 1 : index
    %c0_35 = arith.constant 0 : index
    %c0_36 = arith.constant 0 : index
    %18 = vector.load %arg2[%c0_33, %c1_34, %c0_35, %c0_36] : memref<3x3x128x128xf32, #tpu.memory_space<vmem>>, vector<1x1x128x128xf32>
    %19 = vector.shape_cast %18 : vector<1x1x128x128xf32> to vector<128x128xf32>
    %cst_37 = arith.constant dense<0.000000e+00> : vector<16x16x128xf32>
    %20 = tpu.matmul %16, %19, %cst_37 {dimension_numbers = #tpu.dot_dimension_numbers<[2], [0], [0, 1], [1], [0, 0, 0, 1, 1, 1], [], []>} : vector<16x16x128xf32>, vector<128x128xf32>, vector<16x16x128xf32> -> vector<16x16x128xf32>
    %21 = arith.addf %17, %20 : vector<16x16x128xf32>
    %c0_38 = arith.constant 0 : index
    %c0_39 = arith.constant 0 : index
    %c0_40 = arith.constant 0 : index
    %22 = vector.load %arg13[%c0_38, %c0_39, %c0_40] : memref<16x16x128xf32, #tpu.memory_space<vmem>>, vector<16x16x128xf32>
    tpu.vector_store %arg13[%c0_38, %c0_39, %c0_40], %21 {strides = array<i32>} : memref<16x16x128xf32, #tpu.memory_space<vmem>>, vector<16x16x128xf32>,
    %c0_41 = arith.constant 0 : index
    %c2 = arith.constant 2 : index
    %c0_42 = arith.constant 0 : index
    %23 = vector.load %arg11[%c0_41, %c2, %c0_42] : memref<18x18x128xf32, #tpu.memory_space<vmem>>, vector<16x16x128xf32>
    %c0_43 = arith.constant 0 : index
    %c0_44 = arith.constant 0 : index
    %c0_45 = arith.constant 0 : index
    %24 = vector.load %arg13[%c0_43, %c0_44, %c0_45] : memref<16x16x128xf32, #tpu.memory_space<vmem>>, vector<16x16x128xf32>
    %c0_46 = arith.constant 0 : index
    %c2_47 = arith.constant 2 : index
    %c0_48 = arith.constant 0 : index
    %c0_49 = arith.constant 0 : index
    %25 = vector.load %arg2[%c0_46, %c2_47, %c0_48, %c0_49] : memref<3x3x128x128xf32, #tpu.memory_space<vmem>>, vector<1x1x128x128xf32>
    %26 = vector.shape_cast %25 : vector<1x1x128x128xf32> to vector<128x128xf32>
    %cst_50 = arith.constant dense<0.000000e+00> : vector<16x16x128xf32>
    %27 = tpu.matmul %23, %26, %cst_50 {dimension_numbers = #tpu.dot_dimension_numbers<[2], [0], [0, 1], [1], [0, 0, 0, 1, 1, 1], [], []>} : vector<16x16x128xf32>, vector<128x128xf32>, vector<16x16x128xf32> -> vector<16x16x128xf32>
    %28 = arith.addf %24, %27 : vector<16x16x128xf32>
    %c0_51 = arith.constant 0 : index
    %c0_52 = arith.constant 0 : index
    %c0_53 = arith.constant 0 : index
    %29 = vector.load %arg13[%c0_51, %c0_52, %c0_53] : memref<16x16x128xf32, #tpu.memory_space<vmem>>, vector<16x16x128xf32>
    tpu.vector_store %arg13[%c0_51, %c0_52, %c0_53], %28 {strides = array<i32>} : memref<16x16x128xf32, #tpu.memory_space<vmem>>, vector<16x16x128xf32>,
    %c1_54 = arith.constant 1 : index
    %c0_55 = arith.constant 0 : index
    %c0_56 = arith.constant 0 : index
    %30 = vector.load %arg11[%c1_54, %c0_55, %c0_56] : memref<18x18x128xf32, #tpu.memory_space<vmem>>, vector<16x16x128xf32>
    %c0_57 = arith.constant 0 : index
    %c0_58 = arith.constant 0 : index
    %c0_59 = arith.constant 0 : index
    %31 = vector.load %arg13[%c0_57, %c0_58, %c0_59] : memref<16x16x128xf32, #tpu.memory_space<vmem>>, vector<16x16x128xf32>
    %c1_60 = arith.constant 1 : index
    %c0_61 = arith.constant 0 : index
    %c0_62 = arith.constant 0 : index
    %c0_63 = arith.constant 0 : index
    %32 = vector.load %arg2[%c1_60, %c0_61, %c0_62, %c0_63] : memref<3x3x128x128xf32, #tpu.memory_space<vmem>>, vector<1x1x128x128xf32>
    %33 = vector.shape_cast %32 : vector<1x1x128x128xf32> to vector<128x128xf32>
    %cst_64 = arith.constant dense<0.000000e+00> : vector<16x16x128xf32>
    %34 = tpu.matmul %30, %33, %cst_64 {dimension_numbers = #tpu.dot_dimension_numbers<[2], [0], [0, 1], [1], [0, 0, 0, 1, 1, 1], [], []>} : vector<16x16x128xf32>, vector<128x128xf32>, vector<16x16x128xf32> -> vector<16x16x128xf32>
    %35 = arith.addf %31, %34 : vector<16x16x128xf32>
    %c0_65 = arith.constant 0 : index
    %c0_66 = arith.constant 0 : index
    %c0_67 = arith.constant 0 : index
    %36 = vector.load %arg13[%c0_65, %c0_66, %c0_67] : memref<16x16x128xf32, #tpu.memory_space<vmem>>, vector<16x16x128xf32>
    tpu.vector_store %arg13[%c0_65, %c0_66, %c0_67], %35 {strides = array<i32>} : memref<16x16x128xf32, #tpu.memory_space<vmem>>, vector<16x16x128xf32>,
    %c1_68 = arith.constant 1 : index
    %c1_69 = arith.constant 1 : index
    %c0_70 = arith.constant 0 : index
    %37 = vector.load %arg11[%c1_68, %c1_69, %c0_70] : memref<18x18x128xf32, #tpu.memory_space<vmem>>, vector<16x16x128xf32>
    %c0_71 = arith.constant 0 : index
    %c0_72 = arith.constant 0 : index
    %c0_73 = arith.constant 0 : index
    %38 = vector.load %arg13[%c0_71, %c0_72, %c0_73] : memref<16x16x128xf32, #tpu.memory_space<vmem>>, vector<16x16x128xf32>
    %c1_74 = arith.constant 1 : index
    %c1_75 = arith.constant 1 : index
    %c0_76 = arith.constant 0 : index
    %c0_77 = arith.constant 0 : index
    %39 = vector.load %arg2[%c1_74, %c1_75, %c0_76, %c0_77] : memref<3x3x128x128xf32, #tpu.memory_space<vmem>>, vector<1x1x128x128xf32>
    %40 = vector.shape_cast %39 : vector<1x1x128x128xf32> to vector<128x128xf32>
    %cst_78 = arith.constant dense<0.000000e+00> : vector<16x16x128xf32>
    %41 = tpu.matmul %37, %40, %cst_78 {dimension_numbers = #tpu.dot_dimension_numbers<[2], [0], [0, 1], [1], [0, 0, 0, 1, 1, 1], [], []>} : vector<16x16x128xf32>, vector<128x128xf32>, vector<16x16x128xf32> -> vector<16x16x128xf32>
    %42 = arith.addf %38, %41 : vector<16x16x128xf32>
    %c0_79 = arith.constant 0 : index
    %c0_80 = arith.constant 0 : index
    %c0_81 = arith.constant 0 : index
    %43 = vector.load %arg13[%c0_79, %c0_80, %c0_81] : memref<16x16x128xf32, #tpu.memory_space<vmem>>, vector<16x16x128xf32>
    tpu.vector_store %arg13[%c0_79, %c0_80, %c0_81], %42 {strides = array<i32>} : memref<16x16x128xf32, #tpu.memory_space<vmem>>, vector<16x16x128xf32>,
    %c1_82 = arith.constant 1 : index
    %c2_83 = arith.constant 2 : index
    %c0_84 = arith.constant 0 : index
    %44 = vector.load %arg11[%c1_82, %c2_83, %c0_84] : memref<18x18x128xf32, #tpu.memory_space<vmem>>, vector<16x16x128xf32>
    %c0_85 = arith.constant 0 : index
    %c0_86 = arith.constant 0 : index
    %c0_87 = arith.constant 0 : index
    %45 = vector.load %arg13[%c0_85, %c0_86, %c0_87] : memref<16x16x128xf32, #tpu.memory_space<vmem>>, vector<16x16x128xf32>
    %c1_88 = arith.constant 1 : index
    %c2_89 = arith.constant 2 : index
    %c0_90 = arith.constant 0 : index
    %c0_91 = arith.constant 0 : index
    %46 = vector.load %arg2[%c1_88, %c2_89, %c0_90, %c0_91] : memref<3x3x128x128xf32, #tpu.memory_space<vmem>>, vector<1x1x128x128xf32>
    %47 = vector.shape_cast %46 : vector<1x1x128x128xf32> to vector<128x128xf32>
    %cst_92 = arith.constant dense<0.000000e+00> : vector<16x16x128xf32>
    %48 = tpu.matmul %44, %47, %cst_92 {dimension_numbers = #tpu.dot_dimension_numbers<[2], [0], [0, 1], [1], [0, 0, 0, 1, 1, 1], [], []>} : vector<16x16x128xf32>, vector<128x128xf32>, vector<16x16x128xf32> -> vector<16x16x128xf32>
    %49 = arith.addf %45, %48 : vector<16x16x128xf32>
    %c0_93 = arith.constant 0 : index
    %c0_94 = arith.constant 0 : index
    %c0_95 = arith.constant 0 : index
    %50 = vector.load %arg13[%c0_93, %c0_94, %c0_95] : memref<16x16x128xf32, #tpu.memory_space<vmem>>, vector<16x16x128xf32>
    tpu.vector_store %arg13[%c0_93, %c0_94, %c0_95], %49 {strides = array<i32>} : memref<16x16x128xf32, #tpu.memory_space<vmem>>, vector<16x16x128xf32>,
    %c2_96 = arith.constant 2 : index
    %c0_97 = arith.constant 0 : index
    %c0_98 = arith.constant 0 : index
    %51 = vector.load %arg11[%c2_96, %c0_97, %c0_98] : memref<18x18x128xf32, #tpu.memory_space<vmem>>, vector<16x16x128xf32>
    %c0_99 = arith.constant 0 : index
    %c0_100 = arith.constant 0 : index
    %c0_101 = arith.constant 0 : index
    %52 = vector.load %arg13[%c0_99, %c0_100, %c0_101] : memref<16x16x128xf32, #tpu.memory_space<vmem>>, vector<16x16x128xf32>
    %c2_102 = arith.constant 2 : index
    %c0_103 = arith.constant 0 : index
    %c0_104 = arith.constant 0 : index
    %c0_105 = arith.constant 0 : index
    %53 = vector.load %arg2[%c2_102, %c0_103, %c0_104, %c0_105] : memref<3x3x128x128xf32, #tpu.memory_space<vmem>>, vector<1x1x128x128xf32>
    %54 = vector.shape_cast %53 : vector<1x1x128x128xf32> to vector<128x128xf32>
    %cst_106 = arith.constant dense<0.000000e+00> : vector<16x16x128xf32>
    %55 = tpu.matmul %51, %54, %cst_106 {dimension_numbers = #tpu.dot_dimension_numbers<[2], [0], [0, 1], [1], [0, 0, 0, 1, 1, 1], [], []>} : vector<16x16x128xf32>, vector<128x128xf32>, vector<16x16x128xf32> -> vector<16x16x128xf32>
    %56 = arith.addf %52, %55 : vector<16x16x128xf32>
    %c0_107 = arith.constant 0 : index
    %c0_108 = arith.constant 0 : index
    %c0_109 = arith.constant 0 : index
    %57 = vector.load %arg13[%c0_107, %c0_108, %c0_109] : memref<16x16x128xf32, #tpu.memory_space<vmem>>, vector<16x16x128xf32>
    tpu.vector_store %arg13[%c0_107, %c0_108, %c0_109], %56 {strides = array<i32>} : memref<16x16x128xf32, #tpu.memory_space<vmem>>, vector<16x16x128xf32>,
    %c2_110 = arith.constant 2 : index
    %c1_111 = arith.constant 1 : index
    %c0_112 = arith.constant 0 : index
    %58 = vector.load %arg11[%c2_110, %c1_111, %c0_112] : memref<18x18x128xf32, #tpu.memory_space<vmem>>, vector<16x16x128xf32>
    %c0_113 = arith.constant 0 : index
    %c0_114 = arith.constant 0 : index
    %c0_115 = arith.constant 0 : index
    %59 = vector.load %arg13[%c0_113, %c0_114, %c0_115] : memref<16x16x128xf32, #tpu.memory_space<vmem>>, vector<16x16x128xf32>
    %c2_116 = arith.constant 2 : index
    %c1_117 = arith.constant 1 : index
    %c0_118 = arith.constant 0 : index
    %c0_119 = arith.constant 0 : index
    %60 = vector.load %arg2[%c2_116, %c1_117, %c0_118, %c0_119] : memref<3x3x128x128xf32, #tpu.memory_space<vmem>>, vector<1x1x128x128xf32>
    %61 = vector.shape_cast %60 : vector<1x1x128x128xf32> to vector<128x128xf32>
    %cst_120 = arith.constant dense<0.000000e+00> : vector<16x16x128xf32>
    %62 = tpu.matmul %58, %61, %cst_120 {dimension_numbers = #tpu.dot_dimension_numbers<[2], [0], [0, 1], [1], [0, 0, 0, 1, 1, 1], [], []>} : vector<16x16x128xf32>, vector<128x128xf32>, vector<16x16x128xf32> -> vector<16x16x128xf32>
    %63 = arith.addf %59, %62 : vector<16x16x128xf32>
    %c0_121 = arith.constant 0 : index
    %c0_122 = arith.constant 0 : index
    %c0_123 = arith.constant 0 : index
    %64 = vector.load %arg13[%c0_121, %c0_122, %c0_123] : memref<16x16x128xf32, #tpu.memory_space<vmem>>, vector<16x16x128xf32>
    tpu.vector_store %arg13[%c0_121, %c0_122, %c0_123], %63 {strides = array<i32>} : memref<16x16x128xf32, #tpu.memory_space<vmem>>, vector<16x16x128xf32>,
    %c2_124 = arith.constant 2 : index
    %c2_125 = arith.constant 2 : index
    %c0_126 = arith.constant 0 : index
    %65 = vector.load %arg11[%c2_124, %c2_125, %c0_126] : memref<18x18x128xf32, #tpu.memory_space<vmem>>, vector<16x16x128xf32>
    %c0_127 = arith.constant 0 : index
    %c0_128 = arith.constant 0 : index
    %c0_129 = arith.constant 0 : index
    %66 = vector.load %arg13[%c0_127, %c0_128, %c0_129] : memref<16x16x128xf32, #tpu.memory_space<vmem>>, vector<16x16x128xf32>
    %c2_130 = arith.constant 2 : index
    %c2_131 = arith.constant 2 : index
    %c0_132 = arith.constant 0 : index
    %c0_133 = arith.constant 0 : index
    %67 = vector.load %arg2[%c2_130, %c2_131, %c0_132, %c0_133] : memref<3x3x128x128xf32, #tpu.memory_space<vmem>>, vector<1x1x128x128xf32>
    %68 = vector.shape_cast %67 : vector<1x1x128x128xf32> to vector<128x128xf32>
    %cst_134 = arith.constant dense<0.000000e+00> : vector<16x16x128xf32>
    %69 = tpu.matmul %65, %68, %cst_134 {dimension_numbers = #tpu.dot_dimension_numbers<[2], [0], [0, 1], [1], [0, 0, 0, 1, 1, 1], [], []>} : vector<16x16x128xf32>, vector<128x128xf32>, vector<16x16x128xf32> -> vector<16x16x128xf32>
    %70 = arith.addf %66, %69 : vector<16x16x128xf32>
    %c0_135 = arith.constant 0 : index
    %c0_136 = arith.constant 0 : index
    %c0_137 = arith.constant 0 : index
    %71 = vector.load %arg13[%c0_135, %c0_136, %c0_137] : memref<16x16x128xf32, #tpu.memory_space<vmem>>, vector<16x16x128xf32>
    tpu.vector_store %arg13[%c0_135, %c0_136, %c0_137], %70 {strides = array<i32>} : memref<16x16x128xf32, #tpu.memory_space<vmem>>, vector<16x16x128xf32>,
    %c0_138 = arith.constant 0 : index
    %c0_139 = arith.constant 0 : index
    %c0_140 = arith.constant 0 : index
    %72 = vector.load %arg13[%c0_138, %c0_139, %c0_140] : memref<16x16x128xf32, #tpu.memory_space<vmem>>, vector<16x16x128xf32>
    %c0_141 = arith.constant 0 : index
    %c0_142 = arith.constant 0 : index
    %c0_143 = arith.constant 0 : index
    %c0_144 = arith.constant 0 : index
    %73 = vector.load %arg6[%c0_141, %c0_142, %c0_143, %c0_144] : memref<1x16x16x128xf32, #tpu.memory_space<vmem>>, vector<1x16x16x128xf32>
    %74 = vector.shape_cast %73 : vector<1x16x16x128xf32> to vector<16x16x128xf32>
    %cst_145 = arith.constant 1.000000e+00 : f32
    %75 = vector.broadcast %cst_145 : f32 to vector<16x16x128xf32>
    %76 = arith.cmpf ogt, %74, %75 : vector<16x16x128xf32>
    %77 = arith.extui %76 : vector<16x16x128xi1> to vector<16x16x128xi32>
    %78 = arith.sitofp %77 : vector<16x16x128xi32> to vector<16x16x128xf32>
    %cst_146 = arith.constant 0.899999976 : f32
    %79 = vector.broadcast %cst_146 : f32 to vector<16x16x128xf32>
    %80 = arith.mulf %79, %74 : vector<16x16x128xf32>
    %81 = arith.addf %80, %72 : vector<16x16x128xf32>
    %82 = arith.subf %81, %78 : vector<16x16x128xf32>
    %cst_147 = arith.constant 1.000000e+00 : f32
    %83 = vector.broadcast %cst_147 : f32 to vector<16x16x128xf32>
    %84 = arith.cmpf ogt, %82, %83 : vector<16x16x128xf32>
    %85 = arith.extui %84 : vector<16x16x128xi1> to vector<16x16x128xi32>
    %86 = arith.sitofp %85 : vector<16x16x128xi32> to vector<16x16x128xf32>
    %c0_148 = arith.constant 0 : index
    %c0_149 = arith.constant 0 : index
    %c0_150 = arith.constant 0 : index
    %c0_151 = arith.constant 0 : index
    %87 = vector.load %arg9[%c0_148, %c0_149, %c0_150, %c0_151] : memref<1x16x16x128xf32, #tpu.memory_space<vmem>>, vector<1x16x16x128xf32>
    %88 = vector.shape_cast %87 : vector<1x16x16x128xf32> to vector<16x16x128xf32>
    %89 = vector.shape_cast %82 : vector<16x16x128xf32> to vector<1x16x16x128xf32>
    tpu.vector_store %arg9[%c0_148, %c0_149, %c0_150, %c0_151], %89 {strides = array<i32>} : memref<1x16x16x128xf32, #tpu.memory_space<vmem>>, vector<1x16x16x128xf32>,
    %cst_152 = arith.constant 0.000000e+00 : f32
    %90 = vector.broadcast %cst_152 : f32 to vector<18x18x128xf32>
    %c0_153 = arith.constant 0 : index
    %c0_154 = arith.constant 0 : index
    %c0_155 = arith.constant 0 : index
    %91 = vector.load %arg12[%c0_153, %c0_154, %c0_155] : memref<18x18x128xf32, #tpu.memory_space<vmem>>, vector<18x18x128xf32>
    tpu.vector_store %arg12[%c0_153, %c0_154, %c0_155], %90 {strides = array<i32>} : memref<18x18x128xf32, #tpu.memory_space<vmem>>, vector<18x18x128xf32>,
    %c1_156 = arith.constant 1 : index
    %c1_157 = arith.constant 1 : index
    %c0_158 = arith.constant 0 : index
    %92 = vector.load %arg12[%c1_156, %c1_157, %c0_158] : memref<18x18x128xf32, #tpu.memory_space<vmem>>, vector<16x16x128xf32>
    tpu.vector_store %arg12[%c1_156, %c1_157, %c0_158], %86 {strides = array<i32>} : memref<18x18x128xf32, #tpu.memory_space<vmem>>, vector<16x16x128xf32>,
    %c0_159 = arith.constant 0 : index
    %c0_160 = arith.constant 0 : index
    %93 = vector.load %arg5[%c0_159, %c0_160] : memref<1x128xf32, #tpu.memory_space<vmem>>, vector<1x128xf32>
    %94 = vector.shape_cast %93 : vector<1x128xf32> to vector<1x1x128xf32>
    %95 = vector.broadcast %94 : vector<1x1x128xf32> to vector<16x16x128xf32>
    %c0_161 = arith.constant 0 : index
    %c0_162 = arith.constant 0 : index
    %c0_163 = arith.constant 0 : index
    %96 = vector.load %arg14[%c0_161, %c0_162, %c0_163] : memref<16x16x128xf32, #tpu.memory_space<vmem>>, vector<16x16x128xf32>
    tpu.vector_store %arg14[%c0_161, %c0_162, %c0_163], %95 {strides = array<i32>} : memref<16x16x128xf32, #tpu.memory_space<vmem>>, vector<16x16x128xf32>,
    %c0_164 = arith.constant 0 : index
    %c0_165 = arith.constant 0 : index
    %c0_166 = arith.constant 0 : index
    %97 = vector.load %arg12[%c0_164, %c0_165, %c0_166] : memref<18x18x128xf32, #tpu.memory_space<vmem>>, vector<16x16x128xf32>
    %c0_167 = arith.constant 0 : index
    %c0_168 = arith.constant 0 : index
    %c0_169 = arith.constant 0 : index
    %98 = vector.load %arg14[%c0_167, %c0_168, %c0_169] : memref<16x16x128xf32, #tpu.memory_space<vmem>>, vector<16x16x128xf32>
    %c0_170 = arith.constant 0 : index
    %c0_171 = arith.constant 0 : index
    %c0_172 = arith.constant 0 : index
    %c0_173 = arith.constant 0 : index
    %99 = vector.load %arg4[%c0_170, %c0_171, %c0_172, %c0_173] : memref<3x3x128x128xf32, #tpu.memory_space<vmem>>, vector<1x1x128x128xf32>
    %100 = vector.shape_cast %99 : vector<1x1x128x128xf32> to vector<128x128xf32>
    %cst_174 = arith.constant dense<0.000000e+00> : vector<16x16x128xf32>
    %101 = tpu.matmul %97, %100, %cst_174 {dimension_numbers = #tpu.dot_dimension_numbers<[2], [0], [0, 1], [1], [0, 0, 0, 1, 1, 1], [], []>} : vector<16x16x128xf32>, vector<128x128xf32>, vector<16x16x128xf32> -> vector<16x16x128xf32>
    %102 = arith.addf %98, %101 : vector<16x16x128xf32>
    %c0_175 = arith.constant 0 : index
    %c0_176 = arith.constant 0 : index
    %c0_177 = arith.constant 0 : index
    %103 = vector.load %arg14[%c0_175, %c0_176, %c0_177] : memref<16x16x128xf32, #tpu.memory_space<vmem>>, vector<16x16x128xf32>
    tpu.vector_store %arg14[%c0_175, %c0_176, %c0_177], %102 {strides = array<i32>} : memref<16x16x128xf32, #tpu.memory_space<vmem>>, vector<16x16x128xf32>,
    %c0_178 = arith.constant 0 : index
    %c1_179 = arith.constant 1 : index
    %c0_180 = arith.constant 0 : index
    %104 = vector.load %arg12[%c0_178, %c1_179, %c0_180] : memref<18x18x128xf32, #tpu.memory_space<vmem>>, vector<16x16x128xf32>
    %c0_181 = arith.constant 0 : index
    %c0_182 = arith.constant 0 : index
    %c0_183 = arith.constant 0 : index
    %105 = vector.load %arg14[%c0_181, %c0_182, %c0_183] : memref<16x16x128xf32, #tpu.memory_space<vmem>>, vector<16x16x128xf32>
    %c0_184 = arith.constant 0 : index
    %c1_185 = arith.constant 1 : index
    %c0_186 = arith.constant 0 : index
    %c0_187 = arith.constant 0 : index
    %106 = vector.load %arg4[%c0_184, %c1_185, %c0_186, %c0_187] : memref<3x3x128x128xf32, #tpu.memory_space<vmem>>, vector<1x1x128x128xf32>
    %107 = vector.shape_cast %106 : vector<1x1x128x128xf32> to vector<128x128xf32>
    %cst_188 = arith.constant dense<0.000000e+00> : vector<16x16x128xf32>
    %108 = tpu.matmul %104, %107, %cst_188 {dimension_numbers = #tpu.dot_dimension_numbers<[2], [0], [0, 1], [1], [0, 0, 0, 1, 1, 1], [], []>} : vector<16x16x128xf32>, vector<128x128xf32>, vector<16x16x128xf32> -> vector<16x16x128xf32>
    %109 = arith.addf %105, %108 : vector<16x16x128xf32>
    %c0_189 = arith.constant 0 : index
    %c0_190 = arith.constant 0 : index
    %c0_191 = arith.constant 0 : index
    %110 = vector.load %arg14[%c0_189, %c0_190, %c0_191] : memref<16x16x128xf32, #tpu.memory_space<vmem>>, vector<16x16x128xf32>
    tpu.vector_store %arg14[%c0_189, %c0_190, %c0_191], %109 {strides = array<i32>} : memref<16x16x128xf32, #tpu.memory_space<vmem>>, vector<16x16x128xf32>,
    %c0_192 = arith.constant 0 : index
    %c2_193 = arith.constant 2 : index
    %c0_194 = arith.constant 0 : index
    %111 = vector.load %arg12[%c0_192, %c2_193, %c0_194] : memref<18x18x128xf32, #tpu.memory_space<vmem>>, vector<16x16x128xf32>
    %c0_195 = arith.constant 0 : index
    %c0_196 = arith.constant 0 : index
    %c0_197 = arith.constant 0 : index
    %112 = vector.load %arg14[%c0_195, %c0_196, %c0_197] : memref<16x16x128xf32, #tpu.memory_space<vmem>>, vector<16x16x128xf32>
    %c0_198 = arith.constant 0 : index
    %c2_199 = arith.constant 2 : index
    %c0_200 = arith.constant 0 : index
    %c0_201 = arith.constant 0 : index
    %113 = vector.load %arg4[%c0_198, %c2_199, %c0_200, %c0_201] : memref<3x3x128x128xf32, #tpu.memory_space<vmem>>, vector<1x1x128x128xf32>
    %114 = vector.shape_cast %113 : vector<1x1x128x128xf32> to vector<128x128xf32>
    %cst_202 = arith.constant dense<0.000000e+00> : vector<16x16x128xf32>
    %115 = tpu.matmul %111, %114, %cst_202 {dimension_numbers = #tpu.dot_dimension_numbers<[2], [0], [0, 1], [1], [0, 0, 0, 1, 1, 1], [], []>} : vector<16x16x128xf32>, vector<128x128xf32>, vector<16x16x128xf32> -> vector<16x16x128xf32>
    %116 = arith.addf %112, %115 : vector<16x16x128xf32>
    %c0_203 = arith.constant 0 : index
    %c0_204 = arith.constant 0 : index
    %c0_205 = arith.constant 0 : index
    %117 = vector.load %arg14[%c0_203, %c0_204, %c0_205] : memref<16x16x128xf32, #tpu.memory_space<vmem>>, vector<16x16x128xf32>
    tpu.vector_store %arg14[%c0_203, %c0_204, %c0_205], %116 {strides = array<i32>} : memref<16x16x128xf32, #tpu.memory_space<vmem>>, vector<16x16x128xf32>,
    %c1_206 = arith.constant 1 : index
    %c0_207 = arith.constant 0 : index
    %c0_208 = arith.constant 0 : index
    %118 = vector.load %arg12[%c1_206, %c0_207, %c0_208] : memref<18x18x128xf32, #tpu.memory_space<vmem>>, vector<16x16x128xf32>
    %c0_209 = arith.constant 0 : index
    %c0_210 = arith.constant 0 : index
    %c0_211 = arith.constant 0 : index
    %119 = vector.load %arg14[%c0_209, %c0_210, %c0_211] : memref<16x16x128xf32, #tpu.memory_space<vmem>>, vector<16x16x128xf32>
    %c1_212 = arith.constant 1 : index
    %c0_213 = arith.constant 0 : index
    %c0_214 = arith.constant 0 : index
    %c0_215 = arith.constant 0 : index
    %120 = vector.load %arg4[%c1_212, %c0_213, %c0_214, %c0_215] : memref<3x3x128x128xf32, #tpu.memory_space<vmem>>, vector<1x1x128x128xf32>
    %121 = vector.shape_cast %120 : vector<1x1x128x128xf32> to vector<128x128xf32>
    %cst_216 = arith.constant dense<0.000000e+00> : vector<16x16x128xf32>
    %122 = tpu.matmul %118, %121, %cst_216 {dimension_numbers = #tpu.dot_dimension_numbers<[2], [0], [0, 1], [1], [0, 0, 0, 1, 1, 1], [], []>} : vector<16x16x128xf32>, vector<128x128xf32>, vector<16x16x128xf32> -> vector<16x16x128xf32>
    %123 = arith.addf %119, %122 : vector<16x16x128xf32>
    %c0_217 = arith.constant 0 : index
    %c0_218 = arith.constant 0 : index
    %c0_219 = arith.constant 0 : index
    %124 = vector.load %arg14[%c0_217, %c0_218, %c0_219] : memref<16x16x128xf32, #tpu.memory_space<vmem>>, vector<16x16x128xf32>
    tpu.vector_store %arg14[%c0_217, %c0_218, %c0_219], %123 {strides = array<i32>} : memref<16x16x128xf32, #tpu.memory_space<vmem>>, vector<16x16x128xf32>,
    %c1_220 = arith.constant 1 : index
    %c1_221 = arith.constant 1 : index
    %c0_222 = arith.constant 0 : index
    %125 = vector.load %arg12[%c1_220, %c1_221, %c0_222] : memref<18x18x128xf32, #tpu.memory_space<vmem>>, vector<16x16x128xf32>
    %c0_223 = arith.constant 0 : index
    %c0_224 = arith.constant 0 : index
    %c0_225 = arith.constant 0 : index
    %126 = vector.load %arg14[%c0_223, %c0_224, %c0_225] : memref<16x16x128xf32, #tpu.memory_space<vmem>>, vector<16x16x128xf32>
    %c1_226 = arith.constant 1 : index
    %c1_227 = arith.constant 1 : index
    %c0_228 = arith.constant 0 : index
    %c0_229 = arith.constant 0 : index
    %127 = vector.load %arg4[%c1_226, %c1_227, %c0_228, %c0_229] : memref<3x3x128x128xf32, #tpu.memory_space<vmem>>, vector<1x1x128x128xf32>
    %128 = vector.shape_cast %127 : vector<1x1x128x128xf32> to vector<128x128xf32>
    %cst_230 = arith.constant dense<0.000000e+00> : vector<16x16x128xf32>
    %129 = tpu.matmul %125, %128, %cst_230 {dimension_numbers = #tpu.dot_dimension_numbers<[2], [0], [0, 1], [1], [0, 0, 0, 1, 1, 1], [], []>} : vector<16x16x128xf32>, vector<128x128xf32>, vector<16x16x128xf32> -> vector<16x16x128xf32>
    %130 = arith.addf %126, %129 : vector<16x16x128xf32>
    %c0_231 = arith.constant 0 : index
    %c0_232 = arith.constant 0 : index
    %c0_233 = arith.constant 0 : index
    %131 = vector.load %arg14[%c0_231, %c0_232, %c0_233] : memref<16x16x128xf32, #tpu.memory_space<vmem>>, vector<16x16x128xf32>
    tpu.vector_store %arg14[%c0_231, %c0_232, %c0_233], %130 {strides = array<i32>} : memref<16x16x128xf32, #tpu.memory_space<vmem>>, vector<16x16x128xf32>,
    %c1_234 = arith.constant 1 : index
    %c2_235 = arith.constant 2 : index
    %c0_236 = arith.constant 0 : index
    %132 = vector.load %arg12[%c1_234, %c2_235, %c0_236] : memref<18x18x128xf32, #tpu.memory_space<vmem>>, vector<16x16x128xf32>
    %c0_237 = arith.constant 0 : index
    %c0_238 = arith.constant 0 : index
    %c0_239 = arith.constant 0 : index
    %133 = vector.load %arg14[%c0_237, %c0_238, %c0_239] : memref<16x16x128xf32, #tpu.memory_space<vmem>>, vector<16x16x128xf32>
    %c1_240 = arith.constant 1 : index
    %c2_241 = arith.constant 2 : index
    %c0_242 = arith.constant 0 : index
    %c0_243 = arith.constant 0 : index
    %134 = vector.load %arg4[%c1_240, %c2_241, %c0_242, %c0_243] : memref<3x3x128x128xf32, #tpu.memory_space<vmem>>, vector<1x1x128x128xf32>
    %135 = vector.shape_cast %134 : vector<1x1x128x128xf32> to vector<128x128xf32>
    %cst_244 = arith.constant dense<0.000000e+00> : vector<16x16x128xf32>
    %136 = tpu.matmul %132, %135, %cst_244 {dimension_numbers = #tpu.dot_dimension_numbers<[2], [0], [0, 1], [1], [0, 0, 0, 1, 1, 1], [], []>} : vector<16x16x128xf32>, vector<128x128xf32>, vector<16x16x128xf32> -> vector<16x16x128xf32>
    %137 = arith.addf %133, %136 : vector<16x16x128xf32>
    %c0_245 = arith.constant 0 : index
    %c0_246 = arith.constant 0 : index
    %c0_247 = arith.constant 0 : index
    %138 = vector.load %arg14[%c0_245, %c0_246, %c0_247] : memref<16x16x128xf32, #tpu.memory_space<vmem>>, vector<16x16x128xf32>
    tpu.vector_store %arg14[%c0_245, %c0_246, %c0_247], %137 {strides = array<i32>} : memref<16x16x128xf32, #tpu.memory_space<vmem>>, vector<16x16x128xf32>,
    %c2_248 = arith.constant 2 : index
    %c0_249 = arith.constant 0 : index
    %c0_250 = arith.constant 0 : index
    %139 = vector.load %arg12[%c2_248, %c0_249, %c0_250] : memref<18x18x128xf32, #tpu.memory_space<vmem>>, vector<16x16x128xf32>
    %c0_251 = arith.constant 0 : index
    %c0_252 = arith.constant 0 : index
    %c0_253 = arith.constant 0 : index
    %140 = vector.load %arg14[%c0_251, %c0_252, %c0_253] : memref<16x16x128xf32, #tpu.memory_space<vmem>>, vector<16x16x128xf32>
    %c2_254 = arith.constant 2 : index
    %c0_255 = arith.constant 0 : index
    %c0_256 = arith.constant 0 : index
    %c0_257 = arith.constant 0 : index
    %141 = vector.load %arg4[%c2_254, %c0_255, %c0_256, %c0_257] : memref<3x3x128x128xf32, #tpu.memory_space<vmem>>, vector<1x1x128x128xf32>
    %142 = vector.shape_cast %141 : vector<1x1x128x128xf32> to vector<128x128xf32>
    %cst_258 = arith.constant dense<0.000000e+00> : vector<16x16x128xf32>
    %143 = tpu.matmul %139, %142, %cst_258 {dimension_numbers = #tpu.dot_dimension_numbers<[2], [0], [0, 1], [1], [0, 0, 0, 1, 1, 1], [], []>} : vector<16x16x128xf32>, vector<128x128xf32>, vector<16x16x128xf32> -> vector<16x16x128xf32>
    %144 = arith.addf %140, %143 : vector<16x16x128xf32>
    %c0_259 = arith.constant 0 : index
    %c0_260 = arith.constant 0 : index
    %c0_261 = arith.constant 0 : index
    %145 = vector.load %arg14[%c0_259, %c0_260, %c0_261] : memref<16x16x128xf32, #tpu.memory_space<vmem>>, vector<16x16x128xf32>
    tpu.vector_store %arg14[%c0_259, %c0_260, %c0_261], %144 {strides = array<i32>} : memref<16x16x128xf32, #tpu.memory_space<vmem>>, vector<16x16x128xf32>,
    %c2_262 = arith.constant 2 : index
    %c1_263 = arith.constant 1 : index
    %c0_264 = arith.constant 0 : index
    %146 = vector.load %arg12[%c2_262, %c1_263, %c0_264] : memref<18x18x128xf32, #tpu.memory_space<vmem>>, vector<16x16x128xf32>
    %c0_265 = arith.constant 0 : index
    %c0_266 = arith.constant 0 : index
    %c0_267 = arith.constant 0 : index
    %147 = vector.load %arg14[%c0_265, %c0_266, %c0_267] : memref<16x16x128xf32, #tpu.memory_space<vmem>>, vector<16x16x128xf32>
    %c2_268 = arith.constant 2 : index
    %c1_269 = arith.constant 1 : index
    %c0_270 = arith.constant 0 : index
    %c0_271 = arith.constant 0 : index
    %148 = vector.load %arg4[%c2_268, %c1_269, %c0_270, %c0_271] : memref<3x3x128x128xf32, #tpu.memory_space<vmem>>, vector<1x1x128x128xf32>
    %149 = vector.shape_cast %148 : vector<1x1x128x128xf32> to vector<128x128xf32>
    %cst_272 = arith.constant dense<0.000000e+00> : vector<16x16x128xf32>
    %150 = tpu.matmul %146, %149, %cst_272 {dimension_numbers = #tpu.dot_dimension_numbers<[2], [0], [0, 1], [1], [0, 0, 0, 1, 1, 1], [], []>} : vector<16x16x128xf32>, vector<128x128xf32>, vector<16x16x128xf32> -> vector<16x16x128xf32>
    %151 = arith.addf %147, %150 : vector<16x16x128xf32>
    %c0_273 = arith.constant 0 : index
    %c0_274 = arith.constant 0 : index
    %c0_275 = arith.constant 0 : index
    %152 = vector.load %arg14[%c0_273, %c0_274, %c0_275] : memref<16x16x128xf32, #tpu.memory_space<vmem>>, vector<16x16x128xf32>
    tpu.vector_store %arg14[%c0_273, %c0_274, %c0_275], %151 {strides = array<i32>} : memref<16x16x128xf32, #tpu.memory_space<vmem>>, vector<16x16x128xf32>,
    %c2_276 = arith.constant 2 : index
    %c2_277 = arith.constant 2 : index
    %c0_278 = arith.constant 0 : index
    %153 = vector.load %arg12[%c2_276, %c2_277, %c0_278] : memref<18x18x128xf32, #tpu.memory_space<vmem>>, vector<16x16x128xf32>
    %c0_279 = arith.constant 0 : index
    %c0_280 = arith.constant 0 : index
    %c0_281 = arith.constant 0 : index
    %154 = vector.load %arg14[%c0_279, %c0_280, %c0_281] : memref<16x16x128xf32, #tpu.memory_space<vmem>>, vector<16x16x128xf32>
    %c2_282 = arith.constant 2 : index
    %c2_283 = arith.constant 2 : index
    %c0_284 = arith.constant 0 : index
    %c0_285 = arith.constant 0 : index
    %155 = vector.load %arg4[%c2_282, %c2_283, %c0_284, %c0_285] : memref<3x3x128x128xf32, #tpu.memory_space<vmem>>, vector<1x1x128x128xf32>
    %156 = vector.shape_cast %155 : vector<1x1x128x128xf32> to vector<128x128xf32>
    %cst_286 = arith.constant dense<0.000000e+00> : vector<16x16x128xf32>
    %157 = tpu.matmul %153, %156, %cst_286 {dimension_numbers = #tpu.dot_dimension_numbers<[2], [0], [0, 1], [1], [0, 0, 0, 1, 1, 1], [], []>} : vector<16x16x128xf32>, vector<128x128xf32>, vector<16x16x128xf32> -> vector<16x16x128xf32>
    %158 = arith.addf %154, %157 : vector<16x16x128xf32>
    %c0_287 = arith.constant 0 : index
    %c0_288 = arith.constant 0 : index
    %c0_289 = arith.constant 0 : index
    %159 = vector.load %arg14[%c0_287, %c0_288, %c0_289] : memref<16x16x128xf32, #tpu.memory_space<vmem>>, vector<16x16x128xf32>
    tpu.vector_store %arg14[%c0_287, %c0_288, %c0_289], %158 {strides = array<i32>} : memref<16x16x128xf32, #tpu.memory_space<vmem>>, vector<16x16x128xf32>,
    %c0_290 = arith.constant 0 : index
    %c0_291 = arith.constant 0 : index
    %c0_292 = arith.constant 0 : index
    %160 = vector.load %arg14[%c0_290, %c0_291, %c0_292] : memref<16x16x128xf32, #tpu.memory_space<vmem>>, vector<16x16x128xf32>
    %c0_293 = arith.constant 0 : index
    %c0_294 = arith.constant 0 : index
    %c0_295 = arith.constant 0 : index
    %c0_296 = arith.constant 0 : index
    %161 = vector.load %arg7[%c0_293, %c0_294, %c0_295, %c0_296] : memref<1x16x16x128xf32, #tpu.memory_space<vmem>>, vector<1x16x16x128xf32>
    %162 = vector.shape_cast %161 : vector<1x16x16x128xf32> to vector<16x16x128xf32>
    %cst_297 = arith.constant 1.000000e+00 : f32
    %163 = vector.broadcast %cst_297 : f32 to vector<16x16x128xf32>
    %164 = arith.cmpf ogt, %162, %163 : vector<16x16x128xf32>
    %165 = arith.extui %164 : vector<16x16x128xi1> to vector<16x16x128xi32>
    %166 = arith.sitofp %165 : vector<16x16x128xi32> to vector<16x16x128xf32>
    %cst_298 = arith.constant 0.899999976 : f32
    %167 = vector.broadcast %cst_298 : f32 to vector<16x16x128xf32>
    %168 = arith.mulf %167, %162 : vector<16x16x128xf32>
    %169 = arith.addf %168, %160 : vector<16x16x128xf32>
    %170 = arith.subf %169, %166 : vector<16x16x128xf32>
    %cst_299 = arith.constant 1.000000e+00 : f32
    %171 = vector.broadcast %cst_299 : f32 to vector<16x16x128xf32>
    %172 = arith.cmpf ogt, %170, %171 : vector<16x16x128xf32>
    %173 = arith.extui %172 : vector<16x16x128xi1> to vector<16x16x128xi32>
    %174 = arith.sitofp %173 : vector<16x16x128xi32> to vector<16x16x128xf32>
    %c0_300 = arith.constant 0 : index
    %c0_301 = arith.constant 0 : index
    %c0_302 = arith.constant 0 : index
    %c0_303 = arith.constant 0 : index
    %175 = vector.load %arg10[%c0_300, %c0_301, %c0_302, %c0_303] : memref<1x16x16x128xf32, #tpu.memory_space<vmem>>, vector<1x16x16x128xf32>
    %176 = vector.shape_cast %175 : vector<1x16x16x128xf32> to vector<16x16x128xf32>
    %177 = vector.shape_cast %170 : vector<16x16x128xf32> to vector<1x16x16x128xf32>
    tpu.vector_store %arg10[%c0_300, %c0_301, %c0_302, %c0_303], %177 {strides = array<i32>} : memref<1x16x16x128xf32, #tpu.memory_space<vmem>>, vector<1x16x16x128xf32>,
    %c0_304 = arith.constant 0 : index
    %c0_305 = arith.constant 0 : index
    %c0_306 = arith.constant 0 : index
    %c0_307 = arith.constant 0 : index
    %178 = vector.load %arg1[%c0_304, %c0_305, %c0_306, %c0_307] : memref<1x16x16x128xf32, #tpu.memory_space<vmem>>, vector<1x16x16x128xf32>
    %179 = vector.shape_cast %178 : vector<1x16x16x128xf32> to vector<16x16x128xf32>
    %180 = arith.addf %174, %179 : vector<16x16x128xf32>
    %c0_308 = arith.constant 0 : index
    %c0_309 = arith.constant 0 : index
    %c0_310 = arith.constant 0 : index
    %c0_311 = arith.constant 0 : index
    %181 = vector.load %arg8[%c0_308, %c0_309, %c0_310, %c0_311] : memref<1x16x16x128xf32, #tpu.memory_space<vmem>>, vector<1x16x16x128xf32>
    %182 = vector.shape_cast %181 : vector<1x16x16x128xf32> to vector<16x16x128xf32>
    %183 = vector.shape_cast %180 : vector<16x16x128xf32> to vector<1x16x16x128xf32>
    tpu.vector_store %arg8[%c0_308, %c0_309, %c0_310, %c0_311], %183 {strides = array<i32>} : memref<1x16x16x128xf32, #tpu.memory_space<vmem>>, vector<1x16x16x128xf32>,
    return
  }
  func.func @transform_0(%arg0: i32) -> (i32, i32, i32, i32) {
    %c0_i32 = arith.constant 0 : i32
    %c0_i32_0 = arith.constant 0 : i32
    %c0_i32_1 = arith.constant 0 : i32
    %c0_i32_2 = arith.constant 0 : i32
    return %arg0, %c0_i32, %c0_i32_0, %c0_i32_1 : i32, i32, i32, i32
  }
  func.func @transform_1(%arg0: i32) -> (i32, i32, i32, i32) {
    %c0_i32 = arith.constant 0 : i32
    %c0_i32_0 = arith.constant 0 : i32
    %c0_i32_1 = arith.constant 0 : i32
    %c0_i32_2 = arith.constant 0 : i32
    %c0_i32_3 = arith.constant 0 : i32
    return %c0_i32, %c0_i32_0, %c0_i32_1, %c0_i32_2 : i32, i32, i32, i32
  }
  func.func @transform_2(%arg0: i32) -> (i32, i32) {
    %c0_i32 = arith.constant 0 : i32
    %c0_i32_0 = arith.constant 0 : i32
    %c0_i32_1 = arith.constant 0 : i32
    return %c0_i32, %c0_i32_0 : i32, i32
  }
  func.func @transform_3(%arg0: i32) -> (i32, i32, i32, i32) {
    %c0_i32 = arith.constant 0 : i32
    %c0_i32_0 = arith.constant 0 : i32
    %c0_i32_1 = arith.constant 0 : i32
    %c0_i32_2 = arith.constant 0 : i32
    %c0_i32_3 = arith.constant 0 : i32
    return %c0_i32, %c0_i32_0, %c0_i32_1, %c0_i32_2 : i32, i32, i32, i32
  }
  func.func @transform_4(%arg0: i32) -> (i32, i32) {
    %c0_i32 = arith.constant 0 : i32
    %c0_i32_0 = arith.constant 0 : i32
    %c0_i32_1 = arith.constant 0 : i32
    return %c0_i32, %c0_i32_0 : i32, i32
  }
  func.func @transform_5(%arg0: i32) -> (i32, i32, i32, i32) {
    %c0_i32 = arith.constant 0 : i32
    %c0_i32_0 = arith.constant 0 : i32
    %c0_i32_1 = arith.constant 0 : i32
    %c0_i32_2 = arith.constant 0 : i32
    return %arg0, %c0_i32, %c0_i32_0, %c0_i32_1 : i32, i32, i32, i32
  }
  func.func @transform_6(%arg0: i32) -> (i32, i32, i32, i32) {
    %c0_i32 = arith.constant 0 : i32
    %c0_i32_0 = arith.constant 0 : i32
    %c0_i32_1 = arith.constant 0 : i32
    %c0_i32_2 = arith.constant 0 : i32
    return %arg0, %c0_i32, %c0_i32_0, %c0_i32_1 : i32, i32, i32, i32
  }
  func.func @transform_7(%arg0: i32) -> (i32, i32, i32, i32) {
    %c0_i32 = arith.constant 0 : i32
    %c0_i32_0 = arith.constant 0 : i32
    %c0_i32_1 = arith.constant 0 : i32
    %c0_i32_2 = arith.constant 0 : i32
    return %arg0, %c0_i32, %c0_i32_0, %c0_i32_1 : i32, i32, i32, i32
  }
  func.func @transform_8(%arg0: i32) -> (i32, i32, i32, i32) {
    %c0_i32 = arith.constant 0 : i32
    %c0_i32_0 = arith.constant 0 : i32
    %c0_i32_1 = arith.constant 0 : i32
    %c0_i32_2 = arith.constant 0 : i32
    return %arg0, %c0_i32, %c0_i32_0, %c0_i32_1 : i32, i32, i32, i32
  }
  func.func @transform_9(%arg0: i32) -> (i32, i32, i32, i32) {
    %c0_i32 = arith.constant 0 : i32
    %c0_i32_0 = arith.constant 0 : i32
    %c0_i32_1 = arith.constant 0 : i32
    %c0_i32_2 = arith.constant 0 : i32
    return %arg0, %c0_i32, %c0_i32_0, %c0_i32_1 : i32, i32, i32, i32
  }
}

</mosaic_0001>

<bundles_post_ra>
// kernel: sew_bottleneck_forward.1
= control target key start
LH: loop header
LB: loop body
LE: loop exit
PB: predicated region body
PF: predicated region fallthrough
CT: control target
= control target key end

     0   :  { %s11152_s30 = smov 0   ;;  %s15297_s0 = inlined_call_operand.vmem [shape: f32[2,16,16,128], index: 0, kind: input, shape index: {}]   ;;  %s15298_s1 = inlined_call_operand.vmem [shape: f32[3,3,128,128], index: 1, kind: input, shape index: {}]   ;;  %s15299_s2 = inlined_call_operand.vmem [shape: f32[1,128], index: 2, kind: input, shape index: {}]   ;;  %s15300_s3 = inlined_call_operand.vmem [shape: f32[3,3,128,128], index: 3, kind: input, shape index: {}]   ;;  %s15301_s4 = inlined_call_operand.vmem [shape: f32[1,128], index: 4, kind: input, shape index: {}]   ;;  %s15302_s5 = inlined_call_operand.vmem [shape: f32[2,16,16,128], index: 5, kind: input, shape index: {}, may-alias: {5,8}]   ;;  %s15303_s6 = inlined_call_operand.vmem [shape: f32[2,16,16,128], index: 6, kind: input, shape index: {}, may-alias: {6,9}]   ;;  %s15304_s7 = inlined_call_operand.vmem [shape: f32[2,16,16,128], index: 7, kind: output, shape index: {0}]   ;;  %s15305_s8 = inlined_call_operand.vmem [shape: f32[2,16,16,128], index: 8, kind: output, shape index: {1}, may-alias: {5,8}]   ;;  %s15306_s9 = inlined_call_operand.vmem [shape: f32[2,16,16,128], index: 9, kind: output, shape index: {2}, may-alias: {6,9}]  }
   0x1 LB: > { %s8351_s10 = sadd.s32 4294967295, %s11099_s30   ;;  %p8355_p0 = scmp.ge.s32.totalorder %s11099_s30, 1  ;;  %s11099_s30 = sphi %s11152_s30, %s20_s30  }
   0x2   : > { %p312_p1 = scmp.lt.s32.totalorder %s11099_s30, 3 }
   0x4   : > { %p313_p2 = pnand %p8355_p0, %p312_p1 }
   0x6   : > { %316 = sbr.rel (%p313_p2) target bundleno = 1066 (0x42a), region = 48 }
   0xb   : > { %v11163_v0 = vld [vmem:[%s15298_s1 + $0x78] sm:$0xff]  ;;  %v11168_v1 = vld [vmem:[%s15298_s1 + $0x70] sm:$0xff]  ;;  %p11177_p3 = scmp.lt.s32.totalorder %s8351_s10, 1  ;;  %v11101_v4 = vmov 0.0   ;;  %v633_v5 = vld [vmem:[%s15298_s1 + $0x68] sm:$0xff] }
   0xc   : > { %v11173_v2 = vld [vmem:[%s15298_s1 + $0xf8] sm:$0xff]  ;;  %9626 = vmatprep.subr.mxu0 %v11163_v0  ;;  %v11186_v3 = vld [vmem:[%s15298_s1 + $0xf0] sm:$0xff]  ;;  %398 = vst [vmem:[#allocation2] sm:$0xff] %v11101_v4  ;;  %399 = vst [vmem:[#allocation2 + $0x8] sm:$0xff] %v11101_v4  ;;  %9658 = vmatprep.mubr.f32.mxu0 %v11101_v4 }
   0xd   : > { %9706 = vmatprep.subr.mxu1 %v11173_v2  ;;  %400 = vst [vmem:[#allocation2 + $0x10] sm:$0x3] %v11101_v4  ;;  %401 = vst [vmem:[#allocation2 + $0x18] sm:$0xff] %v11101_v4  ;;  %9627 = vmatpush3.msra.mxu0 %v11163_v0  ;;  %v8382_v6 = vld [vmem:[%s15298_s1 + $0xe8] sm:$0xff]  ;;  %s15806_s10 = smov (!%p11177_p3, %s8351_s10), 1  ;;  %v632_v7 = vld [vmem:[%s15298_s1 + $0x60] sm:$0xff] }
   0xe   : > { %402 = vst [vmem:[#allocation2 + $0x20] sm:$0xff] %v11101_v4  ;;  %403 = vst [vmem:[#allocation2 + $0x28] sm:$0x3] %v11101_v4  ;;  %9707 = vmatpush3.msra.mxu1 %v11173_v2  ;;  %9628 = vmatprep.subr.mxu0 %v11168_v1  ;;  %v8381_v8 = vld [vmem:[%s15298_s1 + $0xe0] sm:$0xff]  ;;  %s11318_s28 = sshll.u32 %s15806_s10, 8  ;;  %v631_v9 = vld [vmem:[%s15298_s1 + $0x58] sm:$0xff] }
   0xf   : > { %404 = vst [vmem:[#allocation2 + $0x30] sm:$0xff] %v11101_v4  ;;  %405 = vst [vmem:[#allocation2 + $0x38] sm:$0xff] %v11101_v4  ;;  %9708 = vmatprep.subr.mxu1 %v11186_v3  ;;  %9629 = vmatpush3.msra.mxu0 %v11168_v1  ;;  %v8380_v10 = vld [vmem:[%s15298_s1 + $0xd8] sm:$0xff]  ;;  %v630_v11 = vld [vmem:[%s15298_s1 + $0x50] sm:$0xff]  ;;  %s11336_s19 = scalar_lea.vmem %s15297_s0, %s11318_s28  ;;  %s12827_s24 = scalar_lea.vmem %s15302_s5, %s11318_s28 }
  0x10   : > { %406 = vst [vmem:[#allocation2 + $0x40] sm:$0x3] %v11101_v4  ;;  %407 = vst [vmem:[#allocation2 + $0x48] sm:$0xff] %v11101_v4  ;;  %9709 = vmatpush3.msra.mxu1 %v11186_v3  ;;  %9630 = vmatprep.subr.mxu0 %v633_v5  ;;  %v8379_v12 = vld [vmem:[%s15298_s1 + $0xd0] sm:$0xff]  ;;  %v629_v13 = vld [vmem:[%s15298_s1 + $0x48] sm:$0xff]  ;;  %s13218_s11 = scalar_lea.vmem %s15305_s8, %s11318_s28  ;;  %s14590_s10 = scalar_lea.vmem %s15303_s6, %s11318_s28 }
  0x11   : > { %408 = vst [vmem:[#allocation2 + $0x50] sm:$0xff] %v11101_v4  ;;  %409 = vst [vmem:[#allocation2 + $0x58] sm:$0x3] %v11101_v4  ;;  %9710 = vmatprep.subr.mxu1 %v8382_v6  ;;  %9631 = vmatpush3.msra.mxu0 %v633_v5  ;;  %v8378_v14 = vld [vmem:[%s15298_s1 + $0xc8] sm:$0xff]  ;;  %v628_v15 = vld [vmem:[%s15298_s1 + $0x40] sm:$0xff]  ;;  %s14963_s18 = scalar_lea.vmem %s15306_s9, %s11318_s28  ;;  %s15012_s22 = scalar_lea.vmem %s15304_s7, %s11318_s28 }
  0x12   : > { %410 = vst [vmem:[#allocation2 + $0x60] sm:$0xff] %v11101_v4  ;;  %411 = vst [vmem:[#allocation2 + $0x68] sm:$0xff] %v11101_v4  ;;  %9711 = vmatpush3.msra.mxu1 %v8382_v6  ;;  %9632 = vmatprep.subr.mxu0 %v632_v7  ;;  %v11348_v16 = vld [vmem:[%s11336_s19] sm:$0xff]  ;;  %v11355_v18 = vld [vmem:[%s11336_s19 + $0x8] sm:$0xff] }
  0x13   : > { %412 = vst [vmem:[#allocation2 + $0x70] sm:$0x3] %v11101_v4  ;;  %413 = vst [vmem:[#allocation2 + $0x78] sm:$0xff] %v11101_v4  ;;  %9712 = vmatprep.subr.mxu1 %v8381_v8  ;;  %9633 = vmatpush3.msra.mxu0 %v632_v7  ;;  %v8377_v17 = vld [vmem:[%s15298_s1 + $0xc0] sm:$0xff]  ;;  %v11358_v19 = vld [vmem:[%s11336_s19 + $0x10] sm:$0xff] }
  0x14   : > { %414 = vst [vmem:[#allocation2 + $0x80] sm:$0xff] %v11101_v4  ;;  %415 = vst [vmem:[#allocation2 + $0x88] sm:$0x3] %v11101_v4  ;;  %9713 = vmatpush3.msra.mxu1 %v8381_v8  ;;  %9634 = vmatprep.subr.mxu0 %v631_v9  ;;  %v627_v20 = vld [vmem:[%s15298_s1 + $0x38] sm:$0xff]  ;;  %v11369_v22 = vld [vmem:[%s11336_s19 + $0x20] sm:$0xff] }
  0x15   : > { %416 = vst [vmem:[#allocation2 + $0x90] sm:$0xff] %v11101_v4  ;;  %417 = vst [vmem:[#allocation2 + $0x98] sm:$0xff] %v11101_v4  ;;  %9714 = vmatprep.subr.mxu1 %v8380_v10  ;;  %9635 = vmatpush3.msra.mxu0 %v631_v9  ;;  %v11366_v21 = vld [vmem:[%s11336_s19 + $0x18] sm:$0xff]  ;;  %v11377_v24 = vld [vmem:[%s11336_s19 + $0x28] sm:$0xff] }
  0x16   : > { %418 = vst [vmem:[#allocation2 + $0xa0] sm:$0x3] %v11101_v4  ;;  %419 = vst [vmem:[#allocation2 + $0xa8] sm:$0xff] %v11101_v4  ;;  %9715 = vmatpush3.msra.mxu1 %v8380_v10  ;;  %9636 = vmatprep.subr.mxu0 %v630_v11  ;;  %v8376_v23 = vld [vmem:[%s15298_s1 + $0xb8] sm:$0xff]  ;;  %v11380_v25 = vld [vmem:[%s11336_s19 + $0x30] sm:$0xff] }
  0x17   : > { %420 = vst [vmem:[#allocation2 + $0xb0] sm:$0xff] %v11101_v4  ;;  %421 = vst [vmem:[#allocation2 + $0xb8] sm:$0x3] %v11101_v4  ;;  %9716 = vmatprep.subr.mxu1 %v8379_v12  ;;  %9637 = vmatpush3.msra.mxu0 %v630_v11  ;;  %v626_v26 = vld [vmem:[%s15298_s1 + $0x30] sm:$0xff]  ;;  %v11388_v27 = vld [vmem:[%s11336_s19 + $0x38] sm:$0xff] }
  0x18   : > { %422 = vst [vmem:[#allocation2 + $0xc0] sm:$0xff] %v11101_v4  ;;  %423 = vst [vmem:[#allocation2 + $0xc8] sm:$0xff] %v11101_v4  ;;  %9717 = vmatpush3.msra.mxu1 %v8379_v12  ;;  %9638 = vmatprep.subr.mxu0 %v629_v13  ;;  %v11391_v28 = vld [vmem:[%s11336_s19 + $0x40] sm:$0xff]  ;;  %v8375_v29 = vld [vmem:[%s15298_s1 + $0xb0] sm:$0xff] }
  0x19   : > { %424 = vst [vmem:[#allocation2 + $0xd0] sm:$0x3] %v11101_v4  ;;  %425 = vst [vmem:[#allocation2 + $0xd8] sm:$0xff] %v11101_v4  ;;  %9718 = vmatprep.subr.mxu1 %v8378_v14  ;;  %9639 = vmatpush3.msra.mxu0 %v629_v13  ;;  %v11399_v30 = vld [vmem:[%s11336_s19 + $0x48] sm:$0xff]  ;;  %v11402_v31 = vld [vmem:[%s11336_s19 + $0x50] sm:$0xff] }
  0x1a   : > { %426 = vst [vmem:[#allocation2 + $0xe0] sm:$0xff] %v11101_v4  ;;  %427 = vst [vmem:[#allocation2 + $0xe8] sm:$0x3] %v11101_v4  ;;  %9719 = vmatpush3.msra.mxu1 %v8378_v14  ;;  %9640 = vmatprep.subr.mxu0 %v628_v15  ;;  %v625_v32 = vld [vmem:[%s15298_s1 + $0x28] sm:$0xff]  ;;  %v11410_v33 = vld [vmem:[%s11336_s19 + $0x58] sm:$0xff] }
  0x1b   : > { %428 = vst [vmem:[#allocation2 + $0xf0] sm:$0xff] %v11101_v4  ;;  %429 = vst [vmem:[#allocation2 + $0xf8] sm:$0xff] %v11101_v4  ;;  %9720 = vmatprep.subr.mxu1 %v8377_v17  ;;  %9641 = vmatpush3.msra.mxu0 %v628_v15  ;;  %v11413_v34 = vld [vmem:[%s11336_s19 + $0x60] sm:$0xff]  ;;  %v8374_v35 = vld [vmem:[%s15298_s1 + $0xa8] sm:$0xff] }
  0x1c   : > { %430 = vst [vmem:[#allocation2 + $0x100] sm:$0x3] %v11101_v4  ;;  %431 = vst [vmem:[#allocation2 + $0x108] sm:$0xff] %v11101_v4  ;;  %9721 = vmatpush3.msra.mxu1 %v8377_v17  ;;  %9642 = vmatprep.subr.mxu0 %v627_v20  ;;  %v11421_v36 = vld [vmem:[%s11336_s19 + $0x68] sm:$0xff]  ;;  %v11424_v37 = vld [vmem:[%s11336_s19 + $0x70] sm:$0xff] }
  0x1d   : > { %432 = vst [vmem:[#allocation2 + $0x110] sm:$0xff] %v11101_v4  ;;  %433 = vst [vmem:[#allocation2 + $0x118] sm:$0x3] %v11101_v4  ;;  %9722 = vmatprep.subr.mxu1 %v8376_v23  ;;  %9643 = vmatpush3.msra.mxu0 %v627_v20  ;;  %v11429_v38 = vld [vmem:[%s11336_s19 + $0x78] sm:$0xff]  ;;  %v624_v39 = vld [vmem:[%s15298_s1 + $0x20] sm:$0xff] }
  0x1e   : > { %434 = vst [vmem:[#allocation2 + $0x120] sm:$0xff] %v11101_v4  ;;  %435 = vst [vmem:[#allocation2 + $0x128] sm:$0xff] %v11101_v4  ;;  %9723 = vmatpush3.msra.mxu1 %v8376_v23  ;;  %9644 = vmatprep.subr.mxu0 %v626_v26  ;;  %v8373_v40 = vld [vmem:[%s15298_s1 + $0xa0] sm:$0xff]  ;;  %v623_v42 = vld [vmem:[%s15298_s1 + $0x18] sm:$0xff] }
  0x1f   : > { %436 = vst [vmem:[#allocation2 + $0x130] sm:$0x3] %v11101_v4  ;;  %437 = vst [vmem:[#allocation2 + $0x138] sm:$0xff] %v11101_v4  ;;  %9724 = vmatprep.subr.mxu1 %v8375_v29  ;;  %9645 = vmatpush3.msra.mxu0 %v626_v26  ;;  %v11439_v41 = vld [vmem:[%s11336_s19 + $0x80] sm:$0xff]  ;;  %v8372_v43 = vld [vmem:[%s15298_s1 + $0x98] sm:$0xff] }
  0x20   : > { %438 = vst [vmem:[#allocation2 + $0x140] sm:$0xff] %v11101_v4  ;;  %439 = vst [vmem:[#allocation2 + $0x148] sm:$0x3] %v11101_v4  ;;  %9725 = vmatpush3.msra.mxu1 %v8375_v29  ;;  %9646 = vmatprep.subr.mxu0 %v625_v32  ;;  %v11449_v44 = vld [vmem:[%s11336_s19 + $0x88] sm:$0xff]  ;;  %v622_v45 = vld [vmem:[%s15298_s1 + $0x10] sm:$0xff] }
  0x21   : > { %440 = vst [vmem:[#allocation2 + $0x150] sm:$0xff] %v11101_v4  ;;  %441 = vst [vmem:[#allocation2 + $0x158] sm:$0xff] %v11101_v4  ;;  %9726 = vmatprep.subr.mxu1 %v8374_v35  ;;  %9647 = vmatpush3.msra.mxu0 %v625_v32  ;;  %v8371_v46 = vld [vmem:[%s15298_s1 + $0x90] sm:$0xff]  ;;  %v621_v47 = vld [vmem:[%s15298_s1 + $0x8] sm:$0xff] }
  0x22   : > { %442 = vst [vmem:[#allocation2 + $0x160] sm:$0x3] %v11101_v4  ;;  %443 = vst [vmem:[#allocation2 + $0x168] sm:$0xff] %v11101_v4  ;;  %9727 = vmatpush3.msra.mxu1 %v8374_v35  ;;  %9648 = vmatprep.subr.mxu0 %v624_v39  ;;  %v8370_v48 = vld [vmem:[%s15298_s1 + $0x88] sm:$0xff]  ;;  %v11465_v49 = vld [vmem:[%s11336_s19 + $0x90] sm:$0xff] }
  0x23   : > { %444 = vst [vmem:[#allocation2 + $0x170] sm:$0xff] %v11101_v4  ;;  %445 = vst [vmem:[#allocation2 + $0x178] sm:$0x3] %v11101_v4  ;;  %9728 = vmatprep.subr.mxu1 %v8373_v40  ;;  %9649 = vmatpush3.msra.mxu0 %v624_v39  ;;  %v11469_v50 = vld [vmem:[%s11336_s19 + $0x98] sm:$0xff]  ;;  %v620_v51 = vld [vmem:[%s15298_s1] sm:$0xff] }
  0x24   : > { %446 = vst [vmem:[#allocation2 + $0x180] sm:$0xff] %v11101_v4  ;;  %447 = vst [vmem:[#allocation2 + $0x188] sm:$0xff] %v11101_v4  ;;  %9729 = vmatpush3.msra.mxu1 %v8373_v40  ;;  %9650 = vmatprep.subr.mxu0 %v623_v42  ;;  %v11476_v52 = vld [vmem:[%s11336_s19 + $0xa0] sm:$0xff]  ;;  %v11483_v54 = vld [vmem:[%s11336_s19 + $0xa8] sm:$0xff] }
  0x25   : > { %448 = vst [vmem:[#allocation2 + $0x190] sm:$0x3] %v11101_v4  ;;  %449 = vst [vmem:[#allocation2 + $0x198] sm:$0xff] %v11101_v4  ;;  %9730 = vmatprep.subr.mxu1 %v8372_v43  ;;  %9651 = vmatpush3.msra.mxu0 %v623_v42  ;;  %v8369_v53 = vld [vmem:[%s15298_s1 + $0x80] sm:$0xff]  ;;  %v8400_v55 = vld [vmem:[%s15298_s1 + $0x178] sm:$0xff] }
  0x26   : > { %450 = vst [vmem:[#allocation2 + $0x1a0] sm:$0xff] %v11101_v4  ;;  %451 = vst [vmem:[#allocation2 + $0x1a8] sm:$0x3] %v11101_v4  ;;  %9731 = vmatpush3.msra.mxu1 %v8372_v43  ;;  %9652 = vmatprep.subr.mxu0 %v622_v45  ;;  %v925_v56 = vld [vmem:[#allocation2 + $0x1] sm:$0xff]  ;;  %v11491_v57 = vld [vmem:[%s11336_s19 + $0xb0] sm:$0xff] }
  0x27   : > { %4270 = vst [vmem:[#allocation3] sm:$0xff] %v11101_v4  ;;  %4271 = vst [vmem:[#allocation3 + $0x8] sm:$0xff] %v11101_v4  ;;  %9732 = vmatprep.subr.mxu1 %v8371_v46  ;;  %9653 = vmatpush3.msra.mxu0 %v622_v45  ;;  %v11494_v58 = vld [vmem:[%s11336_s19 + $0xb8] sm:$0xff]  ;;  %v926_v59 = vld [vmem:[#allocation2 + $0x9] sm:$0xff] }
  0x28   : > { %4272 = vst [vmem:[#allocation3 + $0x10] sm:$0x3] %v11101_v4  ;;  %4273 = vst [vmem:[#allocation3 + $0x18] sm:$0xff] %v11101_v4  ;;  %9733 = vmatpush3.msra.mxu1 %v8371_v46  ;;  %9654 = vmatprep.subr.mxu0 %v621_v47  ;;  %v11499_v60 = vld [vmem:[%s11336_s19 + $0xc0] sm:$0xff]  ;;  %v8399_v62 = vld [vmem:[%s15298_s1 + $0x170] sm:$0xff] }
  0x29   : > { %4274 = vst [vmem:[#allocation3 + $0x20] sm:$0xff] %v11101_v4  ;;  %4275 = vst [vmem:[#allocation3 + $0x28] sm:$0x3] %v11101_v4  ;;  %9734 = vmatprep.subr.mxu1 %v8370_v48  ;;  %9655 = vmatpush3.msra.mxu0 %v621_v47  ;;  %v11509_v63 = vld [vmem:[%s11336_s19 + $0xc8] sm:$0xff]  ;;  %v11515_v1 = vld [vmem:[%s11336_s19 + $0xd0] sm:$0xff] }
  0x2a   : > { %4276 = vst [vmem:[#allocation3 + $0x30] sm:$0xff] %v11101_v4  ;;  %4277 = vst [vmem:[#allocation3 + $0x38] sm:$0xff] %v11101_v4  ;;  %9656 = vmatprep.subr.mxu0 %v620_v51  ;;  %9735 = vmatpush3.msra.mxu1 %v8370_v48  ;;  %v11521_v3 = vld [vmem:[%s11336_s19 + $0xd8] sm:$0xff]  ;;  %v11531_v5 = vld [vmem:[%s11336_s19 + $0xe0] sm:$0xff] }
  0x2b   : > { %4278 = vst [vmem:[#allocation3 + $0x40] sm:$0x3] %v11101_v4  ;;  %4279 = vst [vmem:[#allocation3 + $0x48] sm:$0xff] %v11101_v4  ;;  %9657 = vmatpush3.msra.mxu0 %v620_v51  ;;  %9736 = vmatprep.subr.mxu1 %v8369_v53  ;;  %v11534_v6 = vld [vmem:[%s11336_s19 + $0xe8] sm:$0xff]  ;;  %v8397_v8 = vld [vmem:[%s15298_s1 + $0x160] sm:$0xff] }
  0x2c   : > { %4280 = vst [vmem:[#allocation3 + $0x50] sm:$0xff] %v11101_v4  ;;  %4281 = vst [vmem:[#allocation3 + $0x58] sm:$0x3] %v11101_v4  ;;  %9659 = vmatmul.mubr.f32.vlgmr.msra.gmra.mxu0 %v11101_v4  ;;  %9786 = vmatprep.subr.mxu0 %v8400_v55  ;;  %v8396_v10 = vld [vmem:[%s15298_s1 + $0x158] sm:$0xff]  ;;  %v8395_v12 = vld [vmem:[%s15298_s1 + $0x150] sm:$0xff] }
  0x2d   : > { %4282 = vst [vmem:[#allocation3 + $0x60] sm:$0xff] %v11101_v4  ;;  %4283 = vst [vmem:[#allocation3 + $0x68] sm:$0xff] %v11101_v4  ;;  %9737 = vmatpush3.msra.mxu1 %v8369_v53  ;;  %9738 = vmatprep.mubr.f32.mxu1 %v925_v56  ;;  %v8394_v14 = vld [vmem:[%s15298_s1 + $0x148] sm:$0xff]  ;;  %v8393_v17 = vld [vmem:[%s15298_s1 + $0x140] sm:$0xff] }
  0x2e   : > { %4284 = vst [vmem:[#allocation3 + $0x70] sm:$0x3] %v11101_v4  ;;  %4285 = vst [vmem:[#allocation3 + $0x78] sm:$0xff] %v11101_v4  ;;  %9787 = vmatpush3.msra.mxu0 %v8400_v55  ;;  %9739 = vmatmul.mubr.f32.vlgmr.msra.gmra.mxu1 %v926_v59  ;;  %v8392_v23 = vld [vmem:[%s15298_s1 + $0x138] sm:$0xff]  ;;  %v8391_v35 = vld [vmem:[%s15298_s1 + $0x130] sm:$0xff] }
  0x2f   : > { %4286 = vst [vmem:[#allocation3 + $0x80] sm:$0xff] %v11101_v4  ;;  %4287 = vst [vmem:[#allocation3 + $0x88] sm:$0x3] %v11101_v4  ;;  %9788 = vmatprep.subr.mxu0 %v8399_v62  ;;  %9741 = vmatprep.mubr.f32.mxu1 %v11348_v16  ;;  %v8416_v29 = vld [vmem:[%s15298_s1 + $0x1f8] sm:$0xff]  ;;  %v8415_v39 = vld [vmem:[%s15298_s1 + $0x1f0] sm:$0xff] }
  0x30   : > { %4288 = vst [vmem:[#allocation3 + $0x90] sm:$0xff] %v11101_v4  ;;  %4289 = vst [vmem:[#allocation3 + $0x98] sm:$0xff] %v11101_v4  ;;  %9789 = vmatpush3.msra.mxu0 %v8399_v62  ;;  %9866 = vmatprep.subr.mxu1 %v8416_v29  ;;  %v8414_v43 = vld [vmem:[%s15298_s1 + $0x1e8] sm:$0xff]  ;;  %v8413_v46 = vld [vmem:[%s15298_s1 + $0x1e0] sm:$0xff] }
  0x31   : > { %4290 = vst [vmem:[#allocation3 + $0xa0] sm:$0x3] %v11101_v4  ;;  %4291 = vst [vmem:[#allocation3 + $0xa8] sm:$0xff] %v11101_v4  ;;  %9867 = vmatpush3.msra.mxu1 %v8416_v29  ;;  %v11629_v48 = vld [vmem:[%s11336_s19 + $0xf0] sm:$0xff]  ;;  %v8389_v53 = vld [vmem:[%s15298_s1 + $0x120] sm:$0xff] }
  0x32   : > { %4292 = vst [vmem:[#allocation3 + $0xb0] sm:$0xff] %v11101_v4  ;;  %4293 = vst [vmem:[#allocation3 + $0xb8] sm:$0x3] %v11101_v4  ;;  %9742 = vmatmul.mubr.f32.gmra.mxu1 %v11355_v18  ;;  %9868 = vmatprep.subr.mxu1 %v8415_v39  ;;  %v8410_v56 = vld [vmem:[%s15298_s1 + $0x1c8] sm:$0xff]  ;;  %v8409_v62 = vld [vmem:[%s15298_s1 + $0x1c0] sm:$0xff] }
  0x33   : > { %4294 = vst [vmem:[#allocation3 + $0xc0] sm:$0xff] %v11101_v4  ;;  %4295 = vst [vmem:[#allocation3 + $0xc8] sm:$0xff] %v11101_v4  ;;  %9744 = vmatprep.mubr.f32.mxu1 %v11358_v19  ;;  %9869 = vmatpush3.msra.mxu1 %v8415_v39 }
  0x34   : > { %4296 = vst [vmem:[#allocation3 + $0xd0] sm:$0x3] %v11101_v4  ;;  %4297 = vst [vmem:[#allocation3 + $0xd8] sm:$0xff] %v11101_v4  ;;  %9870 = vmatprep.subr.mxu1 %v8414_v43 }
  0x35   : > { %4298 = vst [vmem:[#allocation3 + $0xe0] sm:$0xff] %v11101_v4  ;;  %4299 = vst [vmem:[#allocation3 + $0xe8] sm:$0x3] %v11101_v4  ;;  %9871 = vmatpush3.msra.mxu1 %v8414_v43  ;;  %v8405_v43 = vld [vmem:[%s15298_s1 + $0x1a0] sm:$0xff] }
  0x36   : > { %4300 = vst [vmem:[#allocation3 + $0xf0] sm:$0xff] %v11101_v4  ;;  %4301 = vst [vmem:[#allocation3 + $0xf8] sm:$0xff] %v11101_v4  ;;  %9745 = vmatmul.mubr.f32.gmra.mxu1 %v11366_v21  ;;  %9872 = vmatprep.subr.mxu1 %v8413_v46 }
  0x37   : > { %4302 = vst [vmem:[#allocation3 + $0x100] sm:$0x3] %v11101_v4  ;;  %4303 = vst [vmem:[#allocation3 + $0x108] sm:$0xff] %v11101_v4  ;;  %9747 = vmatprep.mubr.f32.mxu1 %v11369_v22  ;;  %9873 = vmatpush3.msra.mxu1 %v8413_v46  ;;  %v8404_v46 = vld [vmem:[%s15298_s1 + $0x198] sm:$0xff] }
  0x38   : > { %4304 = vst [vmem:[#allocation3 + $0x110] sm:$0xff] %v11101_v4  ;;  %4305 = vst [vmem:[#allocation3 + $0x118] sm:$0x3] %v11101_v4 }
  0x39   : > { %4306 = vst [vmem:[#allocation3 + $0x120] sm:$0xff] %v11101_v4  ;;  %4307 = vst [vmem:[#allocation3 + $0x128] sm:$0xff] %v11101_v4 }
  0x3a   : > { %4308 = vst [vmem:[#allocation3 + $0x130] sm:$0x3] %v11101_v4  ;;  %4309 = vst [vmem:[#allocation3 + $0x138] sm:$0xff] %v11101_v4  ;;  %9748 = vmatmul.mubr.f32.gmra.mxu1 %v11377_v24 }
  0x3b   : > { %4310 = vst [vmem:[#allocation3 + $0x140] sm:$0xff] %v11101_v4  ;;  %4311 = vst [vmem:[#allocation3 + $0x148] sm:$0x3] %v11101_v4  ;;  %9750 = vmatprep.mubr.f32.mxu1 %v11380_v25 }
  0x3c   : > { %4312 = vst [vmem:[#allocation3 + $0x150] sm:$0xff] %v11101_v4  ;;  %4313 = vst [vmem:[#allocation3 + $0x158] sm:$0xff] %v11101_v4 }
  0x3d   : > { %4314 = vst [vmem:[#allocation3 + $0x160] sm:$0x3] %v11101_v4  ;;  %4315 = vst [vmem:[#allocation3 + $0x168] sm:$0xff] %v11101_v4 }
  0x3e   : > { %4316 = vst [vmem:[#allocation3 + $0x170] sm:$0xff] %v11101_v4  ;;  %4317 = vst [vmem:[#allocation3 + $0x178] sm:$0x3] %v11101_v4  ;;  %9751 = vmatmul.mubr.f32.gmra.mxu1 %v11388_v27 }
  0x3f   : > { %4318 = vst [vmem:[#allocation3 + $0x180] sm:$0xff] %v11101_v4  ;;  %4319 = vst [vmem:[#allocation3 + $0x188] sm:$0xff] %v11101_v4  ;;  %9753 = vmatprep.mubr.f32.mxu1 %v11391_v28 }
  0x40   : > { %4320 = vst [vmem:[#allocation3 + $0x190] sm:$0x3] %v11101_v4  ;;  %4321 = vst [vmem:[#allocation3 + $0x198] sm:$0xff] %v11101_v4 }
  0x41   : > { %4322 = vst [vmem:[#allocation3 + $0x1a0] sm:$0xff] %v11101_v4  ;;  %4323 = vst [vmem:[#allocation3 + $0x1a8] sm:$0x3] %v11101_v4  ;;  %v8398_v4 = vld [vmem:[%s15298_s1 + $0x168] sm:$0xff] }
  0x42   : > { %485 = vst [vmem:[#allocation2 + $0x19] sm:$0xff] %v11348_v16  ;;  %486 = vst [vmem:[#allocation2 + $0x21] sm:$0xff] %v11355_v18  ;;  %9790 = vmatprep.subr.mxu0 %v8398_v4  ;;  %9754 = vmatmul.mubr.f32.gmra.mxu1 %v11399_v30 }
  0x43   : > { %487 = vst [vmem:[#allocation2 + $0x31] sm:$0xff] %v11358_v19  ;;  %488 = vst [vmem:[#allocation2 + $0x39] sm:$0xff] %v11366_v21  ;;  %9791 = vmatpush3.msra.mxu0 %v8398_v4  ;;  %9756 = vmatprep.mubr.f32.mxu1 %v11402_v31 }
  0x44   : > { %489 = vst [vmem:[#allocation2 + $0x49] sm:$0xff] %v11369_v22  ;;  %490 = vst [vmem:[#allocation2 + $0x51] sm:$0xff] %v11377_v24  ;;  %9792 = vmatprep.subr.mxu0 %v8397_v8 }
  0x45   : > { %491 = vst [vmem:[#allocation2 + $0x61] sm:$0xff] %v11380_v25  ;;  %492 = vst [vmem:[#allocation2 + $0x69] sm:$0xff] %v11388_v27  ;;  %9793 = vmatpush3.msra.mxu0 %v8397_v8 }
  0x46   : > { %493 = vst [vmem:[#allocation2 + $0x79] sm:$0xff] %v11391_v28  ;;  %494 = vst [vmem:[#allocation2 + $0x81] sm:$0xff] %v11399_v30  ;;  %9794 = vmatprep.subr.mxu0 %v8396_v10  ;;  %v8390_v30 = vld [vmem:[%s15298_s1 + $0x128] sm:$0xff]  ;;  %9757 = vmatmul.mubr.f32.gmra.mxu1 %v11410_v33 }
  0x47   : > { %495 = vst [vmem:[#allocation2 + $0x91] sm:$0xff] %v11402_v31  ;;  %496 = vst [vmem:[#allocation2 + $0x99] sm:$0xff] %v11410_v33  ;;  %9795 = vmatpush3.msra.mxu0 %v8396_v10  ;;  %9759 = vmatprep.mubr.f32.mxu1 %v11413_v34  ;;  %v8412_v33 = vld [vmem:[%s15298_s1 + $0x1d8] sm:$0xff]  ;;  %v8387_v10 = vld [vmem:[%s15298_s1 + $0x110] sm:$0xff] }
  0x48   : > { %497 = vst [vmem:[#allocation2 + $0xa9] sm:$0xff] %v11413_v34  ;;  %498 = vst [vmem:[#allocation2 + $0xb1] sm:$0xff] %v11421_v36  ;;  %9796 = vmatprep.subr.mxu0 %v8395_v12  ;;  %v11636_v34 = vld [vmem:[%s11336_s19 + $0xf8] sm:$0xff]  ;;  %9874 = vmatprep.subr.mxu1 %v8412_v33 }
  0x49   : > { %499 = vst [vmem:[#allocation2 + $0xc1] sm:$0xff] %v11424_v37  ;;  %500 = vst [vmem:[#allocation2 + $0xc9] sm:$0xff] %v11429_v38  ;;  %v11502_v61 = vld [vmem:[#allocation2 + $0x18] sm:$0xff]  ;;  %v11511_v0 = vld [vmem:[#allocation2 + $0x20] sm:$0xff]  ;;  %9797 = vmatpush3.msra.mxu0 %v8395_v12  ;;  %9875 = vmatpush3.msra.mxu1 %v8412_v33 }
  0x4a   : > { %501 = vst [vmem:[#allocation2 + $0xd9] sm:$0xff] %v11439_v41  ;;  %502 = vst [vmem:[#allocation2 + $0xe1] sm:$0xff] %v11449_v44  ;;  %v11517_v2 = vld [vmem:[#allocation2 + $0x30] sm:$0xff]  ;;  %9661 = vmatprep.mubr.f32.mxu0 %v11502_v61  ;;  %v11537_v7 = vld [vmem:[#allocation2 + $0x38] sm:$0xff]  ;;  %9798 = vmatprep.subr.mxu0 %v8394_v14 }
  0x4b   : > { %503 = vst [vmem:[#allocation2 + $0xf1] sm:$0xff] %v11465_v49  ;;  %504 = vst [vmem:[#allocation2 + $0xf9] sm:$0xff] %v11469_v50  ;;  %9662 = vmatmul.mubr.f32.gmra.mxu0 %v11511_v0  ;;  %v11545_v9 = vld [vmem:[#allocation2 + $0x48] sm:$0xff]  ;;  %v11553_v11 = vld [vmem:[#allocation2 + $0x50] sm:$0xff]  ;;  %9760 = vmatmul.mubr.f32.gmra.mxu1 %v11421_v36 }
  0x4c   : > { %505 = vst [vmem:[#allocation2 + $0x109] sm:$0xff] %v11476_v52  ;;  %506 = vst [vmem:[#allocation2 + $0x111] sm:$0xff] %v11483_v54  ;;  %9664 = vmatprep.mubr.f32.mxu0 %v11517_v2  ;;  %v11559_v13 = vld [vmem:[#allocation2 + $0x60] sm:$0xff]  ;;  %v11567_v15 = vld [vmem:[#allocation2 + $0x68] sm:$0xff]  ;;  %9799 = vmatpush3.msra.mxu0 %v8394_v14 }
  0x4d   : > { %507 = vst [vmem:[#allocation2 + $0x121] sm:$0xff] %v11491_v57  ;;  %508 = vst [vmem:[#allocation2 + $0x129] sm:$0xff] %v11494_v58  ;;  %v11573_v20 = vld [vmem:[#allocation2 + $0x78] sm:$0xff]  ;;  %9800 = vmatprep.subr.mxu0 %v8393_v17  ;;  %v11581_v26 = vld [vmem:[#allocation2 + $0x80] sm:$0xff]  ;;  %9762 = vmatprep.mubr.f32.mxu1 %v11424_v37 }
  0x4e   : > { %509 = vst [vmem:[#allocation2 + $0x139] sm:$0xff] %v11499_v60  ;;  %510 = vst [vmem:[#allocation2 + $0x141] sm:$0xff] %v11509_v63  ;;  %9801 = vmatpush3.msra.mxu0 %v8393_v17  ;;  %v11587_v32 = vld [vmem:[#allocation2 + $0x90] sm:$0xff]  ;;  %v11598_v40 = vld [vmem:[#allocation2 + $0x98] sm:$0xff] }
  0x4f   : > { %511 = vst [vmem:[#allocation2 + $0x151] sm:$0xff] %v11515_v1  ;;  %512 = vst [vmem:[#allocation2 + $0x159] sm:$0xff] %v11521_v3  ;;  %9665 = vmatmul.mubr.f32.gmra.mxu0 %v11537_v7  ;;  %9802 = vmatprep.subr.mxu0 %v8392_v23  ;;  %v11601_v42 = vld [vmem:[#allocation2 + $0xa8] sm:$0xff]  ;;  %v11609_v45 = vld [vmem:[#allocation2 + $0xb0] sm:$0xff] }
  0x50   : > { %513 = vst [vmem:[#allocation2 + $0x169] sm:$0xff] %v11531_v5  ;;  %514 = vst [vmem:[#allocation2 + $0x171] sm:$0xff] %v11534_v6  ;;  %9667 = vmatprep.mubr.f32.mxu0 %v11545_v9  ;;  %9803 = vmatpush3.msra.mxu0 %v8392_v23  ;;  %v11615_v31 = vld [vmem:[#allocation2 + $0xc0] sm:$0xff]  ;;  %v11623_v47 = vld [vmem:[#allocation2 + $0xc8] sm:$0xff] }
  0x51   : > { %9804 = vmatprep.subr.mxu0 %v8391_v35  ;;  %v11632_v51 = vld [vmem:[#allocation2 + $0xd8] sm:$0xff]  ;;  %515 = vst [vmem:[#allocation2 + $0x181] sm:$0xff] %v11629_v48  ;;  %516 = vst [vmem:[#allocation2 + $0x189] sm:$0xff] %v11636_v34  ;;  %v8411_v36 = vld [vmem:[%s15298_s1 + $0x1d0] sm:$0xff]  ;;  %9763 = vmatmul.mubr.f32.gmra.mxu1 %v11429_v38 }
  0x52   : > { %9805 = vmatpush3.msra.mxu0 %v8391_v35  ;;  %v11648_v55 = vld [vmem:[#allocation2 + $0xe0] sm:$0xff]  ;;  %v11651_v37 = vld [vmem:[#allocation2 + $0xf0] sm:$0xff]  ;;  %9765 = vmatprep.mubr.f32.mxu1 %v11439_v41  ;;  %v11659_v59 = vld [vmem:[#allocation2 + $0xf8] sm:$0xff] }
  0x53   : > { %9668 = vmatmul.mubr.f32.gmra.mxu0 %v11553_v11  ;;  %9806 = vmatprep.subr.mxu0 %v8390_v30  ;;  %v8388_v38 = vld [vmem:[%s15298_s1 + $0x118] sm:$0xff]  ;;  %v11665_v41 = vld [vmem:[#allocation2 + $0x108] sm:$0xff]  ;;  %v11673_v4 = vld [vmem:[#allocation2 + $0x110] sm:$0xff] }
  0x54   : > { %9670 = vmatprep.mubr.f32.mxu0 %v11559_v13  ;;  %9807 = vmatpush3.msra.mxu0 %v8390_v30  ;;  %v11679_v8 = vld [vmem:[#allocation2 + $0x120] sm:$0xff]  ;;  %v8407_v12 = vld [vmem:[%s15298_s1 + $0x1b0] sm:$0xff]  ;;  %v11690_v14 = vld [vmem:[#allocation2 + $0x128] sm:$0xff] }
  0x55   : > { %9808 = vmatprep.subr.mxu0 %v8389_v53  ;;  %9876 = vmatprep.subr.mxu1 %v8411_v36  ;;  %v11693_v17 = vld [vmem:[#allocation2 + $0x138] sm:$0xff]  ;;  %v8406_v23 = vld [vmem:[%s15298_s1 + $0x1a8] sm:$0xff]  ;;  %v11701_v29 = vld [vmem:[#allocation2 + $0x140] sm:$0xff] }
  0x56   : > { %9877 = vmatpush3.msra.mxu1 %v8411_v36  ;;  %9809 = vmatpush3.msra.mxu0 %v8389_v53  ;;  %v8386_v35 = vld [vmem:[%s15298_s1 + $0x108] sm:$0xff]  ;;  %v11707_v39 = vld [vmem:[#allocation2 + $0x150] sm:$0xff]  ;;  %v11715_v30 = vld [vmem:[#allocation2 + $0x158] sm:$0xff] }
  0x57   : > { %9671 = vmatmul.mubr.f32.gmra.mxu0 %v11567_v15  ;;  %9766 = vmatmul.mubr.f32.gmra.mxu1 %v11449_v44  ;;  %v8408_v44 = vld [vmem:[%s15298_s1 + $0x1b8] sm:$0xff]  ;;  %v11721_v33 = vld [vmem:[#allocation2 + $0x168] sm:$0xff]  ;;  %v8385_v53 = vld [vmem:[%s15298_s1 + $0x100] sm:$0xff] }
  0x58   : > { %9673 = vmatprep.mubr.f32.mxu0 %v11573_v20  ;;  %9878 = vmatprep.subr.mxu1 %v8410_v56  ;;  %v8403_v36 = vld [vmem:[%s15298_s1 + $0x190] sm:$0xff] }
  0x59   : > { %9768 = vmatprep.mubr.f32.mxu1 %v11465_v49  ;;  %9879 = vmatpush3.msra.mxu1 %v8410_v56  ;;  %v11732_v56 = vld [vmem:[#allocation2 + $0x170] sm:$0xff] }
  0x5a   : > { %9810 = vmatprep.subr.mxu0 %v8388_v38  ;;  %9880 = vmatprep.subr.mxu1 %v8409_v62 }
  0x5b   : > { %9674 = vmatmul.mubr.f32.gmra.mxu0 %v11581_v26  ;;  %9769 = vmatmul.mubr.f32.gmra.mxu1 %v11469_v50 }
  0x5c   : > { %9676 = vmatprep.mubr.f32.mxu0 %v11587_v32  ;;  %9811 = vmatpush3.msra.mxu0 %v8388_v38  ;;  %v8402_v38 = vld [vmem:[%s15298_s1 + $0x188] sm:$0xff] }
  0x5d   : > { %9771 = vmatprep.mubr.f32.mxu1 %v11476_v52  ;;  %9881 = vmatpush3.msra.mxu1 %v8409_v62  ;;  %v1295_v62 = vld [vmem:[#allocation2 + $0x2] sm:$0xff] }
  0x5e   : > { %9882 = vmatprep.subr.mxu1 %v8408_v44  ;;  %9812 = vmatprep.subr.mxu0 %v8387_v10 }
  0x5f   : > { %9677 = vmatmul.mubr.f32.gmra.mxu0 %v11598_v40  ;;  %9883 = vmatpush3.msra.mxu1 %v8408_v44  ;;  %v8432_v44 = vld [vmem:[%s15298_s1 + $0x278] sm:$0xff] }
  0x60   : > { %9679 = vmatprep.mubr.f32.mxu0 %v11601_v42  ;;  %9772 = vmatmul.mubr.f32.gmra.mxu1 %v11483_v54 }
  0x61   : > { %9774 = vmatprep.mubr.f32.mxu1 %v11491_v57  ;;  %9884 = vmatprep.subr.mxu1 %v8407_v12 }
  0x62   : > { %9885 = vmatpush3.msra.mxu1 %v8407_v12  ;;  %9813 = vmatpush3.msra.mxu0 %v8387_v10  ;;  %v1296_v10 = vld [vmem:[#allocation2 + $0xa] sm:$0xff]  ;;  %v8401_v12 = vld [vmem:[%s15298_s1 + $0x180] sm:$0xff] }
  0x63   : > { %9680 = vmatmul.mubr.f32.gmra.mxu0 %v11609_v45  ;;  %9886 = vmatprep.subr.mxu1 %v8406_v23 }
  0x64   : > { %9682 = vmatprep.mubr.f32.mxu0 %v11615_v31  ;;  %9775 = vmatmul.mubr.f32.gmra.mxu1 %v11494_v58 }
  0x65   : > { %9777 = vmatprep.mubr.f32.mxu1 %v11499_v60  ;;  %9887 = vmatpush3.msra.mxu1 %v8406_v23  ;;  %v11747_v23 = vld [vmem:[#allocation2 + $0x1a] sm:$0xff] }
  0x66   : > { %9814 = vmatprep.subr.mxu0 %v8386_v35  ;;  %9888 = vmatprep.subr.mxu1 %v8405_v43 }
  0x67   : > { %9683 = vmatmul.mubr.f32.gmra.mxu0 %v11623_v47  ;;  %9889 = vmatpush3.msra.mxu1 %v8405_v43  ;;  %v11753_v43 = vld [vmem:[#allocation2 + $0x22] sm:$0xff] }
  0x68   : > { %9685 = vmatprep.mubr.f32.mxu0 %v11632_v51  ;;  %9778 = vmatmul.mubr.f32.gmra.mxu1 %v11509_v63 }
  0x69   : > { %9815 = vmatpush3.msra.mxu0 %v8386_v35  ;;  %9780 = vmatprep.mubr.f32.mxu1 %v11515_v1  ;;  %v8431_v35 = vld [vmem:[%s15298_s1 + $0x270] sm:$0xff] }
  0x6a   : > { %9890 = vmatprep.subr.mxu1 %v8404_v46  ;;  %9816 = vmatprep.subr.mxu0 %v8385_v53 }
  0x6b   : > { %9686 = vmatmul.mubr.f32.gmra.mxu0 %v11648_v55  ;;  %9891 = vmatpush3.msra.mxu1 %v8404_v46  ;;  %v11756_v46 = vld [vmem:[#allocation2 + $0x32] sm:$0xff] }
  0x6c   : > { %9688 = vmatprep.mubr.f32.mxu0 %v11651_v37  ;;  %9781 = vmatmul.mubr.f32.gmra.mxu1 %v11521_v3 }
  0x6d   : > { %9892 = vmatprep.subr.mxu1 %v8403_v36  ;;  %9783 = vmatprep.mubr.f32.mxu1 %v11531_v5 }
  0x6e   : > { %9893 = vmatpush3.msra.mxu1 %v8403_v36  ;;  %9817 = vmatpush3.msra.mxu0 %v8385_v53  ;;  %v8430_v53 = vld [vmem:[%s15298_s1 + $0x268] sm:$0xff] }
  0x6f   : > { %9689 = vmatmul.mubr.f32.gmra.mxu0 %v11659_v59  ;;  %9894 = vmatprep.subr.mxu1 %v8402_v38  ;;  %v11771_v36 = vld [vmem:[#allocation2 + $0x4a] sm:$0xff] }
  0x70   : > { %9691 = vmatprep.mubr.f32.mxu0 %v11665_v41  ;;  %9784 = vmatmul.mubr.f32.gmra.mxu1 %v11534_v6 }
  0x71   : > { %9895 = vmatpush3.msra.mxu1 %v8402_v38  ;;  %9946 = vmatprep.subr.mxu0 %v8432_v44  ;;  %v11779_v38 = vld [vmem:[#allocation2 + $0x52] sm:$0xff] }
  0x72   : > { %9896 = vmatprep.subr.mxu1 %v8401_v12  ;;  %9898 = vmatprep.mubr.f32.mxu1 %v11502_v61  ;;  %v11765_v61 = vld [vmem:[#allocation2 + $0x3a] sm:$0xff] }
  0x73   : > { %9692 = vmatmul.mubr.f32.gmra.mxu0 %v11673_v4  ;;  %9897 = vmatpush3.msra.mxu1 %v8401_v12  ;;  %v11807_v12 = vld [vmem:[#allocation2 + $0x82] sm:$0xff] }
  0x74   : > { %9694 = vmatprep.mubr.f32.mxu0 %v11679_v8  ;;  %9899 = vmatmul.mubr.f32.vlgmr.msra.gmra.mxu1 %v11511_v0  ;;  %v8429_v0 = vld [vmem:[%s15298_s1 + $0x260] sm:$0xff] }
  0x75   : > { %9901 = vmatprep.mubr.f32.mxu1 %v11517_v2  ;;  %v8428_v2 = vld [vmem:[%s15298_s1 + $0x258] sm:$0xff] }
  0x77   : > { %9695 = vmatmul.mubr.f32.gmra.mxu0 %v11690_v14 }
  0x78   : > { %9697 = vmatprep.mubr.f32.mxu0 %v11693_v17  ;;  %9902 = vmatmul.mubr.f32.gmra.mxu1 %v11537_v7  ;;  %v8427_v7 = vld [vmem:[%s15298_s1 + $0x250] sm:$0xff] }
  0x79   : > { %9904 = vmatprep.mubr.f32.mxu1 %v11545_v9  ;;  %v11785_v9 = vld [vmem:[#allocation2 + $0x62] sm:$0xff] }
  0x7b   : > { %9698 = vmatmul.mubr.f32.gmra.mxu0 %v11701_v29 }
  0x7c   : > { %9700 = vmatprep.mubr.f32.mxu0 %v11707_v39  ;;  %9905 = vmatmul.mubr.f32.gmra.mxu1 %v11553_v11  ;;  %v8425_v11 = vld [vmem:[%s15298_s1 + $0x240] sm:$0xff] }
  0x7d   : > { %9907 = vmatprep.mubr.f32.mxu1 %v11559_v13  ;;  %v11799_v13 = vld [vmem:[#allocation2 + $0x7a] sm:$0xff] }
  0x7f   : > { %9701 = vmatmul.mubr.f32.gmra.mxu0 %v11715_v30 }
  0x80   : > { %9703 = vmatprep.mubr.f32.mxu0 %v11721_v33  ;;  %9908 = vmatmul.mubr.f32.gmra.mxu1 %v11567_v15  ;;  %v8448_v15 = vld [vmem:[%s15298_s1 + $0x2f8] sm:$0xff] }
  0x81   : > { %9910 = vmatprep.mubr.f32.mxu1 %v11573_v20  ;;  %v11813_v20 = vld [vmem:[#allocation2 + $0x92] sm:$0xff]  ;;  %10026 = vmatprep.subr.mxu1 %v8448_v15 }
  0x82   : > { %10027 = vmatpush3.msra.mxu1 %v8448_v15  ;;  %v8442_v15 = vld [vmem:[%s15298_s1 + $0x2c8] sm:$0xff] }
  0x83   : > { %9704 = vmatmul.mubr.f32.gmra.mxu0 %v11732_v56 }
  0x84   : > { %9818 = vmatprep.mubr.f32.mxu0 %v1295_v62  ;;  %v8426_v62 = vld [vmem:[%s15298_s1 + $0x248] sm:$0xff]  ;;  %9911 = vmatmul.mubr.f32.gmra.mxu1 %v11581_v26  ;;  %v11824_v26 = vld [vmem:[#allocation2 + $0x9a] sm:$0xff] }
  0x85   : > { %9913 = vmatprep.mubr.f32.mxu1 %v11587_v32  ;;  %v11827_v32 = vld [vmem:[#allocation2 + $0xaa] sm:$0xff] }
  0x87   : > { %9819 = vmatmul.mubr.f32.vlgmr.msra.gmra.mxu0 %v1296_v10  ;;  %v8424_v10 = vld [vmem:[%s15298_s1 + $0x238] sm:$0xff] }
  0x88   : > { %9947 = vmatpush3.msra.mxu0 %v8432_v44  ;;  %9821 = vmatprep.mubr.f32.mxu0 %v11747_v23  ;;  %v11793_v44 = vld [vmem:[#allocation2 + $0x6a] sm:$0xff] }
  0x89   : > { %9948 = vmatprep.subr.mxu0 %v8431_v35  ;;  %9914 = vmatmul.mubr.f32.gmra.mxu1 %v11598_v40  ;;  %v8422_v40 = vld [vmem:[%s15298_s1 + $0x228] sm:$0xff] }
  0x8a   : > { %9949 = vmatpush3.msra.mxu0 %v8431_v35  ;;  %v8423_v35 = vld [vmem:[%s15298_s1 + $0x230] sm:$0xff]  ;;  %9916 = vmatprep.mubr.f32.mxu1 %v11601_v42  ;;  %v11841_v42 = vld [vmem:[#allocation2 + $0xc2] sm:$0xff] }
  0x8b   : > { %9822 = vmatmul.mubr.f32.gmra.mxu0 %v11753_v43  ;;  %9950 = vmatprep.subr.mxu0 %v8430_v53 }
  0x8c   : > { %9824 = vmatprep.mubr.f32.mxu0 %v11756_v46  ;;  %9951 = vmatpush3.msra.mxu0 %v8430_v53  ;;  %v8447_v53 = vld [vmem:[%s15298_s1 + $0x2f0] sm:$0xff] }
  0x8d   : > { %9952 = vmatprep.subr.mxu0 %v8429_v0  ;;  %10028 = vmatprep.subr.mxu1 %v8447_v53 }
  0x8e   : > { %9953 = vmatpush3.msra.mxu0 %v8429_v0  ;;  %v8446_v0 = vld [vmem:[%s15298_s1 + $0x2e8] sm:$0xff]  ;;  %10029 = vmatpush3.msra.mxu1 %v8447_v53  ;;  %v8441_v53 = vld [vmem:[%s15298_s1 + $0x2c0] sm:$0xff] }
  0x8f   : > { %9825 = vmatmul.mubr.f32.gmra.mxu0 %v11765_v61  ;;  %9954 = vmatprep.subr.mxu0 %v8428_v2 }
  0x90   : > { %9827 = vmatprep.mubr.f32.mxu0 %v11771_v36  ;;  %9955 = vmatpush3.msra.mxu0 %v8428_v2  ;;  %v11835_v2 = vld [vmem:[#allocation2 + $0xb2] sm:$0xff] }
  0x91   : > { %9956 = vmatprep.subr.mxu0 %v8427_v7  ;;  %9917 = vmatmul.mubr.f32.gmra.mxu1 %v11609_v45  ;;  %v8444_v45 = vld [vmem:[%s15298_s1 + $0x2d8] sm:$0xff] }
  0x92   : > { %9957 = vmatpush3.msra.mxu0 %v8427_v7  ;;  %10030 = vmatprep.subr.mxu1 %v8446_v0  ;;  %v8445_v7 = vld [vmem:[%s15298_s1 + $0x2e0] sm:$0xff] }
  0x93   : > { %9828 = vmatmul.mubr.f32.gmra.mxu0 %v11779_v38  ;;  %9958 = vmatprep.subr.mxu0 %v8426_v62 }
  0x94   : > { %9830 = vmatprep.mubr.f32.mxu0 %v11785_v9  ;;  %9959 = vmatpush3.msra.mxu0 %v8426_v62  ;;  %v11849_v62 = vld [vmem:[#allocation2 + $0xca] sm:$0xff] }
  0x95   : > { %9960 = vmatprep.subr.mxu0 %v8425_v11  ;;  %9919 = vmatprep.mubr.f32.mxu1 %v11615_v31  ;;  %v8421_v31 = vld [vmem:[%s15298_s1 + $0x220] sm:$0xff] }
  0x96   : > { %9961 = vmatpush3.msra.mxu0 %v8425_v11  ;;  %10031 = vmatpush3.msra.mxu1 %v8446_v0  ;;  %v11855_v11 = vld [vmem:[#allocation2 + $0xda] sm:$0xff]  ;;  %v11891_v0 = vld [vmem:[#allocation2 + $0x112] sm:$0xff] }
  0x97   : > { %9831 = vmatmul.mubr.f32.gmra.mxu0 %v11793_v44  ;;  %9962 = vmatprep.subr.mxu0 %v8424_v10 }
  0x98   : > { %9833 = vmatprep.mubr.f32.mxu0 %v11799_v13  ;;  %9963 = vmatpush3.msra.mxu0 %v8424_v10  ;;  %v8443_v10 = vld [vmem:[%s15298_s1 + $0x2d0] sm:$0xff] }
  0x99   : > { %9964 = vmatprep.subr.mxu0 %v8423_v35  ;;  %10032 = vmatprep.subr.mxu1 %v8445_v7 }
  0x9a   : > { %9965 = vmatpush3.msra.mxu0 %v8423_v35  ;;  %9920 = vmatmul.mubr.f32.gmra.mxu1 %v11623_v47  ;;  %v11866_v47 = vld [vmem:[#allocation2 + $0xe2] sm:$0xff]  ;;  %v11877_v35 = vld [vmem:[#allocation2 + $0xfa] sm:$0xff] }
  0x9b   : > { %9834 = vmatmul.mubr.f32.gmra.mxu0 %v11807_v12  ;;  %9966 = vmatprep.subr.mxu0 %v8422_v40 }
  0x9c   : > { %9836 = vmatprep.mubr.f32.mxu0 %v11813_v20  ;;  %9967 = vmatpush3.msra.mxu0 %v8422_v40  ;;  %v11897_v40 = vld [vmem:[#allocation2 + $0x122] sm:$0xff] }
  0x9d   : > { %9922 = vmatprep.mubr.f32.mxu1 %v11632_v51  ;;  %10033 = vmatpush3.msra.mxu1 %v8445_v7  ;;  %v11869_v51 = vld [vmem:[#allocation2 + $0xf2] sm:$0xff] }
  0x9e   : > { %10034 = vmatprep.subr.mxu1 %v8444_v45  ;;  %9923 = vmatmul.mubr.f32.gmra.mxu1 %v11648_v55  ;;  %v8420_v55 = vld [vmem:[%s15298_s1 + $0x218] sm:$0xff]  ;;  %v8439_v7 = vld [vmem:[%s15298_s1 + $0x2b0] sm:$0xff] }
  0x9f   : > { %9837 = vmatmul.mubr.f32.gmra.mxu0 %v11824_v26  ;;  %10035 = vmatpush3.msra.mxu1 %v8444_v45  ;;  %v8438_v45 = vld [vmem:[%s15298_s1 + $0x2a8] sm:$0xff] }
  0xa0   : > { %9839 = vmatprep.mubr.f32.mxu0 %v11827_v32  ;;  %9968 = vmatprep.subr.mxu0 %v8421_v31 }
  0xa1   : > { %9925 = vmatprep.mubr.f32.mxu1 %v11651_v37  ;;  %10036 = vmatprep.subr.mxu1 %v8443_v10  ;;  %v11883_v37 = vld [vmem:[#allocation2 + $0x10a] sm:$0xff] }
  0xa2   : > { %10037 = vmatpush3.msra.mxu1 %v8443_v10  ;;  %9969 = vmatpush3.msra.mxu0 %v8421_v31  ;;  %v11919_v31 = vld [vmem:[#allocation2 + $0x142] sm:$0xff] }
  0xa3   : > { %9840 = vmatmul.mubr.f32.gmra.mxu0 %v11835_v2  ;;  %9926 = vmatmul.mubr.f32.gmra.mxu1 %v11659_v59  ;;  %v8440_v59 = vld [vmem:[%s15298_s1 + $0x2b8] sm:$0xff]  ;;  %v8437_v10 = vld [vmem:[%s15298_s1 + $0x2a0] sm:$0xff] }
  0xa4   : > { %9842 = vmatprep.mubr.f32.mxu0 %v11841_v42  ;;  %10038 = vmatprep.subr.mxu1 %v8442_v15 }
  0xa5   : > { %9928 = vmatprep.mubr.f32.mxu1 %v11665_v41  ;;  %10039 = vmatpush3.msra.mxu1 %v8442_v15  ;;  %v8419_v41 = vld [vmem:[%s15298_s1 + $0x210] sm:$0xff]  ;;  %v11933_v15 = vld [vmem:[#allocation2 + $0x15a] sm:$0xff] }
  0xa6   : > { %9970 = vmatprep.subr.mxu0 %v8420_v55  ;;  %10040 = vmatprep.subr.mxu1 %v8441_v53 }
  0xa7   : > { %9843 = vmatmul.mubr.f32.gmra.mxu0 %v11849_v62  ;;  %9929 = vmatmul.mubr.f32.gmra.mxu1 %v11673_v4  ;;  %v11908_v4 = vld [vmem:[#allocation2 + $0x12a] sm:$0xff] }
  0xa8   : > { %9845 = vmatprep.mubr.f32.mxu0 %v11855_v11  ;;  %9971 = vmatpush3.msra.mxu0 %v8420_v55  ;;  %v11939_v55 = vld [vmem:[#allocation2 + $0x16a] sm:$0xff] }
  0xa9   : > { %9931 = vmatprep.mubr.f32.mxu1 %v11679_v8  ;;  %10041 = vmatpush3.msra.mxu1 %v8441_v53  ;;  %v11911_v8 = vld [vmem:[#allocation2 + $0x13a] sm:$0xff]  ;;  %v8435_v53 = vld [vmem:[%s15298_s1 + $0x290] sm:$0xff] }
  0xaa   : > { %10042 = vmatprep.subr.mxu1 %v8440_v59  ;;  %9972 = vmatprep.subr.mxu0 %v8419_v41 }
  0xab   : > { %9846 = vmatmul.mubr.f32.gmra.mxu0 %v11866_v47  ;;  %10043 = vmatpush3.msra.mxu1 %v8440_v59  ;;  %v11949_v59 = vld [vmem:[#allocation2 + $0x180] sm:$0xff] }
  0xac   : > { %9848 = vmatprep.mubr.f32.mxu0 %v11869_v51  ;;  %9932 = vmatmul.mubr.f32.gmra.mxu1 %v11690_v14  ;;  %v8418_v14 = vld [vmem:[%s15298_s1 + $0x208] sm:$0xff] }
  0xad   : > { %9934 = vmatprep.mubr.f32.mxu1 %v11693_v17  ;;  %10044 = vmatprep.subr.mxu1 %v8439_v7  ;;  %v11925_v17 = vld [vmem:[#allocation2 + $0x152] sm:$0xff] }
  0xae   : > { %10045 = vmatpush3.msra.mxu1 %v8439_v7  ;;  %9973 = vmatpush3.msra.mxu0 %v8419_v41  ;;  %v11959_v41 = vld [vmem:[#allocation2 + $0x188] sm:$0xff]  ;;  %v8464_v7 = vld [vmem:[%s15298_s1 + $0x378] sm:$0xff] }
  0xaf   : > { %9849 = vmatmul.mubr.f32.gmra.mxu0 %v11877_v35  ;;  %10046 = vmatprep.subr.mxu1 %v8438_v45 }
  0xb0   : > { %9851 = vmatprep.mubr.f32.mxu0 %v11883_v37  ;;  %9935 = vmatmul.mubr.f32.gmra.mxu1 %v11701_v29  ;;  %v8436_v29 = vld [vmem:[%s15298_s1 + $0x298] sm:$0xff] }
  0xb1   : > { %9937 = vmatprep.mubr.f32.mxu1 %v11707_v39  ;;  %10047 = vmatpush3.msra.mxu1 %v8438_v45  ;;  %v8417_v39 = vld [vmem:[%s15298_s1 + $0x200] sm:$0xff]  ;;  %v8463_v45 = vld [vmem:[%s15298_s1 + $0x370] sm:$0xff] }
  0xb2   : > { %9974 = vmatprep.subr.mxu0 %v8418_v14  ;;  %10048 = vmatprep.subr.mxu1 %v8437_v10 }
  0xb3   : > { %9852 = vmatmul.mubr.f32.gmra.mxu0 %v11891_v0  ;;  %10049 = vmatpush3.msra.mxu1 %v8437_v10  ;;  %v2779_v10 = vld [vmem:[#allocation2 + $0x50] sm:$0xff] }
  0xb4   : > { %9854 = vmatprep.mubr.f32.mxu0 %v11897_v40  ;;  %9938 = vmatmul.mubr.f32.gmra.mxu1 %v11715_v30  ;;  %v11952_v30 = vld [vmem:[#allocation2 + $0x172] sm:$0xff] }
  0xb5   : > { %9975 = vmatpush3.msra.mxu0 %v8418_v14  ;;  %9940 = vmatprep.mubr.f32.mxu1 %v11721_v33  ;;  %v8434_v33 = vld [vmem:[%s15298_s1 + $0x288] sm:$0xff]  ;;  %v8475_v14 = vld [vmem:[%s15298_s1 + $0x3d0] sm:$0xff] }
  0xb6   : > { %10050 = vmatprep.subr.mxu1 %v8436_v29  ;;  %9976 = vmatprep.subr.mxu0 %v8417_v39 }
  0xb7   : > { %9855 = vmatmul.mubr.f32.gmra.mxu0 %v11908_v4  ;;  %10051 = vmatpush3.msra.mxu1 %v8436_v29 }
  0xb8   : > { %9857 = vmatprep.mubr.f32.mxu0 %v11911_v8  ;;  %9941 = vmatmul.mubr.f32.gmra.mxu1 %v11732_v56  ;;  %v8433_v56 = vld [vmem:[%s15298_s1 + $0x280] sm:$0xff] }
  0xb9   : > { %10052 = vmatprep.subr.mxu1 %v8435_v53  ;;  %9943 = vmatprep.mubr.f32.mxu1 %v11949_v59 }
  0xba   : > { %10053 = vmatpush3.msra.mxu1 %v8435_v53  ;;  %9977 = vmatpush3.msra.mxu0 %v8417_v39  ;;  %v2780_v39 = vld [vmem:[#allocation2 + $0x60] sm:$0xff] }
  0xbb   : > { %9858 = vmatmul.mubr.f32.gmra.mxu0 %v11919_v31  ;;  %10054 = vmatprep.subr.mxu1 %v8434_v33 }
  0xbc   : > { %9860 = vmatprep.mubr.f32.mxu0 %v11925_v17  ;;  %9944 = vmatmul.mubr.f32.gmra.mxu1 %v11959_v41 }
  0xbd   : > { %10055 = vmatpush3.msra.mxu1 %v8434_v33  ;;  %10106 = vmatprep.subr.mxu0 %v8464_v7  ;;  %v3149_v33 = vld [vmem:[#allocation2 + $0x51] sm:$0xff] }
  0xbe   : > { %10056 = vmatprep.subr.mxu1 %v8433_v56  ;;  %10058 = vmatprep.mubr.f32.mxu1 %v11747_v23  ;;  %v11075_v23 = vld [vmem:[#allocation2 + $0x81] sm:$0xff] }
  0xbf   : > { %9861 = vmatmul.mubr.f32.gmra.mxu0 %v11933_v15  ;;  %10057 = vmatpush3.msra.mxu1 %v8433_v56 }
  0xc0   : > { %9863 = vmatprep.mubr.f32.mxu0 %v11939_v55  ;;  %10059 = vmatmul.mubr.f32.vlgmr.msra.gmra.mxu1 %v11753_v43  ;;  %v8455_v43 = vld [vmem:[%s15298_s1 + $0x330] sm:$0xff] }
  0xc1   : > { %10061 = vmatprep.mubr.f32.mxu1 %v11756_v46  ;;  %v11077_v46 = vld [vmem:[#allocation2 + $0x99] sm:$0xff] }
  0xc3   : > { %9864 = vmatmul.mubr.f32.gmra.mxu0 %v11952_v30 }
  0xc4   : > { %9978 = vmatprep.mubr.f32.mxu0 %v11348_v16  ;;  %v8462_v16 = vld [vmem:[%s15298_s1 + $0x368] sm:$0xff]  ;;  %10062 = vmatmul.mubr.f32.gmra.mxu1 %v11765_v61  ;;  %v8479_v61 = vld [vmem:[%s15298_s1 + $0x3f0] sm:$0xff] }
  0xc5   : > { %10064 = vmatprep.mubr.f32.mxu1 %v11771_v36  ;;  %v11078_v36 = vld [vmem:[#allocation2 + $0xa9] sm:$0xff] }
  0xc7   : > { %9979 = vmatmul.mubr.f32.vlgmr.msra.gmra.mxu0 %v11355_v18  ;;  %v8461_v18 = vld [vmem:[%s15298_s1 + $0x360] sm:$0xff] }
  0xc8   : > { %10107 = vmatpush3.msra.mxu0 %v8464_v7  ;;  %9981 = vmatprep.mubr.f32.mxu0 %v11358_v19  ;;  %v8460_v19 = vld [vmem:[%s15298_s1 + $0x358] sm:$0xff]  ;;  %v8494_v7 = vld [vmem:[%s15298_s1 + $0x468] sm:$0xff] }
  0xc9   : > { %10108 = vmatprep.subr.mxu0 %v8463_v45  ;;  %10065 = vmatmul.mubr.f32.gmra.mxu1 %v11779_v38  ;;  %v8478_v38 = vld [vmem:[%s15298_s1 + $0x3e8] sm:$0xff] }
  0xca   : > { %10109 = vmatpush3.msra.mxu0 %v8463_v45  ;;  %10067 = vmatprep.mubr.f32.mxu1 %v11785_v9  ;;  %v11079_v9 = vld [vmem:[#allocation2 + $0xb1] sm:$0xff] }
  0xcb   : > { %9982 = vmatmul.mubr.f32.gmra.mxu0 %v11366_v21  ;;  %10110 = vmatprep.subr.mxu0 %v8462_v16  ;;  %v8459_v21 = vld [vmem:[%s15298_s1 + $0x350] sm:$0xff] }
  0xcc   : > { %9984 = vmatprep.mubr.f32.mxu0 %v11369_v22  ;;  %10111 = vmatpush3.msra.mxu0 %v8462_v16  ;;  %v8458_v22 = vld [vmem:[%s15298_s1 + $0x348] sm:$0xff] }
  0xcd   : > { %10112 = vmatprep.subr.mxu0 %v8461_v18  ;;  %10068 = vmatmul.mubr.f32.gmra.mxu1 %v11793_v44  ;;  %v11080_v44 = vld [vmem:[#allocation2 + $0xc1] sm:$0xff] }
  0xce   : > { %10113 = vmatpush3.msra.mxu0 %v8461_v18  ;;  %10070 = vmatprep.mubr.f32.mxu1 %v11799_v13  ;;  %v8454_v13 = vld [vmem:[%s15298_s1 + $0x328] sm:$0xff] }
  0xcf   : > { %9985 = vmatmul.mubr.f32.gmra.mxu0 %v11377_v24  ;;  %10114 = vmatprep.subr.mxu0 %v8460_v19  ;;  %v8457_v24 = vld [vmem:[%s15298_s1 + $0x340] sm:$0xff] }
  0xd0   : > { %9987 = vmatprep.mubr.f32.mxu0 %v11380_v25  ;;  %10115 = vmatpush3.msra.mxu0 %v8460_v19  ;;  %v8456_v25 = vld [vmem:[%s15298_s1 + $0x338] sm:$0xff]  ;;  %v3150_v16 = vld [vmem:[#allocation2 + $0x61] sm:$0xff] }
  0xd1   : > { %10116 = vmatprep.subr.mxu0 %v8459_v21  ;;  %10071 = vmatmul.mubr.f32.gmra.mxu1 %v11807_v12  ;;  %v8477_v12 = vld [vmem:[%s15298_s1 + $0x3e0] sm:$0xff] }
  0xd2   : > { %10117 = vmatpush3.msra.mxu0 %v8459_v21  ;;  %10073 = vmatprep.mubr.f32.mxu1 %v11813_v20  ;;  %v11081_v20 = vld [vmem:[#allocation2 + $0xc9] sm:$0xff] }
  0xd3   : > { %9988 = vmatmul.mubr.f32.gmra.mxu0 %v11388_v27  ;;  %10118 = vmatprep.subr.mxu0 %v8458_v22  ;;  %v11076_v27 = vld [vmem:[#allocation2 + $0x91] sm:$0xff]  ;;  %v2781_v21 = vld [vmem:[#allocation2 + $0x68] sm:$0xff] }
  0xd4   : > { %9990 = vmatprep.mubr.f32.mxu0 %v11391_v28  ;;  %10119 = vmatpush3.msra.mxu0 %v8458_v22  ;;  %v8480_v28 = vld [vmem:[%s15298_s1 + $0x3f8] sm:$0xff]  ;;  %v8493_v22 = vld [vmem:[%s15298_s1 + $0x460] sm:$0xff] }
  0xd5   : > { %10120 = vmatprep.subr.mxu0 %v8457_v24  ;;  %10186 = vmatprep.subr.mxu1 %v8480_v28 }
  0xd6   : > { %10121 = vmatpush3.msra.mxu0 %v8457_v24  ;;  %10187 = vmatpush3.msra.mxu1 %v8480_v28 }
  0xd7   : > { %9991 = vmatmul.mubr.f32.gmra.mxu0 %v11075_v23  ;;  %10122 = vmatprep.subr.mxu0 %v8456_v25  ;;  %v2782_v23 = vld [vmem:[#allocation2 + $0x78] sm:$0xff] }
  0xd8   : > { %9993 = vmatprep.mubr.f32.mxu0 %v11076_v27  ;;  %10123 = vmatpush3.msra.mxu0 %v8456_v25 }
  0xd9   : > { %10074 = vmatmul.mubr.f32.gmra.mxu1 %v11824_v26  ;;  %10124 = vmatprep.subr.mxu0 %v8455_v43  ;;  %v11082_v26 = vld [vmem:[#allocation2 + $0xd9] sm:$0xff] }
  0xda   : > { %10076 = vmatprep.mubr.f32.mxu1 %v11827_v32  ;;  %10188 = vmatprep.subr.mxu1 %v8479_v61  ;;  %v8476_v32 = vld [vmem:[%s15298_s1 + $0x3d8] sm:$0xff] }
  0xdb   : > { %9994 = vmatmul.mubr.f32.gmra.mxu0 %v11077_v46  ;;  %10189 = vmatpush3.msra.mxu1 %v8479_v61  ;;  %v8492_v46 = vld [vmem:[%s15298_s1 + $0x458] sm:$0xff] }
  0xdc   : > { %9996 = vmatprep.mubr.f32.mxu0 %v11078_v36  ;;  %10125 = vmatpush3.msra.mxu0 %v8455_v43  ;;  %v3151_v43 = vld [vmem:[#allocation2 + $0x69] sm:$0xff] }
  0xdd   : > { %10077 = vmatmul.mubr.f32.gmra.mxu1 %v11835_v2  ;;  %10190 = vmatprep.subr.mxu1 %v8478_v38  ;;  %v8453_v2 = vld [vmem:[%s15298_s1 + $0x320] sm:$0xff] }
  0xde   : > { %10079 = vmatprep.mubr.f32.mxu1 %v11841_v42  ;;  %10191 = vmatpush3.msra.mxu1 %v8478_v38  ;;  %v11083_v42 = vld [vmem:[#allocation2 + $0xe1] sm:$0xff]  ;;  %v3152_v38 = vld [vmem:[#allocation2 + $0x79] sm:$0xff] }
  0xdf   : > { %9997 = vmatmul.mubr.f32.gmra.mxu0 %v11079_v9  ;;  %10126 = vmatprep.subr.mxu0 %v8454_v13 }
  0xe0   : > { %9999 = vmatprep.mubr.f32.mxu0 %v11080_v44  ;;  %10192 = vmatprep.subr.mxu1 %v8477_v12 }
  0xe1   : > { %10080 = vmatmul.mubr.f32.gmra.mxu1 %v11849_v62  ;;  %10127 = vmatpush3.msra.mxu0 %v8454_v13  ;;  %v8474_v62 = vld [vmem:[%s15298_s1 + $0x3c8] sm:$0xff]  ;;  %v2783_v13 = vld [vmem:[#allocation2 + $0x80] sm:$0xff] }
  0xe2   : > { %10082 = vmatprep.mubr.f32.mxu1 %v11855_v11  ;;  %10193 = vmatpush3.msra.mxu1 %v8477_v12  ;;  %v8473_v11 = vld [vmem:[%s15298_s1 + $0x3c0] sm:$0xff]  ;;  %v8491_v12 = vld [vmem:[%s15298_s1 + $0x450] sm:$0xff] }
  0xe3   : > { %10000 = vmatmul.mubr.f32.gmra.mxu0 %v11081_v20  ;;  %10194 = vmatprep.subr.mxu1 %v8476_v32 }
  0xe4   : > { %10002 = vmatprep.mubr.f32.mxu0 %v11082_v26  ;;  %10195 = vmatpush3.msra.mxu1 %v8476_v32  ;;  %v2784_v32 = vld [vmem:[#allocation2 + $0x90] sm:$0xff] }
  0xe5   : > { %10083 = vmatmul.mubr.f32.gmra.mxu1 %v11866_v47  ;;  %10128 = vmatprep.subr.mxu0 %v8453_v2  ;;  %v8466_v47 = vld [vmem:[%s15298_s1 + $0x388] sm:$0xff] }
  0xe6   : > { %10085 = vmatprep.mubr.f32.mxu1 %v11869_v51  ;;  %10196 = vmatprep.subr.mxu1 %v8475_v14  ;;  %v2776_v51 = vld [vmem:[#allocation2 + $0x30] sm:$0xff] }
  0xe7   : > { %10003 = vmatmul.mubr.f32.gmra.mxu0 %v11083_v42  ;;  %10197 = vmatpush3.msra.mxu1 %v8475_v14  ;;  %v3153_v14 = vld [vmem:[#allocation2 + $0x81] sm:$0xff] }
  0xe8   : > { %10005 = vmatprep.mubr.f32.mxu0 %v11465_v49  ;;  %10129 = vmatpush3.msra.mxu0 %v8453_v2  ;;  %v8452_v49 = vld [vmem:[%s15298_s1 + $0x318] sm:$0xff] }
  0xe9   : > { %10086 = vmatmul.mubr.f32.gmra.mxu1 %v11877_v35  ;;  %10198 = vmatprep.subr.mxu1 %v8474_v62  ;;  %v2777_v35 = vld [vmem:[#allocation2 + $0x38] sm:$0xff] }
  0xea   : > { %10088 = vmatprep.mubr.f32.mxu1 %v11883_v37  ;;  %10199 = vmatpush3.msra.mxu1 %v8474_v62  ;;  %v8465_v37 = vld [vmem:[%s15298_s1 + $0x380] sm:$0xff]  ;;  %v8490_v62 = vld [vmem:[%s15298_s1 + $0x448] sm:$0xff] }
  0xeb   : > { %10006 = vmatmul.mubr.f32.gmra.mxu0 %v11469_v50  ;;  %10130 = vmatprep.subr.mxu0 %v8452_v49  ;;  %v8472_v50 = vld [vmem:[%s15298_s1 + $0x3b8] sm:$0xff] }
  0xec   : > { %10008 = vmatprep.mubr.f32.mxu0 %v11476_v52  ;;  %10200 = vmatprep.subr.mxu1 %v8473_v11  ;;  %v8451_v52 = vld [vmem:[%s15298_s1 + $0x310] sm:$0xff] }
  0xed   : > { %10089 = vmatmul.mubr.f32.gmra.mxu1 %v11891_v0  ;;  %10131 = vmatpush3.msra.mxu0 %v8452_v49  ;;  %v12127_v0 = vld [vmem:[%s15299_s2] ss:$0 sm:$0xff] }
  0xee   : > { %10091 = vmatprep.mubr.f32.mxu1 %v11897_v40  ;;  %10201 = vmatpush3.msra.mxu1 %v8473_v11  ;;  %v3147_v40 = vld [vmem:[#allocation2 + $0x39] sm:$0xff] }
  0xef   : > { %10009 = vmatmul.mubr.f32.gmra.mxu0 %v11483_v54  ;;  %10202 = vmatprep.subr.mxu1 %v8472_v50  ;;  %v8471_v54 = vld [vmem:[%s15298_s1 + $0x3b0] sm:$0xff] }
  0xf0   : > { %10011 = vmatprep.mubr.f32.mxu0 %v11491_v57  ;;  %10203 = vmatpush3.msra.mxu1 %v8472_v50  ;;  %v8470_v57 = vld [vmem:[%s15298_s1 + $0x3a8] sm:$0xff]  ;;  %v3154_v50 = vld [vmem:[#allocation2 + $0x91] sm:$0xff] }
  0xf1   : > { %10092 = vmatmul.mubr.f32.gmra.mxu1 %v11908_v4  ;;  %10132 = vmatprep.subr.mxu0 %v8451_v52  ;;  %v9660_v4 = vpop.f32.mrf.mxu0 }
  0xf2   : > { %10094 = vmatprep.mubr.f32.mxu1 %v11911_v8  ;;  %10204 = vmatprep.subr.mxu1 %v8471_v54  ;;  %v2778_v8 = vld [vmem:[#allocation2 + $0x48] sm:$0xff] }
  0xf3   : > { %10012 = vmatmul.mubr.f32.gmra.mxu0 %v11494_v58  ;;  %10205 = vmatpush3.msra.mxu1 %v8471_v54  ;;  %v8450_v58 = vld [vmem:[%s15298_s1 + $0x308] sm:$0xff]  ;;  %v702_v29 = vpop.f32.mrf.mxu0 }
  0xf4   : > { %10014 = vmatprep.mubr.f32.mxu0 %v11499_v60  ;;  %10133 = vmatpush3.msra.mxu0 %v8451_v52  ;;  %v8469_v60 = vld [vmem:[%s15298_s1 + $0x3a0] sm:$0xff]  ;;  %v861_v53 = vadd.f32 %v12127_v0, %v702_v29 }
  0xf5   : > { %10095 = vmatmul.mubr.f32.gmra.mxu1 %v11919_v31  ;;  %10206 = vmatprep.subr.mxu1 %v8470_v57  ;;  %v8495_v31 = vld [vmem:[%s15298_s1 + $0x470] sm:$0xff] }
  0xf6   : > { %10097 = vmatprep.mubr.f32.mxu1 %v11925_v17  ;;  %10207 = vmatpush3.msra.mxu1 %v8470_v57  ;;  %v862_v17 = vadd.f32 %v9660_v4, %v12127_v0  ;;  %v2785_v57 = vld [vmem:[#allocation2 + $0x98] sm:$0xff] }
  0xf7   : > { %10015 = vmatmul.mubr.f32.gmra.mxu0 %v11509_v63  ;;  %10134 = vmatprep.subr.mxu0 %v8450_v58  ;;  %v8468_v63 = vld [vmem:[%s15298_s1 + $0x398] sm:$0xff] }
  0xf8   : > { %10017 = vmatprep.mubr.f32.mxu0 %v11515_v1  ;;  %10208 = vmatprep.subr.mxu1 %v8469_v60  ;;  %v8449_v1 = vld [vmem:[%s15298_s1 + $0x300] sm:$0xff] }
  0xf9   : > { %10098 = vmatmul.mubr.f32.gmra.mxu1 %v11933_v15  ;;  %10135 = vmatpush3.msra.mxu0 %v8450_v58  ;;  %v3148_v15 = vld [vmem:[#allocation2 + $0x49] sm:$0xff]  ;;  %v8489_v58 = vld [vmem:[%s15298_s1 + $0x440] sm:$0xff] }
  0xfa   : > { %10100 = vmatprep.mubr.f32.mxu1 %v11939_v55  ;;  %10209 = vmatpush3.msra.mxu1 %v8469_v60  ;;  %v9740_v55 = vpop.f32.mrf.mxu1 }
  0xfb   : > { %10018 = vmatmul.mubr.f32.gmra.mxu0 %v11521_v3  ;;  %10210 = vmatprep.subr.mxu1 %v8468_v63  ;;  %v8467_v3 = vld [vmem:[%s15298_s1 + $0x390] sm:$0xff] }
  0xfc   : > { %10020 = vmatprep.mubr.f32.mxu0 %v11531_v5  ;;  %v12106_v5 = vld [vmem:[#allocation2 + $0x182] sm:$0xff]  ;;  %10211 = vmatpush3.msra.mxu1 %v8468_v63  ;;  %v1072_v45 = vpop.f32.mrf.mxu1 }
  0xfd   : > { %10101 = vmatmul.mubr.f32.gmra.mxu1 %v11952_v30  ;;  %10136 = vmatprep.subr.mxu0 %v8449_v1  ;;  %v12134_v30 = vadd.f32 %v9740_v55, %v862_v17  ;;  %v12140_v19 = vadd.f32 %v1072_v45, %v861_v53  ;;  %v8486_v53 = vld [vmem:[%s15298_s1 + $0x428] sm:$0xff] }
  0xfe   : > { %10212 = vmatprep.subr.mxu1 %v8467_v3  ;;  %10103 = vmatprep.mubr.f32.mxu1 %v12106_v5  ;;  %v9743_v25 = vpop.f32.mrf.mxu1 }
  0xff   : > { %10021 = vmatmul.mubr.f32.gmra.mxu0 %v11534_v6  ;;  %v12114_v6 = vld [vmem:[#allocation2 + $0x18a] sm:$0xff]  ;;  %10213 = vmatpush3.msra.mxu1 %v8467_v3 }
 0x100   : > { %10023 = vmatprep.mubr.f32.mxu0 %v11629_v48  ;;  %v8496_v48 = vld [vmem:[%s15298_s1 + $0x478] sm:$0xff]  ;;  %10137 = vmatpush3.msra.mxu0 %v8449_v1  ;;  %v1082_v36 = vpop.f32.mrf.mxu1  ;;  %v2786_v1 = vld [vmem:[#allocation2 + $0xa8] sm:$0xff] }
 0x101   : > { %10214 = vmatprep.subr.mxu1 %v8466_v47  ;;  %10104 = vmatmul.mubr.f32.gmra.mxu1 %v12114_v6 }
 0x102   : > { %10215 = vmatpush3.msra.mxu1 %v8466_v47  ;;  %10266 = vmatprep.subr.mxu0 %v8496_v48  ;;  %v9746_v26 = vpop.f32.mrf.mxu1 }
 0x103   : > { %10024 = vmatmul.mubr.f32.gmra.mxu0 %v11636_v34  ;;  %v3146_v34 = vld [vmem:[#allocation2 + $0x31] sm:$0xff]  ;;  %10216 = vmatprep.subr.mxu1 %v8465_v37 }
 0x104   : > { %10138 = vmatprep.mubr.f32.mxu0 %v2776_v51  ;;  %10217 = vmatpush3.msra.mxu1 %v8465_v37  ;;  %v1092_v11 = vpop.f32.mrf.mxu1  ;;  %v3155_v51 = vld [vmem:[#allocation2 + $0x99] sm:$0xff] }
 0x105   : > { %10218 = vmatprep.mubr.f32.mxu1 %v3146_v34  ;;  %v3156_v34 = vld [vmem:[#allocation2 + $0xa9] sm:$0xff] }
 0x106   : > { %10219 = vmatmul.mubr.f32.vlgmr.msra.gmra.mxu1 %v3147_v40  ;;  %v9749_v63 = vpop.f32.mrf.mxu1 }
 0x107   : > { %10139 = vmatmul.mubr.f32.vlgmr.msra.gmra.mxu0 %v2777_v35  ;;  %10221 = vmatprep.mubr.f32.mxu1 %v3148_v15  ;;  %v2788_v15 = vld [vmem:[#allocation2 + $0xc0] sm:$0xff] }
 0x108   : > { %10267 = vmatpush3.msra.mxu0 %v8496_v48  ;;  %10141 = vmatprep.mubr.f32.mxu0 %v2778_v8  ;;  %v8488_v48 = vld [vmem:[%s15298_s1 + $0x438] sm:$0xff]  ;;  %v1102_v37 = vpop.f32.mrf.mxu1  ;;  %v2787_v8 = vld [vmem:[#allocation2 + $0xb0] sm:$0xff] }
 0x109   : > { %10268 = vmatprep.subr.mxu0 %v8495_v31 }
 0x10a   : > { %10269 = vmatpush3.msra.mxu0 %v8495_v31  ;;  %10222 = vmatmul.mubr.f32.gmra.mxu1 %v3149_v33  ;;  %v8487_v31 = vld [vmem:[%s15298_s1 + $0x430] sm:$0xff] }
 0x10b   : > { %v9663_v56 = vpop.f32.mrf.mxu0  ;;  %10142 = vmatmul.mubr.f32.gmra.mxu0 %v2779_v10  ;;  %10270 = vmatprep.subr.mxu0 %v8494_v7  ;;  %v9752_v10 = vpop.f32.mrf.mxu1 }
 0x10c   : > { %v864_v18 = vadd.f32 %v9663_v56, %v12127_v0  ;;  %10144 = vmatprep.mubr.f32.mxu0 %v2780_v39  ;;  %10224 = vmatprep.mubr.f32.mxu1 %v3150_v16  ;;  %v3157_v39 = vld [vmem:[#allocation2 + $0xb1] sm:$0xff]  ;;  %v3158_v56 = vld [vmem:[#allocation2 + $0xc1] sm:$0xff] }
 0x10d   : > { %v712_v24 = vpop.f32.mrf.mxu0  ;;  %10271 = vmatpush3.msra.mxu0 %v8494_v7  ;;  %v1112_v7 = vpop.f32.mrf.mxu1 }
 0x10e   : > { %v863_v27 = vadd.f32 %v12127_v0, %v712_v24  ;;  %v12146_v28 = vadd.f32 %v9743_v25, %v864_v18  ;;  %10272 = vmatprep.subr.mxu0 %v8493_v22  ;;  %10225 = vmatmul.mubr.f32.gmra.mxu1 %v3151_v43  ;;  %v2789_v18 = vld [vmem:[#allocation2 + $0xc8] sm:$0xff]  ;;  %v2790_v25 = vld [vmem:[#allocation2 + $0xd8] sm:$0xff] }
 0x10f   : > { %v9666_v61 = vpop.f32.mrf.mxu0  ;;  %10145 = vmatmul.mubr.f32.gmra.mxu0 %v2781_v21  ;;  %10227 = vmatprep.mubr.f32.mxu1 %v3152_v38  ;;  %v8485_v21 = vld [vmem:[%s15298_s1 + $0x420] sm:$0xff]  ;;  %v9755_v24 = vpop.f32.mrf.mxu1  ;;  %v3159_v43 = vld [vmem:[#allocation2 + $0xc9] sm:$0xff] }
 0x110   : > { %v866_v9 = vadd.f32 %v9666_v61, %v12127_v0  ;;  %v12152_v44 = vadd.f32 %v1082_v36, %v863_v27  ;;  %10147 = vmatprep.mubr.f32.mxu0 %v2782_v23  ;;  %10273 = vmatpush3.msra.mxu0 %v8493_v22  ;;  %v3160_v38 = vld [vmem:[#allocation2 + $0xd9] sm:$0xff] }
 0x111   : > { %v722_v20 = vpop.f32.mrf.mxu0  ;;  %10274 = vmatprep.subr.mxu0 %v8492_v46  ;;  %v1122_v36 = vpop.f32.mrf.mxu1 }
 0x112   : > { %v865_v2 = vadd.f32 %v12127_v0, %v722_v20  ;;  %v12158_v42 = vadd.f32 %v9746_v26, %v866_v9  ;;  %10275 = vmatpush3.msra.mxu0 %v8492_v46  ;;  %10228 = vmatmul.mubr.f32.gmra.mxu1 %v3153_v14  ;;  %v8484_v46 = vld [vmem:[%s15298_s1 + $0x418] sm:$0xff]  ;;  %v8483_v20 = vld [vmem:[%s15298_s1 + $0x410] sm:$0xff] }
 0x113   : > { %v9669_v49 = vpop.f32.mrf.mxu0  ;;  %10148 = vmatmul.mubr.f32.gmra.mxu0 %v2783_v13  ;;  %10276 = vmatprep.subr.mxu0 %v8491_v12 }
 0x114   : > { %v868_v52 = vadd.f32 %v9669_v49, %v12127_v0  ;;  %v12164_v54 = vadd.f32 %v1092_v11, %v865_v2  ;;  %10150 = vmatprep.mubr.f32.mxu0 %v2784_v32  ;;  %10277 = vmatpush3.msra.mxu0 %v8491_v12  ;;  %v2791_v12 = vld [vmem:[#allocation2 + $0xe0] sm:$0xff]  ;;  %v9758_v32 = vpop.f32.mrf.mxu1  ;;  %v2792_v2 = vld [vmem:[#allocation2 + $0xf0] sm:$0xff]  ;;  %v8482_v11 = vld [vmem:[%s15298_s1 + $0x408] sm:$0xff] }
 0x115   : > { %v732_v60 = vpop.f32.mrf.mxu0  ;;  %10278 = vmatprep.subr.mxu0 %v8490_v62  ;;  %10230 = vmatprep.mubr.f32.mxu1 %v3154_v50  ;;  %v3161_v49 = vld [vmem:[#allocation2 + $0xe1] sm:$0xff] }
 0x116   : > { %v867_v3 = vadd.f32 %v12127_v0, %v732_v60  ;;  %v12170_v47 = vadd.f32 %v9749_v63, %v868_v52  ;;  %10279 = vmatpush3.msra.mxu0 %v8490_v62  ;;  %10231 = vmatmul.mubr.f32.gmra.mxu1 %v3155_v51  ;;  %v1132_v52 = vpop.f32.mrf.mxu1  ;;  %v2793_v63 = vld [vmem:[#allocation2 + $0xf8] sm:$0xff] }
 0x117   : > { %v9672_v35 = vpop.f32.mrf.mxu0  ;;  %10151 = vmatmul.mubr.f32.gmra.mxu0 %v2785_v57  ;;  %10280 = vmatprep.subr.mxu0 %v8489_v58  ;;  %v3162_v57 = vld [vmem:[#allocation2 + $0xf1] sm:$0xff] }
 0x118   : > { %v870_v40 = vadd.f32 %v9672_v35, %v12127_v0  ;;  %v12176_v4 = vadd.f32 %v1102_v37, %v867_v3  ;;  %10153 = vmatprep.mubr.f32.mxu0 %v2786_v1  ;;  %10281 = vmatpush3.msra.mxu0 %v8489_v58  ;;  %v8481_v1 = vld [vmem:[%s15298_s1 + $0x400] sm:$0xff]  ;;  %v9761_v51 = vpop.f32.mrf.mxu1 }
 0x119   : > { %v742_v17 = vpop.f32.mrf.mxu0  ;;  %10282 = vmatprep.subr.mxu0 %v8488_v48  ;;  %10233 = vmatprep.mubr.f32.mxu1 %v3156_v34  ;;  %v3163_v34 = vld [vmem:[#allocation2 + $0xf9] sm:$0xff] }
 0x11a   : > { %v869_v29 = vadd.f32 %v12127_v0, %v742_v17  ;;  %v12182_v55 = vadd.f32 %v9752_v10, %v870_v40  ;;  %10283 = vmatpush3.msra.mxu0 %v8488_v48  ;;  %10234 = vmatmul.mubr.f32.gmra.mxu1 %v3157_v39  ;;  %v2794_v48 = vld [vmem:[#allocation2 + $0x108] sm:$0xff] }
 0x11b   : > { %v9675_v33 = vpop.f32.mrf.mxu0  ;;  %10154 = vmatmul.mubr.f32.gmra.mxu0 %v2787_v8  ;;  %10284 = vmatprep.subr.mxu0 %v8487_v31  ;;  %v1142_v8 = vpop.f32.mrf.mxu1 }
 0x11c   : > { %v872_v45 = vadd.f32 %v9675_v33, %v12127_v0  ;;  %v12188_v16 = vadd.f32 %v1112_v7, %v869_v29  ;;  %10156 = vmatprep.mubr.f32.mxu0 %v2788_v15  ;;  %10285 = vmatpush3.msra.mxu0 %v8487_v31  ;;  %v3164_v31 = vld [vmem:[#allocation2 + $0x109] sm:$0xff]  ;;  %v3165_v7 = vld [vmem:[#allocation2 + $0x111] sm:$0xff] }
 0x11d   : > { %v752_v22 = vpop.f32.mrf.mxu0  ;;  %10286 = vmatprep.subr.mxu0 %v8486_v53  ;;  %10236 = vmatprep.mubr.f32.mxu1 %v3158_v56  ;;  %v2795_v15 = vld [vmem:[#allocation2 + $0x110] sm:$0xff]  ;;  %v9764_v39 = vpop.f32.mrf.mxu1 }
 0x11e   : > { %v871_v23 = vadd.f32 %v12127_v0, %v752_v22  ;;  %v12194_v27 = vadd.f32 %v9755_v24, %v872_v45  ;;  %10287 = vmatpush3.msra.mxu0 %v8486_v53  ;;  %10237 = vmatmul.mubr.f32.gmra.mxu1 %v3159_v43  ;;  %v2796_v53 = vld [vmem:[#allocation2 + $0x120] sm:$0xff]  ;;  %v2797_v22 = vld [vmem:[#allocation2 + $0x128] sm:$0xff] }
 0x11f   : > { %v9678_v61 = vpop.f32.mrf.mxu0  ;;  %10157 = vmatmul.mubr.f32.gmra.mxu0 %v2789_v18  ;;  %10288 = vmatprep.subr.mxu0 %v8485_v21  ;;  %v12227_v45 = vpop.f32.mrf.mxu1  ;;  %v3166_v18 = vld [vmem:[#allocation2 + $0x121] sm:$0xff] }
 0x120   : > { %v874_v9 = vadd.f32 %v9678_v61, %v12127_v0  ;;  %v12200_v13 = vadd.f32 %v1122_v36, %v871_v23  ;;  %10159 = vmatprep.mubr.f32.mxu0 %v2790_v25  ;;  %10289 = vmatpush3.msra.mxu0 %v8485_v21  ;;  %v2798_v23 = vld [vmem:[#allocation2 + $0x138] sm:$0xff] }
 0x121   : > { %v762_v26 = vpop.f32.mrf.mxu0  ;;  %10290 = vmatprep.subr.mxu0 %v8484_v46  ;;  %10239 = vmatprep.mubr.f32.mxu1 %v3160_v38  ;;  %v9767_v25 = vpop.f32.mrf.mxu1  ;;  %v3168_v38 = vld [vmem:[#allocation2 + $0x139] sm:$0xff] }
 0x122   : > { %v873_v14 = vadd.f32 %v12127_v0, %v762_v26  ;;  %v12206_v62 = vadd.f32 %v9758_v32, %v874_v9  ;;  %10291 = vmatpush3.msra.mxu0 %v8484_v46  ;;  %10240 = vmatmul.mubr.f32.gmra.mxu1 %v3161_v49  ;;  %v3167_v46 = vld [vmem:[#allocation2 + $0x129] sm:$0xff] }
 0x123   : > { %v9681_v50 = vpop.f32.mrf.mxu0  ;;  %10160 = vmatmul.mubr.f32.gmra.mxu0 %v2791_v12  ;;  %10292 = vmatprep.subr.mxu0 %v8483_v20  ;;  %v12234_v36 = vpop.f32.mrf.mxu1  ;;  %v2799_v12 = vld [vmem:[#allocation2 + $0x140] sm:$0xff]  ;;  %v2800_v32 = vld [vmem:[#allocation2 + $0x150] sm:$0xff] }
 0x124   : > { %v876_v58 = vadd.f32 %v9681_v50, %v12127_v0  ;;  %v12212_v60 = vadd.f32 %v1132_v52, %v873_v14  ;;  %10162 = vmatprep.mubr.f32.mxu0 %v2792_v2  ;;  %10293 = vmatpush3.msra.mxu0 %v8483_v20  ;;  %v3169_v14 = vld [vmem:[#allocation2 + $0x141] sm:$0xff]  ;;  %v3170_v50 = vld [vmem:[#allocation2 + $0x151] sm:$0xff] }
 0x125   : > { %v772_v3 = vpop.f32.mrf.mxu0  ;;  %10294 = vmatprep.subr.mxu0 %v8482_v11  ;;  %10242 = vmatprep.mubr.f32.mxu1 %v3162_v57  ;;  %v9770_v26 = vpop.f32.mrf.mxu1  ;;  %v2801_v57 = vld [vmem:[#allocation2 + $0x158] sm:$0xff] }
 0x126   : > { %v875_v35 = vadd.f32 %v12127_v0, %v772_v3  ;;  %v12218_v37 = vadd.f32 %v9761_v51, %v876_v58  ;;  %10295 = vmatpush3.msra.mxu0 %v8482_v11  ;;  %10243 = vmatmul.mubr.f32.gmra.mxu1 %v3163_v34  ;;  %v3171_v51 = vld [vmem:[#allocation2 + $0x159] sm:$0xff]  ;;  %v3172_v34 = vld [vmem:[#allocation2 + $0x169] sm:$0xff] }
 0x127   : > { %v9684_v40 = vpop.f32.mrf.mxu0  ;;  %10163 = vmatmul.mubr.f32.gmra.mxu0 %v2793_v63  ;;  %10296 = vmatprep.subr.mxu0 %v8481_v1  ;;  %v12241_v11 = vpop.f32.mrf.mxu1 }
 0x128   : > { %v878_v17 = vadd.f32 %v9684_v40, %v12127_v0  ;;  %v12221_v10 = vadd.f32 %v1142_v8, %v875_v35  ;;  %10165 = vmatprep.mubr.f32.mxu0 %v2794_v48  ;;  %10297 = vmatpush3.msra.mxu0 %v8481_v1  ;;  %v2802_v1 = vld [vmem:[#allocation2 + $0x168] sm:$0xff]  ;;  %v2803_v8 = vld [vmem:[#allocation2 + $0x170] sm:$0xff] }
 0x129   : > { %v12223_v29 = vpop.f32.mrf.mxu0  ;;  %10245 = vmatprep.mubr.f32.mxu1 %v3164_v31  ;;  %v9773_v63 = vpop.f32.mrf.mxu1 }
 0x12a   : > { %v12225_v33 = vadd.f32 %v9764_v39, %v878_v17  ;;  %10246 = vmatmul.mubr.f32.gmra.mxu1 %v3165_v7  ;;  %v3173_v39 = vld [vmem:[#allocation2 + $0x171] sm:$0xff] }
 0x12b   : > { %v9687_v56 = vpop.f32.mrf.mxu0  ;;  %10166 = vmatmul.mubr.f32.gmra.mxu0 %v2795_v15  ;;  %10248 = vmatprep.mubr.f32.mxu1 %v3166_v18  ;;  %v12248_v35 = vpop.f32.mrf.mxu1 }
 0x12c   : > { %v880_v21 = vadd.f32 %v9687_v56, %v12127_v0  ;;  %10168 = vmatprep.mubr.f32.mxu0 %v2796_v53  ;;  %v3174_v56 = vld [vmem:[#allocation2 + $0x181] sm:$0xff] }
 0x12d   : > { %v12230_v24 = vpop.f32.mrf.mxu0  ;;  %v9776_v17 = vpop.f32.mrf.mxu1 }
 0x12e   : > { %v12232_v43 = vadd.f32 %v9767_v25, %v880_v21  ;;  %10249 = vmatmul.mubr.f32.gmra.mxu1 %v3167_v46 }
 0x12f   : > { %v9690_v61 = vpop.f32.mrf.mxu0  ;;  %10169 = vmatmul.mubr.f32.gmra.mxu0 %v2797_v22  ;;  %10251 = vmatprep.mubr.f32.mxu1 %v3168_v38  ;;  %v12255_v7 = vpop.f32.mrf.mxu1  ;;  %v3176_v38 = vld [vmem:[#allocation2 + $0x199] sm:$0xff] }
 0x130   : > { %v882_v9 = vadd.f32 %v9690_v61, %v12127_v0  ;;  %10171 = vmatprep.mubr.f32.mxu0 %v2798_v23  ;;  %v3175_v23 = vld [vmem:[#allocation2 + $0x189] sm:$0xff] }
 0x131   : > { %v12237_v20 = vpop.f32.mrf.mxu0  ;;  %v9779_v22 = vpop.f32.mrf.mxu1 }
 0x132   : > { %v12239_v2 = vadd.f32 %v9770_v26, %v882_v9  ;;  %10252 = vmatmul.mubr.f32.gmra.mxu1 %v3169_v14 }
 0x133   : > { %v9693_v49 = vpop.f32.mrf.mxu0  ;;  %10172 = vmatmul.mubr.f32.gmra.mxu0 %v2799_v12  ;;  %10254 = vmatprep.mubr.f32.mxu1 %v3170_v50  ;;  %v12263_v61 = vpop.f32.mrf.mxu1  ;;  %v12267_v12 = vld [vmem:[#allocation2] sm:$0xff] }
 0x134   : > { %v884_v52 = vadd.f32 %v9693_v49, %v12127_v0  ;;  %10174 = vmatprep.mubr.f32.mxu0 %v2800_v32  ;;  %v3516_v32 = vld [vmem:[#allocation2 + $0x32] sm:$0xff]  ;;  %v3177_v49 = vld [vmem:[#allocation2 + $0x1a1] sm:$0xff] }
 0x135   : > { %v12244_v58 = vpop.f32.mrf.mxu0  ;;  %v9782_v26 = vpop.f32.mrf.mxu1 }
 0x136   : > { %v12246_v3 = vadd.f32 %v9773_v63, %v884_v52  ;;  %10255 = vmatmul.mubr.f32.gmra.mxu1 %v3171_v51  ;;  %v3518_v51 = vld [vmem:[#allocation2 + $0x4a] sm:$0xff] }
 0x137   : > { %v9696_v48 = vpop.f32.mrf.mxu0  ;;  %10175 = vmatmul.mubr.f32.gmra.mxu0 %v2801_v57  ;;  %10257 = vmatprep.mubr.f32.mxu1 %v3172_v34  ;;  %v12274_v52 = vpop.f32.mrf.mxu1  ;;  %v3517_v57 = vld [vmem:[#allocation2 + $0x3a] sm:$0xff] }
 0x138   : > { %v886_v40 = vadd.f32 %v9696_v48, %v12127_v0  ;;  %10177 = vmatprep.mubr.f32.mxu0 %v2802_v1 }
 0x139   : > { %v12251_v31 = vpop.f32.mrf.mxu0  ;;  %v9785_v1 = vpop.f32.mrf.mxu1 }
 0x13a   : > { %v12253_v15 = vadd.f32 %v9776_v17, %v886_v40  ;;  %10258 = vmatmul.mubr.f32.gmra.mxu1 %v3173_v39  ;;  %v3519_v17 = vld [vmem:[#allocation2 + $0x52] sm:$0xff] }
 0x13b   : > { %v9699_v53 = vpop.f32.mrf.mxu0  ;;  %10178 = vmatmul.mubr.f32.gmra.mxu0 %v2803_v8  ;;  %10260 = vmatprep.mubr.f32.mxu1 %v3174_v56  ;;  %v12283_v34 = vpop.f32.mrf.mxu1  ;;  %v3520_v56 = vld [vmem:[#allocation2 + $0x62] sm:$0xff] }
 0x13c   : > { %v888_v18 = vadd.f32 %v9699_v53, %v12127_v0  ;;  %10180 = vmatprep.mubr.f32.mxu0 %v11949_v59 }
 0x13d   : > { %v12259_v21 = vpop.f32.mrf.mxu0  ;;  %v9900_v53 = vpop.f32.mrf.mxu1 }
 0x13e   : > { %v12261_v25 = vadd.f32 %v9779_v22, %v888_v18  ;;  %10261 = vmatmul.mubr.f32.gmra.mxu1 %v3175_v23 }
 0x13f   : > { %v9702_v46 = vpop.f32.mrf.mxu0  ;;  %10181 = vmatmul.mubr.f32.gmra.mxu0 %v11959_v41  ;;  %10263 = vmatprep.mubr.f32.mxu1 %v3176_v38 }
 0x140   : > { %v890_v9 = vadd.f32 %v9702_v46, %v12127_v0  ;;  %10183 = vmatprep.mubr.f32.mxu0 %v12267_v12  ;;  %v12291_v46 = vpop.f32.mrf.mxu1 }
 0x141   : > { %v12270_v59 = vpop.f32.mrf.mxu0 }
 0x142   : > { %v12272_v14 = vadd.f32 %v9782_v26, %v890_v9  ;;  %10264 = vmatmul.mubr.f32.gmra.mxu1 %v3177_v49  ;;  %v3521_v9 = vld [vmem:[#allocation2 + $0x6a] sm:$0xff] }
 0x143   : > { %v9705_v50 = vpop.f32.mrf.mxu0  ;;  %10184 = vmatmul.mubr.f32.gmra.mxu0 %v12267_v12  ;;  %10378 = vmatprep.mubr.f32.mxu1 %v12267_v12 }
 0x144   : > { %v892_v41 = vadd.f32 %v9705_v50, %v12127_v0  ;;  %10298 = vmatprep.mubr.f32.mxu0 %v3516_v32  ;;  %v3522_v32 = vld [vmem:[#allocation2 + $0x7a] sm:$0xff] }
 0x145   : > { %v12278_v63 = vpop.f32.mrf.mxu0 }
 0x146   : > { %v12280_v48 = vadd.f32 %v9785_v1, %v892_v41  ;;  %v3523_v1 = vld [vmem:[#allocation2 + $0x82] sm:$0xff] }
 0x147   : > { %v9820_v40 = vpop.f32.mrf.mxu0  ;;  %10299 = vmatmul.mubr.f32.vlgmr.msra.gmra.mxu0 %v3517_v57 }
 0x148   : > { %v1602_v8 = vadd.f32 %v9820_v40, %v12134_v30  ;;  %10301 = vmatprep.mubr.f32.mxu0 %v3518_v51  ;;  %v9903_v30 = vpop.f32.mrf.mxu1  ;;  %v3524_v40 = vld [vmem:[#allocation2 + $0x92] sm:$0xff] }
 0x149   : > { %v1442_v39 = vpop.f32.mrf.mxu0 }
 0x14a   : > { %v12287_v18 = vadd.f32 %v1442_v39, %v12140_v19  ;;  %v12289_v22 = vadd.f32 %v9900_v53, %v1602_v8  ;;  %v12299_v41 = vpop.f32.mrf.mxu1 }
 0x14b   : > { %v9823_v23 = vpop.f32.mrf.mxu0  ;;  %10302 = vmatmul.mubr.f32.gmra.mxu0 %v3519_v17 }
 0x14c   : > { %v1604_v38 = vadd.f32 %v9823_v23, %v12146_v28  ;;  %10304 = vmatprep.mubr.f32.mxu0 %v3520_v56  ;;  %v9906_v28 = vpop.f32.mrf.mxu1  ;;  %v3525_v56 = vld [vmem:[#allocation2 + $0x9a] sm:$0xff] }
 0x14d   : > { %v1452_v26 = vpop.f32.mrf.mxu0 }
 0x14e   : > { %v12295_v49 = vadd.f32 %v1452_v26, %v12152_v44  ;;  %v12297_v50 = vadd.f32 %v9903_v30, %v1604_v38  ;;  %v12307_v39 = vpop.f32.mrf.mxu1  ;;  %v3526_v38 = vld [vmem:[#allocation2 + $0xaa] sm:$0xff] }
 0x14f   : > { %v9826_v19 = vpop.f32.mrf.mxu0  ;;  %10305 = vmatmul.mubr.f32.gmra.mxu0 %v3521_v9 }
 0x150   : > { %v1606_v57 = vadd.f32 %v9826_v19, %v12158_v42  ;;  %10307 = vmatprep.mubr.f32.mxu0 %v3522_v32  ;;  %v9909_v42 = vpop.f32.mrf.mxu1  ;;  %v3527_v19 = vld [vmem:[#allocation2 + $0xb2] sm:$0xff] }
 0x151   : > { %v1462_v51 = vpop.f32.mrf.mxu0 }
 0x152   : > { %v12303_v8 = vadd.f32 %v1462_v51, %v12164_v54  ;;  %v12305_v17 = vadd.f32 %v9906_v28, %v1606_v57  ;;  %v12315_v30 = vpop.f32.mrf.mxu1  ;;  %v3528_v51 = vld [vmem:[#allocation2 + $0xc2] sm:$0xff] }
 0x153   : > { %v9829_v44 = vpop.f32.mrf.mxu0  ;;  %10308 = vmatmul.mubr.f32.gmra.mxu0 %v3523_v1 }
 0x154   : > { %v1608_v53 = vadd.f32 %v9829_v44, %v12170_v47  ;;  %10310 = vmatprep.mubr.f32.mxu0 %v3524_v40  ;;  %v4475_v47 = vld [vmem:[%s15300_s3 + $0x78] sm:$0xff]  ;;  %v9912_v1 = vpop.f32.mrf.mxu1 }
 0x155   : > { %v1472_v23 = vpop.f32.mrf.mxu0  ;;  %10346 = vmatprep.subr.mxu1 %v4475_v47 }
 0x156   : > { %v12311_v9 = vadd.f32 %v1472_v23, %v12176_v4  ;;  %v12313_v26 = vadd.f32 %v9909_v42, %v1608_v53  ;;  %10347 = vmatpush3.msra.mxu1 %v4475_v47  ;;  %v12326_v44 = vpop.f32.mrf.mxu1  ;;  %v3529_v53 = vld [vmem:[#allocation2 + $0xca] sm:$0xff]  ;;  %v3531_v47 = vld [vmem:[#allocation2 + $0xe2] sm:$0xff] }
 0x157   : > { %v9832_v54 = vpop.f32.mrf.mxu0  ;;  %10311 = vmatmul.mubr.f32.gmra.mxu0 %v3525_v56  ;;  %v4474_v56 = vld [vmem:[%s15300_s3 + $0x70] sm:$0xff] }
 0x158   : > { %v1610_v32 = vadd.f32 %v9832_v54, %v12182_v55  ;;  %10313 = vmatprep.mubr.f32.mxu0 %v3526_v38  ;;  %v9915_v42 = vpop.f32.mrf.mxu1  ;;  %v3530_v38 = vld [vmem:[#allocation2 + $0xda] sm:$0xff]  ;;  %10348 = vmatprep.subr.mxu1 %v4474_v56 }
 0x159   : > { %v1482_v57 = vpop.f32.mrf.mxu0  ;;  %10349 = vmatpush3.msra.mxu1 %v4474_v56 }
 0x15a   : > { %v12322_v4 = vadd.f32 %v1482_v57, %v12188_v16  ;;  %v12324_v28 = vadd.f32 %v9912_v1, %v1610_v32  ;;  %v4473_v57 = vld [vmem:[%s15300_s3 + $0x68] sm:$0xff] }
 0x15b   : > { %v9835_v40 = vpop.f32.mrf.mxu0  ;;  %10314 = vmatmul.mubr.f32.gmra.mxu0 %v3527_v19  ;;  %v12337_v19 = vpop.f32.mrf.mxu1  ;;  %10350 = vmatprep.subr.mxu1 %v4473_v57 }
 0x15c   : > { %v1612_v55 = vadd.f32 %v9835_v40, %v12194_v27  ;;  %10316 = vmatprep.mubr.f32.mxu0 %v3528_v51  ;;  %v3532_v40 = vld [vmem:[#allocation2 + $0xf2] sm:$0xff]  ;;  %10351 = vmatpush3.msra.mxu1 %v4473_v57 }
 0x15d   : > { %v1492_v23 = vpop.f32.mrf.mxu0  ;;  %v9918_v51 = vpop.f32.mrf.mxu1 }
 0x15e   : > { %v12333_v16 = vadd.f32 %v1492_v23, %v12200_v13  ;;  %v12335_v54 = vadd.f32 %v9915_v42, %v1612_v55  ;;  %v3533_v42 = vld [vmem:[#allocation2 + $0xfa] sm:$0xff] }
 0x15f   : > { %v9838_v32 = vpop.f32.mrf.mxu0  ;;  %10317 = vmatmul.mubr.f32.gmra.mxu0 %v3529_v53  ;;  %v12348_v53 = vpop.f32.mrf.mxu1 }
 0x160   : > { %v1614_v27 = vadd.f32 %v9838_v32, %v12206_v62  ;;  %10319 = vmatprep.mubr.f32.mxu0 %v3530_v38  ;;  %v877_v62 = vadd.f32 %v12127_v0, %v12223_v29  ;;  %v4472_v38 = vld [vmem:[%s15300_s3 + $0x60] sm:$0xff] }
 0x161   : > { %v1502_v1 = vpop.f32.mrf.mxu0  ;;  %v9921_v32 = vpop.f32.mrf.mxu1  ;;  %10352 = vmatprep.subr.mxu1 %v4472_v38 }
 0x162   : > { %v12344_v13 = vadd.f32 %v1502_v1, %v12212_v60  ;;  %v12346_v55 = vadd.f32 %v9918_v51, %v1614_v27  ;;  %v3534_v27 = vld [vmem:[#allocation2 + $0x10a] sm:$0xff]  ;;  %10353 = vmatpush3.msra.mxu1 %v4472_v38  ;;  %v3535_v51 = vld [vmem:[#allocation2 + $0x112] sm:$0xff] }
 0x163   : > { %v9841_v56 = vpop.f32.mrf.mxu0  ;;  %10320 = vmatmul.mubr.f32.gmra.mxu0 %v3531_v47  ;;  %v12361_v0 = vpop.f32.mrf.mxu1 }
 0x164   : > { %v1616_v23 = vadd.f32 %v9841_v56, %v12218_v37  ;;  %10322 = vmatprep.mubr.f32.mxu0 %v3532_v40  ;;  %v1247_v37 = vadd.f32 %v12227_v45, %v877_v62  ;;  %v4471_v40 = vld [vmem:[%s15300_s3 + $0x58] sm:$0xff]  ;;  %v3537_v45 = vld [vmem:[#allocation2 + $0x12a] sm:$0xff] }
 0x165   : > { %v1512_v60 = vpop.f32.mrf.mxu0  ;;  %10354 = vmatprep.subr.mxu1 %v4471_v40  ;;  %v4470_v62 = vld [vmem:[%s15300_s3 + $0x50] sm:$0xff] }
 0x166   : > { %v12357_v57 = vadd.f32 %v1512_v60, %v12221_v10  ;;  %v12359_v1 = vadd.f32 %v9921_v32, %v1616_v23  ;;  %v9924_v10 = vpop.f32.mrf.mxu1  ;;  %v3536_v60 = vld [vmem:[#allocation2 + $0x122] sm:$0xff]  ;;  %10355 = vmatpush3.msra.mxu1 %v4471_v40 }
 0x167   : > { %v9844_v47 = vpop.f32.mrf.mxu0  ;;  %10323 = vmatmul.mubr.f32.gmra.mxu0 %v3533_v42  ;;  %10356 = vmatprep.subr.mxu1 %v4470_v62 }
 0x168   : > { %v1618_v29 = vadd.f32 %v9844_v47, %v12225_v33  ;;  %10325 = vmatprep.mubr.f32.mxu0 %v3534_v27  ;;  %v12372_v32 = vpop.f32.mrf.mxu1  ;;  %10357 = vmatpush3.msra.mxu1 %v4470_v62 }
 0x169   : > { %v1522_v56 = vpop.f32.mrf.mxu0  ;;  %15313 = vst [vmem:[#allocation6_spill] sm:$0xff] %v12372_v32  ;;  %v3542_v32 = vld [vmem:[#allocation2 + $0x16a] sm:$0xff] }
 0x16a   : > { %v12368_v23 = vadd.f32 %v1522_v56, %v1247_v37  ;;  %v12370_v38 = vadd.f32 %v9924_v10, %v1618_v29  ;;  %v9927_v47 = vpop.f32.mrf.mxu1  ;;  %v3538_v37 = vld [vmem:[#allocation2 + $0x13a] sm:$0xff]  ;;  %v3539_v10 = vld [vmem:[#allocation2 + $0x142] sm:$0xff] }
 0x16b   : > { %v9847_v42 = vpop.f32.mrf.mxu0  ;;  %10326 = vmatmul.mubr.f32.gmra.mxu0 %v3535_v51  ;;  %v8577_v51 = vld [vmem:[%s15300_s3 + $0xf8] sm:$0xff] }
 0x16c   : > { %v1620_v33 = vadd.f32 %v9847_v42, %v12232_v43  ;;  %10328 = vmatprep.mubr.f32.mxu0 %v3536_v60  ;;  %v12385_v43 = vpop.f32.mrf.mxu1  ;;  %10426 = vmatprep.subr.mxu0 %v8577_v51  ;;  %v4469_v60 = vld [vmem:[%s15300_s3 + $0x48] sm:$0xff]  ;;  %v8576_v42 = vld [vmem:[%s15300_s3 + $0xf0] sm:$0xff] }
 0x16d   : > { %v12378_v27 = vpop.f32.mrf.mxu0  ;;  %15314 = vst [vmem:[#allocation7_spill] sm:$0xff] %v12385_v43  ;;  %10427 = vmatpush3.msra.mxu0 %v8577_v51  ;;  %10358 = vmatprep.subr.mxu1 %v4469_v60  ;;  %v3541_v43 = vld [vmem:[#allocation2 + $0x15a] sm:$0xff] }
 0x16e   : > { %v12380_v29 = vadd.f32 %v9927_v47, %v1620_v33  ;;  %v9930_v62 = vpop.f32.mrf.mxu1  ;;  %v3540_v47 = vld [vmem:[#allocation2 + $0x152] sm:$0xff]  ;;  %10428 = vmatprep.subr.mxu0 %v8576_v42  ;;  %10359 = vmatpush3.msra.mxu1 %v4469_v60  ;;  %v8574_v60 = vld [vmem:[%s15300_s3 + $0xe0] sm:$0xff] }
 0x16f   : > { %v9850_v40 = vpop.f32.mrf.mxu0  ;;  %10329 = vmatmul.mubr.f32.gmra.mxu0 %v3537_v45 }
 0x170   : > { %v1622_v56 = vadd.f32 %v9850_v40, %v12239_v2  ;;  %10331 = vmatprep.mubr.f32.mxu0 %v3538_v37  ;;  %10429 = vmatpush3.msra.mxu0 %v8576_v42  ;;  %v8575_v2 = vld [vmem:[%s15300_s3 + $0xe8] sm:$0xff]  ;;  %v12401_v51 = vpop.f32.mrf.mxu1 }
 0x171   : > { %v12394_v33 = vpop.f32.mrf.mxu0  ;;  %15315 = vst [vmem:[#allocation8_spill] sm:$0xff] %v12401_v51  ;;  %10430 = vmatprep.subr.mxu0 %v8575_v2  ;;  %v3543_v51 = vld [vmem:[#allocation2 + $0x172] sm:$0xff] }
 0x172   : > { %v12396_v45 = vadd.f32 %v9930_v62, %v1622_v56  ;;  %v4468_v56 = vld [vmem:[%s15300_s3 + $0x40] sm:$0xff]  ;;  %10431 = vmatpush3.msra.mxu0 %v8575_v2  ;;  %v9933_v62 = vpop.f32.mrf.mxu1 }
 0x173   : > { %v9853_v37 = vpop.f32.mrf.mxu0  ;;  %10332 = vmatmul.mubr.f32.gmra.mxu0 %v3539_v10  ;;  %10360 = vmatprep.subr.mxu1 %v4468_v56 }
 0x174   : > { %v1624_v40 = vadd.f32 %v9853_v37, %v12246_v3  ;;  %10334 = vmatprep.mubr.f32.mxu0 %v3540_v47  ;;  %10432 = vmatprep.subr.mxu0 %v8574_v60  ;;  %v8573_v3 = vld [vmem:[%s15300_s3 + $0xd8] sm:$0xff]  ;;  %v12417_v2 = vpop.f32.mrf.mxu1 }
 0x175   : > { %v12410_v42 = vpop.f32.mrf.mxu0  ;;  %10361 = vmatpush3.msra.mxu1 %v4468_v56  ;;  %10433 = vmatpush3.msra.mxu0 %v8574_v60  ;;  %15316 = vst [vmem:[#allocation9_spill] sm:$0xff] %v12417_v2  ;;  %v8572_v56 = vld [vmem:[%s15300_s3 + $0xd0] sm:$0xff]  ;;  %v3546_v2 = vld [vmem:[#allocation2 + $0x19a] sm:$0xff] }
 0x176   : > { %v12412_v10 = vadd.f32 %v9933_v62, %v1624_v40  ;;  %10434 = vmatprep.subr.mxu0 %v8573_v3  ;;  %v4467_v40 = vld [vmem:[%s15300_s3 + $0x38] sm:$0xff]  ;;  %v9936_v62 = vpop.f32.mrf.mxu1 }
 0x177   : > { %v9856_v47 = vpop.f32.mrf.mxu0  ;;  %10335 = vmatmul.mubr.f32.gmra.mxu0 %v3541_v43  ;;  %10362 = vmatprep.subr.mxu1 %v4467_v40 }
 0x178   : > { %v1626_v37 = vadd.f32 %v9856_v47, %v12253_v15  ;;  %10337 = vmatprep.mubr.f32.mxu0 %v3542_v32  ;;  %10435 = vmatpush3.msra.mxu0 %v8573_v3  ;;  %v8571_v15 = vld [vmem:[%s15300_s3 + $0xc8] sm:$0xff]  ;;  %v12433_v47 = vpop.f32.mrf.mxu1 }
 0x179   : > { %v12426_v60 = vpop.f32.mrf.mxu0  ;;  %10436 = vmatprep.subr.mxu0 %v8572_v56  ;;  %10363 = vmatpush3.msra.mxu1 %v4467_v40  ;;  %15317 = vst [vmem:[#allocation10_spill] sm:$0xff] %v12433_v47  ;;  %v8570_v40 = vld [vmem:[%s15300_s3 + $0xc0] sm:$0xff] }
 0x17a   : > { %v12428_v43 = vadd.f32 %v9936_v62, %v1626_v37  ;;  %10437 = vmatpush3.msra.mxu0 %v8572_v56  ;;  %v4466_v37 = vld [vmem:[%s15300_s3 + $0x30] sm:$0xff]  ;;  %v9939_v62 = vpop.f32.mrf.mxu1  ;;  %v3547_v47 = vld [vmem:[#allocation2 + $0x1a2] sm:$0xff] }
 0x17b   : > { %v9859_v32 = vpop.f32.mrf.mxu0  ;;  %10338 = vmatmul.mubr.f32.gmra.mxu0 %v3543_v51  ;;  %10438 = vmatprep.subr.mxu0 %v8571_v15 }
 0x17c   : > { %v1628_v3 = vadd.f32 %v9859_v32, %v12261_v25  ;;  %10340 = vmatprep.mubr.f32.mxu0 %v12106_v5  ;;  %10439 = vmatpush3.msra.mxu0 %v8571_v15  ;;  %v8569_v5 = vld [vmem:[%s15300_s3 + $0xb8] sm:$0xff]  ;;  %v12450_v15 = vpop.f32.mrf.mxu1 }
 0x17d   : > { %v12443_v56 = vpop.f32.mrf.mxu0  ;;  %10364 = vmatprep.subr.mxu1 %v4466_v37  ;;  %10440 = vmatprep.subr.mxu0 %v8570_v40  ;;  %15318 = vst [vmem:[#allocation11_spill] sm:$0xff] %v12450_v15  ;;  %v4464_v15 = vld [vmem:[%s15300_s3 + $0x20] sm:$0xff] }
 0x17e   : > { %v12445_v51 = vadd.f32 %v9939_v62, %v1628_v3  ;;  %10365 = vmatpush3.msra.mxu1 %v4466_v37  ;;  %10441 = vmatpush3.msra.mxu0 %v8570_v40  ;;  %v4465_v3 = vld [vmem:[%s15300_s3 + $0x28] sm:$0xff]  ;;  %v8568_v37 = vld [vmem:[%s15300_s3 + $0xb0] sm:$0xff]  ;;  %v9942_v62 = vpop.f32.mrf.mxu1 }
 0x17f   : > { %v9862_v25 = vpop.f32.mrf.mxu0  ;;  %10341 = vmatmul.mubr.f32.gmra.mxu0 %v12114_v6  ;;  %10442 = vmatprep.subr.mxu0 %v8569_v5 }
 0x180   : > { %v1630_v32 = vadd.f32 %v9862_v25, %v12272_v14  ;;  %10343 = vmatprep.mubr.f32.mxu0 %v3546_v2  ;;  %10443 = vmatpush3.msra.mxu0 %v8569_v5  ;;  %v8567_v14 = vld [vmem:[%s15300_s3 + $0xa8] sm:$0xff]  ;;  %v12467_v25 = vpop.f32.mrf.mxu1 }
 0x181   : > { %v12460_v40 = vpop.f32.mrf.mxu0  ;;  %10366 = vmatprep.subr.mxu1 %v4465_v3  ;;  %10444 = vmatprep.subr.mxu0 %v8568_v37  ;;  %15319 = vst [vmem:[#allocation12_spill] sm:$0xff] %v12467_v25  ;;  %v8564_v25 = vld [vmem:[%s15300_s3 + $0x90] sm:$0xff] }
 0x182   : > { %v12462_v6 = vadd.f32 %v9942_v62, %v1630_v32  ;;  %10367 = vmatpush3.msra.mxu1 %v4465_v3  ;;  %10445 = vmatpush3.msra.mxu0 %v8568_v37  ;;  %v8566_v32 = vld [vmem:[%s15300_s3 + $0xa0] sm:$0xff]  ;;  %v9945_v37 = vpop.f32.mrf.mxu1 }
 0x183   : > { %v9865_v2 = vpop.f32.mrf.mxu0  ;;  %10344 = vmatmul.mubr.f32.gmra.mxu0 %v3547_v47  ;;  %10446 = vmatprep.subr.mxu0 %v8567_v14 }
 0x184   : > { %v1632_v5 = vadd.f32 %v9865_v2, %v12280_v48  ;;  %10447 = vmatpush3.msra.mxu0 %v8567_v14  ;;  %10368 = vmatprep.subr.mxu1 %v4464_v15  ;;  %v8565_v48 = vld [vmem:[%s15300_s3 + $0x98] sm:$0xff]  ;;  %v12483_v47 = vpop.f32.mrf.mxu1 }
 0x185   : > { %v12476_v3 = vpop.f32.mrf.mxu0  ;;  %10448 = vmatprep.subr.mxu0 %v8566_v32  ;;  %10369 = vmatpush3.msra.mxu1 %v4464_v15  ;;  %15320 = vst [vmem:[#allocation13_spill] sm:$0xff] %v12483_v47 }
 0x186   : > { %v12478_v62 = vadd.f32 %v9945_v37, %v1632_v5  ;;  %10449 = vmatpush3.msra.mxu0 %v8566_v32  ;;  %v12493_v15 = vpop.f32.mrf.mxu1  ;;  %v8563_v32 = vld [vmem:[%s15300_s3 + $0x88] sm:$0xff] }
 0x187   : > { %v9980_v14 = vpop.f32.mrf.mxu0  ;;  %10450 = vmatprep.subr.mxu0 %v8565_v48  ;;  %15322 = vst [vmem:[#allocation15_spill] sm:$0xff] %v12493_v15 }
 0x188   : > { %v12486_v2 = vadd.f32 %v9980_v14, %v12289_v22  ;;  %10451 = vmatpush3.msra.mxu0 %v8565_v48  ;;  %v12498_v47 = vpop.f32.mrf.mxu1  ;;  %v4463_v48 = vld [vmem:[%s15300_s3 + $0x18] sm:$0xff] }
 0x189   : > { %v12491_v5 = vpop.f32.mrf.mxu0  ;;  %10452 = vmatprep.subr.mxu0 %v8564_v25  ;;  %15323 = vst [vmem:[#allocation16_spill] sm:$0xff] %v12498_v47  ;;  %10370 = vmatprep.subr.mxu1 %v4463_v48  ;;  %v4766_v47 = vld [vmem:[#allocation3 + $0x9] sm:$0xff] }
 0x18a   : > { %15321 = vst [vmem:[#allocation14_spill] sm:$0xff] %v12486_v2  ;;  %10453 = vmatpush3.msra.mxu0 %v8564_v25  ;;  %v8562_v25 = vld [vmem:[%s15300_s3 + $0x80] sm:$0xff]  ;;  %v12511_v15 = vpop.f32.mrf.mxu1  ;;  %10371 = vmatpush3.msra.mxu1 %v4463_v48 }
 0x18b   : > { %v9983_v37 = vpop.f32.mrf.mxu0  ;;  %10454 = vmatprep.subr.mxu0 %v8563_v32  ;;  %15326 = vst [vmem:[#allocation19_spill] sm:$0xff] %v12511_v15  ;;  %v4461_v15 = vld [vmem:[%s15300_s3 + $0x8] sm:$0xff] }
 0x18c   : > { %v12501_v22 = vadd.f32 %v9983_v37, %v12297_v50  ;;  %10455 = vmatpush3.msra.mxu0 %v8563_v32  ;;  %v4462_v50 = vld [vmem:[%s15300_s3 + $0x10] sm:$0xff] }
 0x18d   : > { %v12509_v14 = vpop.f32.mrf.mxu0  ;;  %10456 = vmatprep.subr.mxu0 %v8562_v25  ;;  %10372 = vmatprep.subr.mxu1 %v4462_v50  ;;  %v4765_v32 = vld [vmem:[#allocation3 + $0x1] sm:$0xff] }
 0x18e   : > { %15324 = vst [vmem:[#allocation17_spill] sm:$0xff] %v12501_v22  ;;  %15325 = vst [vmem:[#allocation18_spill] sm:$0xff] %v12509_v14  ;;  %10457 = vmatpush3.msra.mxu0 %v8562_v25  ;;  %v12516_v22 = vpop.f32.mrf.mxu1  ;;  %10373 = vmatpush3.msra.mxu1 %v4462_v50  ;;  %v4460_v25 = vld [vmem:[%s15300_s3] sm:$0xff] }
 0x18f   : > { %v9986_v37 = vpop.f32.mrf.mxu0  ;;  %15327 = vst [vmem:[#allocation20_spill] sm:$0xff] %v12516_v22  ;;  %10458 = vmatprep.mubr.f32.mxu0 %v4765_v32  ;;  %10374 = vmatprep.subr.mxu1 %v4461_v15 }
 0x190   : > { %v12519_v2 = vadd.f32 %v9986_v37, %v12305_v17  ;;  %v12526_v14 = vpop.f32.mrf.mxu1  ;;  %10459 = vmatmul.mubr.f32.vlgmr.msra.gmra.mxu0 %v4766_v47  ;;  %10375 = vmatpush3.msra.mxu1 %v4461_v15 }
 0x191   : > { %v12524_v48 = vpop.f32.mrf.mxu0  ;;  %15330 = vst [vmem:[#allocation23_spill] sm:$0xff] %v12526_v14  ;;  %10376 = vmatprep.subr.mxu1 %v4460_v25 }
 0x192   : > { %15328 = vst [vmem:[#allocation21_spill] sm:$0xff] %v12519_v2  ;;  %15329 = vst [vmem:[#allocation22_spill] sm:$0xff] %v12524_v48  ;;  %v12531_v17 = vpop.f32.mrf.mxu1  ;;  %10377 = vmatpush3.msra.mxu1 %v4460_v25 }
 0x193   : > { %v9989_v22 = vpop.f32.mrf.mxu0  ;;  %15331 = vst [vmem:[#allocation24_spill] sm:$0xff] %v12531_v17  ;;  %10379 = vmatmul.mubr.f32.vlgmr.msra.gmra.mxu1 %v12267_v12 }
 0x194   : > { %v12534_v50 = vadd.f32 %v9989_v22, %v12313_v26  ;;  %v12538_v32 = vpop.f32.mrf.mxu1 }
 0x195   : > { %v12536_v37 = vpop.f32.mrf.mxu0  ;;  %15333 = vst [vmem:[#allocation26_spill] sm:$0xff] %v12538_v32 }
 0x196   : > { %15332 = vst [vmem:[#allocation25_spill] sm:$0xff] %v12534_v50  ;;  %v12541_v15 = vpop.f32.mrf.mxu1 }
 0x197   : > { %v9992_v47 = vpop.f32.mrf.mxu0 }
 0x198   : > { %v12544_v14 = vadd.f32 %v9992_v47, %v12324_v28  ;;  %v12548_v17 = vpop.f32.mrf.mxu1  ;;  %v8593_v47 = vld [vmem:[%s15300_s3 + $0x178] sm:$0xff] }
 0x199   : > { %v12546_v2 = vpop.f32.mrf.mxu0  ;;  %15334 = vst [vmem:[#allocation27_spill] sm:$0xff] %v12548_v17  ;;  %10506 = vmatprep.subr.mxu1 %v8593_v47 }
 0x19a   : > { %v12550_v26 = vpop.f32.mrf.mxu1  ;;  %10507 = vmatpush3.msra.mxu1 %v8593_v47 }
 0x19b   : > { %v9995_v48 = vpop.f32.mrf.mxu0  ;;  %15335 = vst [vmem:[#allocation28_spill] sm:$0xff] %v12550_v26 }
 0x19c   : > { %v12553_v22 = vadd.f32 %v9995_v48, %v12335_v54  ;;  %v12557_v32 = vpop.f32.mrf.mxu1 }
 0x19d   : > { %v12555_v25 = vpop.f32.mrf.mxu0  ;;  %15336 = vst [vmem:[#allocation29_spill] sm:$0xff] %v12557_v32 }
 0x19e   : > { %v12559_v50 = vpop.f32.mrf.mxu1 }
 0x19f   : > { %v9998_v12 = vpop.f32.mrf.mxu0  ;;  %15337 = vst [vmem:[#allocation30_spill] sm:$0xff] %v12559_v50 }
 0x1a0   : > { %v12562_v28 = vadd.f32 %v9998_v12, %v12346_v55  ;;  %v12569_v26 = vpop.f32.mrf.mxu1  ;;  %v8592_v55 = vld [vmem:[%s15300_s3 + $0x170] sm:$0xff] }
 0x1a1   : > { %v12567_v17 = vpop.f32.mrf.mxu0  ;;  %15339 = vst [vmem:[#allocation32_spill] sm:$0xff] %v12569_v26  ;;  %10508 = vmatprep.subr.mxu1 %v8592_v55 }
 0x1a2   : > { %15338 = vst [vmem:[#allocation31_spill] sm:$0xff] %v12562_v28  ;;  %v12571_v48 = vpop.f32.mrf.mxu1  ;;  %10509 = vmatpush3.msra.mxu1 %v8592_v55 }
 0x1a3   : > { %v10001_v54 = vpop.f32.mrf.mxu0  ;;  %15340 = vst [vmem:[#allocation33_spill] sm:$0xff] %v12571_v48 }
 0x1a4   : > { %v12574_v32 = vadd.f32 %v10001_v54, %v12359_v1  ;;  %v12581_v28 = vpop.f32.mrf.mxu1  ;;  %v8591_v1 = vld [vmem:[%s15300_s3 + $0x168] sm:$0xff] }
 0x1a5   : > { %v12579_v12 = vpop.f32.mrf.mxu0  ;;  %15342 = vst [vmem:[#allocation35_spill] sm:$0xff] %v12581_v28  ;;  %10510 = vmatprep.subr.mxu1 %v8591_v1 }
 0x1a6   : > { %15341 = vst [vmem:[#allocation34_spill] sm:$0xff] %v12574_v32  ;;  %v12583_v26 = vpop.f32.mrf.mxu1  ;;  %10511 = vmatpush3.msra.mxu1 %v8591_v1  ;;  %v8609_v1 = vld [vmem:[%s15300_s3 + $0x1f8] sm:$0xff] }
 0x1a7   : > { %v10004_v50 = vpop.f32.mrf.mxu0  ;;  %15343 = vst [vmem:[#allocation36_spill] sm:$0xff] %v12583_v26  ;;  %10586 = vmatprep.subr.mxu0 %v8609_v1 }
 0x1a8   : > { %v12586_v47 = vadd.f32 %v10004_v50, %v12370_v38  ;;  %v12593_v32 = vpop.f32.mrf.mxu1  ;;  %v8590_v38 = vld [vmem:[%s15300_s3 + $0x160] sm:$0xff]  ;;  %10587 = vmatpush3.msra.mxu0 %v8609_v1 }
 0x1a9   : > { %v12591_v54 = vpop.f32.mrf.mxu0  ;;  %15345 = vst [vmem:[#allocation38_spill] sm:$0xff] %v12593_v32  ;;  %10512 = vmatprep.subr.mxu1 %v8590_v38 }
 0x1aa   : > { %15344 = vst [vmem:[#allocation37_spill] sm:$0xff] %v12586_v47  ;;  %v12595_v28 = vpop.f32.mrf.mxu1  ;;  %10513 = vmatpush3.msra.mxu1 %v8590_v38  ;;  %v8608_v38 = vld [vmem:[%s15300_s3 + $0x1f0] sm:$0xff] }
 0x1ab   : > { %v10007_v48 = vpop.f32.mrf.mxu0  ;;  %10588 = vmatprep.subr.mxu0 %v8608_v38 }
 0x1ac   : > { %v12598_v55 = vadd.f32 %v10007_v48, %v12380_v29  ;;  %v12605_v47 = vpop.f32.mrf.mxu1  ;;  %v8589_v48 = vld [vmem:[%s15300_s3 + $0x158] sm:$0xff]  ;;  %10589 = vmatpush3.msra.mxu0 %v8608_v38 }
 0x1ad   : > { %v12603_v50 = vpop.f32.mrf.mxu0  ;;  %15347 = vst [vmem:[#allocation40_spill] sm:$0xff] %v12605_v47  ;;  %10514 = vmatprep.subr.mxu1 %v8589_v48 }
 0x1ae   : > { %15346 = vst [vmem:[#allocation39_spill] sm:$0xff] %v12598_v55  ;;  %v12610_v26 = vpop.f32.mrf.mxu1  ;;  %10515 = vmatpush3.msra.mxu1 %v8589_v48  ;;  %v8606_v48 = vld [vmem:[%s15300_s3 + $0x1e0] sm:$0xff] }
 0x1af   : > { %v10010_v32 = vpop.f32.mrf.mxu0  ;;  %15348 = vst [vmem:[#allocation41_spill] sm:$0xff] %v12610_v26  ;;  %v8588_v26 = vld [vmem:[%s15300_s3 + $0x150] sm:$0xff] }
 0x1b0   : > { %v12613_v29 = vadd.f32 %v10010_v32, %v12396_v45  ;;  %v12623_v55 = vpop.f32.mrf.mxu1  ;;  %v8607_v45 = vld [vmem:[%s15300_s3 + $0x1e8] sm:$0xff]  ;;  %10516 = vmatprep.subr.mxu1 %v8588_v26 }
 0x1b1   : > { %v12621_v47 = vpop.f32.mrf.mxu0  ;;  %15350 = vst [vmem:[#allocation43_spill] sm:$0xff] %v12623_v55  ;;  %10590 = vmatprep.subr.mxu0 %v8607_v45  ;;  %10517 = vmatpush3.msra.mxu1 %v8588_v26  ;;  %v8604_v26 = vld [vmem:[%s15300_s3 + $0x1d0] sm:$0xff] }
 0x1b2   : > { %15349 = vst [vmem:[#allocation42_spill] sm:$0xff] %v12613_v29  ;;  %v12628_v29 = vpop.f32.mrf.mxu1  ;;  %10591 = vmatpush3.msra.mxu0 %v8607_v45 }
 0x1b3   : > { %v10013_v32 = vpop.f32.mrf.mxu0  ;;  %15351 = vst [vmem:[#allocation44_spill] sm:$0xff] %v12628_v29  ;;  %10592 = vmatprep.subr.mxu0 %v8606_v48  ;;  %v8587_v29 = vld [vmem:[%s15300_s3 + $0x148] sm:$0xff] }
 0x1b4   : > { %v12631_v1 = vadd.f32 %v10013_v32, %v12412_v10  ;;  %v12641_v55 = vpop.f32.mrf.mxu1  ;;  %10593 = vmatpush3.msra.mxu0 %v8606_v48  ;;  %v8605_v10 = vld [vmem:[%s15300_s3 + $0x1d8] sm:$0xff]  ;;  %10518 = vmatprep.subr.mxu1 %v8587_v29 }
 0x1b5   : > { %v12639_v38 = vpop.f32.mrf.mxu0  ;;  %15354 = vst [vmem:[#allocation47_spill] sm:$0xff] %v12641_v55  ;;  %10594 = vmatprep.subr.mxu0 %v8605_v10  ;;  %10519 = vmatpush3.msra.mxu1 %v8587_v29  ;;  %v8602_v29 = vld [vmem:[%s15300_s3 + $0x1c0] sm:$0xff] }
 0x1b6   : > { %15352 = vst [vmem:[#allocation45_spill] sm:$0xff] %v12631_v1  ;;  %15353 = vst [vmem:[#allocation46_spill] sm:$0xff] %v12639_v38  ;;  %v12646_v1 = vpop.f32.mrf.mxu1  ;;  %10595 = vmatpush3.msra.mxu0 %v8605_v10 }
 0x1b7   : > { %v10016_v32 = vpop.f32.mrf.mxu0  ;;  %15355 = vst [vmem:[#allocation48_spill] sm:$0xff] %v12646_v1  ;;  %10596 = vmatprep.subr.mxu0 %v8604_v26  ;;  %v8580_v1 = vld [vmem:[%s15300_s3 + $0x110] sm:$0xff] }
 0x1b8   : > { %v12649_v45 = vadd.f32 %v10016_v32, %v12428_v43  ;;  %v12659_v55 = vpop.f32.mrf.mxu1  ;;  %10597 = vmatpush3.msra.mxu0 %v8604_v26  ;;  %v8603_v43 = vld [vmem:[%s15300_s3 + $0x1c8] sm:$0xff] }
 0x1b9   : > { %v12657_v48 = vpop.f32.mrf.mxu0  ;;  %15358 = vst [vmem:[#allocation51_spill] sm:$0xff] %v12659_v55  ;;  %10598 = vmatprep.subr.mxu0 %v8603_v43 }
 0x1ba   : > { %15356 = vst [vmem:[#allocation49_spill] sm:$0xff] %v12649_v45  ;;  %15357 = vst [vmem:[#allocation50_spill] sm:$0xff] %v12657_v48  ;;  %v12664_v45 = vpop.f32.mrf.mxu1  ;;  %v8586_v48 = vld [vmem:[%s15300_s3 + $0x140] sm:$0xff]  ;;  %10599 = vmatpush3.msra.mxu0 %v8603_v43 }
 0x1bb   : > { %v10019_v32 = vpop.f32.mrf.mxu0  ;;  %15359 = vst [vmem:[#allocation52_spill] sm:$0xff] %v12664_v45  ;;  %10520 = vmatprep.subr.mxu1 %v8586_v48  ;;  %10600 = vmatprep.subr.mxu0 %v8602_v29  ;;  %v8581_v45 = vld [vmem:[%s15300_s3 + $0x118] sm:$0xff] }
 0x1bc   : > { %v12667_v10 = vadd.f32 %v10019_v32, %v12445_v51  ;;  %v12677_v55 = vpop.f32.mrf.mxu1  ;;  %10521 = vmatpush3.msra.mxu1 %v8586_v48  ;;  %10601 = vmatpush3.msra.mxu0 %v8602_v29  ;;  %v8601_v51 = vld [vmem:[%s15300_s3 + $0x1b8] sm:$0xff]  ;;  %v8600_v48 = vld [vmem:[%s15300_s3 + $0x1b0] sm:$0xff] }
 0x1bd   : > { %v12675_v26 = vpop.f32.mrf.mxu0  ;;  %15362 = vst [vmem:[#allocation55_spill] sm:$0xff] %v12677_v55  ;;  %10602 = vmatprep.subr.mxu0 %v8601_v51 }
 0x1be   : > { %15360 = vst [vmem:[#allocation53_spill] sm:$0xff] %v12667_v10  ;;  %15361 = vst [vmem:[#allocation54_spill] sm:$0xff] %v12675_v26  ;;  %v12682_v10 = vpop.f32.mrf.mxu1  ;;  %v8585_v26 = vld [vmem:[%s15300_s3 + $0x138] sm:$0xff]  ;;  %10603 = vmatpush3.msra.mxu0 %v8601_v51 }
 0x1bf   : > { %v10022_v32 = vpop.f32.mrf.mxu0  ;;  %15363 = vst [vmem:[#allocation56_spill] sm:$0xff] %v12682_v10  ;;  %10522 = vmatprep.subr.mxu1 %v8585_v26  ;;  %10604 = vmatprep.subr.mxu0 %v8600_v48  ;;  %v8594_v10 = vld [vmem:[%s15300_s3 + $0x180] sm:$0xff] }
 0x1c0   : > { %v12685_v43 = vadd.f32 %v10022_v32, %v12462_v6  ;;  %v12695_v55 = vpop.f32.mrf.mxu1  ;;  %10523 = vmatpush3.msra.mxu1 %v8585_v26  ;;  %10605 = vmatpush3.msra.mxu0 %v8600_v48  ;;  %v8599_v6 = vld [vmem:[%s15300_s3 + $0x1a8] sm:$0xff]  ;;  %v8598_v26 = vld [vmem:[%s15300_s3 + $0x1a0] sm:$0xff] }
 0x1c1   : > { %v12693_v29 = vpop.f32.mrf.mxu0  ;;  %15366 = vst [vmem:[#allocation59_spill] sm:$0xff] %v12695_v55  ;;  %10606 = vmatprep.subr.mxu0 %v8599_v6 }
 0x1c2   : > { %15364 = vst [vmem:[#allocation57_spill] sm:$0xff] %v12685_v43  ;;  %15365 = vst [vmem:[#allocation58_spill] sm:$0xff] %v12693_v29  ;;  %v12700_v43 = vpop.f32.mrf.mxu1  ;;  %v8584_v29 = vld [vmem:[%s15300_s3 + $0x130] sm:$0xff]  ;;  %10607 = vmatpush3.msra.mxu0 %v8599_v6  ;;  %v8583_v6 = vld [vmem:[%s15300_s3 + $0x128] sm:$0xff] }
 0x1c3   : > { %v10025_v32 = vpop.f32.mrf.mxu0  ;;  %15367 = vst [vmem:[#allocation60_spill] sm:$0xff] %v12700_v43  ;;  %10524 = vmatprep.subr.mxu1 %v8584_v29  ;;  %10608 = vmatprep.subr.mxu0 %v8598_v26 }
 0x1c4   : > { %v12703_v51 = vadd.f32 %v10025_v32, %v12478_v62  ;;  %v12713_v55 = vpop.f32.mrf.mxu1  ;;  %10525 = vmatpush3.msra.mxu1 %v8584_v29  ;;  %10609 = vmatpush3.msra.mxu0 %v8598_v26  ;;  %v8597_v62 = vld [vmem:[%s15300_s3 + $0x198] sm:$0xff] }
 0x1c5   : > { %v12711_v48 = vpop.f32.mrf.mxu0  ;;  %15370 = vst [vmem:[#allocation63_spill] sm:$0xff] %v12713_v55  ;;  %10610 = vmatprep.subr.mxu0 %v8597_v62  ;;  %v8596_v55 = vld [vmem:[%s15300_s3 + $0x190] sm:$0xff]  ;;  %10526 = vmatprep.subr.mxu1 %v8583_v6 }
 0x1c6   : > { %15368 = vst [vmem:[#allocation61_spill] sm:$0xff] %v12703_v51  ;;  %15369 = vst [vmem:[#allocation62_spill] sm:$0xff] %v12711_v48  ;;  %v12718_v32 = vpop.f32.mrf.mxu1  ;;  %10611 = vmatpush3.msra.mxu0 %v8597_v62  ;;  %10527 = vmatpush3.msra.mxu1 %v8583_v6  ;;  %v8582_v62 = vld [vmem:[%s15300_s3 + $0x120] sm:$0xff] }
 0x1c7   : > { %15371 = vst [vmem:[#allocation64_spill] sm:$0xff] %v12718_v32  ;;  %v12720_v51 = vpop.f32.mrf.mxu0  ;;  %10612 = vmatprep.subr.mxu0 %v8596_v55  ;;  %v8595_v32 = vld [vmem:[%s15300_s3 + $0x188] sm:$0xff]  ;;  %10528 = vmatprep.subr.mxu1 %v8582_v62 }
 0x1c8   : > { %v12730_v26 = vpop.f32.mrf.mxu1  ;;  %10613 = vmatpush3.msra.mxu0 %v8596_v55  ;;  %10529 = vmatpush3.msra.mxu1 %v8582_v62 }
 0x1c9   : > { %v12728_v29 = vpop.f32.mrf.mxu0  ;;  %15372 = vst [vmem:[#allocation65_spill] sm:$0xff] %v12730_v26  ;;  %10614 = vmatprep.subr.mxu0 %v8595_v32  ;;  %10530 = vmatprep.subr.mxu1 %v8581_v45 }
 0x1ca   : > { %v12737_v43 = vpop.f32.mrf.mxu1  ;;  %10615 = vmatpush3.msra.mxu0 %v8595_v32  ;;  %10531 = vmatpush3.msra.mxu1 %v8581_v45 }
 0x1cb   : > { %v12735_v48 = vpop.f32.mrf.mxu0  ;;  %15374 = vst [vmem:[#allocation67_spill] sm:$0xff] %v12737_v43  ;;  %10616 = vmatprep.subr.mxu0 %v8594_v10  ;;  %10532 = vmatprep.subr.mxu1 %v8580_v1 }
 0x1cc   : > { %15373 = vst [vmem:[#allocation66_spill] sm:$0xff] %v12735_v48  ;;  %v12747_v55 = vpop.f32.mrf.mxu1  ;;  %10617 = vmatpush3.msra.mxu0 %v8594_v10  ;;  %10533 = vmatpush3.msra.mxu1 %v8580_v1  ;;  %v8578_v10 = vld [vmem:[%s15300_s3 + $0x100] sm:$0xff]  ;;  %v8625_v1 = vld [vmem:[%s15300_s3 + $0x278] sm:$0xff] }
 0x1cd   : > { %v12745_v6 = vpop.f32.mrf.mxu0  ;;  %15376 = vst [vmem:[#allocation69_spill] sm:$0xff] %v12747_v55  ;;  %v8579_v55 = vld [vmem:[%s15300_s3 + $0x108] sm:$0xff] }
 0x1ce   : > { %15375 = vst [vmem:[#allocation68_spill] sm:$0xff] %v12745_v6  ;;  %v12757_v43 = vpop.f32.mrf.mxu1  ;;  %10534 = vmatprep.subr.mxu1 %v8579_v55 }
 0x1cf   : > { %v12755_v32 = vpop.f32.mrf.mxu0  ;;  %15378 = vst [vmem:[#allocation71_spill] sm:$0xff] %v12757_v43  ;;  %10535 = vmatpush3.msra.mxu1 %v8579_v55 }
 0x1d0   : > { %15377 = vst [vmem:[#allocation70_spill] sm:$0xff] %v12755_v32  ;;  %v12769_v32 = vpop.f32.mrf.mxu1  ;;  %10536 = vmatprep.subr.mxu1 %v8578_v10 }
 0x1d1   : > { %v12762_v62 = vpop.f32.mrf.mxu0  ;;  %15381 = vst [vmem:[#allocation74_spill] sm:$0xff] %v12769_v32  ;;  %10537 = vmatpush3.msra.mxu1 %v8578_v10 }
 0x1d2   : > { %15379 = vst [vmem:[#allocation72_spill] sm:$0xff] %v12762_v62  ;;  %v12778_v62 = vpop.f32.mrf.mxu1  ;;  %10666 = vmatprep.subr.mxu1 %v8625_v1 }
 0x1d3   : > { %v12764_v6 = vpop.f32.mrf.mxu0  ;;  %15384 = vst [vmem:[#allocation77_spill] sm:$0xff] %v12778_v62 }
 0x1d4   : > { %15380 = vst [vmem:[#allocation73_spill] sm:$0xff] %v12764_v6  ;;  %v12784_v26 = vpop.f32.mrf.mxu1 }
 0x1d5   : > { %v12771_v43 = vpop.f32.mrf.mxu0  ;;  %15387 = vst [vmem:[#allocation80_spill] sm:$0xff] %v12784_v26 }
 0x1d6   : > { %15382 = vst [vmem:[#allocation75_spill] sm:$0xff] %v12771_v43  ;;  %v12790_v10 = vpop.f32.mrf.mxu1 }
 0x1d7   : > { %v12773_v45 = vpop.f32.mrf.mxu0  ;;  %15390 = vst [vmem:[#allocation83_spill] sm:$0xff] %v12790_v10 }
 0x1d8   : > { %15383 = vst [vmem:[#allocation76_spill] sm:$0xff] %v12773_v45  ;;  %v11085_v45 = vld [vmem:[%s15299_s2] ss:$0 sm:$0xff]  ;;  %v12806_v38 = vpop.f32.mrf.mxu1 }
 0x1d9   : > { %v12780_v6 = vpop.f32.mrf.mxu0  ;;  %v879_v32 = vadd.f32 %v11085_v45, %v12230_v24  ;;  %v881_v1 = vadd.f32 %v11085_v45, %v12237_v20  ;;  %v891_v10 = vadd.f32 %v11085_v45, %v12278_v63 }
 0x1da   : > { %15385 = vst [vmem:[#allocation78_spill] sm:$0xff] %v12780_v6  ;;  %v885_v6 = vadd.f32 %v11085_v45, %v12251_v31 }
 0x1db   : > { %v12782_v48 = vpop.f32.mrf.mxu0  ;;  %v1249_v24 = vadd.f32 %v12234_v36, %v879_v32  ;;  %v1251_v20 = vadd.f32 %v12241_v11, %v881_v1  ;;  %v1261_v63 = vadd.f32 %v12283_v34, %v891_v10  ;;  %v1973_v36 = vadd.f32 %v12299_v41, %v12295_v49 }
 0x1dc   : > { %15386 = vst [vmem:[#allocation79_spill] sm:$0xff] %v12782_v48  ;;  %v883_v48 = vadd.f32 %v11085_v45, %v12244_v58  ;;  %v1255_v31 = vadd.f32 %v12255_v7, %v885_v6  ;;  %v1975_v34 = vadd.f32 %v12307_v39, %v12303_v8  ;;  %v12851_v8 = vadd.f32 %v12348_v53, %v12344_v13  ;;  %v15399_v13 = vld [vmem:[#allocation8_spill] sm:$0xff] }
 0x1dd   : > { %v12786_v55 = vpop.f32.mrf.mxu0  ;;  %v1619_v11 = vadd.f32 %v12378_v27, %v1249_v24  ;;  %v1979_v27 = vadd.f32 %v12326_v44, %v12322_v4  ;;  %v1631_v39 = vadd.f32 %v12476_v3, %v1261_v63  ;;  %v3918_v3 = vld [vmem:[%s12827_s24] sm:$0xff]  ;;  %v3921_v24 = vld [vmem:[%s12827_s24 + $0x18] sm:$0xff]  ;;  %v3920_v63 = vld [vmem:[%s12827_s24 + $0x10] sm:$0xff] }
 0x1de   : > { %15388 = vst [vmem:[#allocation81_spill] sm:$0xff] %v12786_v55  ;;  %v887_v55 = vadd.f32 %v11085_v45, %v12259_v21  ;;  %v1253_v58 = vadd.f32 %v12248_v35, %v883_v48  ;;  %v1621_v35 = vadd.f32 %v12394_v33, %v1251_v20  ;;  %v12847_v33 = vadd.f32 %v12337_v19, %v12333_v16  ;;  %v15398_v16 = vld [vmem:[#allocation7_spill] sm:$0xff]  ;;  %v15403_v48 = vld [vmem:[#allocation12_spill] sm:$0xff]  ;;  %v15407_v20 = vld [vmem:[#allocation13_spill] sm:$0xff] }
 0x1df   : > { %v12788_v43 = vpop.f32.mrf.mxu0  ;;  %v12867_v19 = vadd.f32 %v15398_v16, %v1619_v11  ;;  %vm3950_vm1 = vcmp.gt.f32.partialorder %v3918_v3, 1.0  ;;  %vm3953_vm2 = vcmp.gt.f32.partialorder %v3921_v24, 1.0  ;;  %v15410_v11 = vld [vmem:[#allocation15_spill] sm:$0xff]  ;;  %vm3952_vm3 = vcmp.gt.f32.partialorder %v3920_v63, 1.0 }
 0x1e0   : > { %15389 = vst [vmem:[#allocation82_spill] sm:$0xff] %v12788_v43  ;;  %v889_v43 = vadd.f32 %v11085_v45, %v12270_v59  ;;  %v1257_v21 = vadd.f32 %v12263_v61, %v887_v55  ;;  %v1971_v45 = vadd.f32 %v12291_v46, %v12287_v18  ;;  %v1623_v7 = vadd.f32 %v12410_v42, %v1253_v58  ;;  %v15396_v42 = vld [vmem:[#allocation6_spill] sm:$0xff] }
 0x1e1   : > { %v12796_v62 = vpop.f32.mrf.mxu0  ;;  %v1625_v61 = vadd.f32 %v12426_v60, %v1255_v31  ;;  %v1977_v18 = vadd.f32 %v12315_v30, %v12311_v9  ;;  %v3919_v9 = vld [vmem:[%s12827_s24 + $0x8] sm:$0xff]  ;;  %v12857_v30 = vadd.f32 %v12361_v0, %v12357_v57  ;;  %v12861_v60 = vadd.f32 %v15396_v42, %v12368_v23  ;;  %v15401_v0 = vld [vmem:[#allocation10_spill] sm:$0xff] }
 0x1e2   : > { %15391 = vst [vmem:[#allocation84_spill] sm:$0xff] %v12796_v62  ;;  %v1259_v59 = vadd.f32 %v12274_v52, %v889_v43  ;;  %v12833_v52 = vpop.f32.mrf.mxu1  ;;  %v1627_v46 = vadd.f32 %v12443_v56, %v1257_v21  ;;  %v2341_v4 = vadd.f32 %v12491_v5, %v1971_v45  ;;  %vm3951_vm0 = vcmp.gt.f32.partialorder %v3919_v9, 1.0  ;;  %v15400_v56 = vld [vmem:[#allocation9_spill] sm:$0xff]  ;;  %v15402_v5 = vld [vmem:[#allocation11_spill] sm:$0xff]  ;;  %v15405_v55 = vld [vmem:[#allocation18_spill] sm:$0xff] }
 0x1e3   : > { %v12804_v26 = vpop.f32.mrf.mxu0  ;;  %v12870_v53 = vadd.f32 %v15399_v13, %v1621_v35  ;;  %v12873_v57 = vadd.f32 %v15400_v56, %v1623_v7  ;;  %v2343_v10 = vadd.f32 %v15405_v55, %v1973_v36  ;;  %v12892_v58 = vadd.f32 %v15407_v20, %v1631_v39  ;;  %v12894_v31 = vld [vmem:[#allocation2] sm:$0xff]  ;;  %v15411_v36 = vld [vmem:[#allocation16_spill] sm:$0xff]  ;;  %v15414_v56 = vld [vmem:[#allocation17_spill] sm:$0xff] }
 0x1e4   : > { %15392 = vst [vmem:[#allocation85_spill] sm:$0xff] %v12804_v26  ;;  %v1629_v49 = vadd.f32 %v12460_v40, %v1259_v59  ;;  %v12876_v40 = vadd.f32 %v15401_v0, %v1625_v61  ;;  %v12878_v23 = vpop.f32.mrf.mxu1  ;;  %v12882_v43 = vadd.f32 %v15402_v5, %v1627_v46  ;;  %v12897_v21 = vsel %vm3951_vm0, 1.0, %v12894_v31  ;;  %v15409_v45 = vld [vmem:[#allocation14_spill] sm:$0xff]  ;;  %v15415_v0 = vld [vmem:[#allocation19_spill] sm:$0xff] }
 0x1e5   : > { %v12809_v62 = vpop.f32.mrf.mxu0  ;;  %15408 = vst [vmem:[#allocation9_spill] sm:$0xff] %v12892_v58  ;;  %v12899_v59 = vmul.f32 0.9, %v3919_v9  ;;  %v12904_v35 = vadd.f32 %v15410_v11, %v15409_v45  ;;  %v12907_v7 = vadd.f32 %v15411_v36, %v2341_v4  ;;  %v12911_v46 = vmul.f32 0.9, %v3918_v3  ;;  %v15413_v39 = vld [vmem:[#allocation22_spill] sm:$0xff] }
 0x1e6   : > { %15393 = vst [vmem:[#allocation86_spill] sm:$0xff] %v12809_v62  ;;  %v12885_v6 = vadd.f32 %v15403_v48, %v1629_v49  ;;  %v3923_v49 = vld [vmem:[%s12827_s24 + $0x28] sm:$0xff]  ;;  %v2345_v42 = vadd.f32 %v15413_v39, %v1975_v34  ;;  %v12915_v9 = vpop.f32.mrf.mxu1  ;;  %v12919_v16 = vsel %vm3950_vm1, 1.0, %v12894_v31  ;;  %v12921_v13 = vmul.f32 0.9, %v3921_v24  ;;  %v8641_v4 = vld [vmem:[%s15300_s3 + $0x2f8] sm:$0xff] }
 0x1e7   : > { %v12821_v32 = vpop.f32.mrf.mxu0  ;;  %vm3955_vm4 = vcmp.gt.f32.partialorder %v3923_v49, 1.0  ;;  %v12928_v5 = vadd.f32 %v15415_v0, %v15414_v56  ;;  %v15416_v48 = vld [vmem:[#allocation20_spill] sm:$0xff]  ;;  %v12937_v3 = vsel %vm3953_vm2, 1.0, %v12894_v31  ;;  %v12939_v20 = vmul.f32 0.9, %v3920_v63  ;;  %v3922_v45 = vld [vmem:[%s12827_s24 + $0x20] sm:$0xff]  ;;  %10746 = vmatprep.subr.mxu0 %v8641_v4 }
 0x1e8   : > { %15394 = vst [vmem:[#allocation87_spill] sm:$0xff] %v12821_v32  ;;  %15404 = vst [vmem:[#allocation7_spill] sm:$0xff] %v12885_v6  ;;  %v12931_v34 = vadd.f32 %v15416_v48, %v2343_v10  ;;  %v2347_v11 = vadd.f32 %v12536_v37, %v1977_v18  ;;  %v12945_v36 = vsel %vm3952_vm3, 1.0, %v12894_v31  ;;  %v12947_v10 = vmul.f32 0.9, %v3923_v49  ;;  %v3925_v39 = vld [vmem:[%s12827_s24 + $0x38] sm:$0xff]  ;;  %v12967_v6 = vpop.f32.mrf.mxu1 }
 0x1e9   : > { %v12841_v41 = vpop.f32.mrf.mxu0  ;;  %vm3954_vm5 = vcmp.gt.f32.partialorder %v3922_v45, 1.0  ;;  %v15418_v56 = vld [vmem:[#allocation21_spill] sm:$0xff]  ;;  %v15419_v0 = vld [vmem:[#allocation23_spill] sm:$0xff]  ;;  %v12958_v4 = vsel %vm3955_vm4, 1.0, %v12894_v31  ;;  %v12960_v37 = vmul.f32 0.9, %v3922_v45 }
 0x1ea   : > { %15395 = vst [vmem:[#allocation88_spill] sm:$0xff] %v12841_v41  ;;  %v12952_v24 = vadd.f32 %v15419_v0, %v15418_v56  ;;  %vm3957_vm6 = vcmp.gt.f32.partialorder %v3925_v39, 1.0  ;;  %v3924_v18 = vld [vmem:[%s12827_s24 + $0x30] sm:$0xff]  ;;  %15422 = vst [vmem:[#allocation18_spill] sm:$0xff] %v12967_v6  ;;  %v12969_v56 = vmul.f32 0.9, %v3925_v39  ;;  %v13010_v39 = vpop.f32.mrf.mxu1 }
 0x1eb   : > { %v12864_v44 = vpop.f32.mrf.mxu0  ;;  %v15421_v63 = vld [vmem:[#allocation24_spill] sm:$0xff]  ;;  %vm3956_vm7 = vcmp.gt.f32.partialorder %v3924_v18, 1.0  ;;  %v3927_v0 = vld [vmem:[%s12827_s24 + $0x48] sm:$0xff]  ;;  %v15423_v49 = vld [vmem:[#allocation25_spill] sm:$0xff]  ;;  %15429 = vst [vmem:[#allocation15_spill] sm:$0xff] %v13010_v39 }
 0x1ec   : > { %15397 = vst [vmem:[#allocation6_spill] sm:$0xff] %v12864_v44  ;;  %v12964_v58 = vadd.f32 %v15421_v63, %v2345_v42  ;;  %v12980_v42 = vsel %vm3954_vm5, 1.0, %v12894_v31  ;;  %v12982_v63 = vmul.f32 0.9, %v3924_v18  ;;  %vm3959_vm8 = vcmp.gt.f32.partialorder %v3927_v0, 1.0  ;;  %v15426_v45 = vld [vmem:[#allocation27_spill] sm:$0xff] }
 0x1ed   : > { %v12888_v1 = vpop.f32.mrf.mxu0  ;;  %v2351_v44 = vadd.f32 %v12555_v25, %v12847_v33  ;;  %v13002_v41 = vsel %vm3956_vm7, 1.0, %v12894_v31  ;;  %v15428_v25 = vld [vmem:[#allocation28_spill] sm:$0xff]  ;;  %v13013_v32 = vsel %vm3959_vm8, 1.0, %v12894_v31  ;;  %v15435_v26 = vld [vmem:[#allocation30_spill] sm:$0xff] }
 0x1ee   : > { %15406 = vst [vmem:[#allocation8_spill] sm:$0xff] %v12888_v1 }
 0x1ef   : > { %v12909_v61 = vpop.f32.mrf.mxu0  ;;  %v13033_v6 = vadd.f32 %v15435_v26, %v2351_v44  ;;  %v3933_v26 = vld [vmem:[%s12827_s24 + $0x78] sm:$0xff]  ;;  %v15441_v44 = vld [vmem:[#allocation31_spill] sm:$0xff] }
 0x1f0   : > { %15412 = vst [vmem:[#allocation10_spill] sm:$0xff] %v12909_v61  ;;  %vm3965_vm14 = vcmp.gt.f32.partialorder %v3933_v26, 1.0 }
 0x1f1   : > { %v12933_v55 = vpop.f32.mrf.mxu0 }
 0x1f2   : > { %15417 = vst [vmem:[#allocation11_spill] sm:$0xff] %v12933_v55  ;;  %v2349_v55 = vadd.f32 %v12546_v2, %v1979_v27  ;;  %v3926_v2 = vld [vmem:[%s12827_s24 + $0x40] sm:$0xff]  ;;  %v12986_v27 = vadd.f32 %v12541_v15, %v2347_v11  ;;  %v13004_v15 = vmul.f32 0.9, %v3927_v0  ;;  %v3928_v11 = vld [vmem:[%s12827_s24 + $0x50] sm:$0xff]  ;;  %v2353_v0 = vadd.f32 %v12567_v17, %v12851_v8 }
 0x1f3   : > { %v12954_v48 = vpop.f32.mrf.mxu0  ;;  %vm3958_vm9 = vcmp.gt.f32.partialorder %v3926_v2, 1.0  ;;  %vm3960_vm11 = vcmp.gt.f32.partialorder %v3928_v11, 1.0  ;;  %v13038_v17 = vmul.f32 0.9, %v3928_v11  ;;  %v3930_v8 = vld [vmem:[%s12827_s24 + $0x60] sm:$0xff]  ;;  %v13055_v11 = vpop.f32.mrf.mxu1 }
 0x1f4   : > { %15420 = vst [vmem:[#allocation12_spill] sm:$0xff] %v12954_v48  ;;  %v15424_v48 = vld [vmem:[#allocation26_spill] sm:$0xff]  ;;  %v13008_v33 = vadd.f32 %v15428_v25, %v2349_v55  ;;  %v13024_v62 = vsel %vm3958_vm9, 1.0, %v12894_v31  ;;  %v15434_v25 = vld [vmem:[#allocation29_spill] sm:$0xff]  ;;  %vm3962_vm13 = vcmp.gt.f32.partialorder %v3930_v8, 1.0 }
 0x1f5   : > { %v12974_v61 = vadd.f32 %v15424_v48, %v15423_v49  ;;  %v12976_v1 = vpop.f32.mrf.mxu0  ;;  %v12992_v48 = vsel %vm3957_vm6, 1.0, %v12894_v31  ;;  %v3929_v49 = vld [vmem:[%s12827_s24 + $0x58] sm:$0xff]  ;;  %15432 = vst [vmem:[#allocation17_spill] sm:$0xff] %v13024_v62  ;;  %v13030_v39 = vadd.f32 %v15434_v25, %v12553_v22  ;;  %15437 = vst [vmem:[#allocation21_spill] sm:$0xff] %v13038_v17  ;;  %v15442_v25 = vld [vmem:[#allocation32_spill] sm:$0xff] }
 0x1f6   : > { %15425 = vst [vmem:[#allocation13_spill] sm:$0xff] %v12976_v1  ;;  %v12997_v1 = vadd.f32 %v15426_v45, %v12544_v14  ;;  %vm3961_vm10 = vcmp.gt.f32.partialorder %v3929_v49, 1.0  ;;  %v13015_v14 = vmul.f32 0.9, %v3926_v2  ;;  %v3931_v45 = vld [vmem:[%s12827_s24 + $0x68] sm:$0xff]  ;;  %v2355_v2 = vadd.f32 %v12579_v12, %v12857_v30  ;;  %15443 = vst [vmem:[#allocation26_spill] sm:$0xff] %v13055_v11 }
 0x1f7   : > { %v12999_v18 = vpop.f32.mrf.mxu0  ;;  %v13026_v55 = vmul.f32 0.9, %v3929_v49  ;;  %vm3963_vm12 = vcmp.gt.f32.partialorder %v3931_v45, 1.0  ;;  %v13048_v22 = vmul.f32 0.9, %v3931_v45  ;;  %v3932_v30 = vld [vmem:[%s12827_s24 + $0x70] sm:$0xff]  ;;  %v2357_v45 = vadd.f32 %v12591_v54, %v12861_v60 }
 0x1f8   : > { %15427 = vst [vmem:[#allocation14_spill] sm:$0xff] %v12999_v18  ;;  %15430 = vst [vmem:[#allocation16_spill] sm:$0xff] %v13015_v14  ;;  %v13036_v14 = vsel %vm3961_vm10, 1.0, %v12894_v31  ;;  %v13058_v17 = vsel %vm3963_vm12, 1.0, %v12894_v31  ;;  %v13060_v12 = vmul.f32 0.9, %v3930_v8 }
 0x1f9   : > { %v13020_v18 = vpop.f32.mrf.mxu0  ;;  %15433 = vst [vmem:[#allocation19_spill] sm:$0xff] %v13026_v55  ;;  %15436 = vst [vmem:[#allocation20_spill] sm:$0xff] %v13036_v14  ;;  %v13053_v55 = vadd.f32 %v15442_v25, %v15441_v44  ;;  %v13070_v44 = vmul.f32 0.9, %v3933_v26  ;;  %vm3964_vm15 = vcmp.gt.f32.partialorder %v3932_v30, 1.0  ;;  %v3935_v25 = vld [vmem:[%s12827_s24 + $0x88] sm:$0xff] }
 0x1fa   : > { %15431 = vst [vmem:[#allocation22_spill] sm:$0xff] %v13020_v18  ;;  %v13046_v18 = vsel %vm3960_vm11, 1.0, %v12894_v31  ;;  %15440 = vst [vmem:[#allocation25_spill] sm:$0xff] %v13048_v22  ;;  %v15449_v11 = vld [vmem:[#allocation34_spill] sm:$0xff]  ;;  %v15450_v14 = vld [vmem:[#allocation35_spill] sm:$0xff]  ;;  %v13078_v8 = vsel %vm3962_vm13, 1.0, %v12894_v31 }
 0x1fb   : > { %v13043_v49 = vpop.f32.mrf.mxu0  ;;  %15439 = vst [vmem:[#allocation24_spill] sm:$0xff] %v13046_v18  ;;  %15444 = vst [vmem:[#allocation27_spill] sm:$0xff] %v13058_v17  ;;  %v13075_v17 = vadd.f32 %v15450_v14, %v15449_v11  ;;  %vm3967_vm0 = vcmp.gt.f32.partialorder %v3935_v25, 1.0  ;;  %v13089_v60 = vsel %vm3965_vm14, 1.0, %v12894_v31  ;;  %v13091_v26 = vmul.f32 0.9, %v3935_v25 }
 0x1fc   : > { %15438 = vst [vmem:[#allocation23_spill] sm:$0xff] %v13043_v49  ;;  %15445 = vst [vmem:[#allocation28_spill] sm:$0xff] %v13060_v12  ;;  %v15446_v49 = vld [vmem:[#allocation33_spill] sm:$0xff]  ;;  %v13080_v12 = vmul.f32 0.9, %v3932_v30  ;;  %v13107_v25 = vadd.f32 %v12595_v28, %v2357_v45  ;;  %v3939_v45 = vld [vmem:[%s12827_s24 + $0xa8] sm:$0xff] }
 0x1fd   : > { %v13064_v18 = vadd.f32 %v15446_v49, %v2353_v0  ;;  %v13068_v22 = vpop.f32.mrf.mxu0  ;;  %15448 = vst [vmem:[#allocation30_spill] sm:$0xff] %v13070_v44  ;;  %15451 = vst [vmem:[#allocation31_spill] sm:$0xff] %v13078_v8  ;;  %v3934_v0 = vld [vmem:[%s12827_s24 + $0x80] sm:$0xff]  ;;  %v15453_v49 = vld [vmem:[#allocation36_spill] sm:$0xff]  ;;  %vm3971_vm4 = vcmp.gt.f32.partialorder %v3939_v45, 1.0 }
 0x1fe   : > { %15447 = vst [vmem:[#allocation29_spill] sm:$0xff] %v13068_v22  ;;  %15452 = vst [vmem:[#allocation32_spill] sm:$0xff] %v13080_v12  ;;  %v13084_v62 = vadd.f32 %v15453_v49, %v2355_v2  ;;  %vm3966_vm1 = vcmp.gt.f32.partialorder %v3934_v0, 1.0  ;;  %v3937_v14 = vld [vmem:[%s12827_s24 + $0x98] sm:$0xff]  ;;  %v15458_v22 = vld [vmem:[#allocation38_spill] sm:$0xff]  ;;  %v2359_v12 = vadd.f32 %v12603_v50, %v12867_v19  ;;  %v13100_v2 = vpop.f32.mrf.mxu1  ;;  %v13104_v49 = vsel %vm3964_vm15, 1.0, %v12894_v31 }
 0x1ff   : > { %v13086_v54 = vpop.f32.mrf.mxu0  ;;  %15455 = vst [vmem:[#allocation34_spill] sm:$0xff] %v13089_v60  ;;  %15456 = vst [vmem:[#allocation35_spill] sm:$0xff] %v13091_v26  ;;  %v15457_v11 = vld [vmem:[#allocation37_spill] sm:$0xff]  ;;  %vm3969_vm2 = vcmp.gt.f32.partialorder %v3937_v14, 1.0  ;;  %v13112_v26 = vsel %vm3967_vm0, 1.0, %v12894_v31  ;;  %v3936_v50 = vld [vmem:[%s12827_s24 + $0x90] sm:$0xff] }
 0x200   : > { %15454 = vst [vmem:[#allocation33_spill] sm:$0xff] %v13086_v54  ;;  %v13096_v44 = vadd.f32 %v15458_v22, %v15457_v11  ;;  %15459 = vst [vmem:[#allocation36_spill] sm:$0xff] %v13104_v49  ;;  %v13114_v22 = vmul.f32 0.9, %v3934_v0  ;;  %v13116_v11 = vmul.f32 0.9, %v3937_v14  ;;  %v3083_v49 = vadd.f32 %v12720_v51, %v12904_v35 }
 0x201   : > { %v13109_v54 = vpop.f32.mrf.mxu0  ;;  %15461 = vst [vmem:[#allocation38_spill] sm:$0xff] %v13112_v26  ;;  %v15464_v19 = vld [vmem:[#allocation39_spill] sm:$0xff]  ;;  %v15465_v60 = vld [vmem:[#allocation40_spill] sm:$0xff]  ;;  %v13126_v28 = vsel %vm3966_vm1, 1.0, %v12894_v31  ;;  %vm3968_vm3 = vcmp.gt.f32.partialorder %v3936_v50, 1.0  ;;  %v13134_v14 = vsel %vm3969_vm2, 1.0, %v12894_v31  ;;  %v3082_v35 = vadd.f32 %v12728_v29, %v12907_v7 }
 0x202   : > { %15460 = vst [vmem:[#allocation37_spill] sm:$0xff] %v13109_v54  ;;  %15462 = vst [vmem:[#allocation89_spill] sm:$0xff] %v13114_v22  ;;  %v13121_v30 = vadd.f32 %v15465_v60, %v15464_v19  ;;  %v2361_v54 = vadd.f32 %v12621_v47, %v12870_v53  ;;  %v3938_v60 = vld [vmem:[%s12827_s24 + $0xa0] sm:$0xff]  ;;  %v15471_v19 = vld [vmem:[#allocation41_spill] sm:$0xff]  ;;  %v13146_v22 = vmul.f32 0.9, %v3939_v45 }
 0x203   : > { %15463 = vst [vmem:[#allocation90_spill] sm:$0xff] %v13116_v11  ;;  %15467 = vst [vmem:[#allocation40_spill] sm:$0xff] %v13126_v28  ;;  %v13131_v0 = vpop.f32.mrf.mxu0  ;;  %v13136_v11 = vmul.f32 0.9, %v3936_v50  ;;  %v13140_v51 = vadd.f32 %v15471_v19, %v2359_v12  ;;  %v13144_v28 = vpop.f32.mrf.mxu1  ;;  %vm3970_vm5 = vcmp.gt.f32.partialorder %v3938_v60, 1.0  ;;  %v15474_v47 = vld [vmem:[#allocation42_spill] sm:$0xff] }
 0x204   : > { %15466 = vst [vmem:[#allocation39_spill] sm:$0xff] %v13121_v30  ;;  %15468 = vst [vmem:[#allocation91_spill] sm:$0xff] %v13131_v0  ;;  %v15475_v53 = vld [vmem:[#allocation43_spill] sm:$0xff]  ;;  %v13158_v12 = vsel %vm3968_vm3, 1.0, %v12894_v31  ;;  %v13160_v29 = vmul.f32 0.9, %v3938_v60 }
 0x205   : > { %15469 = vst [vmem:[#allocation92_spill] sm:$0xff] %v13134_v14  ;;  %15470 = vst [vmem:[#allocation93_spill] sm:$0xff] %v13136_v11  ;;  %v13150_v0 = vadd.f32 %v15475_v53, %v15474_v47  ;;  %v15477_v11 = vld [vmem:[#allocation46_spill] sm:$0xff]  ;;  %v13154_v26 = vpop.f32.mrf.mxu0  ;;  %v3941_v7 = vld [vmem:[%s12827_s24 + $0xb8] sm:$0xff]  ;;  %v13167_v47 = vsel %vm3971_vm4, 1.0, %v12894_v31 }
 0x206   : > { %15472 = vst [vmem:[#allocation41_spill] sm:$0xff] %v13140_v51  ;;  %15473 = vst [vmem:[#allocation94_spill] sm:$0xff] %v13146_v22  ;;  %v2363_v14 = vadd.f32 %v15477_v11, %v12873_v57  ;;  %v15481_v45 = vld [vmem:[#allocation65_spill] sm:$0xff]  ;;  %v15482_v22 = vld [vmem:[#allocation66_spill] sm:$0xff]  ;;  %vm3973_vm6 = vcmp.gt.f32.partialorder %v3941_v7, 1.0 }
 0x207   : > { %15476 = vst [vmem:[#allocation42_spill] sm:$0xff] %v13150_v0  ;;  %15478 = vst [vmem:[#allocation43_spill] sm:$0xff] %v13154_v26  ;;  %v3453_v19 = vadd.f32 %v15481_v45, %v3083_v49  ;;  %v3085_v51 = vadd.f32 %v15482_v22, %v12928_v5  ;;  %v15484_v53 = vld [vmem:[#allocation44_spill] sm:$0xff]  ;;  %v15486_v11 = vld [vmem:[#allocation45_spill] sm:$0xff]  ;;  %v10300_v60 = vpop.f32.mrf.mxu0  ;;  %v13179_v49 = vmul.f32 0.9, %v3941_v7 }
 0x208   : > { %15479 = vst [vmem:[#allocation46_spill] sm:$0xff] %v13158_v12  ;;  %15480 = vst [vmem:[#allocation95_spill] sm:$0xff] %v13160_v29  ;;  %v13170_v57 = vadd.f32 %v15484_v53, %v2361_v54  ;;  %v15487_v26 = vld [vmem:[#allocation47_spill] sm:$0xff]  ;;  %v13177_v29 = vsel %vm3970_vm5, 1.0, %v12894_v31  ;;  %v3940_v5 = vld [vmem:[%s12827_s24 + $0xb0] sm:$0xff]  ;;  %v13185_v53 = vpop.f32.mrf.mxu1 }
 0x209   : > { %15483 = vst [vmem:[#allocation65_spill] sm:$0xff] %v13167_v47  ;;  %v13174_v50 = vadd.f32 %v15487_v26, %v15486_v11  ;;  %15489 = vst [vmem:[#allocation45_spill] sm:$0xff] %v13177_v29  ;;  %v15491_v22 = vld [vmem:[#allocation67_spill] sm:$0xff]  ;;  %v15492_v47 = vld [vmem:[#allocation68_spill] sm:$0xff]  ;;  %v3823_v26 = vadd.f32 %v10300_v60, %v3453_v19  ;;  %vm3972_vm7 = vcmp.gt.f32.partialorder %v3940_v5, 1.0  ;;  %v3663_v29 = vpop.f32.mrf.mxu0 }
 0x20a   : > { %15485 = vst [vmem:[#allocation66_spill] sm:$0xff] %v13170_v57  ;;  %15490 = vst [vmem:[#allocation47_spill] sm:$0xff] %v13179_v49  ;;  %v3452_v45 = vadd.f32 %v15491_v22, %v3082_v35  ;;  %v3084_v54 = vadd.f32 %v15492_v47, %v12931_v34  ;;  %v15494_v11 = vld [vmem:[#allocation48_spill] sm:$0xff]  ;;  %v15496_v7 = vld [vmem:[#allocation70_spill] sm:$0xff]  ;;  %v13193_v35 = vsel %vm3973_vm6, 1.0, %v12894_v31 }
 0x20b   : > { %15488 = vst [vmem:[#allocation44_spill] sm:$0xff] %v13174_v50  ;;  %15493 = vst [vmem:[#allocation67_spill] sm:$0xff] %v13185_v53  ;;  %v13188_v12 = vadd.f32 %v15494_v11, %v2363_v14  ;;  %v3087_v49 = vadd.f32 %v15496_v7, %v12952_v24  ;;  %v13195_v22 = vmul.f32 0.9, %v3940_v5  ;;  %v3943_v34 = vld [vmem:[%s12827_s24 + $0xc8] sm:$0xff]  ;;  %v13199_v47 = vld [vmem:[%s12827_s24 + $0xc0] sm:$0xff]  ;;  %v4079_v14 = vadd.f32 %v12899_v59, %v3823_v26 }
 0x20c   : > { %15497 = vst [vmem:[#allocation48_spill] sm:$0xff] %v13193_v35  ;;  %v15499_v19 = vld [vmem:[#allocation69_spill] sm:$0xff]  ;;  %v3822_v11 = vadd.f32 %v3663_v29, %v3452_v45  ;;  %v13209_v7 = vld [vmem:[%s12827_s24 + $0xd0] sm:$0xff]  ;;  %v13212_v35 = vld [vmem:[%s12827_s24 + $0xe8] sm:$0xff]  ;;  %v10303_v29 = vpop.f32.mrf.mxu0  ;;  %v13226_v45 = vsel %vm3972_vm7, 1.0, %v12894_v31  ;;  %vm3975_vm8 = vcmp.gt.f32.partialorder %v3943_v34, 1.0 }
 0x20d   : > { %15495 = vst [vmem:[#allocation68_spill] sm:$0xff] %v13188_v12  ;;  %15498 = vst [vmem:[#allocation70_spill] sm:$0xff] %v13195_v22  ;;  %v3455_v60 = vadd.f32 %v15499_v19, %v3085_v51  ;;  %v13203_v12 = vmul.f32 0.9, %v3943_v34  ;;  %v13206_v24 = vld [vmem:[%s12827_s24 + $0xd8] sm:$0xff]  ;;  %v15502_v22 = vld [vmem:[#allocation50_spill] sm:$0xff] }
 0x20e   : > { %15501 = vst [vmem:[#allocation96_spill] sm:$0xff] %v13212_v35  ;;  %v2365_v50 = vadd.f32 %v15502_v22, %v12876_v40  ;;  %v15503_v51 = vld [vmem:[#allocation72_spill] sm:$0xff]  ;;  %15504 = vst [vmem:[#allocation50_spill] sm:$0xff] %v13226_v45  ;;  %v13229_v26 = vld [vmem:[%s12827_s24 + $0xe0] sm:$0xff]  ;;  %v13238_v35 = vpop.f32.mrf.mxu1  ;;  %v4111_v40 = vsub.f32 %v4079_v14, %v12897_v21  ;;  %v3673_v30 = vpop.f32.mrf.mxu0  ;;  %vm3974_vm12 = vcmp.gt.f32.partialorder %v13199_v47, 1.0  ;;  %vm3977_vm2 = vcmp.gt.f32.partialorder %v13206_v24, 1.0 }
 0x20f   : > { %15500 = vst [vmem:[#allocation69_spill] sm:$0xff] %v13203_v12  ;;  %v3086_v59 = vadd.f32 %v15503_v51, %v12964_v58  ;;  %15505 = vst [vmem:[#allocation72_spill] sm:$0xff] %v13229_v26  ;;  %v13232_v19 = vld [vmem:[%s12827_s24 + $0xf8] sm:$0xff]  ;;  %v13235_v12 = vld [vmem:[%s12827_s24 + $0xf0] sm:$0xff]  ;;  %v4078_v58 = vadd.f32 %v12911_v46, %v3822_v11  ;;  %v3825_v22 = vadd.f32 %v10303_v29, %v3455_v60  ;;  %v13261_v11 = vsel %vm3975_vm8, 1.0, %v12894_v31 }
 0x210   : > { %15506 = vst [vmem:[#allocation97_spill] sm:$0xff] %v13232_v19  ;;  %15507 = vst [vmem:[#allocation98_spill] sm:$0xff] %v13235_v12  ;;  %v15508_v57 = vld [vmem:[#allocation71_spill] sm:$0xff]  ;;  %v15509_v5 = vld [vmem:[#allocation49_spill] sm:$0xff]  ;;  %v13250_v12 = vmul.f32 0.9, %v13199_v47  ;;  %v13263_v29 = vpop.f32.mrf.mxu1 }
 0x211   : > { %v3454_v0 = vadd.f32 %v15508_v57, %v3084_v54  ;;  %v15510_v51 = vld [vmem:[#allocation51_spill] sm:$0xff]  ;;  %v15511_v53 = vld [vmem:[#allocation74_spill] sm:$0xff]  ;;  %v15512_v19 = vld [vmem:[#allocation73_spill] sm:$0xff]  ;;  %vm4143_vm9 = vcmp.gt.f32.partialorder %v4111_v40, 1.0  ;;  %v4110_v21 = vsub.f32 %v4078_v58, %v12919_v16  ;;  %v4081_v46 = vadd.f32 %v12921_v13, %v3825_v22  ;;  %4239 = vst [vmem:[%s13218_s11 + $0x8] sm:$0xff] %v4111_v40 }
 0x212   : > { %v13244_v45 = vadd.f32 %v15510_v51, %v15509_v5  ;;  %v3457_v26 = vadd.f32 %v15511_v53, %v3087_v49  ;;  %v3089_v8 = vadd.f32 %v15512_v19, %v12974_v61  ;;  %v15513_v54 = vld [vmem:[#allocation77_spill] sm:$0xff]  ;;  %v15514_v14 = vld [vmem:[#allocation75_spill] sm:$0xff]  ;;  %v8530_v53 = vsel %vm4143_vm9, 1.0, %v12894_v31  ;;  %v10306_v61 = vpop.f32.mrf.mxu0  ;;  %v15517_v34 = vld [vmem:[#allocation76_spill] sm:$0xff] }
 0x213   : > { %v3824_v57 = vadd.f32 %v3673_v30, %v3454_v0  ;;  %v3456_v60 = vadd.f32 %v15513_v54, %v3086_v59  ;;  %v3088_v49 = vadd.f32 %v15514_v14, %v12986_v27  ;;  %4326 = vst [vmem:[#allocation3 + $0x21] sm:$0xff] %v8530_v53  ;;  %vm4142_vm10 = vcmp.gt.f32.partialorder %v4110_v21, 1.0  ;;  %4238 = vst [vmem:[%s13218_s11] sm:$0xff] %v4110_v21  ;;  %v15515_v0 = vld [vmem:[#allocation52_spill] sm:$0xff]  ;;  %v15523_v47 = vld [vmem:[#allocation82_spill] sm:$0xff] }
 0x214   : > { %v4113_v16 = vsub.f32 %v4081_v46, %v12937_v3  ;;  %v3827_v30 = vadd.f32 %v10306_v61, %v3457_v26  ;;  %v13269_v27 = vadd.f32 %v15515_v0, %v2365_v50  ;;  %v15516_v59 = vld [vmem:[#allocation80_spill] sm:$0xff]  ;;  %v3091_v40 = vadd.f32 %v15517_v34, %v12997_v1  ;;  %v3683_v22 = vpop.f32.mrf.mxu0  ;;  %v15518_v50 = vld [vmem:[#allocation83_spill] sm:$0xff]  ;;  %v13283_v46 = vpop.f32.mrf.mxu1 }
 0x215   : > { %v4080_v13 = vadd.f32 %v12939_v20, %v3824_v57  ;;  %v3459_v19 = vadd.f32 %v15516_v59, %v3089_v8  ;;  %v8529_v58 = vsel %vm4142_vm10, 1.0, %v12894_v31  ;;  %v3826_v20 = vadd.f32 %v3683_v22, %v3456_v60  ;;  %v15519_v8 = vld [vmem:[#allocation78_spill] sm:$0xff] }
 0x216   : > { %4325 = vst [vmem:[#allocation3 + $0x19] sm:$0xff] %v8529_v58  ;;  %vm4145_vm11 = vcmp.gt.f32.partialorder %v4113_v16, 1.0  ;;  %v4083_v3 = vadd.f32 %v12947_v10, %v3827_v30  ;;  %10461 = vmatprep.mubr.f32.mxu0 %v8529_v58  ;;  %4241 = vst [vmem:[%s13218_s11 + $0x18] sm:$0xff] %v4113_v16  ;;  %v3458_v26 = vadd.f32 %v15518_v50, %v3088_v49  ;;  %v10309_v21 = vpop.f32.mrf.mxu0  ;;  %v13305_v0 = vsel %vm3974_vm12, 1.0, %v12894_v31 }
 0x217   : > { %v4112_v5 = vsub.f32 %v4080_v13, %v12945_v36  ;;  %v3090_v51 = vadd.f32 %v15519_v8, %v13008_v33  ;;  %v8532_v1 = vsel %vm4145_vm11, 1.0, %v12894_v31  ;;  %10462 = vmatmul.mubr.f32.gmra.mxu0 %v8530_v53  ;;  %v4082_v10 = vadd.f32 %v12960_v37, %v3826_v20  ;;  %v15520_v33 = vld [vmem:[#allocation79_spill] sm:$0xff] }
 0x218   : > { %4328 = vst [vmem:[#allocation3 + $0x39] sm:$0xff] %v8532_v1  ;;  %v4115_v36 = vsub.f32 %v4083_v3, %v12958_v4  ;;  %v3829_v57 = vadd.f32 %v10309_v21, %v3459_v19  ;;  %v3461_v54 = vadd.f32 %v12806_v38, %v3091_v40  ;;  %v3093_v60 = vadd.f32 %v15520_v33, %v13030_v39  ;;  %v3693_v49 = vpop.f32.mrf.mxu0  ;;  %v15521_v39 = vld [vmem:[#allocation81_spill] sm:$0xff]  ;;  %v15527_v21 = vld [vmem:[#allocation16_spill] sm:$0xff] }
 0x219   : > { %vm4144_vm13 = vcmp.gt.f32.partialorder %v4112_v5, 1.0  ;;  %4240 = vst [vmem:[%s13218_s11 + $0x10] sm:$0xff] %v4112_v5  ;;  %v13293_v53 = vmul.f32 0.9, %v13206_v24  ;;  %v4114_v61 = vsub.f32 %v4082_v10, %v12980_v42  ;;  %v3828_v37 = vadd.f32 %v3693_v49, %v3458_v26  ;;  %v13307_v42 = vpop.f32.mrf.mxu1  ;;  %v15526_v26 = vld [vmem:[#allocation84_spill] sm:$0xff] }
 0x21a   : > { %v8531_v14 = vsel %vm4144_vm13, 1.0, %v12894_v31  ;;  %vm4147_vm14 = vcmp.gt.f32.partialorder %v4115_v36, 1.0  ;;  %v4085_v4 = vadd.f32 %v12969_v56, %v3829_v57  ;;  %4243 = vst [vmem:[%s13218_s11 + $0x28] sm:$0xff] %v4115_v36  ;;  %v3460_v38 = vadd.f32 %v12833_v52, %v3090_v51  ;;  %v10312_v30 = vpop.f32.mrf.mxu0 }
 0x21b   : > { %4327 = vst [vmem:[#allocation3 + $0x31] sm:$0xff] %v8531_v14  ;;  %10464 = vmatprep.mubr.f32.mxu0 %v8531_v14  ;;  %v3092_v16 = vadd.f32 %v15521_v39, %v13033_v6  ;;  %v8534_v13 = vsel %vm4147_vm14, 1.0, %v12894_v31  ;;  %vm4146_vm15 = vcmp.gt.f32.partialorder %v4114_v61, 1.0  ;;  %v4084_v52 = vadd.f32 %v12982_v63, %v3828_v37  ;;  %4242 = vst [vmem:[%s13218_s11 + $0x20] sm:$0xff] %v4114_v61  ;;  %v15522_v6 = vld [vmem:[#allocation54_spill] sm:$0xff] }
 0x21c   : > { %10465 = vmatmul.mubr.f32.gmra.mxu0 %v8532_v1  ;;  %4330 = vst [vmem:[#allocation3 + $0x51] sm:$0xff] %v8534_v13  ;;  %v4117_v56 = vsub.f32 %v4085_v4, %v12992_v48  ;;  %v3831_v59 = vadd.f32 %v10312_v30, %v3461_v54  ;;  %v13314_v19 = vadd.f32 %v15522_v6, %v12882_v43  ;;  %v8533_v58 = vsel %vm4146_vm15, 1.0, %v12894_v31  ;;  %v3703_v22 = vpop.f32.mrf.mxu0  ;;  %v15531_v4 = vld [vmem:[#allocation19_spill] sm:$0xff]  ;;  %v15534_v6 = vld [vmem:[#allocation20_spill] sm:$0xff] }
 0x21d   : > { %v3463_v34 = vadd.f32 %v12878_v23, %v3093_v60  ;;  %v3095_v40 = vadd.f32 %v15523_v47, %v13053_v55  ;;  %v13320_v5 = vld [vmem:[#allocation3 + $0x18] sm:$0xff]  ;;  %v13322_v48 = vld [vmem:[#allocation3 + $0x20] sm:$0xff]  ;;  %4329 = vst [vmem:[#allocation3 + $0x49] sm:$0xff] %v8533_v58  ;;  %v4116_v63 = vsub.f32 %v4084_v52, %v13002_v41  ;;  %v3830_v43 = vadd.f32 %v3703_v22, %v3460_v38  ;;  %v15524_v23 = vld [vmem:[#allocation53_spill] sm:$0xff] }
 0x21e   : > { %vm4149_vm0 = vcmp.gt.f32.partialorder %v4117_v56, 1.0  ;;  %v4087_v3 = vadd.f32 %v13004_v15, %v3831_v59  ;;  %10381 = vmatprep.mubr.f32.mxu1 %v13320_v5  ;;  %10467 = vmatprep.mubr.f32.mxu0 %v8533_v58  ;;  %4245 = vst [vmem:[%s13218_s11 + $0x38] sm:$0xff] %v4117_v56  ;;  %v15525_v55 = vld [vmem:[#allocation55_spill] sm:$0xff]  ;;  %v3462_v50 = vadd.f32 %v12915_v9, %v3092_v16  ;;  %v10315_v41 = vpop.f32.mrf.mxu0  ;;  %v13337_v15 = vpop.f32.mrf.mxu1  ;;  %v15528_v9 = vld [vmem:[#allocation18_spill] sm:$0xff]  ;;  %v13361_v52 = vmul.f32 0.9, %v13209_v7 }
 0x21f   : > { %v13330_v20 = vadd.f32 %v15525_v55, %v15524_v23  ;;  %v3094_v8 = vadd.f32 %v15526_v26, %v13064_v18  ;;  %v8536_v51 = vsel %vm4149_vm0, 1.0, %v12894_v31  ;;  %10382 = vmatmul.mubr.f32.gmra.mxu1 %v13322_v48  ;;  %vm4148_vm1 = vcmp.gt.f32.partialorder %v4116_v63, 1.0  ;;  %4244 = vst [vmem:[%s13218_s11 + $0x30] sm:$0xff] %v4116_v63  ;;  %v15529_v18 = vld [vmem:[#allocation85_spill] sm:$0xff]  ;;  %v15533_v16 = vld [vmem:[#allocation86_spill] sm:$0xff]  ;;  %v15537_v63 = vld [vmem:[#allocation87_spill] sm:$0xff] }
 0x220   : > { %10468 = vmatmul.mubr.f32.gmra.mxu0 %v8534_v13  ;;  %4332 = vst [vmem:[#allocation3 + $0x69] sm:$0xff] %v8536_v51  ;;  %v4119_v1 = vsub.f32 %v4087_v3, %v13013_v32  ;;  %v4086_v36 = vadd.f32 %v15527_v21, %v3830_v43  ;;  %v3833_v10 = vadd.f32 %v10315_v41, %v3463_v34  ;;  %v8535_v33 = vsel %vm4148_vm1, 1.0, %v12894_v31  ;;  %v3713_v60 = vpop.f32.mrf.mxu0  ;;  %v15530_v32 = vld [vmem:[#allocation17_spill] sm:$0xff]  ;;  %v13363_v59 = vpop.f32.mrf.mxu1 }
 0x221   : > { %v3465_v57 = vadd.f32 %v15528_v9, %v3095_v40  ;;  %v3097_v54 = vadd.f32 %v15529_v18, %v13075_v17  ;;  %4331 = vst [vmem:[#allocation3 + $0x61] sm:$0xff] %v8535_v33  ;;  %v3832_v38 = vadd.f32 %v3713_v60, %v3462_v50  ;;  %10470 = vmatprep.mubr.f32.mxu0 %v8535_v33  ;;  %v15532_v17 = vld [vmem:[#allocation15_spill] sm:$0xff]  ;;  %v15535_v47 = vld [vmem:[#allocation21_spill] sm:$0xff]  ;;  %v13379_v26 = vsel %vm3977_vm2, 1.0, %v12894_v31 }
 0x222   : > { %v13346_v14 = vld [vmem:[#allocation3 + $0x30] sm:$0xff]  ;;  %v13348_v49 = vld [vmem:[#allocation3 + $0x38] sm:$0xff]  ;;  %vm4151_vm3 = vcmp.gt.f32.partialorder %v4119_v1, 1.0  ;;  %v4118_v61 = vsub.f32 %v4086_v36, %v15530_v32  ;;  %v4089_v37 = vadd.f32 %v15531_v4, %v3833_v10  ;;  %4247 = vst [vmem:[%s13218_s11 + $0x48] sm:$0xff] %v4119_v1  ;;  %v3464_v39 = vadd.f32 %v15532_v17, %v3094_v8  ;;  %v10318_v56 = vpop.f32.mrf.mxu0  ;;  %v15538_v8 = vld [vmem:[#allocation24_spill] sm:$0xff] }
 0x223   : > { %10384 = vmatprep.mubr.f32.mxu1 %v13346_v14  ;;  %v3096_v13 = vadd.f32 %v15533_v16, %v13084_v62  ;;  %v8538_v30 = vsel %vm4151_vm3, 1.0, %v12894_v31  ;;  %v4088_v40 = vadd.f32 %v15535_v47, %v3832_v38  ;;  %v3835_v58 = vadd.f32 %v10318_v56, %v3465_v57  ;;  %v15536_v62 = vld [vmem:[#allocation26_spill] sm:$0xff]  ;;  %v15539_v41 = vld [vmem:[#allocation25_spill] sm:$0xff]  ;;  %v15541_v10 = vld [vmem:[#allocation88_spill] sm:$0xff] }
 0x224   : > { %10385 = vmatmul.mubr.f32.gmra.mxu1 %v13348_v49  ;;  %10471 = vmatmul.mubr.f32.gmra.mxu0 %v8536_v51  ;;  %4334 = vst [vmem:[#allocation3 + $0x81] sm:$0xff] %v8538_v30  ;;  %vm4150_vm4 = vcmp.gt.f32.partialorder %v4118_v61, 1.0  ;;  %v4121_v34 = vsub.f32 %v4089_v37, %v15534_v6  ;;  %4246 = vst [vmem:[%s13218_s11 + $0x40] sm:$0xff] %v4118_v61  ;;  %v3467_v22 = vadd.f32 %v15536_v62, %v3097_v54  ;;  %v3723_v23 = vpop.f32.mrf.mxu0  ;;  %v13372_v55 = vld [vmem:[#allocation3 + $0x48] sm:$0xff]  ;;  %v13374_v50 = vld [vmem:[#allocation3 + $0x50] sm:$0xff]  ;;  %v13394_v54 = vpop.f32.mrf.mxu1 }
 0x225   : > { %v3099_v3 = vadd.f32 %v15537_v63, %v13096_v44  ;;  %v8537_v43 = vsel %vm4150_vm4, 1.0, %v12894_v31  ;;  %v4120_v51 = vsub.f32 %v4088_v40, %v15538_v8  ;;  %v4091_v1 = vadd.f32 %v15539_v41, %v3835_v58  ;;  %10387 = vmatprep.mubr.f32.mxu1 %v13372_v55  ;;  %v15540_v44 = vld [vmem:[#allocation56_spill] sm:$0xff]  ;;  %v15542_v33 = vld [vmem:[#allocation27_spill] sm:$0xff]  ;;  %v15545_v4 = vld [vmem:[#allocation6_spill] sm:$0xff] }
 0x226   : > { %4333 = vst [vmem:[#allocation3 + $0x79] sm:$0xff] %v8537_v43  ;;  %vm4153_vm5 = vcmp.gt.f32.partialorder %v4121_v34, 1.0  ;;  %v3834_v21 = vadd.f32 %v3723_v23, %v3464_v39  ;;  %10473 = vmatprep.mubr.f32.mxu0 %v8537_v43  ;;  %4249 = vst [vmem:[%s13218_s11 + $0x58] sm:$0xff] %v4121_v34  ;;  %v13387_v36 = vadd.f32 %v15540_v44, %v13314_v19  ;;  %v10321_v18 = vpop.f32.mrf.mxu0  ;;  %v15543_v32 = vld [vmem:[#allocation28_spill] sm:$0xff]  ;;  %vm3976_vm7 = vcmp.gt.f32.partialorder %v13209_v7, 1.0  ;;  %v15547_v56 = vld [vmem:[#allocation30_spill] sm:$0xff]  ;;  %v13420_v23 = vpop.f32.mrf.mxu1 }
 0x227   : > { %v3466_v24 = vadd.f32 %v13100_v2, %v3096_v13  ;;  %v3098_v9 = vadd.f32 %v15541_v10, %v13107_v25  ;;  %v8540_v57 = vsel %vm4153_vm5, 1.0, %v12894_v31  ;;  %vm4152_vm6 = vcmp.gt.f32.partialorder %v4120_v51, 1.0  ;;  %4248 = vst [vmem:[%s13218_s11 + $0x50] sm:$0xff] %v4120_v51  ;;  %v15544_v25 = vld [vmem:[#allocation39_spill] sm:$0xff]  ;;  %v15549_v40 = vld [vmem:[#allocation41_spill] sm:$0xff]  ;;  %v15550_v58 = vld [vmem:[#allocation8_spill] sm:$0xff] }
 0x228   : > { %10388 = vmatmul.mubr.f32.gmra.mxu1 %v13374_v50  ;;  %10474 = vmatmul.mubr.f32.gmra.mxu0 %v8538_v30  ;;  %4336 = vst [vmem:[#allocation3 + $0x99] sm:$0xff] %v8540_v57  ;;  %v4123_v60 = vsub.f32 %v4091_v1, %v15542_v33  ;;  %v4090_v19 = vadd.f32 %v15543_v32, %v3834_v21  ;;  %v8539_v38 = vsel %vm4152_vm6, 1.0, %v12894_v31  ;;  %v3733_v17 = vpop.f32.mrf.mxu0  ;;  %v13403_v39 = vld [vmem:[#allocation3 + $0x60] sm:$0xff]  ;;  %v13405_v16 = vld [vmem:[#allocation3 + $0x68] sm:$0xff]  ;;  %v15546_v13 = vld [vmem:[#allocation31_spill] sm:$0xff]  ;;  %v13436_v32 = vsel %vm3976_vm7, 1.0, %v12894_v31 }
 0x229   : > { %v3837_v61 = vadd.f32 %v10321_v18, %v3467_v22  ;;  %v3469_v2 = vadd.f32 %v13144_v28, %v3099_v3  ;;  %v3101_v37 = vadd.f32 %v15545_v4, %v15544_v25  ;;  %4335 = vst [vmem:[#allocation3 + $0x91] sm:$0xff] %v8539_v38  ;;  %v3836_v34 = vadd.f32 %v3733_v17, %v3466_v24  ;;  %v15548_v28 = vld [vmem:[#allocation67_spill] sm:$0xff]  ;;  %v15551_v3 = vld [vmem:[#allocation96_spill] sm:$0xff]  ;;  %v15552_v8 = vld [vmem:[#allocation34_spill] sm:$0xff] }
 0x22a   : > { %vm4155_vm8 = vcmp.gt.f32.partialorder %v4123_v60, 1.0  ;;  %v4122_v30 = vsub.f32 %v4090_v19, %v15546_v13  ;;  %10390 = vmatprep.mubr.f32.mxu1 %v13403_v39  ;;  %10476 = vmatprep.mubr.f32.mxu0 %v8539_v38  ;;  %4251 = vst [vmem:[%s13218_s11 + $0x68] sm:$0xff] %v4123_v60  ;;  %v3468_v47 = vadd.f32 %v15548_v28, %v3098_v9  ;;  %v10324_v63 = vpop.f32.mrf.mxu0  ;;  %v13418_v43 = vmul.f32 0.9, %v15551_v3  ;;  %v15553_v41 = vld [vmem:[#allocation32_spill] sm:$0xff]  ;;  %v15554_v24 = vld [vmem:[#allocation42_spill] sm:$0xff] }
 0x22b   : > { %v4093_v6 = vadd.f32 %v15547_v56, %v3837_v61  ;;  %v3100_v62 = vadd.f32 %v15550_v58, %v15549_v40  ;;  %v8542_v22 = vsel %vm4155_vm8, 1.0, %v12894_v31  ;;  %v4092_v1 = vadd.f32 %v15553_v41, %v3836_v34  ;;  %v15555_v10 = vld [vmem:[#allocation10_spill] sm:$0xff]  ;;  %v15556_v19 = vld [vmem:[#allocation36_spill] sm:$0xff]  ;;  %v15558_v4 = vld [vmem:[#allocation7_spill] sm:$0xff]  ;;  %v13451_v34 = vpop.f32.mrf.mxu1 }
 0x22c   : > { %10391 = vmatmul.mubr.f32.gmra.mxu1 %v13405_v16  ;;  %10477 = vmatmul.mubr.f32.gmra.mxu0 %v8540_v57  ;;  %4338 = vst [vmem:[#allocation3 + $0xb1] sm:$0xff] %v8542_v22  ;;  %vm4154_vm9 = vcmp.gt.f32.partialorder %v4122_v30, 1.0  ;;  %v3839_v21 = vadd.f32 %v10324_v63, %v3469_v2  ;;  %4250 = vst [vmem:[%s13218_s11 + $0x60] sm:$0xff] %v4122_v30  ;;  %v3471_v44 = vadd.f32 %v13238_v35, %v3101_v37  ;;  %v3743_v18 = vpop.f32.mrf.mxu0  ;;  %v15557_v35 = vld [vmem:[#allocation35_spill] sm:$0xff]  ;;  %v15559_v37 = vld [vmem:[#allocation58_spill] sm:$0xff] }
 0x22d   : > { %v4125_v51 = vsub.f32 %v4093_v6, %v15552_v8  ;;  %v3103_v9 = vadd.f32 %v15555_v10, %v15554_v24  ;;  %v8541_v57 = vsel %vm4154_vm9, 1.0, %v12894_v31  ;;  %v13429_v33 = vld [vmem:[#allocation3 + $0x78] sm:$0xff]  ;;  %v13431_v60 = vld [vmem:[#allocation3 + $0x80] sm:$0xff]  ;;  %v4124_v61 = vsub.f32 %v4092_v1, %v15556_v19  ;;  %v15560_v17 = vld [vmem:[#allocation66_spill] sm:$0xff] }
 0x22e   : > { %4337 = vst [vmem:[#allocation3 + $0xa9] sm:$0xff] %v8541_v57  ;;  %v4095_v2 = vadd.f32 %v15557_v35, %v3839_v21  ;;  %v3838_v25 = vadd.f32 %v3743_v18, %v3468_v47  ;;  %10393 = vmatprep.mubr.f32.mxu1 %v13429_v33  ;;  %10479 = vmatprep.mubr.f32.mxu0 %v8541_v57  ;;  %v15561_v13 = vld [vmem:[#allocation11_spill] sm:$0xff]  ;;  %v10327_v6 = vpop.f32.mrf.mxu0  ;;  %v15562_v28 = vld [vmem:[#allocation38_spill] sm:$0xff]  ;;  %v15563_v40 = vld [vmem:[#allocation89_spill] sm:$0xff]  ;;  %vm3979_vm13 = vcmp.gt.f32.partialorder %v15551_v3, 1.0 }
 0x22f   : > { %vm4157_vm10 = vcmp.gt.f32.partialorder %v4125_v51, 1.0  ;;  %4253 = vst [vmem:[%s13218_s11 + $0x78] sm:$0xff] %v4125_v51  ;;  %v13444_v38 = vadd.f32 %v15559_v37, %v15558_v4  ;;  %v3470_v7 = vadd.f32 %v13263_v29, %v3100_v62  ;;  %v3102_v30 = vadd.f32 %v15561_v13, %v15560_v17  ;;  %4252 = vst [vmem:[%s13218_s11 + $0x70] sm:$0xff] %v4124_v61  ;;  %v15564_v29 = vld [vmem:[#allocation57_spill] sm:$0xff]  ;;  %v15565_v62 = vld [vmem:[#allocation59_spill] sm:$0xff]  ;;  %v13478_v17 = vpop.f32.mrf.mxu1 }
 0x230   : > { %v8544_v56 = vsel %vm4157_vm10, 1.0, %v12894_v31  ;;  %10394 = vmatmul.mubr.f32.gmra.mxu1 %v13431_v60  ;;  %10480 = vmatmul.mubr.f32.gmra.mxu0 %v8542_v22  ;;  %vm4156_vm11 = vcmp.gt.f32.partialorder %v4124_v61, 1.0  ;;  %v4127_v47 = vsub.f32 %v4095_v2, %v15562_v28  ;;  %v4094_v58 = vadd.f32 %v15563_v40, %v3838_v25  ;;  %v15566_v41 = vld [vmem:[#allocation44_spill] sm:$0xff]  ;;  %v3753_v24 = vpop.f32.mrf.mxu0  ;;  %v13464_v10 = vld [vmem:[#allocation3 + $0x90] sm:$0xff]  ;;  %v13466_v57 = vld [vmem:[#allocation3 + $0x98] sm:$0xff] }
 0x231   : > { %4340 = vst [vmem:[#allocation3 + $0xc9] sm:$0xff] %v8544_v56  ;;  %v3841_v63 = vadd.f32 %v10327_v6, %v3471_v44  ;;  %v13458_v8 = vadd.f32 %v15565_v62, %v15564_v29  ;;  %v3473_v51 = vadd.f32 %v13283_v46, %v3103_v9  ;;  %v15567_v1 = vld [vmem:[#allocation12_spill] sm:$0xff]  ;;  %v8543_v21 = vsel %vm4156_vm11, 1.0, %v12894_v31  ;;  %v15569_v19 = vld [vmem:[#allocation90_spill] sm:$0xff]  ;;  %10396 = vmatprep.mubr.f32.mxu1 %v13464_v10  ;;  %v15571_v2 = vld [vmem:[#allocation13_spill] sm:$0xff] }
 0x232   : > { %v3105_v22 = vadd.f32 %v15567_v1, %v15566_v41  ;;  %4339 = vst [vmem:[#allocation3 + $0xc1] sm:$0xff] %v8543_v21  ;;  %vm4159_vm12 = vcmp.gt.f32.partialorder %v4127_v47, 1.0  ;;  %v15568_v44 = vld [vmem:[#allocation40_spill] sm:$0xff]  ;;  %v3840_v35 = vadd.f32 %v3753_v24, %v3470_v7  ;;  %10482 = vmatprep.mubr.f32.mxu0 %v8543_v21  ;;  %4255 = vst [vmem:[%s13218_s11 + $0x88] sm:$0xff] %v4127_v47  ;;  %v10330_v37 = vpop.f32.mrf.mxu0  ;;  %v15573_v6 = vld [vmem:[#allocation93_spill] sm:$0xff] }
 0x233   : > { %v4126_v18 = vsub.f32 %v4094_v58, %v15568_v44  ;;  %v4097_v61 = vadd.f32 %v15569_v19, %v3841_v63  ;;  %v3472_v46 = vadd.f32 %v13307_v42, %v3102_v30  ;;  %v15570_v9 = vld [vmem:[#allocation68_spill] sm:$0xff]  ;;  %v8546_v4 = vsel %vm4159_vm12, 1.0, %v12894_v31  ;;  %v15574_v47 = vld [vmem:[#allocation14_spill] sm:$0xff]  ;;  %v15582_v3 = vld [vmem:[#allocation23_spill] sm:$0xff] }
 0x234   : > { %v3104_v25 = vadd.f32 %v15571_v2, %v15570_v9  ;;  %10397 = vmatmul.mubr.f32.gmra.mxu1 %v13466_v57  ;;  %10483 = vmatmul.mubr.f32.gmra.mxu0 %v8544_v56  ;;  %4342 = vst [vmem:[#allocation3 + $0xe1] sm:$0xff] %v8546_v4  ;;  %v15572_v7 = vld [vmem:[#allocation92_spill] sm:$0xff]  ;;  %v4096_v28 = vadd.f32 %v15573_v6, %v3840_v35  ;;  %v3763_v58 = vpop.f32.mrf.mxu0  ;;  %v15577_v21 = vld [vmem:[#allocation94_spill] sm:$0xff]  ;;  %v13508_v35 = vpop.f32.mrf.mxu1  ;;  %v15580_v9 = vld [vmem:[#allocation95_spill] sm:$0xff] }
 0x235   : > { %vm4158_vm14 = vcmp.gt.f32.partialorder %v4126_v18, 1.0  ;;  %v4129_v13 = vsub.f32 %v4097_v61, %v15572_v7  ;;  %v3843_v42 = vadd.f32 %v10330_v37, %v3473_v51  ;;  %4254 = vst [vmem:[%s13218_s11 + $0x80] sm:$0xff] %v4126_v18  ;;  %v3475_v30 = vadd.f32 %v13337_v15, %v3105_v22  ;;  %v13487_v63 = vld [vmem:[#allocation3 + $0xa8] sm:$0xff]  ;;  %v13489_v29 = vld [vmem:[#allocation3 + $0xb0] sm:$0xff]  ;;  %v15575_v62 = vld [vmem:[#allocation72_spill] sm:$0xff] }
 0x236   : > { %v3107_v40 = vadd.f32 %v15574_v47, %v13244_v45  ;;  %v8545_v56 = vsel %vm4158_vm14, 1.0, %v12894_v31  ;;  %v13492_v41 = vmul.f32 0.9, %v15575_v62  ;;  %v15576_v51 = vld [vmem:[#allocation46_spill] sm:$0xff]  ;;  %v3842_v15 = vadd.f32 %v3763_v58, %v3472_v46  ;;  %10399 = vmatprep.mubr.f32.mxu1 %v13487_v63  ;;  %v10333_v19 = vpop.f32.mrf.mxu0  ;;  %v15579_v46 = vld [vmem:[#allocation65_spill] sm:$0xff] }
 0x237   : > { %4341 = vst [vmem:[#allocation3 + $0xd9] sm:$0xff] %v8545_v56  ;;  %vm4161_vm15 = vcmp.gt.f32.partialorder %v4129_v13, 1.0  ;;  %v4128_v1 = vsub.f32 %v4096_v28, %v15576_v51  ;;  %v4099_v24 = vadd.f32 %v15577_v21, %v3843_v42  ;;  %10485 = vmatprep.mubr.f32.mxu0 %v8545_v56  ;;  %4257 = vst [vmem:[%s13218_s11 + $0x98] sm:$0xff] %v4129_v13  ;;  %v15578_v22 = vld [vmem:[#allocation22_spill] sm:$0xff]  ;;  %v13506_v61 = vsel %vm3979_vm13, 1.0, %v12894_v31  ;;  %v15584_v56 = vld [vmem:[#allocation47_spill] sm:$0xff]  ;;  %v3433_v21 = vpop.f32.mrf.mxu1 }
 0x238   : > { %v3474_v45 = vadd.f32 %v13363_v59, %v3104_v25  ;;  %v3106_v44 = vadd.f32 %v15578_v22, %v13269_v27  ;;  %v8548_v18 = vsel %vm4161_vm15, 1.0, %v12894_v31  ;;  %10400 = vmatmul.mubr.f32.gmra.mxu1 %v13489_v29  ;;  %10486 = vmatmul.mubr.f32.gmra.mxu0 %v8546_v4  ;;  %v4098_v2 = vadd.f32 %v15580_v9, %v3842_v15  ;;  %v15581_v25 = vld [vmem:[#allocation60_spill] sm:$0xff]  ;;  %v3773_v6 = vpop.f32.mrf.mxu0 }
 0x239   : > { %4344 = vst [vmem:[#allocation3 + $0xf9] sm:$0xff] %v8548_v18  ;;  %vm4160_vm0 = vcmp.gt.f32.partialorder %v4128_v1, 1.0  ;;  %v4131_v59 = vsub.f32 %v4099_v24, %v15579_v46  ;;  %v3845_v27 = vadd.f32 %v10333_v19, %v3475_v30  ;;  %4256 = vst [vmem:[%s13218_s11 + $0x90] sm:$0xff] %v4128_v1  ;;  %v2739_v37 = vadd.f32 %v15581_v25, %v13444_v38  ;;  %v13519_v28 = vld [vmem:[#allocation3 + $0xc0] sm:$0xff]  ;;  %v13521_v42 = vld [vmem:[#allocation3 + $0xc8] sm:$0xff] }
 0x23a   : > { %v3477_v4 = vadd.f32 %v13394_v54, %v3107_v40  ;;  %v3109_v7 = vadd.f32 %v15582_v3, %v13330_v20  ;;  %v8547_v13 = vsel %vm4160_vm0, 1.0, %v12894_v31  ;;  %v15583_v30 = vld [vmem:[#allocation45_spill] sm:$0xff]  ;;  %v3844_v51 = vadd.f32 %v3773_v6, %v3474_v45  ;;  %10402 = vmatprep.mubr.f32.mxu1 %v13519_v28  ;;  %v10336_v1 = vpop.f32.mrf.mxu0  ;;  %v15586_v24 = vld [vmem:[#allocation48_spill] sm:$0xff]  ;;  %v15587_v45 = vld [vmem:[#allocation70_spill] sm:$0xff] }
 0x23b   : > { %4343 = vst [vmem:[#allocation3 + $0xf1] sm:$0xff] %v8547_v13  ;;  %vm4163_vm1 = vcmp.gt.f32.partialorder %v4131_v59, 1.0  ;;  %v4130_v47 = vsub.f32 %v4098_v2, %v15583_v30  ;;  %v4101_v58 = vadd.f32 %v15584_v56, %v3845_v27  ;;  %10488 = vmatprep.mubr.f32.mxu0 %v8547_v13  ;;  %4259 = vst [vmem:[%s13218_s11 + $0xa8] sm:$0xff] %v4131_v59  ;;  %v15585_v54 = vld [vmem:[#allocation29_spill] sm:$0xff]  ;;  %vm3978_vm2 = vcmp.gt.f32.partialorder %v15575_v62, 1.0 }
 0x23c   : > { %v3476_v20 = vadd.f32 %v13420_v23, %v3106_v44  ;;  %v3108_v38 = vadd.f32 %v15585_v54, %v13387_v36  ;;  %v8550_v40 = vsel %vm4163_vm1, 1.0, %v12894_v31  ;;  %10403 = vmatmul.mubr.f32.gmra.mxu1 %v13521_v42  ;;  %10489 = vmatmul.mubr.f32.gmra.mxu0 %v8548_v18  ;;  %v4100_v22 = vadd.f32 %v15587_v45, %v3844_v51  ;;  %v15588_v23 = vld [vmem:[#allocation9_spill] sm:$0xff]  ;;  %v15589_v36 = vld [vmem:[#allocation62_spill] sm:$0xff]  ;;  %v3783_v2 = vpop.f32.mrf.mxu0  ;;  %v15596_v45 = vld [vmem:[#allocation64_spill] sm:$0xff] }
 0x23d   : > { %4346 = vst [vmem:[#allocation3 + $0x111] sm:$0xff] %v8550_v40  ;;  %vm4162_vm3 = vcmp.gt.f32.partialorder %v4130_v47, 1.0  ;;  %v4133_v15 = vsub.f32 %v4101_v58, %v15586_v24  ;;  %v3847_v19 = vadd.f32 %v10336_v1, %v3477_v4  ;;  %4258 = vst [vmem:[%s13218_s11 + $0xa0] sm:$0xff] %v4130_v47  ;;  %v2371_v44 = vadd.f32 %v15589_v36, %v15588_v23  ;;  %v15590_v59 = vld [vmem:[#allocation33_spill] sm:$0xff]  ;;  %v15591_v4 = vld [vmem:[#allocation50_spill] sm:$0xff]  ;;  %v10265_v1 = vpop.f32.mrf.mxu1 }
 0x23e   : > { %v3479_v46 = vadd.f32 %v13451_v34, %v3109_v7  ;;  %v3111_v18 = vadd.f32 %v15590_v59, %v13458_v8  ;;  %v8549_v9 = vsel %vm4162_vm3, 1.0, %v12894_v31  ;;  %v13542_v27 = vld [vmem:[#allocation3 + $0xd8] sm:$0xff]  ;;  %v13544_v25 = vld [vmem:[#allocation3 + $0xe0] sm:$0xff]  ;;  %v4132_v3 = vsub.f32 %v4100_v22, %v15591_v4  ;;  %v15592_v13 = vld [vmem:[#allocation69_spill] sm:$0xff]  ;;  %v10339_v54 = vpop.f32.mrf.mxu0 }
 0x23f   : > { %4345 = vst [vmem:[#allocation3 + $0x109] sm:$0xff] %v8549_v9  ;;  %vm4165_vm4 = vcmp.gt.f32.partialorder %v4133_v15, 1.0  ;;  %v4103_v6 = vadd.f32 %v15592_v13, %v3847_v19  ;;  %v3846_v30 = vadd.f32 %v3783_v2, %v3476_v20  ;;  %10405 = vmatprep.mubr.f32.mxu1 %v13542_v27  ;;  %10491 = vmatprep.mubr.f32.mxu0 %v8549_v9  ;;  %4261 = vst [vmem:[%s13218_s11 + $0xb8] sm:$0xff] %v4133_v15  ;;  %v15593_v34 = vld [vmem:[#allocation61_spill] sm:$0xff]  ;;  %v15594_v8 = vld [vmem:[#allocation63_spill] sm:$0xff] }
 0x240   : > { %v2742_v7 = vadd.f32 %v15594_v8, %v15593_v34  ;;  %v3478_v47 = vadd.f32 %v13478_v17, %v3108_v38  ;;  %v15595_v56 = vld [vmem:[#allocation37_spill] sm:$0xff]  ;;  %v8552_v51 = vsel %vm4165_vm4, 1.0, %v12894_v31  ;;  %10406 = vmatmul.mubr.f32.gmra.mxu1 %v13544_v25  ;;  %10492 = vmatmul.mubr.f32.gmra.mxu0 %v8550_v40  ;;  %vm4164_vm5 = vcmp.gt.f32.partialorder %v4132_v3, 1.0  ;;  %4260 = vst [vmem:[%s13218_s11 + $0xb0] sm:$0xff] %v4132_v3  ;;  %v15597_v38 = vld [vmem:[#allocation91_spill] sm:$0xff]  ;;  %v13562_v22 = vld [vmem:[#allocation2] sm:$0xff]  ;;  %v3793_v19 = vpop.f32.mrf.mxu0 }
 0x241   : > { %v3110_v58 = vadd.f32 %v15595_v56, %v2739_v37  ;;  %4348 = vst [vmem:[#allocation3 + $0x129] sm:$0xff] %v8552_v51  ;;  %v4135_v20 = vsub.f32 %v4103_v6, %v13261_v11  ;;  %v4102_v24 = vadd.f32 %v13250_v12, %v3846_v30  ;;  %v3849_v15 = vadd.f32 %v10339_v54, %v3479_v46  ;;  %v15598_v46 = vld [vmem:[#allocation43_spill] sm:$0xff]  ;;  %v15599_v2 = vld [vmem:[#allocation97_spill] sm:$0xff] }
 0x242   : > { %v2741_v17 = vadd.f32 %v15596_v45, %v2371_v44  ;;  %v3481_v37 = vadd.f32 %v13508_v35, %v3111_v18  ;;  %v3113_v31 = vadd.f32 %v15597_v38, %v2742_v7  ;;  %v8551_v40 = vsel %vm4164_vm5, 1.0, %v13562_v22  ;;  %v13565_v23 = vld [vmem:[#allocation3 + $0xf0] sm:$0xff]  ;;  %v13567_v36 = vld [vmem:[#allocation3 + $0xf8] sm:$0xff]  ;;  %v10342_v9 = vpop.f32.mrf.mxu0 }
 0x243   : > { %4347 = vst [vmem:[#allocation3 + $0x121] sm:$0xff] %v8551_v40  ;;  %vm4167_vm6 = vcmp.gt.f32.partialorder %v4135_v20, 1.0  ;;  %v4134_v12 = vsub.f32 %v4102_v24, %v13305_v0  ;;  %v4105_v11 = vadd.f32 %v13293_v53, %v3849_v15  ;;  %v3848_v44 = vadd.f32 %v3793_v19, %v3478_v47  ;;  %10408 = vmatprep.mubr.f32.mxu1 %v13565_v23  ;;  %v3443_v0 = vpop.f32.mrf.mxu1 }
 0x244   : > { %4263 = vst [vmem:[%s13218_s11 + $0xc8] sm:$0xff] %v4135_v20  ;;  %10494 = vmatprep.mubr.f32.mxu0 %v8551_v40  ;;  %v3480_v35 = vadd.f32 %v3433_v21, %v3110_v58  ;;  %v3112_v59 = vadd.f32 %v15598_v46, %v2741_v17  ;;  %v8554_v18 = vsel %vm4167_vm6, 1.0, %v13562_v22  ;;  %10409 = vmatmul.mubr.f32.gmra.mxu1 %v13567_v36  ;;  %v4077_v4 = vmul.f32 0.9, %v15599_v2  ;;  %v3803_v30 = vpop.f32.mrf.mxu0 }
 0x245   : > { %10495 = vmatmul.mubr.f32.gmra.mxu0 %v8552_v51  ;;  %4350 = vst [vmem:[#allocation3 + $0x141] sm:$0xff] %v8554_v18  ;;  %vm4166_vm7 = vcmp.gt.f32.partialorder %v4134_v12, 1.0  ;;  %v4137_v53 = vsub.f32 %v4105_v11, %v13379_v26  ;;  %v4104_v3 = vadd.f32 %v13361_v52, %v3848_v44  ;;  %v3851_v13 = vadd.f32 %v10342_v9, %v3481_v37  ;;  %v15600_v51 = vld [vmem:[#allocation98_spill] sm:$0xff] }
 0x246   : > { %4262 = vst [vmem:[%s13218_s11 + $0xc0] sm:$0xff] %v4134_v12  ;;  %v3483_v21 = vadd.f32 %v10265_v1, %v3113_v31  ;;  %v8553_v6 = vsel %vm4166_vm7, 1.0, %v13562_v22  ;;  %v8525_v34 = vsel %vm3978_vm2, 1.0, %v13562_v22  ;;  %v13584_v8 = vld [vmem:[#allocation3 + $0x108] sm:$0xff]  ;;  %vm3981_vm8 = vcmp.gt.f32.partialorder %v15599_v2, 1.0  ;;  %v13587_v7 = vld [vmem:[#allocation3 + $0x110] sm:$0xff]  ;;  %v10345_v58 = vpop.f32.mrf.mxu0 }
 0x247   : > { %4349 = vst [vmem:[#allocation3 + $0x139] sm:$0xff] %v8553_v6  ;;  %vm4169_vm9 = vcmp.gt.f32.partialorder %v4137_v53, 1.0  ;;  %v4136_v52 = vsub.f32 %v4104_v3, %v13436_v32  ;;  %v4107_v26 = vadd.f32 %v13418_v43, %v3851_v13  ;;  %v3850_v47 = vadd.f32 %v3803_v30, %v3480_v35  ;;  %10411 = vmatprep.mubr.f32.mxu1 %v13584_v8  ;;  %v8640_v2 = vld [vmem:[%s15300_s3 + $0x2f0] sm:$0xff]  ;;  %v11089_v30 = vld [vmem:[%s15300_s3 + $0x278] sm:$0xff] }
 0x248   : > { %4265 = vst [vmem:[%s13218_s11 + $0xd8] sm:$0xff] %v4137_v53  ;;  %10497 = vmatprep.mubr.f32.mxu0 %v8553_v6  ;;  %v3482_v62 = vadd.f32 %v3443_v0, %v3112_v59  ;;  %v8556_v56 = vsel %vm4169_vm9, 1.0, %v13562_v22  ;;  %10412 = vmatmul.mubr.f32.gmra.mxu1 %v13587_v7  ;;  %vm3980_vm10 = vcmp.gt.f32.partialorder %v15600_v51, 1.0  ;;  %v4076_v54 = vmul.f32 0.9, %v15600_v51  ;;  %v3813_v15 = vpop.f32.mrf.mxu0  ;;  %v5135_v0 = vld [vmem:[#allocation3 + $0x2] sm:$0xff] }
 0x249   : > { %10498 = vmatmul.mubr.f32.gmra.mxu0 %v8554_v18  ;;  %4352 = vst [vmem:[#allocation3 + $0x159] sm:$0xff] %v8556_v56  ;;  %vm4168_vm11 = vcmp.gt.f32.partialorder %v4136_v52, 1.0  ;;  %v4139_v43 = vsub.f32 %v4107_v26, %v13506_v61  ;;  %v4106_v32 = vadd.f32 %v13492_v41, %v3850_v47  ;;  %v3853_v1 = vadd.f32 %v10345_v58, %v3483_v21  ;;  %v13659_v53 = vld [vmem:[%s15301_s4] ss:$0 sm:$0xff]  ;;  %v8624_v13 = vld [vmem:[%s15300_s3 + $0x270] sm:$0xff]  ;;  %v13687_v47 = vld [vmem:[#allocation3 + $0x32] sm:$0xff] }
 0x24a   : > { %4264 = vst [vmem:[%s13218_s11 + $0xd0] sm:$0xff] %v4136_v52  ;;  %v8555_v20 = vsel %vm4168_vm11, 1.0, %v13562_v22  ;;  %v8528_v24 = vsel %vm3981_vm8, 1.0, %v13562_v22  ;;  %v13604_v45 = vld [vmem:[#allocation3 + $0x120] sm:$0xff]  ;;  %v13606_v17 = vld [vmem:[#allocation3 + $0x128] sm:$0xff]  ;;  %v3852_v38 = vadd.f32 %v3813_v15, %v3482_v62  ;;  %v8527_v31 = vsel %vm3980_vm10, 1.0, %v13562_v22 }
 0x24b   : > { %4351 = vst [vmem:[#allocation3 + $0x151] sm:$0xff] %v8555_v20  ;;  %vm4171_vm12 = vcmp.gt.f32.partialorder %v4139_v43, 1.0  ;;  %v4138_v37 = vsub.f32 %v4106_v32, %v8525_v34  ;;  %v4109_v61 = vadd.f32 %v4077_v4, %v3853_v1  ;;  %4267 = vst [vmem:[%s13218_s11 + $0xe8] sm:$0xff] %v4139_v43  ;;  %10414 = vmatprep.mubr.f32.mxu1 %v13604_v45  ;;  %10500 = vmatprep.mubr.f32.mxu0 %v8555_v20  ;;  %v8623_v34 = vld [vmem:[%s15300_s3 + $0x268] sm:$0xff]  ;;  %v8622_v26 = vld [vmem:[%s15300_s3 + $0x260] sm:$0xff] }
 0x24c   : > { %v8558_v41 = vsel %vm4171_vm12, 1.0, %v13562_v22  ;;  %10415 = vmatmul.mubr.f32.gmra.mxu1 %v13606_v17  ;;  %v4108_v19 = vadd.f32 %v4076_v54, %v3852_v38  ;;  %v13694_v62 = vld [vmem:[#allocation3 + $0x3a] sm:$0xff]  ;;  %v13701_v58 = vld [vmem:[#allocation3 + $0x4a] sm:$0xff]  ;;  %v13715_v54 = vld [vmem:[#allocation3 + $0x62] sm:$0xff] }
 0x24d   : > { %10501 = vmatmul.mubr.f32.gmra.mxu0 %v8556_v56  ;;  %4354 = vst [vmem:[#allocation3 + $0x171] sm:$0xff] %v8558_v41  ;;  %vm4170_vm13 = vcmp.gt.f32.partialorder %v4138_v37, 1.0  ;;  %v4141_v40 = vsub.f32 %v4109_v61, %v8528_v24  ;;  %4266 = vst [vmem:[%s13218_s11 + $0xe0] sm:$0xff] %v4138_v37  ;;  %v8620_v56 = vld [vmem:[%s15300_s3 + $0x250] sm:$0xff]  ;;  %v8618_v51 = vld [vmem:[%s15300_s3 + $0x240] sm:$0xff] }
 0x24e   : > { %v8557_v12 = vsel %vm4170_vm13, 1.0, %v13562_v22  ;;  %v13617_v11 = vld [vmem:[#allocation3 + $0x138] sm:$0xff]  ;;  %v13619_v44 = vld [vmem:[#allocation3 + $0x140] sm:$0xff]  ;;  %v4140_v35 = vsub.f32 %v4108_v19, %v8527_v31  ;;  %v8637_v1 = vld [vmem:[%s15300_s3 + $0x2d8] sm:$0xff] }
 0x24f   : > { %4353 = vst [vmem:[#allocation3 + $0x169] sm:$0xff] %v8557_v12  ;;  %vm4173_vm14 = vcmp.gt.f32.partialorder %v4141_v40, 1.0  ;;  %4269 = vst [vmem:[%s13218_s11 + $0xf8] sm:$0xff] %v4141_v40  ;;  %10417 = vmatprep.mubr.f32.mxu1 %v13617_v11  ;;  %10503 = vmatprep.mubr.f32.mxu0 %v8557_v12  ;;  %v8616_v43 = vld [vmem:[%s15300_s3 + $0x230] sm:$0xff]  ;;  %v13743_v20 = vld [vmem:[#allocation3 + $0x92] sm:$0xff] }
 0x250   : > { %v8560_v46 = vsel %vm4173_vm14, 1.0, %v13562_v22  ;;  %10418 = vmatmul.mubr.f32.gmra.mxu1 %v13619_v44  ;;  %vm4172_vm15 = vcmp.gt.f32.partialorder %v4140_v35, 1.0  ;;  %4268 = vst [vmem:[%s13218_s11 + $0xf0] sm:$0xff] %v4140_v35  ;;  %v10460_v6 = vpop.f32.mrf.mxu0  ;;  %v13729_v32 = vld [vmem:[#allocation3 + $0x7a] sm:$0xff]  ;;  %v8614_v24 = vld [vmem:[%s15300_s3 + $0x220] sm:$0xff]  ;;  %v8613_v37 = vld [vmem:[%s15300_s3 + $0x218] sm:$0xff] }
 0x251   : > { %10504 = vmatmul.mubr.f32.gmra.mxu0 %v8558_v41  ;;  %4356 = vst [vmem:[#allocation3 + $0x189] sm:$0xff] %v8560_v46  ;;  %v13628_v59 = vsel %vm4172_vm15, 1.0, %v13562_v22  ;;  %v13757_v15 = vld [vmem:[#allocation3 + $0xaa] sm:$0xff]  ;;  %v13771_v61 = vld [vmem:[#allocation3 + $0xc2] sm:$0xff]  ;;  %v13785_v41 = vld [vmem:[#allocation3 + $0xda] sm:$0xff] }
 0x252   : > { %10618 = vmatprep.mubr.f32.mxu0 %v13320_v5  ;;  %v13630_v18 = vld [vmem:[#allocation3 + $0x150] sm:$0xff]  ;;  %v13632_v9 = vld [vmem:[#allocation3 + $0x158] sm:$0xff]  ;;  %4355 = vst [vmem:[#allocation3 + $0x181] sm:$0xff] %v13628_v59  ;;  %v11088_v5 = vld [vmem:[%s15300_s3 + $0x2f8] sm:$0xff] }
 0x253   : > { %10420 = vmatprep.mubr.f32.mxu1 %v13630_v18  ;;  %v10380_v3 = vpop.f32.mrf.mxu1  ;;  %v8633_v38 = vld [vmem:[%s15300_s3 + $0x2b8] sm:$0xff]  ;;  %v8612_v31 = vld [vmem:[%s15300_s3 + $0x210] sm:$0xff]  ;;  %v13799_v40 = vld [vmem:[#allocation3 + $0xf2] sm:$0xff] }
 0x254   : > { %10421 = vmatmul.mubr.f32.gmra.mxu1 %v13632_v9  ;;  %v4702_v21 = vadd.f32 %v10380_v3, %v13659_v53  ;;  %v8611_v19 = vld [vmem:[%s15300_s3 + $0x208] sm:$0xff]  ;;  %v13813_v12 = vld [vmem:[#allocation3 + $0x10a] sm:$0xff]  ;;  %v13827_v46 = vld [vmem:[#allocation3 + $0x122] sm:$0xff] }
 0x255   : > { %10619 = vmatmul.mubr.f32.vlgmr.msra.gmra.mxu0 %v13322_v48  ;;  %v8639_v48 = vld [vmem:[%s15300_s3 + $0x2e8] sm:$0xff]  ;;  %v8629_v35 = vld [vmem:[%s15300_s3 + $0x298] sm:$0xff]  ;;  %v8626_v3 = vld [vmem:[%s15300_s3 + $0x280] sm:$0xff] }
 0x256   : > { %10621 = vmatprep.mubr.f32.mxu0 %v13346_v14  ;;  %10747 = vmatpush3.msra.mxu0 %v11088_v5  ;;  %v13645_v22 = vld [vmem:[#allocation3 + $0x168] sm:$0xff]  ;;  %v13647_v4 = vld [vmem:[#allocation3 + $0x170] sm:$0xff]  ;;  %v13678_v52 = vadd.f32 %v10460_v6, %v4702_v21  ;;  %v13841_v5 = vld [vmem:[#allocation3 + $0x13a] sm:$0xff] }
 0x257   : > { %10748 = vmatprep.subr.mxu0 %v8640_v2  ;;  %10423 = vmatprep.mubr.f32.mxu1 %v13645_v22  ;;  %v5136_v14 = vld [vmem:[#allocation3 + $0xa] sm:$0xff]  ;;  %v8672_v6 = vld [vmem:[%s15300_s3 + $0x3f0] sm:$0xff] }
 0x258   : > { %10749 = vmatpush3.msra.mxu0 %v8640_v2  ;;  %10424 = vmatmul.mubr.f32.gmra.mxu1 %v13647_v4  ;;  %v8610_v2 = vld [vmem:[%s15300_s3 + $0x200] sm:$0xff]  ;;  %v8673_v21 = vld [vmem:[%s15300_s3 + $0x3f8] sm:$0xff] }
 0x259   : > { %10622 = vmatmul.mubr.f32.gmra.mxu0 %v13348_v49  ;;  %10538 = vmatprep.mubr.f32.mxu1 %v5135_v0  ;;  %v13665_v49 = vld [vmem:[#allocation3 + $0x1a] sm:$0xff]  ;;  %v13850_v0 = vld [vmem:[#allocation3 + $0x142] sm:$0xff] }
 0x25a   : > { %10624 = vmatprep.mubr.f32.mxu0 %v13372_v55  ;;  %10750 = vmatprep.subr.mxu0 %v8639_v48  ;;  %v8638_v55 = vld [vmem:[%s15300_s3 + $0x2e0] sm:$0xff] }
 0x25b   : > { %10751 = vmatpush3.msra.mxu0 %v8639_v48  ;;  %v8657_v48 = vld [vmem:[%s15300_s3 + $0x378] sm:$0xff] }
 0x25c   : > { %10539 = vmatmul.mubr.f32.vlgmr.msra.gmra.mxu1 %v5136_v14  ;;  %10752 = vmatprep.subr.mxu0 %v8638_v55  ;;  %v13857_v14 = vld [vmem:[#allocation3 + $0x152] sm:$0xff] }
 0x25d   : > { %10625 = vmatmul.mubr.f32.gmra.mxu0 %v13374_v50  ;;  %10541 = vmatprep.mubr.f32.mxu1 %v13665_v49  ;;  %v13681_v50 = vld [vmem:[#allocation3 + $0x22] sm:$0xff] }
 0x25e   : > { %10667 = vmatpush3.msra.mxu1 %v11089_v30  ;;  %10627 = vmatprep.mubr.f32.mxu0 %v13403_v39  ;;  %v8621_v39 = vld [vmem:[%s15300_s3 + $0x258] sm:$0xff]  ;;  %v8671_v30 = vld [vmem:[%s15300_s3 + $0x3e8] sm:$0xff] }
 0x25f   : > { %10668 = vmatprep.subr.mxu1 %v8624_v13  ;;  %10753 = vmatpush3.msra.mxu0 %v8638_v55  ;;  %v13873_v55 = vld [vmem:[#allocation3 + $0x16a] sm:$0xff] }
 0x260   : > { %10669 = vmatpush3.msra.mxu1 %v8624_v13  ;;  %10754 = vmatprep.subr.mxu0 %v8637_v1  ;;  %v13866_v13 = vld [vmem:[#allocation3 + $0x15a] sm:$0xff] }
 0x261   : > { %10542 = vmatmul.mubr.f32.gmra.mxu1 %v13681_v50  ;;  %10670 = vmatprep.subr.mxu1 %v8623_v34 }
 0x262   : > { %10544 = vmatprep.mubr.f32.mxu1 %v13687_v47  ;;  %10671 = vmatpush3.msra.mxu1 %v8623_v34  ;;  %v5875_v34 = vld [vmem:[#allocation3 + $0x19] sm:$0xff] }
 0x263   : > { %10628 = vmatmul.mubr.f32.gmra.mxu0 %v13405_v16  ;;  %10672 = vmatprep.subr.mxu1 %v8622_v26  ;;  %v8619_v16 = vld [vmem:[%s15300_s3 + $0x248] sm:$0xff] }
 0x264   : > { %10630 = vmatprep.mubr.f32.mxu0 %v13429_v33  ;;  %10673 = vmatpush3.msra.mxu1 %v8622_v26  ;;  %v13708_v33 = vld [vmem:[#allocation3 + $0x52] sm:$0xff]  ;;  %v5876_v26 = vld [vmem:[#allocation3 + $0x21] sm:$0xff] }
 0x265   : > { %10545 = vmatmul.mubr.f32.gmra.mxu1 %v13694_v62  ;;  %10674 = vmatprep.subr.mxu1 %v8621_v39 }
 0x266   : > { %10547 = vmatprep.mubr.f32.mxu1 %v13701_v58  ;;  %10675 = vmatpush3.msra.mxu1 %v8621_v39  ;;  %v13897_v39 = vld [vmem:[#allocation3 + $0x31] sm:$0xff] }
 0x267   : > { %10631 = vmatmul.mubr.f32.gmra.mxu0 %v13431_v60  ;;  %10676 = vmatprep.subr.mxu1 %v8620_v56  ;;  %v8617_v60 = vld [vmem:[%s15300_s3 + $0x238] sm:$0xff] }
 0x268   : > { %10633 = vmatprep.mubr.f32.mxu0 %v13464_v10  ;;  %10677 = vmatpush3.msra.mxu1 %v8620_v56  ;;  %v13722_v10 = vld [vmem:[#allocation3 + $0x6a] sm:$0xff]  ;;  %v13905_v56 = vld [vmem:[#allocation3 + $0x39] sm:$0xff] }
 0x269   : > { %10548 = vmatmul.mubr.f32.gmra.mxu1 %v13708_v33  ;;  %10678 = vmatprep.subr.mxu1 %v8619_v16 }
 0x26a   : > { %10550 = vmatprep.mubr.f32.mxu1 %v13715_v54  ;;  %10679 = vmatpush3.msra.mxu1 %v8619_v16  ;;  %v13912_v16 = vld [vmem:[#allocation3 + $0x49] sm:$0xff] }
 0x26b   : > { %10634 = vmatmul.mubr.f32.gmra.mxu0 %v13466_v57  ;;  %10680 = vmatprep.subr.mxu1 %v8618_v51  ;;  %v8615_v57 = vld [vmem:[%s15300_s3 + $0x228] sm:$0xff] }
 0x26c   : > { %10636 = vmatprep.mubr.f32.mxu0 %v13487_v63  ;;  %10681 = vmatpush3.msra.mxu1 %v8618_v51  ;;  %v13736_v63 = vld [vmem:[#allocation3 + $0x82] sm:$0xff]  ;;  %v13919_v51 = vld [vmem:[#allocation3 + $0x51] sm:$0xff] }
 0x26d   : > { %10551 = vmatmul.mubr.f32.gmra.mxu1 %v13722_v10  ;;  %10682 = vmatprep.subr.mxu1 %v8617_v60 }
 0x26e   : > { %10553 = vmatprep.mubr.f32.mxu1 %v13729_v32  ;;  %10683 = vmatpush3.msra.mxu1 %v8617_v60  ;;  %v13926_v60 = vld [vmem:[#allocation3 + $0x61] sm:$0xff] }
 0x26f   : > { %10637 = vmatmul.mubr.f32.gmra.mxu0 %v13489_v29  ;;  %10684 = vmatprep.subr.mxu1 %v8616_v43  ;;  %v8636_v29 = vld [vmem:[%s15300_s3 + $0x2d0] sm:$0xff] }
 0x270   : > { %10639 = vmatprep.mubr.f32.mxu0 %v13519_v28  ;;  %10685 = vmatpush3.msra.mxu1 %v8616_v43  ;;  %v13750_v28 = vld [vmem:[#allocation3 + $0x9a] sm:$0xff]  ;;  %v13933_v43 = vld [vmem:[#allocation3 + $0x69] sm:$0xff] }
 0x271   : > { %10554 = vmatmul.mubr.f32.gmra.mxu1 %v13736_v63  ;;  %10686 = vmatprep.subr.mxu1 %v8615_v57 }
 0x272   : > { %10556 = vmatprep.mubr.f32.mxu1 %v13743_v20  ;;  %10687 = vmatpush3.msra.mxu1 %v8615_v57  ;;  %v13940_v57 = vld [vmem:[#allocation3 + $0x79] sm:$0xff] }
 0x273   : > { %10640 = vmatmul.mubr.f32.gmra.mxu0 %v13521_v42  ;;  %v8635_v42 = vld [vmem:[%s15300_s3 + $0x2c8] sm:$0xff]  ;;  %10688 = vmatprep.subr.mxu1 %v8614_v24 }
 0x274   : > { %10642 = vmatprep.mubr.f32.mxu0 %v13542_v27  ;;  %10755 = vmatpush3.msra.mxu0 %v8637_v1  ;;  %v13764_v27 = vld [vmem:[#allocation3 + $0xb2] sm:$0xff]  ;;  %v13947_v1 = vld [vmem:[#allocation3 + $0x81] sm:$0xff] }
 0x275   : > { %10557 = vmatmul.mubr.f32.gmra.mxu1 %v13750_v28  ;;  %10756 = vmatprep.subr.mxu0 %v8636_v29 }
 0x276   : > { %10559 = vmatprep.mubr.f32.mxu1 %v13757_v15  ;;  %10757 = vmatpush3.msra.mxu0 %v8636_v29  ;;  %v13954_v29 = vld [vmem:[#allocation3 + $0x91] sm:$0xff] }
 0x277   : > { %10643 = vmatmul.mubr.f32.gmra.mxu0 %v13544_v25  ;;  %10758 = vmatprep.subr.mxu0 %v8635_v42  ;;  %v8634_v25 = vld [vmem:[%s15300_s3 + $0x2c0] sm:$0xff] }
 0x278   : > { %10645 = vmatprep.mubr.f32.mxu0 %v13565_v23  ;;  %10689 = vmatpush3.msra.mxu1 %v8614_v24  ;;  %v13778_v23 = vld [vmem:[#allocation3 + $0xca] sm:$0xff]  ;;  %v13961_v24 = vld [vmem:[#allocation3 + $0x99] sm:$0xff] }
 0x279   : > { %10560 = vmatmul.mubr.f32.gmra.mxu1 %v13764_v27  ;;  %10690 = vmatprep.subr.mxu1 %v8613_v37 }
 0x27a   : > { %10562 = vmatprep.mubr.f32.mxu1 %v13771_v61  ;;  %10759 = vmatpush3.msra.mxu0 %v8635_v42  ;;  %v13968_v42 = vld [vmem:[#allocation3 + $0xa9] sm:$0xff] }
 0x27b   : > { %10646 = vmatmul.mubr.f32.gmra.mxu0 %v13567_v36  ;;  %10760 = vmatprep.subr.mxu0 %v8634_v25  ;;  %v8632_v36 = vld [vmem:[%s15300_s3 + $0x2b0] sm:$0xff] }
 0x27c   : > { %10648 = vmatprep.mubr.f32.mxu0 %v13584_v8  ;;  %10761 = vmatpush3.msra.mxu0 %v8634_v25  ;;  %v13792_v8 = vld [vmem:[#allocation3 + $0xe2] sm:$0xff] }
 0x27d   : > { %10563 = vmatmul.mubr.f32.gmra.mxu1 %v13778_v23  ;;  %10762 = vmatprep.subr.mxu0 %v8633_v38  ;;  %v13983_v25 = vld [vmem:[#allocation3 + $0xc1] sm:$0xff] }
 0x27e   : > { %10565 = vmatprep.mubr.f32.mxu1 %v13785_v41  ;;  %10691 = vmatpush3.msra.mxu1 %v8613_v37  ;;  %v13976_v37 = vld [vmem:[#allocation3 + $0xb1] sm:$0xff] }
 0x27f   : > { %10649 = vmatmul.mubr.f32.gmra.mxu0 %v13587_v7  ;;  %v8631_v7 = vld [vmem:[%s15300_s3 + $0x2a8] sm:$0xff]  ;;  %10692 = vmatprep.subr.mxu1 %v8612_v31 }
 0x280   : > { %10651 = vmatprep.mubr.f32.mxu0 %v13604_v45  ;;  %10763 = vmatpush3.msra.mxu0 %v8633_v38  ;;  %v13806_v45 = vld [vmem:[#allocation3 + $0xfa] sm:$0xff]  ;;  %v13990_v38 = vld [vmem:[#allocation3 + $0xc9] sm:$0xff] }
 0x281   : > { %10566 = vmatmul.mubr.f32.gmra.mxu1 %v13792_v8  ;;  %10764 = vmatprep.subr.mxu0 %v8632_v36 }
 0x282   : > { %10568 = vmatprep.mubr.f32.mxu1 %v13799_v40  ;;  %10765 = vmatpush3.msra.mxu0 %v8632_v36  ;;  %v13997_v36 = vld [vmem:[#allocation3 + $0xd9] sm:$0xff] }
 0x283   : > { %10652 = vmatmul.mubr.f32.gmra.mxu0 %v13606_v17  ;;  %10766 = vmatprep.subr.mxu0 %v8631_v7  ;;  %v8630_v17 = vld [vmem:[%s15300_s3 + $0x2a0] sm:$0xff] }
 0x284   : > { %10654 = vmatprep.mubr.f32.mxu0 %v13617_v11  ;;  %10693 = vmatpush3.msra.mxu1 %v8612_v31  ;;  %v13820_v11 = vld [vmem:[#allocation3 + $0x112] sm:$0xff]  ;;  %v14004_v31 = vld [vmem:[#allocation3 + $0xe1] sm:$0xff] }
 0x285   : > { %10569 = vmatmul.mubr.f32.gmra.mxu1 %v13806_v45  ;;  %10694 = vmatprep.subr.mxu1 %v8611_v19 }
 0x286   : > { %10571 = vmatprep.mubr.f32.mxu1 %v13813_v12  ;;  %10767 = vmatpush3.msra.mxu0 %v8631_v7  ;;  %v14011_v7 = vld [vmem:[#allocation3 + $0xf1] sm:$0xff] }
 0x287   : > { %10655 = vmatmul.mubr.f32.gmra.mxu0 %v13619_v44  ;;  %10768 = vmatprep.subr.mxu0 %v8630_v17  ;;  %v8628_v44 = vld [vmem:[%s15300_s3 + $0x290] sm:$0xff] }
 0x288   : > { %10657 = vmatprep.mubr.f32.mxu0 %v13630_v18  ;;  %10769 = vmatpush3.msra.mxu0 %v8630_v17  ;;  %v13834_v18 = vld [vmem:[#allocation3 + $0x12a] sm:$0xff] }
 0x289   : > { %10572 = vmatmul.mubr.f32.gmra.mxu1 %v13820_v11  ;;  %10770 = vmatprep.subr.mxu0 %v8629_v35  ;;  %v14025_v17 = vld [vmem:[#allocation3 + $0x109] sm:$0xff] }
 0x28a   : > { %10574 = vmatprep.mubr.f32.mxu1 %v13827_v46  ;;  %10695 = vmatpush3.msra.mxu1 %v8611_v19  ;;  %v14018_v19 = vld [vmem:[#allocation3 + $0xf9] sm:$0xff] }
 0x28b   : > { %10658 = vmatmul.mubr.f32.gmra.mxu0 %v13632_v9  ;;  %v8627_v9 = vld [vmem:[%s15300_s3 + $0x288] sm:$0xff]  ;;  %10696 = vmatprep.subr.mxu1 %v8610_v2 }
 0x28c   : > { %10660 = vmatprep.mubr.f32.mxu0 %v13645_v22  ;;  %10771 = vmatpush3.msra.mxu0 %v8629_v35  ;;  %v13848_v22 = vld [vmem:[#allocation3 + $0x180] sm:$0xff]  ;;  %v14032_v35 = vld [vmem:[#allocation3 + $0x111] sm:$0xff] }
 0x28d   : > { %10575 = vmatmul.mubr.f32.gmra.mxu1 %v13834_v18  ;;  %10772 = vmatprep.subr.mxu0 %v8628_v44 }
 0x28e   : > { %10577 = vmatprep.mubr.f32.mxu1 %v13841_v5  ;;  %10773 = vmatpush3.msra.mxu0 %v8628_v44  ;;  %v14039_v44 = vld [vmem:[#allocation3 + $0x121] sm:$0xff] }
 0x28f   : > { %10661 = vmatmul.mubr.f32.gmra.mxu0 %v13647_v4  ;;  %10774 = vmatprep.subr.mxu0 %v8627_v9  ;;  %v13860_v4 = vld [vmem:[#allocation3 + $0x188] sm:$0xff] }
 0x290   : > { %10663 = vmatprep.mubr.f32.mxu0 %v13848_v22  ;;  %10697 = vmatpush3.msra.mxu1 %v8610_v2  ;;  %v14046_v2 = vld [vmem:[#allocation3 + $0x129] sm:$0xff] }
 0x291   : > { %10578 = vmatmul.mubr.f32.gmra.mxu1 %v13850_v0  ;;  %10826 = vmatprep.subr.mxu1 %v8657_v48 }
 0x292   : > { %10580 = vmatprep.mubr.f32.mxu1 %v13857_v14  ;;  %10775 = vmatpush3.msra.mxu0 %v8627_v9  ;;  %v14053_v9 = vld [vmem:[#allocation3 + $0x139] sm:$0xff] }
 0x293   : > { %10664 = vmatmul.mubr.f32.gmra.mxu0 %v13860_v4  ;;  %10776 = vmatprep.subr.mxu0 %v8626_v3 }
 0x294   : > { %10778 = vmatprep.mubr.f32.mxu0 %v13665_v49  ;;  %10777 = vmatpush3.msra.mxu0 %v8626_v3  ;;  %v13880_v49 = vld [vmem:[#allocation3 + $0x172] sm:$0xff] }
 0x295   : > { %10581 = vmatmul.mubr.f32.gmra.mxu1 %v13866_v13  ;;  %10906 = vmatprep.subr.mxu0 %v8673_v21  ;;  %v14067_v3 = vld [vmem:[#allocation3 + $0x151] sm:$0xff] }
 0x296   : > { %10583 = vmatprep.mubr.f32.mxu1 %v13873_v55 }
 0x297   : > { %10779 = vmatmul.mubr.f32.vlgmr.msra.gmra.mxu0 %v13681_v50  ;;  %v13890_v50 = vld [vmem:[%s15300_s3 + $0x3e0] sm:$0xff] }
 0x298   : > { %10781 = vmatprep.mubr.f32.mxu0 %v13687_v47  ;;  %10907 = vmatpush3.msra.mxu0 %v8673_v21  ;;  %v8656_v47 = vld [vmem:[%s15300_s3 + $0x370] sm:$0xff] }
 0x299   : > { %10584 = vmatmul.mubr.f32.gmra.mxu1 %v13880_v49  ;;  %10908 = vmatprep.subr.mxu0 %v8672_v6  ;;  %v14074_v21 = vld [vmem:[#allocation3 + $0x182] sm:$0xff] }
 0x29a   : > { %10698 = vmatprep.mubr.f32.mxu1 %v5875_v34  ;;  %10909 = vmatpush3.msra.mxu0 %v8672_v6  ;;  %v8689_v6 = vld [vmem:[%s15300_s3 + $0x478] sm:$0xff]  ;;  %v8658_v34 = vld [vmem:[%s15300_s3 + $0x380] sm:$0xff] }
 0x29b   : > { %10782 = vmatmul.mubr.f32.gmra.mxu0 %v13694_v62  ;;  %10910 = vmatprep.subr.mxu0 %v8671_v30  ;;  %v8655_v62 = vld [vmem:[%s15300_s3 + $0x368] sm:$0xff] }
 0x29c   : > { %10784 = vmatprep.mubr.f32.mxu0 %v13701_v58  ;;  %10911 = vmatpush3.msra.mxu0 %v8671_v30  ;;  %v8654_v58 = vld [vmem:[%s15300_s3 + $0x360] sm:$0xff] }
 0x29d   : > { %10699 = vmatmul.mubr.f32.vlgmr.msra.gmra.mxu1 %v5876_v26  ;;  %10912 = vmatprep.subr.mxu0 %v13890_v50  ;;  %v14083_v30 = vld [vmem:[#allocation3 + $0x169] sm:$0xff]  ;;  %v14096_v26 = vpop.f32.mrf.mxu0 }
 0x29e   : > { %10701 = vmatprep.mubr.f32.mxu1 %v13897_v39  ;;  %10827 = vmatpush3.msra.mxu1 %v8657_v48  ;;  %v14060_v48 = vld [vmem:[#allocation3 + $0x141] sm:$0xff] }
 0x29f   : > { %10828 = vmatprep.subr.mxu1 %v8656_v47  ;;  %10785 = vmatmul.mubr.f32.gmra.mxu0 %v13708_v33  ;;  %v8653_v33 = vld [vmem:[%s15300_s3 + $0x358] sm:$0xff] }
 0x2a0   : > { %10829 = vmatpush3.msra.mxu1 %v8656_v47  ;;  %10787 = vmatprep.mubr.f32.mxu0 %v13715_v54  ;;  %v8652_v54 = vld [vmem:[%s15300_s3 + $0x350] sm:$0xff]  ;;  %v14100_v47 = vld [vmem:[#allocation3 + $0x189] sm:$0xff] }
 0x2a1   : > { %10702 = vmatmul.mubr.f32.gmra.mxu1 %v13905_v56  ;;  %10830 = vmatprep.subr.mxu1 %v8655_v62 }
 0x2a2   : > { %10704 = vmatprep.mubr.f32.mxu1 %v13912_v16  ;;  %10831 = vmatpush3.msra.mxu1 %v8655_v62  ;;  %v6616_v62 = vld [vmem:[#allocation3 + $0x30] sm:$0xff] }
 0x2a3   : > { %10788 = vmatmul.mubr.f32.gmra.mxu0 %v13722_v10  ;;  %10832 = vmatprep.subr.mxu1 %v8654_v58  ;;  %v8651_v10 = vld [vmem:[%s15300_s3 + $0x348] sm:$0xff] }
 0x2a4   : > { %10790 = vmatprep.mubr.f32.mxu0 %v13729_v32  ;;  %10833 = vmatpush3.msra.mxu1 %v8654_v58  ;;  %v8650_v32 = vld [vmem:[%s15300_s3 + $0x340] sm:$0xff] }
 0x2a5   : > { %10705 = vmatmul.mubr.f32.gmra.mxu1 %v13919_v51  ;;  %10834 = vmatprep.subr.mxu1 %v8653_v33 }
 0x2a6   : > { %10707 = vmatprep.mubr.f32.mxu1 %v13926_v60  ;;  %10835 = vmatpush3.msra.mxu1 %v8653_v33  ;;  %v6617_v33 = vld [vmem:[#allocation3 + $0x38] sm:$0xff] }
 0x2a7   : > { %10791 = vmatmul.mubr.f32.gmra.mxu0 %v13736_v63  ;;  %10836 = vmatprep.subr.mxu1 %v8652_v54  ;;  %v8649_v63 = vld [vmem:[%s15300_s3 + $0x338] sm:$0xff] }
 0x2a8   : > { %10793 = vmatprep.mubr.f32.mxu0 %v13743_v20  ;;  %10837 = vmatpush3.msra.mxu1 %v8652_v54  ;;  %v8648_v20 = vld [vmem:[%s15300_s3 + $0x330] sm:$0xff] }
 0x2a9   : > { %10708 = vmatmul.mubr.f32.gmra.mxu1 %v13933_v43  ;;  %10838 = vmatprep.subr.mxu1 %v8651_v10 }
 0x2aa   : > { %10710 = vmatprep.mubr.f32.mxu1 %v13940_v57  ;;  %10839 = vmatpush3.msra.mxu1 %v8651_v10  ;;  %v14112_v10 = vpop.f32.mrf.mxu1 }
 0x2ab   : > { %10794 = vmatmul.mubr.f32.gmra.mxu0 %v13750_v28  ;;  %10840 = vmatprep.subr.mxu1 %v8650_v32  ;;  %v8647_v28 = vld [vmem:[%s15300_s3 + $0x328] sm:$0xff] }
 0x2ac   : > { %10796 = vmatprep.mubr.f32.mxu0 %v13757_v15  ;;  %10841 = vmatpush3.msra.mxu1 %v8650_v32  ;;  %v8669_v15 = vld [vmem:[%s15300_s3 + $0x3d8] sm:$0xff]  ;;  %v6619_v32 = vld [vmem:[#allocation3 + $0x50] sm:$0xff] }
 0x2ad   : > { %10711 = vmatmul.mubr.f32.gmra.mxu1 %v13947_v1  ;;  %10842 = vmatprep.subr.mxu1 %v8649_v63 }
 0x2ae   : > { %10713 = vmatprep.mubr.f32.mxu1 %v13954_v29  ;;  %10843 = vmatpush3.msra.mxu1 %v8649_v63 }
 0x2af   : > { %10797 = vmatmul.mubr.f32.gmra.mxu0 %v13764_v27  ;;  %10844 = vmatprep.subr.mxu1 %v8648_v20  ;;  %v8668_v27 = vld [vmem:[%s15300_s3 + $0x3d0] sm:$0xff] }
 0x2b0   : > { %10799 = vmatprep.mubr.f32.mxu0 %v13771_v61  ;;  %10845 = vmatpush3.msra.mxu1 %v8648_v20  ;;  %v8646_v61 = vld [vmem:[%s15300_s3 + $0x320] sm:$0xff]  ;;  %v6620_v20 = vld [vmem:[#allocation3 + $0x60] sm:$0xff] }
 0x2b1   : > { %10714 = vmatmul.mubr.f32.gmra.mxu1 %v13961_v24  ;;  %10913 = vmatpush3.msra.mxu0 %v13890_v50  ;;  %v14092_v50 = vld [vmem:[#allocation3 + $0x171] sm:$0xff] }
 0x2b2   : > { %10716 = vmatprep.mubr.f32.mxu1 %v13968_v42  ;;  %10846 = vmatprep.subr.mxu1 %v8647_v28 }
 0x2b3   : > { %10800 = vmatmul.mubr.f32.gmra.mxu0 %v13778_v23  ;;  %10914 = vmatprep.subr.mxu0 %v8669_v15  ;;  %v8667_v23 = vld [vmem:[%s15300_s3 + $0x3c8] sm:$0xff] }
 0x2b4   : > { %10802 = vmatprep.mubr.f32.mxu0 %v13785_v41  ;;  %10847 = vmatpush3.msra.mxu1 %v8647_v28  ;;  %v8645_v41 = vld [vmem:[%s15300_s3 + $0x318] sm:$0xff] }
 0x2b5   : > { %10717 = vmatmul.mubr.f32.gmra.mxu1 %v13976_v37  ;;  %10915 = vmatpush3.msra.mxu0 %v8669_v15 }
 0x2b6   : > { %10719 = vmatprep.mubr.f32.mxu1 %v13983_v25  ;;  %10916 = vmatprep.subr.mxu0 %v8668_v27 }
 0x2b7   : > { %10803 = vmatmul.mubr.f32.gmra.mxu0 %v13792_v8  ;;  %10848 = vmatprep.subr.mxu1 %v8646_v61  ;;  %v8666_v8 = vld [vmem:[%s15300_s3 + $0x3c0] sm:$0xff] }
 0x2b8   : > { %10805 = vmatprep.mubr.f32.mxu0 %v13799_v40  ;;  %10917 = vmatpush3.msra.mxu0 %v8668_v27  ;;  %v8665_v40 = vld [vmem:[%s15300_s3 + $0x3b8] sm:$0xff] }
 0x2b9   : > { %10720 = vmatmul.mubr.f32.gmra.mxu1 %v13990_v38  ;;  %10918 = vmatprep.subr.mxu0 %v8667_v23 }
 0x2ba   : > { %10722 = vmatprep.mubr.f32.mxu1 %v13997_v36  ;;  %10849 = vmatpush3.msra.mxu1 %v8646_v61 }
 0x2bb   : > { %10806 = vmatmul.mubr.f32.gmra.mxu0 %v13806_v45  ;;  %10850 = vmatprep.subr.mxu1 %v8645_v41  ;;  %v8664_v45 = vld [vmem:[%s15300_s3 + $0x3b0] sm:$0xff] }
 0x2bc   : > { %10808 = vmatprep.mubr.f32.mxu0 %v13813_v12  ;;  %10919 = vmatpush3.msra.mxu0 %v8667_v23  ;;  %v8644_v12 = vld [vmem:[%s15300_s3 + $0x310] sm:$0xff] }
 0x2bd   : > { %10723 = vmatmul.mubr.f32.gmra.mxu1 %v14004_v31  ;;  %10920 = vmatprep.subr.mxu0 %v8666_v8 }
 0x2be   : > { %10725 = vmatprep.mubr.f32.mxu1 %v14011_v7  ;;  %10921 = vmatpush3.msra.mxu0 %v8666_v8  ;;  %v8684_v8 = vld [vmem:[%s15300_s3 + $0x450] sm:$0xff] }
 0x2bf   : > { %10809 = vmatmul.mubr.f32.gmra.mxu0 %v13820_v11  ;;  %10922 = vmatprep.subr.mxu0 %v8665_v40  ;;  %v8663_v11 = vld [vmem:[%s15300_s3 + $0x3a8] sm:$0xff] }
 0x2c0   : > { %10811 = vmatprep.mubr.f32.mxu0 %v13827_v46  ;;  %10851 = vmatpush3.msra.mxu1 %v8645_v41  ;;  %v8643_v46 = vld [vmem:[%s15300_s3 + $0x308] sm:$0xff]  ;;  %v6621_v41 = vld [vmem:[#allocation3 + $0x68] sm:$0xff] }
 0x2c1   : > { %10726 = vmatmul.mubr.f32.gmra.mxu1 %v14018_v19  ;;  %10923 = vmatpush3.msra.mxu0 %v8665_v40 }
 0x2c2   : > { %10728 = vmatprep.mubr.f32.mxu1 %v14025_v17  ;;  %10924 = vmatprep.subr.mxu0 %v8664_v45 }
 0x2c3   : > { %10812 = vmatmul.mubr.f32.gmra.mxu0 %v13834_v18  ;;  %10852 = vmatprep.subr.mxu1 %v8644_v12  ;;  %v8662_v18 = vld [vmem:[%s15300_s3 + $0x3a0] sm:$0xff] }
 0x2c4   : > { %10814 = vmatprep.mubr.f32.mxu0 %v13841_v5  ;;  %10925 = vmatpush3.msra.mxu0 %v8664_v45  ;;  %v8661_v5 = vld [vmem:[%s15300_s3 + $0x398] sm:$0xff]  ;;  %v6622_v45 = vld [vmem:[#allocation3 + $0x78] sm:$0xff] }
 0x2c5   : > { %10729 = vmatmul.mubr.f32.gmra.mxu1 %v14032_v35  ;;  %10926 = vmatprep.subr.mxu0 %v8663_v11 }
 0x2c6   : > { %10731 = vmatprep.mubr.f32.mxu1 %v14039_v44  ;;  %10853 = vmatpush3.msra.mxu1 %v8644_v12 }
 0x2c7   : > { %10815 = vmatmul.mubr.f32.gmra.mxu0 %v13850_v0  ;;  %10854 = vmatprep.subr.mxu1 %v8643_v46  ;;  %v8660_v0 = vld [vmem:[%s15300_s3 + $0x390] sm:$0xff] }
 0x2c8   : > { %10817 = vmatprep.mubr.f32.mxu0 %v13857_v14  ;;  %10927 = vmatpush3.msra.mxu0 %v8663_v11  ;;  %v8642_v14 = vld [vmem:[%s15300_s3 + $0x300] sm:$0xff] }
 0x2c9   : > { %10732 = vmatmul.mubr.f32.gmra.mxu1 %v14046_v2  ;;  %10928 = vmatprep.subr.mxu0 %v8662_v18 }
 0x2ca   : > { %10734 = vmatprep.mubr.f32.mxu1 %v14053_v9  ;;  %10929 = vmatpush3.msra.mxu0 %v8662_v18 }
 0x2cb   : > { %10818 = vmatmul.mubr.f32.gmra.mxu0 %v13866_v13  ;;  %10930 = vmatprep.subr.mxu0 %v8661_v5  ;;  %v8659_v13 = vld [vmem:[%s15300_s3 + $0x388] sm:$0xff] }
 0x2cc   : > { %10820 = vmatprep.mubr.f32.mxu0 %v13873_v55  ;;  %10855 = vmatpush3.msra.mxu1 %v8643_v46  ;;  %v14076_v55 = vld [vmem:[#allocation3 + $0x159] sm:$0xff] }
 0x2cd   : > { %10735 = vmatmul.mubr.f32.gmra.mxu1 %v14060_v48  ;;  %10931 = vmatpush3.msra.mxu0 %v8661_v5 }
 0x2ce   : > { %10737 = vmatprep.mubr.f32.mxu1 %v14067_v3  ;;  %10932 = vmatprep.subr.mxu0 %v8660_v0 }
 0x2cf   : > { %10821 = vmatmul.mubr.f32.gmra.mxu0 %v13880_v49  ;;  %10856 = vmatprep.subr.mxu1 %v8642_v14  ;;  %v14086_v49 = vld [vmem:[#allocation3 + $0x18a] sm:$0xff] }
 0x2d0   : > { %10823 = vmatprep.mubr.f32.mxu0 %v14074_v21  ;;  %10933 = vmatpush3.msra.mxu0 %v8660_v0 }
 0x2d1   : > { %10738 = vmatmul.mubr.f32.gmra.mxu1 %v14076_v55  ;;  %10934 = vmatprep.subr.mxu0 %v8659_v13 }
 0x2d2   : > { %10740 = vmatprep.mubr.f32.mxu1 %v14083_v30  ;;  %10857 = vmatpush3.msra.mxu1 %v8642_v14  ;;  %v6623_v14 = vld [vmem:[#allocation3 + $0x80] sm:$0xff] }
 0x2d3   : > { %10824 = vmatmul.mubr.f32.gmra.mxu0 %v14086_v49  ;;  %10986 = vmatprep.subr.mxu1 %v8689_v6 }
 0x2d4   : > { %10935 = vmatpush3.msra.mxu0 %v8659_v13  ;;  %10938 = vmatprep.mubr.f32.mxu0 %v13897_v39  ;;  %v8682_v13 = vld [vmem:[%s15300_s3 + $0x440] sm:$0xff] }
 0x2d5   : > { %10741 = vmatmul.mubr.f32.gmra.mxu1 %v14092_v50  ;;  %10936 = vmatprep.subr.mxu0 %v8658_v34 }
 0x2d6   : > { %10743 = vmatprep.mubr.f32.mxu1 %v13628_v59  ;;  %10937 = vmatpush3.msra.mxu0 %v8658_v34  ;;  %v8688_v59 = vld [vmem:[%s15300_s3 + $0x470] sm:$0xff]  ;;  %v6624_v34 = vld [vmem:[#allocation3 + $0x90] sm:$0xff] }
 0x2d7   : > { %10939 = vmatmul.mubr.f32.vlgmr.msra.gmra.mxu0 %v13905_v56  ;;  %v10463_v58 = vpop.f32.mrf.mxu0  ;;  %v6618_v56 = vld [vmem:[#allocation3 + $0x48] sm:$0xff] }
 0x2d8   : > { %10941 = vmatprep.mubr.f32.mxu0 %v13912_v16  ;;  %v8687_v16 = vld [vmem:[%s15300_s3 + $0x468] sm:$0xff] }
 0x2d9   : > { %10744 = vmatmul.mubr.f32.gmra.mxu1 %v14100_v47  ;;  %v4922_v39 = vpop.f32.mrf.mxu0 }
 0x2da   : > { %10858 = vmatprep.mubr.f32.mxu1 %v6616_v62 }
 0x2db   : > { %10942 = vmatmul.mubr.f32.gmra.mxu0 %v13919_v51 }
 0x2dc   : > { %10944 = vmatprep.mubr.f32.mxu0 %v13926_v60  ;;  %v10466_v54 = vpop.f32.mrf.mxu0  ;;  %v8686_v60 = vld [vmem:[%s15300_s3 + $0x460] sm:$0xff] }
 0x2dd   : > { %10859 = vmatmul.mubr.f32.vlgmr.msra.gmra.mxu1 %v6617_v33 }
 0x2de   : > { %10861 = vmatprep.mubr.f32.mxu1 %v6618_v56  ;;  %10987 = vmatpush3.msra.mxu1 %v8689_v6  ;;  %v4932_v51 = vpop.f32.mrf.mxu0 }
 0x2df   : > { %10988 = vmatprep.subr.mxu1 %v8688_v59  ;;  %10945 = vmatmul.mubr.f32.gmra.mxu0 %v13933_v43  ;;  %v10383_v63 = vpop.f32.mrf.mxu1  ;;  %v8685_v43 = vld [vmem:[%s15300_s3 + $0x458] sm:$0xff] }
 0x2e0   : > { %10989 = vmatpush3.msra.mxu1 %v8688_v59  ;;  %10947 = vmatprep.mubr.f32.mxu0 %v13940_v57  ;;  %v10469_v28 = vpop.f32.mrf.mxu0  ;;  %v4704_v15 = vadd.f32 %v10383_v63, %v13659_v53 }
 0x2e1   : > { %10862 = vmatmul.mubr.f32.gmra.mxu1 %v6619_v32  ;;  %10990 = vmatprep.subr.mxu1 %v8687_v16  ;;  %v4552_v27 = vpop.f32.mrf.mxu1  ;;  %v6626_v32 = vld [vmem:[#allocation3 + $0xa8] sm:$0xff] }
 0x2e2   : > { %10864 = vmatprep.mubr.f32.mxu1 %v6620_v20  ;;  %10991 = vmatpush3.msra.mxu1 %v8687_v16  ;;  %v4942_v57 = vpop.f32.mrf.mxu0  ;;  %v14124_v61 = vadd.f32 %v10463_v58, %v4704_v15  ;;  %v4703_v23 = vadd.f32 %v13659_v53, %v4552_v27  ;;  %v8680_v16 = vld [vmem:[%s15300_s3 + $0x430] sm:$0xff]  ;;  %v6627_v27 = vld [vmem:[#allocation3 + $0xb0] sm:$0xff] }
 0x2e3   : > { %10948 = vmatmul.mubr.f32.gmra.mxu0 %v13947_v1  ;;  %10992 = vmatprep.subr.mxu1 %v8686_v60 }
 0x2e4   : > { %10950 = vmatprep.mubr.f32.mxu0 %v13954_v29  ;;  %10993 = vmatpush3.msra.mxu1 %v8686_v60  ;;  %v10386_v40 = vpop.f32.mrf.mxu1  ;;  %v10472_v12 = vpop.f32.mrf.mxu0  ;;  %v14131_v1 = vadd.f32 %v4922_v39, %v4703_v23  ;;  %v8683_v29 = vld [vmem:[%s15300_s3 + $0x448] sm:$0xff] }
 0x2e5   : > { %10865 = vmatmul.mubr.f32.gmra.mxu1 %v6621_v41  ;;  %10994 = vmatprep.subr.mxu1 %v8685_v43  ;;  %v4706_v11 = vadd.f32 %v10386_v40, %v13659_v53  ;;  %v6628_v41 = vld [vmem:[#allocation3 + $0xc0] sm:$0xff] }
 0x2e6   : > { %10867 = vmatprep.mubr.f32.mxu1 %v6622_v45  ;;  %10995 = vmatpush3.msra.mxu1 %v8685_v43  ;;  %v4562_v46 = vpop.f32.mrf.mxu1  ;;  %v4952_v18 = vpop.f32.mrf.mxu0 }
 0x2e7   : > { %10951 = vmatmul.mubr.f32.gmra.mxu0 %v13961_v24  ;;  %10996 = vmatprep.subr.mxu1 %v8684_v8  ;;  %v14138_v5 = vadd.f32 %v10466_v54, %v4706_v11  ;;  %v4705_v0 = vadd.f32 %v13659_v53, %v4562_v46  ;;  %v6625_v54 = vld [vmem:[#allocation3 + $0x98] sm:$0xff]  ;;  %v6629_v46 = vld [vmem:[#allocation3 + $0xc8] sm:$0xff] }
 0x2e8   : > { %10953 = vmatprep.mubr.f32.mxu0 %v13968_v42  ;;  %10997 = vmatpush3.msra.mxu1 %v8684_v8  ;;  %v10389_v6 = vpop.f32.mrf.mxu1  ;;  %v10475_v62 = vpop.f32.mrf.mxu0  ;;  %v8681_v42 = vld [vmem:[%s15300_s3 + $0x438] sm:$0xff] }
 0x2e9   : > { %10868 = vmatmul.mubr.f32.gmra.mxu1 %v6623_v14  ;;  %10998 = vmatprep.subr.mxu1 %v8683_v29  ;;  %v14145_v24 = vadd.f32 %v4932_v51, %v4705_v0  ;;  %v4708_v58 = vadd.f32 %v10389_v6, %v13659_v53  ;;  %v6630_v14 = vld [vmem:[#allocation3 + $0xd8] sm:$0xff] }
 0x2ea   : > { %10870 = vmatprep.mubr.f32.mxu1 %v6624_v34  ;;  %10999 = vmatpush3.msra.mxu1 %v8683_v29  ;;  %v4572_v39 = vpop.f32.mrf.mxu1  ;;  %v4962_v33 = vpop.f32.mrf.mxu0 }
 0x2eb   : > { %10954 = vmatmul.mubr.f32.gmra.mxu0 %v13976_v37  ;;  %11000 = vmatprep.subr.mxu1 %v8682_v13  ;;  %v14152_v59 = vadd.f32 %v10469_v28, %v4708_v58  ;;  %v4707_v56 = vadd.f32 %v13659_v53, %v4572_v39  ;;  %v6631_v39 = vld [vmem:[#allocation3 + $0xe0] sm:$0xff] }
 0x2ec   : > { %10956 = vmatprep.mubr.f32.mxu0 %v13983_v25  ;;  %11001 = vmatpush3.msra.mxu1 %v8682_v13  ;;  %v10392_v51 = vpop.f32.mrf.mxu1  ;;  %v10478_v60 = vpop.f32.mrf.mxu0  ;;  %v8679_v25 = vld [vmem:[%s15300_s3 + $0x428] sm:$0xff] }
 0x2ed   : > { %10871 = vmatmul.mubr.f32.gmra.mxu1 %v6625_v54  ;;  %11002 = vmatprep.subr.mxu1 %v8681_v42  ;;  %v14159_v37 = vadd.f32 %v4942_v57, %v4707_v56  ;;  %v4710_v63 = vadd.f32 %v10392_v51, %v13659_v53  ;;  %v8678_v57 = vld [vmem:[%s15300_s3 + $0x420] sm:$0xff] }
 0x2ee   : > { %10873 = vmatprep.mubr.f32.mxu1 %v6626_v32  ;;  %11003 = vmatpush3.msra.mxu1 %v8681_v42  ;;  %v4582_v20 = vpop.f32.mrf.mxu1  ;;  %v4972_v28 = vpop.f32.mrf.mxu0  ;;  %v14199_v42 = vld [vmem:[%s15301_s4] ss:$0 sm:$0xff] }
 0x2ef   : > { %10957 = vmatmul.mubr.f32.gmra.mxu0 %v13990_v38  ;;  %11004 = vmatprep.subr.mxu1 %v8680_v16  ;;  %v14166_v15 = vadd.f32 %v10472_v12, %v4710_v63  ;;  %v4709_v43 = vadd.f32 %v13659_v53, %v4582_v20  ;;  %v6632_v56 = vld [vmem:[#allocation3 + $0xf0] sm:$0xff] }
 0x2f0   : > { %10959 = vmatprep.mubr.f32.mxu0 %v13997_v36  ;;  %11005 = vmatpush3.msra.mxu1 %v8680_v16  ;;  %v10395_v23 = vpop.f32.mrf.mxu1  ;;  %v10481_v8 = vpop.f32.mrf.mxu0  ;;  %v8677_v36 = vld [vmem:[%s15300_s3 + $0x418] sm:$0xff] }
 0x2f1   : > { %10874 = vmatmul.mubr.f32.gmra.mxu1 %v6627_v27  ;;  %11006 = vmatprep.subr.mxu1 %v8679_v25  ;;  %v14173_v38 = vadd.f32 %v4952_v18, %v4709_v43  ;;  %v4712_v40 = vadd.f32 %v10395_v23, %v13659_v53  ;;  %v8676_v18 = vld [vmem:[%s15300_s3 + $0x410] sm:$0xff] }
 0x2f2   : > { %10876 = vmatprep.mubr.f32.mxu1 %v6628_v41  ;;  %11007 = vmatpush3.msra.mxu1 %v8679_v25  ;;  %v4592_v45 = vpop.f32.mrf.mxu1  ;;  %v4982_v12 = vpop.f32.mrf.mxu0  ;;  %v6633_v25 = vld [vmem:[#allocation3 + $0xf8] sm:$0xff] }
 0x2f3   : > { %10960 = vmatmul.mubr.f32.gmra.mxu0 %v14004_v31  ;;  %11008 = vmatprep.subr.mxu1 %v8678_v57  ;;  %v14180_v11 = vadd.f32 %v10475_v62, %v4712_v40  ;;  %v4711_v29 = vadd.f32 %v13659_v53, %v4592_v45  ;;  %v6635_v40 = vld [vmem:[#allocation3 + $0x110] sm:$0xff] }
 0x2f4   : > { %10962 = vmatprep.mubr.f32.mxu0 %v14011_v7  ;;  %11009 = vmatpush3.msra.mxu1 %v8678_v57  ;;  %v10398_v0 = vpop.f32.mrf.mxu1  ;;  %v10484_v13 = vpop.f32.mrf.mxu0  ;;  %v8675_v7 = vld [vmem:[%s15300_s3 + $0x408] sm:$0xff] }
 0x2f5   : > { %10877 = vmatmul.mubr.f32.gmra.mxu1 %v6629_v46  ;;  %11010 = vmatprep.subr.mxu1 %v8677_v36  ;;  %v14187_v31 = vadd.f32 %v4962_v33, %v4711_v29  ;;  %v4714_v6 = vadd.f32 %v10398_v0, %v13659_v53  ;;  %v8674_v33 = vld [vmem:[%s15300_s3 + $0x400] sm:$0xff] }
 0x2f6   : > { %10879 = vmatprep.mubr.f32.mxu1 %v6630_v14  ;;  %11011 = vmatpush3.msra.mxu1 %v8677_v36  ;;  %v4602_v34 = vpop.f32.mrf.mxu1  ;;  %v4992_v62 = vpop.f32.mrf.mxu0  ;;  %v6636_v36 = vld [vmem:[#allocation3 + $0x120] sm:$0xff]  ;;  %v6637_v14 = vld [vmem:[#allocation3 + $0x128] sm:$0xff] }
 0x2f7   : > { %10963 = vmatmul.mubr.f32.gmra.mxu0 %v14018_v19  ;;  %11012 = vmatprep.subr.mxu1 %v8676_v18  ;;  %v14194_v58 = vadd.f32 %v10478_v60, %v4714_v6  ;;  %v4713_v53 = vadd.f32 %v14199_v42, %v4602_v34 }
 0x2f8   : > { %10965 = vmatprep.mubr.f32.mxu0 %v14025_v17  ;;  %11013 = vmatpush3.msra.mxu1 %v8676_v18  ;;  %v10401_v19 = vpop.f32.mrf.mxu1  ;;  %v10487_v54 = vpop.f32.mrf.mxu0 }
 0x2f9   : > { %10880 = vmatmul.mubr.f32.gmra.mxu1 %v6631_v39  ;;  %11014 = vmatprep.subr.mxu1 %v8675_v7  ;;  %v14206_v16 = vadd.f32 %v4972_v28, %v4713_v53  ;;  %v4716_v51 = vadd.f32 %v14199_v42, %v10401_v19  ;;  %v6634_v28 = vld [vmem:[#allocation3 + $0x108] sm:$0xff]  ;;  %v6640_v19 = vld [vmem:[#allocation3 + $0x150] sm:$0xff] }
 0x2fa   : > { %10882 = vmatprep.mubr.f32.mxu1 %v6632_v56  ;;  %11015 = vmatpush3.msra.mxu1 %v8675_v7  ;;  %v4612_v32 = vpop.f32.mrf.mxu1  ;;  %v5002_v17 = vpop.f32.mrf.mxu0 }
 0x2fb   : > { %10966 = vmatmul.mubr.f32.gmra.mxu0 %v14032_v35  ;;  %11016 = vmatprep.subr.mxu1 %v8674_v33  ;;  %v14210_v60 = vadd.f32 %v10481_v8, %v4716_v51  ;;  %v4715_v63 = vadd.f32 %v14199_v42, %v4612_v32 }
 0x2fc   : > { %10968 = vmatprep.mubr.f32.mxu0 %v14039_v44  ;;  %11017 = vmatpush3.msra.mxu1 %v8674_v33  ;;  %v10404_v20 = vpop.f32.mrf.mxu1  ;;  %v10490_v43 = vpop.f32.mrf.mxu0  ;;  %v6639_v33 = vld [vmem:[#allocation3 + $0x140] sm:$0xff] }
 0x2fd   : > { %10883 = vmatmul.mubr.f32.gmra.mxu1 %v6633_v25  ;;  %v14214_v27 = vadd.f32 %v4982_v12, %v4715_v63  ;;  %v4718_v57 = vadd.f32 %v14199_v42, %v10404_v20  ;;  %v6641_v20 = vld [vmem:[#allocation3 + $0x158] sm:$0xff] }
 0x2fe   : > { %10885 = vmatprep.mubr.f32.mxu1 %v6634_v28  ;;  %v4622_v35 = vpop.f32.mrf.mxu1  ;;  %v5012_v23 = vpop.f32.mrf.mxu0  ;;  %v6642_v28 = vld [vmem:[#allocation3 + $0x168] sm:$0xff] }
 0x2ff   : > { %10969 = vmatmul.mubr.f32.gmra.mxu0 %v14046_v2  ;;  %v14218_v41 = vadd.f32 %v10484_v13, %v4718_v57  ;;  %v4717_v8 = vadd.f32 %v14199_v42, %v4622_v35  ;;  %v6638_v13 = vld [vmem:[#allocation3 + $0x138] sm:$0xff] }
 0x300   : > { %10971 = vmatprep.mubr.f32.mxu0 %v14053_v9  ;;  %v10407_v44 = vpop.f32.mrf.mxu1  ;;  %v10493_v45 = vpop.f32.mrf.mxu0  ;;  %v7016_v57 = vld [vmem:[#allocation3 + $0x199] sm:$0xff] }
 0x301   : > { %10886 = vmatmul.mubr.f32.gmra.mxu1 %v6635_v40  ;;  %v14222_v12 = vadd.f32 %v4992_v62, %v4717_v8  ;;  %v4720_v29 = vadd.f32 %v14199_v42, %v10407_v44 }
 0x302   : > { %10888 = vmatprep.mubr.f32.mxu1 %v6636_v36  ;;  %v4632_v46 = vpop.f32.mrf.mxu1  ;;  %v5022_v2 = vpop.f32.mrf.mxu0  ;;  %v6643_v36 = vld [vmem:[#allocation3 + $0x170] sm:$0xff] }
 0x303   : > { %10972 = vmatmul.mubr.f32.gmra.mxu0 %v14060_v48  ;;  %v14226_v18 = vadd.f32 %v10487_v54, %v4720_v29  ;;  %v4719_v0 = vadd.f32 %v14199_v42, %v4632_v46 }
 0x304   : > { %10974 = vmatprep.mubr.f32.mxu0 %v14067_v3  ;;  %v10410_v9 = vpop.f32.mrf.mxu1 }
 0x305   : > { %10889 = vmatmul.mubr.f32.gmra.mxu1 %v6637_v14  ;;  %v10496_v6 = vpop.f32.mrf.mxu0  ;;  %v14230_v7 = vadd.f32 %v5002_v17, %v4719_v0  ;;  %v4722_v34 = vadd.f32 %v14199_v42, %v10410_v9 }
 0x306   : > { %10891 = vmatprep.mubr.f32.mxu1 %v6638_v13  ;;  %v4642_v62 = vpop.f32.mrf.mxu1 }
 0x307   : > { %10975 = vmatmul.mubr.f32.gmra.mxu0 %v14076_v55  ;;  %v5032_v48 = vpop.f32.mrf.mxu0  ;;  %v14234_v53 = vadd.f32 %v10490_v43, %v4722_v34  ;;  %v4721_v39 = vadd.f32 %v14199_v42, %v4642_v62  ;;  %v7014_v55 = vld [vmem:[#allocation3 + $0x181] sm:$0xff] }
 0x308   : > { %10977 = vmatprep.mubr.f32.mxu0 %v14083_v30  ;;  %v10413_v3 = vpop.f32.mrf.mxu1 }
 0x309   : > { %10892 = vmatmul.mubr.f32.gmra.mxu1 %v6639_v33  ;;  %v10499_v56 = vpop.f32.mrf.mxu0  ;;  %v14238_v54 = vadd.f32 %v5012_v23, %v4721_v39  ;;  %v4724_v51 = vadd.f32 %v14199_v42, %v10413_v3  ;;  %v14263_v39 = vld [vmem:[#allocation2] sm:$0xff] }
 0x30a   : > { %10894 = vmatprep.mubr.f32.mxu1 %v6640_v19  ;;  %v4652_v32 = vpop.f32.mrf.mxu1 }
 0x30b   : > { %10978 = vmatmul.mubr.f32.gmra.mxu0 %v14092_v50  ;;  %v5042_v17 = vpop.f32.mrf.mxu0  ;;  %v14242_v63 = vadd.f32 %v10493_v45, %v4724_v51  ;;  %v4723_v25 = vadd.f32 %v14199_v42, %v4652_v32  ;;  %v7017_v45 = vld [vmem:[#allocation3 + $0x1a1] sm:$0xff]  ;;  %v7356_v51 = vld [vmem:[#allocation3 + $0x32] sm:$0xff]  ;;  %v4701_v32 = vadd.f32 %v14199_v42, %v14112_v10 }
 0x30c   : > { %10980 = vmatprep.mubr.f32.mxu0 %v7014_v55  ;;  %v10416_v30 = vpop.f32.mrf.mxu1 }
 0x30d   : > { %10895 = vmatmul.mubr.f32.gmra.mxu1 %v6641_v20  ;;  %v10502_v43 = vpop.f32.mrf.mxu0  ;;  %v14245_v35 = vadd.f32 %v5022_v2, %v4723_v25  ;;  %v4726_v23 = vadd.f32 %v14199_v42, %v10416_v30 }
 0x30e   : > { %10897 = vmatprep.mubr.f32.mxu1 %v6642_v28  ;;  %v4662_v8 = vpop.f32.mrf.mxu1 }
 0x30f   : > { %10981 = vmatmul.mubr.f32.gmra.mxu0 %v14100_v47  ;;  %v5052_v50 = vpop.f32.mrf.mxu0  ;;  %v14249_v40 = vadd.f32 %v10496_v6, %v4726_v23  ;;  %v4725_v44 = vadd.f32 %v14199_v42, %v4662_v8  ;;  %v7358_v23 = vld [vmem:[#allocation3 + $0x4a] sm:$0xff] }
 0x310   : > { %10983 = vmatprep.mubr.f32.mxu0 %v7016_v57  ;;  %v10419_v29 = vpop.f32.mrf.mxu1 }
 0x311   : > { %10898 = vmatmul.mubr.f32.gmra.mxu1 %v6643_v36  ;;  %v10505_v46 = vpop.f32.mrf.mxu0  ;;  %v14252_v0 = vadd.f32 %v5032_v48, %v4725_v44  ;;  %v4728_v2 = vadd.f32 %v14199_v42, %v10419_v29  ;;  %v5071_v44 = vadd.f32 %v14096_v26, %v4701_v32 }
 0x312   : > { %10900 = vmatprep.mubr.f32.mxu1 %v13848_v22  ;;  %v4672_v14 = vpop.f32.mrf.mxu1 }
 0x313   : > { %v5062_v9 = vpop.f32.mrf.mxu0  ;;  %10984 = vmatmul.mubr.f32.gmra.mxu0 %v7017_v45  ;;  %v14256_v47 = vadd.f32 %v10499_v56, %v4728_v2  ;;  %v4727_v13 = vadd.f32 %v14199_v42, %v4672_v14  ;;  %v7359_v2 = vld [vmem:[#allocation3 + $0x52] sm:$0xff] }
 0x314   : > { %v10422_v6 = vpop.f32.mrf.mxu1 }
 0x315   : > { %10901 = vmatmul.mubr.f32.gmra.mxu1 %v13860_v4  ;;  %v10620_v34 = vpop.f32.mrf.mxu0  ;;  %v14260_v62 = vadd.f32 %v5042_v17, %v4727_v13  ;;  %v4730_v48 = vadd.f32 %v14199_v42, %v10422_v6 }
 0x316   : > { %10903 = vmatprep.mubr.f32.mxu1 %v14263_v39  ;;  %v4682_v22 = vpop.f32.mrf.mxu1 }
 0x317   : > { %v5652_v33 = vpop.f32.mrf.mxu0  ;;  %v14266_v3 = vadd.f32 %v10502_v43, %v4730_v48  ;;  %v4729_v19 = vadd.f32 %v14199_v42, %v4682_v22  ;;  %v7357_v43 = vld [vmem:[#allocation3 + $0x3a] sm:$0xff]  ;;  %v7361_v22 = vld [vmem:[#allocation3 + $0x6a] sm:$0xff] }
 0x318   : > { %v10425_v56 = vpop.f32.mrf.mxu1 }
 0x319   : > { %10904 = vmatmul.mubr.f32.gmra.mxu1 %v14263_v39  ;;  %v10623_v4 = vpop.f32.mrf.mxu0  ;;  %v14272_v55 = vadd.f32 %v5052_v50, %v4729_v19  ;;  %v4732_v17 = vadd.f32 %v14199_v42, %v10425_v56 }
 0x31a   : > { %11018 = vmatprep.mubr.f32.mxu1 %v7356_v51  ;;  %v4692_v25 = vpop.f32.mrf.mxu1 }
 0x31b   : > { %v5662_v20 = vpop.f32.mrf.mxu0  ;;  %v14275_v30 = vadd.f32 %v10505_v46, %v4732_v17  ;;  %v4731_v28 = vadd.f32 %v14199_v42, %v4692_v25  ;;  %v7360_v42 = vld [vmem:[#allocation3 + $0x62] sm:$0xff] }
 0x31c   : > { %v10540_v57 = vpop.f32.mrf.mxu1 }
 0x31d   : > { %11019 = vmatmul.mubr.f32.vlgmr.msra.gmra.mxu1 %v7357_v43  ;;  %v10626_v8 = vpop.f32.mrf.mxu0  ;;  %v14279_v36 = vadd.f32 %v5062_v9, %v4731_v28  ;;  %v5442_v10 = vadd.f32 %v10540_v57, %v13678_v52 }
 0x31e   : > { %11021 = vmatprep.mubr.f32.mxu1 %v7358_v23  ;;  %v5282_v50 = vpop.f32.mrf.mxu1 }
 0x31f   : > { %v5672_v45 = vpop.f32.mrf.mxu0  ;;  %v14282_v29 = vadd.f32 %v10620_v34, %v5442_v10  ;;  %v5441_v46 = vadd.f32 %v5282_v50, %v5071_v44  ;;  %v7362_v34 = vld [vmem:[#allocation3 + $0x7a] sm:$0xff] }
 0x321   : > { %v10543_v14 = vpop.f32.mrf.mxu1  ;;  %11022 = vmatmul.mubr.f32.gmra.mxu1 %v7359_v2  ;;  %v14284_v13 = vadd.f32 %v5652_v33, %v5441_v46 }
 0x322   : > { %v5444_v6 = vadd.f32 %v10543_v14, %v14124_v61  ;;  %11024 = vmatprep.mubr.f32.mxu1 %v7360_v42 }
 0x323   : > { %v5292_v26 = vpop.f32.mrf.mxu1  ;;  %v10629_v9 = vpop.f32.mrf.mxu0 }
 0x324   : > { %v14287_v48 = vadd.f32 %v10623_v4, %v5444_v6  ;;  %v5443_v52 = vadd.f32 %v5292_v26, %v14131_v1  ;;  %v7363_v4 = vld [vmem:[#allocation3 + $0x82] sm:$0xff]  ;;  %v7364_v1 = vld [vmem:[#allocation3 + $0x92] sm:$0xff] }
 0x325   : > { %v10546_v19 = vpop.f32.mrf.mxu1  ;;  %11025 = vmatmul.mubr.f32.gmra.mxu1 %v7361_v22  ;;  %v5682_v56 = vpop.f32.mrf.mxu0  ;;  %v7367_v26 = vld [vmem:[#allocation3 + $0xb2] sm:$0xff] }
 0x326   : > { %v14290_v51 = vadd.f32 %v5662_v20, %v5443_v52  ;;  %v5446_v32 = vadd.f32 %v10546_v19, %v14138_v5  ;;  %11027 = vmatprep.mubr.f32.mxu1 %v7362_v34 }
 0x327   : > { %v5302_v33 = vpop.f32.mrf.mxu1  ;;  %v10632_v17 = vpop.f32.mrf.mxu0 }
 0x328   : > { %v14293_v61 = vadd.f32 %v10626_v8, %v5446_v32  ;;  %v5445_v25 = vadd.f32 %v5302_v33, %v14145_v24  ;;  %v7365_v8 = vld [vmem:[#allocation3 + $0x9a] sm:$0xff]  ;;  %v7366_v24 = vld [vmem:[#allocation3 + $0xaa] sm:$0xff] }
 0x329   : > { %v10549_v28 = vpop.f32.mrf.mxu1  ;;  %11028 = vmatmul.mubr.f32.gmra.mxu1 %v7363_v4  ;;  %v5692_v43 = vpop.f32.mrf.mxu0  ;;  %v7369_v33 = vld [vmem:[#allocation3 + $0xca] sm:$0xff] }
 0x32a   : > { %v14296_v57 = vadd.f32 %v5672_v45, %v5445_v25  ;;  %v5448_v23 = vadd.f32 %v10549_v28, %v14152_v59  ;;  %11030 = vmatprep.mubr.f32.mxu1 %v7364_v1 }
 0x32b   : > { %v5312_v20 = vpop.f32.mrf.mxu1  ;;  %v10635_v44 = vpop.f32.mrf.mxu0 }
 0x32c   : > { %v14299_v5 = vadd.f32 %v10629_v9, %v5448_v23  ;;  %v5447_v10 = vadd.f32 %v5312_v20, %v14159_v37  ;;  %v7368_v37 = vld [vmem:[#allocation3 + $0xc2] sm:$0xff] }
 0x32d   : > { %v10552_v50 = vpop.f32.mrf.mxu1  ;;  %11031 = vmatmul.mubr.f32.gmra.mxu1 %v7365_v8  ;;  %v5702_v46 = vpop.f32.mrf.mxu0  ;;  %v7371_v20 = vld [vmem:[#allocation3 + $0xe2] sm:$0xff] }
 0x32e   : > { %v14302_v2 = vadd.f32 %v5682_v56, %v5447_v10  ;;  %v5450_v14 = vadd.f32 %v10552_v50, %v14166_v15  ;;  %11033 = vmatprep.mubr.f32.mxu1 %v7366_v24 }
 0x32f   : > { %v5322_v45 = vpop.f32.mrf.mxu1  ;;  %v10638_v42 = vpop.f32.mrf.mxu0 }
 0x330   : > { %v14305_v59 = vadd.f32 %v10632_v17, %v5450_v14  ;;  %v5449_v6 = vadd.f32 %v5322_v45, %v14173_v38  ;;  %v7370_v38 = vld [vmem:[#allocation3 + $0xda] sm:$0xff] }
 0x331   : > { %v10555_v9 = vpop.f32.mrf.mxu1  ;;  %11034 = vmatmul.mubr.f32.gmra.mxu1 %v7367_v26  ;;  %v5712_v52 = vpop.f32.mrf.mxu0  ;;  %v7373_v45 = vld [vmem:[#allocation3 + $0xfa] sm:$0xff] }
 0x332   : > { %v14308_v22 = vadd.f32 %v5692_v43, %v5449_v6  ;;  %v5452_v19 = vadd.f32 %v10555_v9, %v14180_v11  ;;  %11036 = vmatprep.mubr.f32.mxu1 %v7368_v37 }
 0x333   : > { %v5332_v34 = vpop.f32.mrf.mxu1  ;;  %v10641_v56 = vpop.f32.mrf.mxu0 }
 0x334   : > { %v14311_v15 = vadd.f32 %v10635_v44, %v5452_v19  ;;  %v5451_v32 = vadd.f32 %v5332_v34, %v14187_v31  ;;  %v7372_v31 = vld [vmem:[#allocation3 + $0xf2] sm:$0xff] }
 0x335   : > { %v10558_v17 = vpop.f32.mrf.mxu1  ;;  %11037 = vmatmul.mubr.f32.gmra.mxu1 %v7369_v33  ;;  %v5722_v25 = vpop.f32.mrf.mxu0  ;;  %v7375_v34 = vld [vmem:[#allocation3 + $0x112] sm:$0xff] }
 0x336   : > { %v14314_v4 = vadd.f32 %v5702_v46, %v5451_v32  ;;  %v5454_v28 = vadd.f32 %v10558_v17, %v14194_v58  ;;  %11039 = vmatprep.mubr.f32.mxu1 %v7370_v38 }
 0x337   : > { %v5342_v1 = vpop.f32.mrf.mxu1  ;;  %v10644_v43 = vpop.f32.mrf.mxu0 }
 0x338   : > { %v14317_v11 = vadd.f32 %v10638_v42, %v5454_v28  ;;  %v5453_v23 = vadd.f32 %v5342_v1, %v14206_v16  ;;  %v7374_v16 = vld [vmem:[#allocation3 + $0x10a] sm:$0xff] }
 0x339   : > { %v10561_v44 = vpop.f32.mrf.mxu1  ;;  %11040 = vmatmul.mubr.f32.gmra.mxu1 %v7371_v20  ;;  %v5732_v10 = vpop.f32.mrf.mxu0  ;;  %v7377_v1 = vld [vmem:[#allocation3 + $0x12a] sm:$0xff] }
 0x33a   : > { %v14320_v8 = vadd.f32 %v5712_v52, %v5453_v23  ;;  %v5456_v50 = vadd.f32 %v10561_v44, %v14210_v60  ;;  %11042 = vmatprep.mubr.f32.mxu1 %v7372_v31 }
 0x33b   : > { %v5352_v24 = vpop.f32.mrf.mxu1  ;;  %v10647_v46 = vpop.f32.mrf.mxu0 }
 0x33c   : > { %v14323_v58 = vadd.f32 %v10641_v56, %v5456_v50  ;;  %v5455_v14 = vadd.f32 %v5352_v24, %v14214_v27  ;;  %v7376_v27 = vld [vmem:[#allocation3 + $0x122] sm:$0xff] }
 0x33d   : > { %v10564_v42 = vpop.f32.mrf.mxu1  ;;  %11043 = vmatmul.mubr.f32.gmra.mxu1 %v7373_v45  ;;  %v5742_v6 = vpop.f32.mrf.mxu0  ;;  %v7379_v24 = vld [vmem:[#allocation3 + $0x142] sm:$0xff] }
 0x33e   : > { %v14326_v26 = vadd.f32 %v5722_v25, %v5455_v14  ;;  %v5458_v9 = vadd.f32 %v10564_v42, %v14218_v41  ;;  %11045 = vmatprep.mubr.f32.mxu1 %v7374_v16 }
 0x33f   : > { %v5362_v37 = vpop.f32.mrf.mxu1  ;;  %v10650_v52 = vpop.f32.mrf.mxu0 }
 0x340   : > { %v14329_v60 = vadd.f32 %v10644_v43, %v5458_v9  ;;  %v5457_v19 = vadd.f32 %v5362_v37, %v14222_v12  ;;  %v7378_v12 = vld [vmem:[#allocation3 + $0x13a] sm:$0xff] }
 0x341   : > { %v10567_v56 = vpop.f32.mrf.mxu1  ;;  %11046 = vmatmul.mubr.f32.gmra.mxu1 %v7375_v34  ;;  %v5752_v32 = vpop.f32.mrf.mxu0  ;;  %v7381_v37 = vld [vmem:[#allocation3 + $0x15a] sm:$0xff] }
 0x342   : > { %v14332_v33 = vadd.f32 %v5732_v10, %v5457_v19  ;;  %v5460_v17 = vadd.f32 %v10567_v56, %v14226_v18  ;;  %11048 = vmatprep.mubr.f32.mxu1 %v7376_v27 }
 0x343   : > { %v5372_v38 = vpop.f32.mrf.mxu1  ;;  %v10653_v25 = vpop.f32.mrf.mxu0 }
 0x344   : > { %v14335_v41 = vadd.f32 %v10647_v46, %v5460_v17  ;;  %v5459_v28 = vadd.f32 %v5372_v38, %v14230_v7  ;;  %v7380_v7 = vld [vmem:[#allocation3 + $0x152] sm:$0xff] }
 0x345   : > { %v10570_v43 = vpop.f32.mrf.mxu1  ;;  %11049 = vmatmul.mubr.f32.gmra.mxu1 %v7377_v1  ;;  %v5762_v23 = vpop.f32.mrf.mxu0  ;;  %v7383_v38 = vld [vmem:[#allocation3 + $0x172] sm:$0xff] }
 0x346   : > { %v14338_v20 = vadd.f32 %v5742_v6, %v5459_v28  ;;  %v5462_v44 = vadd.f32 %v10570_v43, %v14234_v53  ;;  %11051 = vmatprep.mubr.f32.mxu1 %v7378_v12  ;;  %v7386_v12 = vld [vmem:[#allocation3 + $0x19a] sm:$0xff] }
 0x347   : > { %v5382_v31 = vpop.f32.mrf.mxu1  ;;  %v10656_v10 = vpop.f32.mrf.mxu0 }
 0x348   : > { %v14341_v18 = vadd.f32 %v10650_v52, %v5462_v44  ;;  %v5461_v50 = vadd.f32 %v5382_v31, %v14238_v54  ;;  %v7382_v54 = vld [vmem:[#allocation3 + $0x16a] sm:$0xff] }
 0x349   : > { %v10573_v46 = vpop.f32.mrf.mxu1  ;;  %11052 = vmatmul.mubr.f32.gmra.mxu1 %v7379_v24  ;;  %v5772_v14 = vpop.f32.mrf.mxu0  ;;  %v7387_v24 = vld [vmem:[#allocation3 + $0x1a2] sm:$0xff] }
 0x34a   : > { %v14344_v45 = vadd.f32 %v5752_v32, %v5461_v50  ;;  %v5464_v42 = vadd.f32 %v10573_v46, %v14242_v63  ;;  %11054 = vmatprep.mubr.f32.mxu1 %v7380_v7 }
 0x34b   : > { %v5392_v16 = vpop.f32.mrf.mxu1  ;;  %v10659_v6 = vpop.f32.mrf.mxu0 }
 0x34c   : > { %v14347_v53 = vadd.f32 %v10653_v25, %v5464_v42  ;;  %v5463_v9 = vadd.f32 %v5392_v16, %v14245_v35 }
 0x34d   : > { %v10576_v52 = vpop.f32.mrf.mxu1  ;;  %11055 = vmatmul.mubr.f32.gmra.mxu1 %v7381_v37  ;;  %v5782_v19 = vpop.f32.mrf.mxu0 }
 0x34e   : > { %v14350_v34 = vadd.f32 %v5762_v23, %v5463_v9  ;;  %v5466_v56 = vadd.f32 %v10576_v52, %v14249_v40  ;;  %11057 = vmatprep.mubr.f32.mxu1 %v7382_v54 }
 0x34f   : > { %v5402_v27 = vpop.f32.mrf.mxu1  ;;  %v10662_v32 = vpop.f32.mrf.mxu0 }
 0x350   : > { %v14353_v63 = vadd.f32 %v10656_v10, %v5466_v56  ;;  %v5465_v17 = vadd.f32 %v5402_v27, %v14252_v0 }
 0x351   : > { %v10579_v25 = vpop.f32.mrf.mxu1  ;;  %11058 = vmatmul.mubr.f32.gmra.mxu1 %v7383_v38  ;;  %v5792_v35 = vpop.f32.mrf.mxu0 }
 0x352   : > { %v14356_v28 = vadd.f32 %v5772_v14, %v5465_v17  ;;  %v5468_v1 = vadd.f32 %v10579_v25, %v14256_v47  ;;  %11060 = vmatprep.mubr.f32.mxu1 %v14074_v21 }
 0x353   : > { %v5412_v43 = vpop.f32.mrf.mxu1  ;;  %v10665_v40 = vpop.f32.mrf.mxu0 }
 0x354   : > { %v14360_v23 = vadd.f32 %v10659_v6, %v5468_v1  ;;  %v5467_v44 = vadd.f32 %v5412_v43, %v14260_v62 }
 0x355   : > { %v10582_v31 = vpop.f32.mrf.mxu1  ;;  %11061 = vmatmul.mubr.f32.gmra.mxu1 %v14086_v49  ;;  %v5802_v0 = vpop.f32.mrf.mxu0 }
 0x356   : > { %v14364_v10 = vadd.f32 %v5782_v19, %v5467_v44  ;;  %v5470_v50 = vadd.f32 %v10582_v31, %v14266_v3  ;;  %11063 = vmatprep.mubr.f32.mxu1 %v7386_v12 }
 0x357   : > { %v5422_v47 = vpop.f32.mrf.mxu1  ;;  %v14367_v46 = vpop.f32.mrf.mxu0 }
 0x358   : > { %v14369_v21 = vadd.f32 %v10662_v32, %v5470_v50  ;;  %v5469_v7 = vadd.f32 %v5422_v47, %v14272_v55 }
 0x359   : > { %v10585_v14 = vpop.f32.mrf.mxu1  ;;  %11064 = vmatmul.mubr.f32.gmra.mxu1 %v7387_v24  ;;  %v14372_v62 = vpop.f32.mrf.mxu0 }
 0x35a   : > { %v14374_v42 = vadd.f32 %v5792_v35, %v5469_v7  ;;  %v5472_v49 = vadd.f32 %v10585_v14, %v14275_v30 }
 0x35b   : > { %v5432_v16 = vpop.f32.mrf.mxu1  ;;  %v14377_v6 = vpop.f32.mrf.mxu0 }
 0x35c   : > { %v14379_v3 = vadd.f32 %v10665_v40, %v5472_v49  ;;  %v5471_v9 = vadd.f32 %v5432_v16, %v14279_v36 }
 0x35d   : > { %v10700_v37 = vpop.f32.mrf.mxu1  ;;  %v14382_v52 = vpop.f32.mrf.mxu0 }
 0x35e   : > { %v14384_v54 = vadd.f32 %v5802_v0, %v5471_v9  ;;  %v14387_v55 = vadd.f32 %v10700_v37, %v14282_v29 }
 0x35f   : > { %v6022_v19 = vpop.f32.mrf.mxu1  ;;  %v14389_v56 = vpop.f32.mrf.mxu0 }
 0x360   : > { %v14392_v30 = vadd.f32 %v6022_v19, %v14284_v13 }
 0x361   : > { %v10703_v27 = vpop.f32.mrf.mxu1  ;;  %v14394_v32 = vpop.f32.mrf.mxu0 }
 0x362   : > { %v14397_v17 = vadd.f32 %v10703_v27, %v14287_v48 }
 0x363   : > { %v6032_v36 = vpop.f32.mrf.mxu1  ;;  %v14399_v38 = vpop.f32.mrf.mxu0 }
 0x364   : > { %v14402_v25 = vadd.f32 %v6032_v36, %v14290_v51 }
 0x365   : > { %v10706_v29 = vpop.f32.mrf.mxu1  ;;  %v14404_v35 = vpop.f32.mrf.mxu0 }
 0x366   : > { %v14407_v1 = vadd.f32 %v10706_v29, %v14293_v61 }
 0x367   : > { %v6042_v13 = vpop.f32.mrf.mxu1  ;;  %v14409_v43 = vpop.f32.mrf.mxu0 }
 0x368   : > { %v14412_v12 = vadd.f32 %v6042_v13, %v14296_v57 }
 0x369   : > { %v10709_v48 = vpop.f32.mrf.mxu1  ;;  %v14414_v40 = vpop.f32.mrf.mxu0 }
 0x36a   : > { %v14417_v44 = vadd.f32 %v10709_v48, %v14299_v5 }
 0x36b   : > { %v6052_v51 = vpop.f32.mrf.mxu1  ;;  %v14419_v31 = vpop.f32.mrf.mxu0 }
 0x36c   : > { %v14422_v0 = vadd.f32 %v6052_v51, %v14302_v2 }
 0x36d   : > { %v10712_v61 = vpop.f32.mrf.mxu1  ;;  %v14424_v50 = vpop.f32.mrf.mxu0 }
 0x36e   : > { %v14427_v24 = vadd.f32 %v10712_v61, %v14305_v59 }
 0x36f   : > { %v6062_v57 = vpop.f32.mrf.mxu1  ;;  %v14429_v47 = vpop.f32.mrf.mxu0 }
 0x370   : > { %v14432_v7 = vadd.f32 %v6062_v57, %v14308_v22 }
 0x371   : > { %v10715_v5 = vpop.f32.mrf.mxu1  ;;  %v14434_v14 = vpop.f32.mrf.mxu0 }
 0x372   : > { %v14437_v49 = vadd.f32 %v10715_v5, %v14311_v15 }
 0x373   : > { %v6072_v2 = vpop.f32.mrf.mxu1  ;;  %v14439_v16 = vpop.f32.mrf.mxu0 }
 0x374   : > { %v14442_v9 = vadd.f32 %v6072_v2, %v14314_v4 }
 0x375   : > { %v10718_v59 = vpop.f32.mrf.mxu1  ;;  %v14444_v37 = vpop.f32.mrf.mxu0 }
 0x376   : > { %v14447_v19 = vadd.f32 %v10718_v59, %v14317_v11 }
 0x377   : > { %v6082_v22 = vpop.f32.mrf.mxu1  ;;  %v14449_v27 = vpop.f32.mrf.mxu0 }
 0x378   : > { %v14452_v36 = vadd.f32 %v6082_v22, %v14320_v8 }
 0x379   : > { %v10721_v15 = vpop.f32.mrf.mxu1  ;;  %v14454_v29 = vpop.f32.mrf.mxu0 }
 0x37a   : > { %v14457_v13 = vadd.f32 %v10721_v15, %v14323_v58 }
 0x37b   : > { %v6092_v4 = vpop.f32.mrf.mxu1  ;;  %v14459_v48 = vpop.f32.mrf.mxu0 }
 0x37c   : > { %v14462_v51 = vadd.f32 %v6092_v4, %v14326_v26 }
 0x37d   : > { %v10724_v11 = vpop.f32.mrf.mxu1  ;;  %v14464_v61 = vpop.f32.mrf.mxu0 }
 0x37e   : > { %v14467_v57 = vadd.f32 %v10724_v11, %v14329_v60 }
 0x37f   : > { %v6102_v8 = vpop.f32.mrf.mxu1  ;;  %v14469_v5 = vpop.f32.mrf.mxu0 }
 0x380   : > { %15601 = vst [vmem:[#allocation71_spill] sm:$0xff] %v14469_v5  ;;  %v14472_v2 = vadd.f32 %v6102_v8, %v14332_v33 }
 0x381   : > { %v10727_v58 = vpop.f32.mrf.mxu1  ;;  %v14474_v59 = vpop.f32.mrf.mxu0 }
 0x382   : > { %15602 = vst [vmem:[#allocation49_spill] sm:$0xff] %v14474_v59  ;;  %v14477_v22 = vadd.f32 %v10727_v58, %v14335_v41 }
 0x383   : > { %v6112_v26 = vpop.f32.mrf.mxu1  ;;  %v14479_v15 = vpop.f32.mrf.mxu0 }
 0x384   : > { %15603 = vst [vmem:[#allocation51_spill] sm:$0xff] %v14479_v15  ;;  %v14482_v4 = vadd.f32 %v6112_v26, %v14338_v20 }
 0x385   : > { %v10730_v60 = vpop.f32.mrf.mxu1  ;;  %v14484_v11 = vpop.f32.mrf.mxu0 }
 0x386   : > { %15604 = vst [vmem:[#allocation74_spill] sm:$0xff] %v14484_v11  ;;  %v14487_v5 = vadd.f32 %v10730_v60, %v14341_v18 }
 0x387   : > { %v6122_v33 = vpop.f32.mrf.mxu1  ;;  %v14489_v8 = vpop.f32.mrf.mxu0 }
 0x388   : > { %15605 = vst [vmem:[#allocation73_spill] sm:$0xff] %v14489_v8  ;;  %v14492_v59 = vadd.f32 %v6122_v33, %v14344_v45 }
 0x389   : > { %v10733_v41 = vpop.f32.mrf.mxu1  ;;  %v14494_v58 = vpop.f32.mrf.mxu0 }
 0x38a   : > { %15606 = vst [vmem:[#allocation77_spill] sm:$0xff] %v14494_v58  ;;  %v14497_v15 = vadd.f32 %v10733_v41, %v14347_v53 }
 0x38b   : > { %v6132_v20 = vpop.f32.mrf.mxu1  ;;  %v14499_v26 = vpop.f32.mrf.mxu0 }
 0x38c   : > { %15607 = vst [vmem:[#allocation75_spill] sm:$0xff] %v14499_v26  ;;  %v14502_v11 = vadd.f32 %v6132_v20, %v14350_v34 }
 0x38d   : > { %v10736_v18 = vpop.f32.mrf.mxu1  ;;  %v14504_v60 = vpop.f32.mrf.mxu0 }
 0x38e   : > { %15608 = vst [vmem:[#allocation52_spill] sm:$0xff] %v14504_v60  ;;  %v14507_v8 = vadd.f32 %v10736_v18, %v14353_v63 }
 0x38f   : > { %v6142_v45 = vpop.f32.mrf.mxu1  ;;  %v14509_v33 = vpop.f32.mrf.mxu0 }
 0x390   : > { %15609 = vst [vmem:[#allocation80_spill] sm:$0xff] %v14509_v33  ;;  %v14512_v58 = vadd.f32 %v6142_v45, %v14356_v28 }
 0x391   : > { %v10739_v53 = vpop.f32.mrf.mxu1  ;;  %v14514_v41 = vpop.f32.mrf.mxu0 }
 0x392   : > { %15610 = vst [vmem:[#allocation76_spill] sm:$0xff] %v14514_v41  ;;  %v14517_v26 = vadd.f32 %v10739_v53, %v14360_v23 }
 0x393   : > { %v6152_v34 = vpop.f32.mrf.mxu1  ;;  %v14522_v60 = vpop.f32.mrf.mxu0 }
 0x394   : > { %v14520_v20 = vadd.f32 %v6152_v34, %v14364_v10  ;;  %15611 = vst [vmem:[#allocation83_spill] sm:$0xff] %v14522_v60 }
 0x395   : > { %v10742_v63 = vpop.f32.mrf.mxu1  ;;  %v14530_v45 = vpop.f32.mrf.mxu0 }
 0x396   : > { %v14525_v18 = vadd.f32 %v10742_v63, %v14369_v21  ;;  %15613 = vst [vmem:[#allocation79_spill] sm:$0xff] %v14530_v45 }
 0x397   : > { %v6162_v33 = vpop.f32.mrf.mxu1  ;;  %v14538_v34 = vpop.f32.mrf.mxu0 }
 0x398   : > { %v14528_v28 = vadd.f32 %v6162_v33, %v14374_v42 }
 0x399   : > { %v10745_v41 = vpop.f32.mrf.mxu1  ;;  %v14544_v63 = vpop.f32.mrf.mxu0 }
 0x39a   : > { %15612 = vst [vmem:[#allocation78_spill] sm:$0xff] %v14528_v28  ;;  %v14533_v23 = vadd.f32 %v10745_v41, %v14379_v3  ;;  %15616 = vst [vmem:[#allocation82_spill] sm:$0xff] %v14544_v63 }
 0x39b   : > { %v6172_v53 = vpop.f32.mrf.mxu1  ;;  %v14550_v45 = vpop.f32.mrf.mxu0 }
 0x39c   : > { %15614 = vst [vmem:[#allocation81_spill] sm:$0xff] %v14533_v23  ;;  %v14536_v10 = vadd.f32 %v6172_v53, %v14384_v54  ;;  %15619 = vst [vmem:[#allocation84_spill] sm:$0xff] %v14550_v45 }
 0x39d   : > { %v14540_v60 = vpop.f32.mrf.mxu1  ;;  %v14556_v54 = vpop.f32.mrf.mxu0 }
 0x39e   : > { %15615 = vst [vmem:[#allocation54_spill] sm:$0xff] %v14536_v10  ;;  %15622 = vst [vmem:[#allocation85_spill] sm:$0xff] %v14556_v54 }
 0x39f   : > { %v14542_v21 = vpop.f32.mrf.mxu1  ;;  %v14562_v23 = vpop.f32.mrf.mxu0 }
 0x3a0   : > { %15625 = vst [vmem:[#allocation15_spill] sm:$0xff] %v14562_v23 }
 0x3a1   : > { %v14546_v42 = vpop.f32.mrf.mxu1 }
 0x3a2   : > { %15617 = vst [vmem:[#allocation53_spill] sm:$0xff] %v14546_v42 }
 0x3a3   : > { %v14548_v33 = vpop.f32.mrf.mxu1 }
 0x3a4   : > { %15618 = vst [vmem:[#allocation55_spill] sm:$0xff] %v14548_v33  ;;  %v14568_v33 = vpop.f32.mrf.mxu0 }
 0x3a5   : > { %v14552_v3 = vpop.f32.mrf.mxu1 }
 0x3a6   : > { %15620 = vst [vmem:[#allocation16_spill] sm:$0xff] %v14552_v3 }
 0x3a7   : > { %v14554_v41 = vpop.f32.mrf.mxu1 }
 0x3a8   : > { %15621 = vst [vmem:[#allocation18_spill] sm:$0xff] %v14554_v41  ;;  %v14574_v41 = vpop.f32.mrf.mxu0 }
 0x3a9   : > { %v14558_v53 = vpop.f32.mrf.mxu1 }
 0x3aa   : > { %15623 = vst [vmem:[#allocation17_spill] sm:$0xff] %v14558_v53  ;;  %v14580_v53 = vpop.f32.mrf.mxu0 }
 0x3ab   : > { %v14560_v10 = vpop.f32.mrf.mxu1  ;;  %15632 = vst [vmem:[#allocation25_spill] sm:$0xff] %v14580_v53  ;;  %v7761_v53 = vld [vmem:[%s14590_s10 + $0x18] sm:$0xff] }
 0x3ac   : > { %15624 = vst [vmem:[#allocation19_spill] sm:$0xff] %v14560_v10  ;;  %vm7793_vm2 = vcmp.gt.f32.partialorder %v7761_v53, 1.0 }
 0x3ad   : > { %v14564_v63 = vpop.f32.mrf.mxu1 }
 0x3ae   : > { %15626 = vst [vmem:[#allocation86_spill] sm:$0xff] %v14564_v63 }
 0x3af   : > { %v14566_v28 = vpop.f32.mrf.mxu1 }
 0x3b0   : > { %15627 = vst [vmem:[#allocation20_spill] sm:$0xff] %v14566_v28  ;;  %v14604_v28 = vadd.f32 %v14367_v46, %v14387_v55  ;;  %v14621_v46 = vadd.f32 %v14377_v6, %v14397_v17  ;;  %v14625_v55 = vadd.f32 %v14382_v52, %v14402_v25  ;;  %v7762_v25 = vld [vmem:[%s14590_s10 + $0x20] sm:$0xff] }
 0x3b1   : > { %v14570_v45 = vpop.f32.mrf.mxu1  ;;  %vm7794_vm5 = vcmp.gt.f32.partialorder %v7762_v25, 1.0 }
 0x3b2   : > { %15628 = vst [vmem:[#allocation21_spill] sm:$0xff] %v14570_v45 }
 0x3b3   : > { %v14572_v3 = vpop.f32.mrf.mxu1 }
 0x3b4   : > { %15629 = vst [vmem:[#allocation26_spill] sm:$0xff] %v14572_v3  ;;  %v14592_v3 = vpop.f32.mrf.mxu0 }
 0x3b5   : > { %v14576_v42 = vpop.f32.mrf.mxu1  ;;  %15635 = vst [vmem:[#allocation27_spill] sm:$0xff] %v14592_v3  ;;  %v14611_v3 = vadd.f32 %v14372_v62, %v14392_v30  ;;  %v14629_v62 = vadd.f32 %v14389_v56, %v14407_v1  ;;  %v14648_v56 = vadd.f32 %v14399_v38, %v14417_v44  ;;  %v7764_v44 = vld [vmem:[%s14590_s10 + $0x30] sm:$0xff] }
 0x3b6   : > { %15630 = vst [vmem:[#allocation87_spill] sm:$0xff] %v14576_v42  ;;  %vm7796_vm7 = vcmp.gt.f32.partialorder %v7764_v44, 1.0 }
 0x3b7   : > { %v14578_v54 = vpop.f32.mrf.mxu1 }
 0x3b8   : > { %15631 = vst [vmem:[#allocation24_spill] sm:$0xff] %v14578_v54  ;;  %v7759_v54 = vld [vmem:[%s14590_s10 + $0x8] sm:$0xff] }
 0x3b9   : > { %v14582_v10 = vpop.f32.mrf.mxu1  ;;  %vm7791_vm0 = vcmp.gt.f32.partialorder %v7759_v54, 1.0 }
 0x3ba   : > { %15633 = vst [vmem:[#allocation56_spill] sm:$0xff] %v14582_v10  ;;  %v14599_v10 = vpop.f32.mrf.mxu0 }
 0x3bb   : > { %v14584_v23 = vpop.f32.mrf.mxu1  ;;  %15638 = vst [vmem:[#allocation6_spill] sm:$0xff] %v14599_v10  ;;  %v7760_v10 = vld [vmem:[%s14590_s10 + $0x10] sm:$0xff] }
 0x3bc   : > { %15634 = vst [vmem:[#allocation88_spill] sm:$0xff] %v14584_v23  ;;  %v7758_v23 = vld [vmem:[%s14590_s10] sm:$0xff]  ;;  %vm7792_vm3 = vcmp.gt.f32.partialorder %v7760_v10, 1.0  ;;  %v14638_v6 = vpop.f32.mrf.mxu0  ;;  %v14666_v38 = vmul.f32 0.9, %v7760_v10  ;;  %v14683_v10 = vadd.f32 %v14414_v40, %v14432_v7 }
 0x3bd   : > { %v14594_v42 = vpop.f32.mrf.mxu1  ;;  %vm7790_vm1 = vcmp.gt.f32.partialorder %v7758_v23, 1.0  ;;  %15641 = vst [vmem:[#allocation67_spill] sm:$0xff] %v14638_v6  ;;  %v14643_v52 = vmul.f32 0.9, %v7758_v23  ;;  %v14661_v23 = vadd.f32 %v14404_v35, %v14422_v0  ;;  %v14664_v6 = vsel %vm7792_vm3, 1.0, %v14263_v39  ;;  %v7767_v0 = vld [vmem:[%s14590_s10 + $0x48] sm:$0xff] }
 0x3be   : > { %15636 = vst [vmem:[#allocation28_spill] sm:$0xff] %v14594_v42  ;;  %v14616_v42 = vmul.f32 0.9, %v7759_v54  ;;  %v7763_v54 = vld [vmem:[%s14590_s10 + $0x28] sm:$0xff]  ;;  %v14641_v17 = vsel %vm7790_vm1, 1.0, %v14263_v39  ;;  %15644 = vst [vmem:[#allocation96_spill] sm:$0xff] %v14664_v6  ;;  %v14685_v6 = vpop.f32.mrf.mxu0 }
 0x3bf   : > { %v14597_v45 = vpop.f32.mrf.mxu1  ;;  %vm7795_vm4 = vcmp.gt.f32.partialorder %v7763_v54, 1.0  ;;  %v14678_v35 = vmul.f32 0.9, %v7763_v54  ;;  %15647 = vst [vmem:[#allocation42_spill] sm:$0xff] %v14685_v6  ;;  %vm7799_vm8 = vcmp.gt.f32.partialorder %v7767_v0, 1.0  ;;  %v14695_v54 = vadd.f32 %v14419_v31, %v14437_v49  ;;  %v7769_v6 = vld [vmem:[%s14590_s10 + $0x58] sm:$0xff] }
 0x3c0   : > { %15637 = vst [vmem:[#allocation39_spill] sm:$0xff] %v14597_v45  ;;  %v14614_v45 = vsel %vm7791_vm0, 1.0, %v14263_v39  ;;  %v14713_v31 = vmul.f32 0.9, %v7764_v44  ;;  %vm7801_vm10 = vcmp.gt.f32.partialorder %v7769_v6, 1.0  ;;  %v7768_v49 = vld [vmem:[%s14590_s10 + $0x50] sm:$0xff]  ;;  %v14730_v44 = vadd.f32 %v14434_v14, %v14452_v36 }
 0x3c1   : > { %v14606_v63 = vpop.f32.mrf.mxu1  ;;  %vm7800_vm11 = vcmp.gt.f32.partialorder %v7768_v49, 1.0  ;;  %v14748_v14 = vsel %vm7801_vm10, 1.0, %v14263_v39  ;;  %v14750_v36 = vmul.f32 0.9, %v7769_v6 }
 0x3c2   : > { %15639 = vst [vmem:[#allocation31_spill] sm:$0xff] %v14606_v63  ;;  %v14636_v63 = vadd.f32 %v14394_v32, %v14412_v12  ;;  %v14654_v32 = vsel %vm7793_vm2, 1.0, %v14263_v39  ;;  %v14656_v12 = vmul.f32 0.9, %v7761_v53  ;;  %15657 = vst [vmem:[#allocation57_spill] sm:$0xff] %v14748_v14 }
 0x3c3   : > { %v14631_v30 = vpop.f32.mrf.mxu1  ;;  %15643 = vst [vmem:[#allocation8_spill] sm:$0xff] %v14654_v32  ;;  %v14676_v32 = vsel %vm7795_vm4, 1.0, %v14263_v39 }
 0x3c4   : > { %15640 = vst [vmem:[#allocation30_spill] sm:$0xff] %v14631_v30  ;;  %v7765_v30 = vld [vmem:[%s14590_s10 + $0x38] sm:$0xff]  ;;  %15646 = vst [vmem:[#allocation32_spill] sm:$0xff] %v14676_v32 }
 0x3c5   : > { %v14650_v1 = vpop.f32.mrf.mxu1  ;;  %vm7797_vm6 = vcmp.gt.f32.partialorder %v7765_v30, 1.0  ;;  %v14703_v7 = vmul.f32 0.9, %v7765_v30 }
 0x3c6   : > { %15642 = vst [vmem:[#allocation41_spill] sm:$0xff] %v14650_v1  ;;  %v14671_v1 = vadd.f32 %v14409_v43, %v14427_v24  ;;  %v14688_v43 = vsel %vm7794_vm5, 1.0, %v14263_v39  ;;  %v14690_v24 = vmul.f32 0.9, %v7762_v25  ;;  %v14701_v40 = vsel %vm7797_vm6, 1.0, %v14263_v39 }
 0x3c7   : > { %v14673_v53 = vpop.f32.mrf.mxu1  ;;  %15648 = vst [vmem:[#allocation10_spill] sm:$0xff] %v14688_v43  ;;  %15650 = vst [vmem:[#allocation35_spill] sm:$0xff] %v14701_v40  ;;  %v14708_v25 = vadd.f32 %v14424_v50, %v14442_v9  ;;  %v14711_v43 = vsel %vm7796_vm7, 1.0, %v14263_v39  ;;  %v14723_v40 = vsel %vm7799_vm8, 1.0, %v14263_v39  ;;  %v14725_v50 = vmul.f32 0.9, %v7767_v0 }
 0x3c8   : > { %15645 = vst [vmem:[#allocation34_spill] sm:$0xff] %v14673_v53  ;;  %v7766_v53 = vld [vmem:[%s14590_s10 + $0x40] sm:$0xff]  ;;  %15651 = vst [vmem:[#allocation7_spill] sm:$0xff] %v14711_v43  ;;  %v7771_v9 = vld [vmem:[%s14590_s10 + $0x68] sm:$0xff]  ;;  %v14732_v43 = vpop.f32.mrf.mxu0  ;;  %v14742_v0 = vadd.f32 %v14439_v16, %v14457_v13  ;;  %v14760_v16 = vmul.f32 0.9, %v7768_v49  ;;  %v14777_v49 = vadd.f32 %v14454_v29, %v14472_v2 }
 0x3c9   : > { %v14697_v32 = vpop.f32.mrf.mxu1  ;;  %vm7798_vm9 = vcmp.gt.f32.partialorder %v7766_v53, 1.0  ;;  %15653 = vst [vmem:[#allocation66_spill] sm:$0xff] %v14723_v40  ;;  %15654 = vst [vmem:[#allocation11_spill] sm:$0xff] %v14732_v43  ;;  %vm7803_vm12 = vcmp.gt.f32.partialorder %v7771_v9, 1.0  ;;  %v7773_v43 = vld [vmem:[%s14590_s10 + $0x78] sm:$0xff]  ;;  %v7772_v13 = vld [vmem:[%s14590_s10 + $0x70] sm:$0xff] }
 0x3ca   : > { %15649 = vst [vmem:[#allocation36_spill] sm:$0xff] %v14697_v32  ;;  %v14718_v32 = vadd.f32 %v14429_v47, %v14447_v19  ;;  %v14735_v47 = vsel %vm7798_vm9, 1.0, %v14263_v39  ;;  %v14737_v19 = vmul.f32 0.9, %v7766_v53  ;;  %v14755_v53 = vadd.f32 %v14444_v37, %v14462_v51  ;;  %v7775_v51 = vld [vmem:[%s14590_s10 + $0x88] sm:$0xff] }
 0x3cb   : > { %v14720_v30 = vpop.f32.mrf.mxu1  ;;  %15655 = vst [vmem:[#allocation38_spill] sm:$0xff] %v14735_v47  ;;  %v14758_v47 = vsel %vm7800_vm11, 1.0, %v14263_v39  ;;  %vm7805_vm14 = vcmp.gt.f32.partialorder %v7773_v43, 1.0  ;;  %v14770_v14 = vsel %vm7803_vm12, 1.0, %v14263_v39  ;;  %v14772_v37 = vmul.f32 0.9, %v7771_v9 }
 0x3cc   : > { %15652 = vst [vmem:[#allocation58_spill] sm:$0xff] %v14720_v30  ;;  %v7770_v30 = vld [vmem:[%s14590_s10 + $0x60] sm:$0xff]  ;;  %15658 = vst [vmem:[#allocation59_spill] sm:$0xff] %v14758_v47  ;;  %vm7804_vm15 = vcmp.gt.f32.partialorder %v7772_v13, 1.0  ;;  %v14779_v47 = vpop.f32.mrf.mxu0  ;;  %vm7807_vm0 = vcmp.gt.f32.partialorder %v7775_v51, 1.0  ;;  %v14789_v9 = vadd.f32 %v14459_v48, %v14477_v22  ;;  %v14795_v29 = vsel %vm7805_vm14, 1.0, %v14263_v39 }
 0x3cd   : > { %v14744_v40 = vpop.f32.mrf.mxu1  ;;  %vm7802_vm13 = vcmp.gt.f32.partialorder %v7770_v30, 1.0  ;;  %15660 = vst [vmem:[#allocation12_spill] sm:$0xff] %v14770_v14  ;;  %15661 = vst [vmem:[#allocation40_spill] sm:$0xff] %v14772_v37  ;;  %v14797_v2 = vmul.f32 0.9, %v7773_v43  ;;  %v7777_v37 = vld [vmem:[%s14590_s10 + $0x98] sm:$0xff] }
 0x3ce   : > { %15656 = vst [vmem:[#allocation89_spill] sm:$0xff] %v14744_v40  ;;  %v14765_v40 = vadd.f32 %v14449_v27, %v14467_v57  ;;  %v14782_v27 = vsel %vm7802_vm13, 1.0, %v14263_v39  ;;  %v14784_v57 = vmul.f32 0.9, %v7770_v30  ;;  %15665 = vst [vmem:[#allocation92_spill] sm:$0xff] %v14795_v29  ;;  %v14802_v30 = vadd.f32 %v14464_v61, %v14482_v4  ;;  %v7776_v22 = vld [vmem:[%s14590_s10 + $0x90] sm:$0xff] }
 0x3cf   : > { %v14767_v6 = vpop.f32.mrf.mxu1  ;;  %15662 = vst [vmem:[#allocation90_spill] sm:$0xff] %v14782_v27  ;;  %v14805_v27 = vsel %vm7804_vm15, 1.0, %v14263_v39  ;;  %v14807_v48 = vmul.f32 0.9, %v7772_v13  ;;  %vm7809_vm2 = vcmp.gt.f32.partialorder %v7777_v37, 1.0  ;;  %v14817_v29 = vsel %vm7807_vm0, 1.0, %v14263_v39 }
 0x3d0   : > { %15659 = vst [vmem:[#allocation44_spill] sm:$0xff] %v14767_v6  ;;  %15663 = vst [vmem:[#allocation68_spill] sm:$0xff] %v14784_v57  ;;  %v7774_v6 = vld [vmem:[%s14590_s10 + $0x80] sm:$0xff]  ;;  %v14819_v61 = vmul.f32 0.9, %v7775_v51  ;;  %vm7808_vm3 = vcmp.gt.f32.partialorder %v7776_v22, 1.0 }
 0x3d1   : > { %v14791_v14 = vpop.f32.mrf.mxu1  ;;  %vm7806_vm1 = vcmp.gt.f32.partialorder %v7774_v6, 1.0  ;;  %15666 = vst [vmem:[#allocation93_spill] sm:$0xff] %v14805_v27  ;;  %15667 = vst [vmem:[#allocation14_spill] sm:$0xff] %v14807_v48  ;;  %v7779_v4 = vld [vmem:[%s14590_s10 + $0xa8] sm:$0xff]  ;;  %v15673_v27 = vld [vmem:[#allocation49_spill] sm:$0xff]  ;;  %v14826_v48 = vpop.f32.mrf.mxu0 }
 0x3d2   : > { %15664 = vst [vmem:[#allocation13_spill] sm:$0xff] %v14791_v14  ;;  %v15668_v14 = vld [vmem:[#allocation71_spill] sm:$0xff]  ;;  %15671 = vst [vmem:[#allocation94_spill] sm:$0xff] %v14817_v29  ;;  %v14824_v13 = vadd.f32 %v15673_v27, %v14492_v59  ;;  %vm7811_vm4 = vcmp.gt.f32.partialorder %v7779_v4, 1.0  ;;  %v14842_v59 = vsel %vm7809_vm2, 1.0, %v14263_v39 }
 0x3d3   : > { %v14812_v57 = vadd.f32 %v15668_v14, %v14487_v5  ;;  %v14814_v43 = vpop.f32.mrf.mxu1  ;;  %15672 = vst [vmem:[#allocation22_spill] sm:$0xff] %v14819_v61  ;;  %v14829_v5 = vsel %vm7806_vm1, 1.0, %v14263_v39  ;;  %v14831_v14 = vmul.f32 0.9, %v7774_v6  ;;  %v15677_v29 = vld [vmem:[#allocation51_spill] sm:$0xff]  ;;  %15679 = vst [vmem:[#allocation45_spill] sm:$0xff] %v14842_v59 }
 0x3d4   : > { %15670 = vst [vmem:[#allocation46_spill] sm:$0xff] %v14814_v43  ;;  %15674 = vst [vmem:[#allocation65_spill] sm:$0xff] %v14824_v13  ;;  %v7778_v43 = vld [vmem:[%s14590_s10 + $0xa0] sm:$0xff]  ;;  %v14836_v51 = vadd.f32 %v15677_v29, %v14497_v15  ;;  %v14844_v27 = vmul.f32 0.9, %v7777_v37  ;;  %v7780_v15 = vld [vmem:[%s14590_s10 + $0xb0] sm:$0xff] }
 0x3d5   : > { %15669 = vst [vmem:[#allocation72_spill] sm:$0xff] %v14812_v57  ;;  %15675 = vst [vmem:[#allocation95_spill] sm:$0xff] %v14829_v5  ;;  %v14838_v61 = vpop.f32.mrf.mxu1  ;;  %v14846_v13 = vmul.f32 0.9, %v7776_v22  ;;  %v7781_v5 = vld [vmem:[%s14590_s10 + $0xb8] sm:$0xff]  ;;  %v15681_v6 = vld [vmem:[#allocation74_spill] sm:$0xff] }
 0x3d6   : > { %15676 = vst [vmem:[#allocation60_spill] sm:$0xff] %v14831_v14  ;;  %15678 = vst [vmem:[#allocation23_spill] sm:$0xff] %v14838_v61  ;;  %v14851_v14 = vadd.f32 %v15681_v6, %v14502_v11  ;;  %v14854_v57 = vsel %vm7808_vm3, 1.0, %v14263_v39  ;;  %vm7810_vm5 = vcmp.gt.f32.partialorder %v7778_v43, 1.0  ;;  %vm7813_vm6 = vcmp.gt.f32.partialorder %v7781_v5, 1.0  ;;  %v15683_v29 = vld [vmem:[#allocation73_spill] sm:$0xff] }
 0x3d7   : > { %15680 = vst [vmem:[#allocation47_spill] sm:$0xff] %v14846_v13  ;;  %15682 = vst [vmem:[#allocation29_spill] sm:$0xff] %v14854_v57  ;;  %v14859_v61 = vadd.f32 %v15683_v29, %v14507_v8  ;;  %v14861_v37 = vpop.f32.mrf.mxu1  ;;  %v14864_v22 = vsel %vm7811_vm4, 1.0, %v14263_v39  ;;  %v14866_v13 = vmul.f32 0.9, %v7779_v4  ;;  %v7783_v6 = vld [vmem:[%s14590_s10 + $0xc8] sm:$0xff]  ;;  %v6923_v8 = vadd.f32 %v14540_v60, %v14604_v28  ;;  %v14877_v29 = vpop.f32.mrf.mxu0 }
 0x3d8   : > { %15685 = vst [vmem:[#allocation70_spill] sm:$0xff] %v14861_v37  ;;  %15686 = vst [vmem:[#allocation9_spill] sm:$0xff] %v14864_v22  ;;  %v14868_v11 = vmul.f32 0.9, %v7778_v43  ;;  %v15688_v57 = vld [vmem:[#allocation77_spill] sm:$0xff]  ;;  %vm7812_vm7 = vcmp.gt.f32.partialorder %v7780_v15, 1.0 }
 0x3d9   : > { %15684 = vst [vmem:[#allocation48_spill] sm:$0xff] %v14859_v61  ;;  %v14873_v59 = vadd.f32 %v15688_v57, %v14512_v58  ;;  %vm7815_vm8 = vcmp.gt.f32.partialorder %v7783_v6, 1.0  ;;  %v15689_v37 = vld [vmem:[#allocation75_spill] sm:$0xff]  ;;  %v14883_v4 = vpop.f32.mrf.mxu1  ;;  %v14887_v22 = vsel %vm7810_vm5, 1.0, %v14263_v39  ;;  %v14891_v58 = vsel %vm7813_vm6, 1.0, %v14263_v39  ;;  %v7782_v28 = vld [vmem:[%s14590_s10 + $0xc0] sm:$0xff] }
 0x3da   : > { %15687 = vst [vmem:[#allocation62_spill] sm:$0xff] %v14868_v11  ;;  %v14881_v61 = vadd.f32 %v15689_v37, %v14517_v26  ;;  %15690 = vst [vmem:[#allocation33_spill] sm:$0xff] %v14883_v4  ;;  %v14893_v60 = vmul.f32 0.9, %v7781_v5  ;;  %v7785_v57 = vld [vmem:[%s14590_s10 + $0xd8] sm:$0xff]  ;;  %v6922_v11 = vadd.f32 %v14542_v21, %v14611_v3  ;;  %vm7814_vm9 = vcmp.gt.f32.partialorder %v7782_v28, 1.0 }
 0x3db   : > { %15691 = vst [vmem:[#allocation50_spill] sm:$0xff] %v14887_v22  ;;  %15692 = vst [vmem:[#allocation69_spill] sm:$0xff] %v14891_v58  ;;  %v14899_v26 = vmul.f32 0.9, %v7780_v15  ;;  %vm7817_vm10 = vcmp.gt.f32.partialorder %v7785_v57, 1.0  ;;  %v15695_v37 = vld [vmem:[#allocation52_spill] sm:$0xff]  ;;  %v14905_v4 = vpop.f32.mrf.mxu1  ;;  %v7293_v15 = vadd.f32 %v14538_v34, %v6923_v8 }
 0x3dc   : > { %15693 = vst [vmem:[#allocation61_spill] sm:$0xff] %v14893_v60  ;;  %v14903_v43 = vadd.f32 %v15695_v37, %v14520_v20  ;;  %15697 = vst [vmem:[#allocation64_spill] sm:$0xff] %v14905_v4  ;;  %v14908_v22 = vsel %vm7812_vm7, 1.0, %v14263_v39  ;;  %v14911_v5 = vsel %vm7815_vm8, 1.0, %v14263_v39  ;;  %v14913_v58 = vmul.f32 0.9, %v7783_v6 }
 0x3dd   : > { %15694 = vst [vmem:[#allocation63_spill] sm:$0xff] %v14899_v26  ;;  %15698 = vst [vmem:[#allocation91_spill] sm:$0xff] %v14908_v22  ;;  %v7784_v60 = vld [vmem:[%s14590_s10 + $0xd0] sm:$0xff]  ;;  %v15703_v20 = vld [vmem:[#allocation53_spill] sm:$0xff]  ;;  %v14923_v26 = vpop.f32.mrf.mxu0  ;;  %v11020_v6 = vpop.f32.mrf.mxu1 }
 0x3de   : > { %15696 = vst [vmem:[#allocation37_spill] sm:$0xff] %v14903_v43  ;;  %15699 = vst [vmem:[#allocation43_spill] sm:$0xff] %v14911_v5  ;;  %v15701_v21 = vld [vmem:[#allocation80_spill] sm:$0xff]  ;;  %v6925_v37 = vadd.f32 %v15703_v20, %v14621_v46  ;;  %vm7816_vm11 = vcmp.gt.f32.partialorder %v7784_v60, 1.0  ;;  %v15704_v4 = vld [vmem:[#allocation78_spill] sm:$0xff]  ;;  %v14930_v5 = vsel %vm7814_vm9, 1.0, %v14263_v39  ;;  %v7663_v20 = vadd.f32 %v11020_v6, %v7293_v15 }
 0x3df   : > { %15700 = vst [vmem:[#allocation97_spill] sm:$0xff] %v14913_v58  ;;  %v14918_v3 = vadd.f32 %v15701_v21, %v14525_v18  ;;  %v15705_v22 = vld [vmem:[#allocation76_spill] sm:$0xff]  ;;  %15707 = vst [vmem:[#allocation49_spill] sm:$0xff] %v14930_v5  ;;  %v14932_v58 = vmul.f32 0.9, %v7782_v28  ;;  %v14936_v18 = vsel %vm7817_vm10, 1.0, %v14263_v39  ;;  %v14956_v6 = vpop.f32.mrf.mxu0 }
 0x3e0   : > { %v14927_v43 = vadd.f32 %v15705_v22, %v15704_v4  ;;  %15709 = vst [vmem:[#allocation74_spill] sm:$0xff] %v14936_v18  ;;  %v15710_v34 = vld [vmem:[#allocation82_spill] sm:$0xff]  ;;  %v15711_v8 = vld [vmem:[#allocation55_spill] sm:$0xff]  ;;  %v15713_v22 = vld [vmem:[#allocation81_spill] sm:$0xff]  ;;  %v14950_v18 = vsel %vm7816_vm11, 1.0, %v14263_v39 }
 0x3e1   : > { %15702 = vst [vmem:[#allocation98_spill] sm:$0xff] %v14918_v3  ;;  %15708 = vst [vmem:[#allocation51_spill] sm:$0xff] %v14932_v58  ;;  %v7292_v46 = vadd.f32 %v15710_v34, %v6922_v11  ;;  %v6924_v21 = vadd.f32 %v15711_v8, %v14625_v55  ;;  %v14941_v3 = vmul.f32 0.9, %v7785_v57  ;;  %v15714_v4 = vld [vmem:[#allocation83_spill] sm:$0xff]  ;;  %v15715_v28 = vld [vmem:[#allocation16_spill] sm:$0xff]  ;;  %v7503_v58 = vpop.f32.mrf.mxu1  ;;  %v7919_v34 = vadd.f32 %v14616_v42, %v7663_v20 }
 0x3e2   : > { %15706 = vst [vmem:[#allocation71_spill] sm:$0xff] %v14927_v43  ;;  %v14945_v43 = vadd.f32 %v15714_v4, %v15713_v22  ;;  %v6927_v5 = vadd.f32 %v15715_v28, %v14629_v62  ;;  %15716 = vst [vmem:[#allocation77_spill] sm:$0xff] %v14950_v18  ;;  %v14952_v11 = vmul.f32 0.9, %v7784_v60  ;;  %v7787_v55 = vld [vmem:[%s14590_s10 + $0xe8] sm:$0xff]  ;;  %v15718_v15 = vld [vmem:[#allocation84_spill] sm:$0xff] }
 0x3e3   : > { %15712 = vst [vmem:[#allocation73_spill] sm:$0xff] %v14941_v3  ;;  %v7295_v57 = vadd.f32 %v15718_v15, %v6925_v37  ;;  %v7662_v8 = vadd.f32 %v7503_v58, %v7292_v46  ;;  %vm7819_vm12 = vcmp.gt.f32.partialorder %v7787_v55, 1.0  ;;  %v15719_v39 = vld [vmem:[#allocation54_spill] sm:$0xff]  ;;  %v15720_v62 = vld [vmem:[#allocation79_spill] sm:$0xff]  ;;  %v15723_v37 = vld [vmem:[#allocation17_spill] sm:$0xff]  ;;  %v11023_v46 = vpop.f32.mrf.mxu1 }
 0x3e4   : > { %15717 = vst [vmem:[#allocation75_spill] sm:$0xff] %v14952_v11  ;;  %v14967_v22 = vadd.f32 %v15720_v62, %v15719_v39  ;;  %v15722_v60 = vld [vmem:[#allocation18_spill] sm:$0xff]  ;;  %v6929_v28 = vadd.f32 %v15723_v37, %v14648_v56  ;;  %v15724_v42 = vld [vmem:[#allocation19_spill] sm:$0xff]  ;;  %v14979_v15 = vld [vmem:[%s14590_s10 + $0xf8] sm:$0xff]  ;;  %v7951_v39 = vsub.f32 %v7919_v34, %v14614_v45  ;;  %v15000_v45 = vpop.f32.mrf.mxu0 }
 0x3e5   : > { %v6926_v4 = vadd.f32 %v15722_v60, %v14636_v63  ;;  %v6928_v58 = vadd.f32 %v15724_v42, %v14661_v23  ;;  %v14976_v20 = vld [vmem:[%s14590_s10 + $0xe0] sm:$0xff]  ;;  %v14982_v18 = vld [vmem:[%s14590_s10 + $0xf0] sm:$0xff]  ;;  %v15726_v11 = vld [vmem:[#allocation85_spill] sm:$0xff]  ;;  %v7918_v63 = vadd.f32 %v14643_v52, %v7662_v8  ;;  %v7665_v62 = vadd.f32 %v11023_v46, %v7295_v57  ;;  %v7513_v23 = vpop.f32.mrf.mxu1 }
 0x3e6   : > { %15721 = vst [vmem:[#allocation52_spill] sm:$0xff] %v14967_v22  ;;  %15725 = vst [vmem:[#allocation80_spill] sm:$0xff] %v14982_v18  ;;  %v7294_v3 = vadd.f32 %v15726_v11, %v6924_v21  ;;  %v15727_v60 = vld [vmem:[#allocation15_spill] sm:$0xff]  ;;  %v14989_v42 = vld [vmem:[#allocation2] sm:$0xff]  ;;  %v14995_v18 = vmul.f32 0.9, %v7787_v55  ;;  %v7299_v34 = vadd.f32 %v14574_v41, %v6929_v28 }
 0x3e7   : > { %v7297_v56 = vadd.f32 %v15727_v60, %v6927_v5  ;;  %v8111_v37 = vld [vmem:[%s11336_s19 + $0x8] sm:$0xff]  ;;  %v14993_v22 = vsel %vm7819_vm12, 1.0, %v14989_v42  ;;  %v14998_v21 = vmul.f32 0.9, %v14976_v20  ;;  %vm7983_vm13 = vcmp.gt.f32.partialorder %v7951_v39, 1.0  ;;  %8079 = vst [vmem:[%s14963_s18 + $0x8] sm:$0xff] %v7951_v39 }
 0x3e8   : > { %v7950_v52 = vsub.f32 %v7918_v63, %v14641_v17  ;;  %v7921_v5 = vadd.f32 %v14656_v12, %v7665_v62  ;;  %v7664_v11 = vadd.f32 %v7513_v23, %v7294_v3  ;;  %v7296_v57 = vadd.f32 %v14568_v33, %v6926_v4  ;;  %v15728_v55 = vld [vmem:[#allocation25_spill] sm:$0xff]  ;;  %v8110_v17 = vld [vmem:[%s11336_s19] sm:$0xff]  ;;  %v11026_v63 = vpop.f32.mrf.mxu1  ;;  %v15729_v3 = vld [vmem:[#allocation8_spill] sm:$0xff] }
 0x3e9   : > { %v7298_v8 = vadd.f32 %v15728_v55, %v6928_v58  ;;  %v8723_v46 = vsel %vm7983_vm13, 1.0, %v14989_v42  ;;  %v15730_v41 = vld [vmem:[#allocation86_spill] sm:$0xff]  ;;  %v15731_v28 = vld [vmem:[#allocation20_spill] sm:$0xff]  ;;  %v8113_v60 = vld [vmem:[%s11336_s19 + $0x18] sm:$0xff]  ;;  %v7667_v23 = vadd.f32 %v11026_v63, %v7297_v56  ;;  %v15025_v55 = vpop.f32.mrf.mxu0  ;;  %vm7818_vm8 = vcmp.gt.f32.partialorder %v14976_v20, 1.0 }
 0x3ea   : > { %v8143_v12 = vadd.f32 %v8723_v46, %v8111_v37  ;;  %vm7982_vm14 = vcmp.gt.f32.partialorder %v7950_v52, 1.0  ;;  %v7953_v39 = vsub.f32 %v7921_v5, %v15729_v3  ;;  %v7920_v33 = vadd.f32 %v14666_v38, %v7664_v11  ;;  %8078 = vst [vmem:[%s14963_s18] sm:$0xff] %v7950_v52  ;;  %v7523_v37 = vpop.f32.mrf.mxu1  ;;  %v15732_v38 = vld [vmem:[#allocation96_spill] sm:$0xff] }
 0x3eb   : > { %v6931_v4 = vadd.f32 %v15730_v41, %v14671_v1  ;;  %v6930_v58 = vadd.f32 %v15731_v28, %v14683_v10  ;;  %v8722_v62 = vsel %vm7982_vm14, 1.0, %v14989_v42  ;;  %v7666_v11 = vadd.f32 %v7523_v37, %v7296_v57  ;;  %v15733_v1 = vld [vmem:[#allocation21_spill] sm:$0xff]  ;;  %v15734_v10 = vld [vmem:[#allocation26_spill] sm:$0xff]  ;;  %v8112_v56 = vld [vmem:[%s11336_s19 + $0x10] sm:$0xff] }
 0x3ec   : > { %8175 = vst [vmem:[%s15012_s22 + $0x8] sm:$0xff] %v8143_v12  ;;  %v8142_v5 = vadd.f32 %v8722_v62, %v8110_v17  ;;  %vm7985_vm15 = vcmp.gt.f32.partialorder %v7953_v39, 1.0  ;;  %v7952_v52 = vsub.f32 %v7920_v33, %v15732_v38  ;;  %8081 = vst [vmem:[%s14963_s18 + $0x18] sm:$0xff] %v7953_v39  ;;  %v6933_v46 = vadd.f32 %v15733_v1, %v14695_v54  ;;  %v11029_v17 = vpop.f32.mrf.mxu1  ;;  %v15735_v33 = vld [vmem:[#allocation27_spill] sm:$0xff]  ;;  %v15736_v28 = vld [vmem:[#allocation6_spill] sm:$0xff] }
 0x3ed   : > { %v6932_v3 = vadd.f32 %v15734_v10, %v14708_v25  ;;  %v8725_v41 = vsel %vm7985_vm15, 1.0, %v14989_v42  ;;  %v7923_v63 = vadd.f32 %v14678_v35, %v7667_v23  ;;  %v7922_v57 = vadd.f32 %v14690_v24, %v7666_v11  ;;  %v15737_v37 = vld [vmem:[#allocation32_spill] sm:$0xff]  ;;  %v15044_v23 = vpop.f32.mrf.mxu0  ;;  %v15738_v24 = vld [vmem:[#allocation10_spill] sm:$0xff]  ;;  %v15739_v11 = vld [vmem:[#allocation67_spill] sm:$0xff] }
 0x3ee   : > { %8174 = vst [vmem:[%s15012_s22] sm:$0xff] %v8142_v5  ;;  %v8145_v12 = vadd.f32 %v8725_v41, %v8113_v60  ;;  %vm7984_vm0 = vcmp.gt.f32.partialorder %v7952_v52, 1.0  ;;  %v7669_v39 = vadd.f32 %v11029_v17, %v7299_v34  ;;  %8080 = vst [vmem:[%s14963_s18 + $0x10] sm:$0xff] %v7952_v52  ;;  %v7301_v54 = vadd.f32 %v15735_v33, %v6931_v4  ;;  %v7533_v35 = vpop.f32.mrf.mxu1  ;;  %v8115_v5 = vld [vmem:[%s11336_s19 + $0x28] sm:$0xff]  ;;  %v15740_v1 = vld [vmem:[#allocation42_spill] sm:$0xff] }
 0x3ef   : > { %v7300_v25 = vadd.f32 %v15736_v28, %v6930_v58  ;;  %v8724_v62 = vsel %vm7984_vm0, 1.0, %v14989_v42  ;;  %v7955_v38 = vsub.f32 %v7923_v63, %v15737_v37  ;;  %v7954_v34 = vsub.f32 %v7922_v57, %v15738_v24  ;;  %v15741_v41 = vld [vmem:[#allocation87_spill] sm:$0xff]  ;;  %v8114_v17 = vld [vmem:[%s11336_s19 + $0x20] sm:$0xff]  ;;  %v15065_v37 = vpop.f32.mrf.mxu0  ;;  %v15745_v24 = vld [vmem:[#allocation56_spill] sm:$0xff] }
 0x3f0   : > { %8177 = vst [vmem:[%s15012_s22 + $0x18] sm:$0xff] %v8145_v12  ;;  %v8144_v60 = vadd.f32 %v8724_v62, %v8112_v56  ;;  %v7925_v4 = vadd.f32 %v14703_v7, %v7669_v39  ;;  %v7668_v52 = vadd.f32 %v7533_v35, %v7298_v8  ;;  %v7303_v58 = vadd.f32 %v15739_v11, %v6933_v46  ;;  %v11032_v33 = vpop.f32.mrf.mxu1  ;;  %v15742_v12 = vld [vmem:[#allocation35_spill] sm:$0xff]  ;;  %v15743_v46 = vld [vmem:[#allocation24_spill] sm:$0xff]  ;;  %v8117_v39 = vld [vmem:[%s11336_s19 + $0x38] sm:$0xff] }
 0x3f1   : > { %v7302_v10 = vadd.f32 %v15740_v1, %v6932_v3  ;;  %v6935_v63 = vadd.f32 %v15741_v41, %v14718_v32  ;;  %vm7987_vm1 = vcmp.gt.f32.partialorder %v7955_v38, 1.0  ;;  %8083 = vst [vmem:[%s14963_s18 + $0x28] sm:$0xff] %v7955_v38  ;;  %vm7986_vm2 = vcmp.gt.f32.partialorder %v7954_v34, 1.0  ;;  %8082 = vst [vmem:[%s14963_s18 + $0x20] sm:$0xff] %v7954_v34  ;;  %v15744_v35 = vld [vmem:[#allocation7_spill] sm:$0xff] }
 0x3f2   : > { %8176 = vst [vmem:[%s15012_s22 + $0x10] sm:$0xff] %v8144_v60  ;;  %v8727_v56 = vsel %vm7987_vm1, 1.0, %v14989_v42  ;;  %v7957_v7 = vsub.f32 %v7925_v4, %v15742_v12  ;;  %v7924_v8 = vadd.f32 %v14713_v31, %v7668_v52  ;;  %v6934_v3 = vadd.f32 %v15743_v46, %v14730_v44  ;;  %v7543_v62 = vpop.f32.mrf.mxu1  ;;  %v8119_v46 = vld [vmem:[%s11336_s19 + $0x48] sm:$0xff] }
 0x3f3   : > { %v8147_v32 = vadd.f32 %v8727_v56, %v8115_v5  ;;  %v8726_v57 = vsel %vm7986_vm2, 1.0, %v14989_v42  ;;  %v7671_v28 = vadd.f32 %v11032_v33, %v7301_v54  ;;  %v7670_v60 = vadd.f32 %v7543_v62, %v7300_v25  ;;  %v15746_v5 = vld [vmem:[#allocation88_spill] sm:$0xff]  ;;  %v15748_v56 = vld [vmem:[#allocation66_spill] sm:$0xff] }
 0x3f4   : > { %v8146_v38 = vadd.f32 %v8726_v57, %v8114_v17  ;;  %vm7989_vm3 = vcmp.gt.f32.partialorder %v7957_v7, 1.0  ;;  %v7956_v31 = vsub.f32 %v7924_v8, %v15744_v35  ;;  %8085 = vst [vmem:[%s14963_s18 + $0x38] sm:$0xff] %v7957_v7  ;;  %v6937_v44 = vadd.f32 %v15745_v24, %v14742_v0  ;;  %v8116_v54 = vld [vmem:[%s11336_s19 + $0x30] sm:$0xff]  ;;  %v11035_v11 = vpop.f32.mrf.mxu1  ;;  %v15747_v0 = vld [vmem:[#allocation11_spill] sm:$0xff]  ;;  %v15084_v7 = vpop.f32.mrf.mxu0  ;;  %v15751_v35 = vld [vmem:[#allocation57_spill] sm:$0xff] }
 0x3f5   : > { %v6936_v34 = vadd.f32 %v15746_v5, %v14755_v53  ;;  %8179 = vst [vmem:[%s15012_s22 + $0x28] sm:$0xff] %v8147_v32  ;;  %v8729_v4 = vsel %vm7989_vm3, 1.0, %v14989_v42  ;;  %v7927_v52 = vadd.f32 %v14725_v50, %v7671_v28  ;;  %v7926_v25 = vadd.f32 %v14737_v19, %v7670_v60  ;;  %v15749_v19 = vld [vmem:[#allocation38_spill] sm:$0xff]  ;;  %v15750_v57 = vld [vmem:[#allocation28_spill] sm:$0xff]  ;;  %v8121_v60 = vld [vmem:[%s11336_s19 + $0x58] sm:$0xff] }
 0x3f6   : > { %8178 = vst [vmem:[%s15012_s22 + $0x20] sm:$0xff] %v8146_v38  ;;  %v8149_v1 = vadd.f32 %v8729_v4, %v8117_v39  ;;  %vm7988_vm4 = vcmp.gt.f32.partialorder %v7956_v31, 1.0  ;;  %v7673_v41 = vadd.f32 %v11035_v11, %v7303_v58  ;;  %8084 = vst [vmem:[%s14963_s18 + $0x30] sm:$0xff] %v7956_v31  ;;  %v7305_v17 = vadd.f32 %v15747_v0, %v6935_v63  ;;  %v7553_v50 = vpop.f32.mrf.mxu1  ;;  %v8118_v28 = vld [vmem:[%s11336_s19 + $0x40] sm:$0xff]  ;;  %v15105_v5 = vpop.f32.mrf.mxu0  ;;  %v15753_v4 = vld [vmem:[#allocation59_spill] sm:$0xff] }
 0x3f7   : > { %v7304_v53 = vadd.f32 %v14779_v47, %v6934_v3  ;;  %v8728_v33 = vsel %vm7988_vm4, 1.0, %v14989_v42  ;;  %v7959_v12 = vsub.f32 %v7927_v52, %v15748_v56  ;;  %v7958_v58 = vsub.f32 %v7926_v25, %v15749_v19  ;;  %v15755_v11 = vld [vmem:[#allocation30_spill] sm:$0xff]  ;;  %v15756_v0 = vld [vmem:[#allocation40_spill] sm:$0xff] }
 0x3f8   : > { %8181 = vst [vmem:[%s15012_s22 + $0x38] sm:$0xff] %v8149_v1  ;;  %v8148_v8 = vadd.f32 %v8728_v33, %v8116_v54  ;;  %v7929_v63 = vadd.f32 %v14750_v36, %v7673_v41  ;;  %v7672_v32 = vadd.f32 %v7553_v50, %v7302_v10  ;;  %v7307_v47 = vadd.f32 %v14826_v48, %v6937_v44  ;;  %v11038_v62 = vpop.f32.mrf.mxu1  ;;  %v15752_v48 = vld [vmem:[#allocation39_spill] sm:$0xff]  ;;  %v8120_v41 = vld [vmem:[%s11336_s19 + $0x50] sm:$0xff] }
 0x3f9   : > { %v7306_v3 = vadd.f32 %v14877_v29, %v6936_v34  ;;  %v6939_v39 = vadd.f32 %v15750_v57, %v14765_v40  ;;  %vm7991_vm5 = vcmp.gt.f32.partialorder %v7959_v12, 1.0  ;;  %8087 = vst [vmem:[%s14963_s18 + $0x48] sm:$0xff] %v7959_v12  ;;  %vm7990_vm6 = vcmp.gt.f32.partialorder %v7958_v58, 1.0  ;;  %8086 = vst [vmem:[%s14963_s18 + $0x40] sm:$0xff] %v7958_v58  ;;  %v15757_v56 = vld [vmem:[#allocation68_spill] sm:$0xff]  ;;  %v8123_v57 = vld [vmem:[%s11336_s19 + $0x68] sm:$0xff] }
 0x3fa   : > { %8180 = vst [vmem:[%s15012_s22 + $0x30] sm:$0xff] %v8148_v8  ;;  %v8731_v38 = vsel %vm7991_vm5, 1.0, %v14989_v42  ;;  %v7961_v36 = vsub.f32 %v7929_v63, %v15751_v35  ;;  %v7928_v10 = vadd.f32 %v14760_v16, %v7672_v32  ;;  %v6938_v29 = vadd.f32 %v15752_v48, %v14777_v49  ;;  %v7563_v44 = vpop.f32.mrf.mxu1  ;;  %v15754_v49 = vld [vmem:[#allocation31_spill] sm:$0xff]  ;;  %v15125_v63 = vpop.f32.mrf.mxu0  ;;  %v15761_v35 = vld [vmem:[#allocation41_spill] sm:$0xff] }
 0x3fb   : > { %v8151_v31 = vadd.f32 %v8731_v38, %v8119_v46  ;;  %v8730_v40 = vsel %vm7990_vm6, 1.0, %v14989_v42  ;;  %v7675_v24 = vadd.f32 %v11038_v62, %v7305_v17  ;;  %v7674_v16 = vadd.f32 %v7563_v44, %v7304_v53  ;;  %v15758_v46 = vld [vmem:[#allocation12_spill] sm:$0xff] }
 0x3fc   : > { %v8150_v34 = vadd.f32 %v8730_v40, %v8118_v28  ;;  %vm7993_vm7 = vcmp.gt.f32.partialorder %v7961_v36, 1.0  ;;  %v7960_v54 = vsub.f32 %v7928_v10, %v15753_v4  ;;  %8089 = vst [vmem:[%s14963_s18 + $0x58] sm:$0xff] %v7961_v36  ;;  %v6941_v52 = vadd.f32 %v15754_v49, %v14789_v9  ;;  %v11041_v33 = vpop.f32.mrf.mxu1  ;;  %v15759_v28 = vld [vmem:[#allocation90_spill] sm:$0xff]  ;;  %v15760_v38 = vld [vmem:[#allocation72_spill] sm:$0xff] }
 0x3fd   : > { %v6940_v1 = vadd.f32 %v15755_v11, %v14802_v30  ;;  %8183 = vst [vmem:[%s15012_s22 + $0x48] sm:$0xff] %v8151_v31  ;;  %v8733_v25 = vsel %vm7993_vm7, 1.0, %v14989_v42  ;;  %v7931_v17 = vadd.f32 %v15756_v0, %v7675_v24  ;;  %v7930_v12 = vadd.f32 %v15757_v56, %v7674_v16  ;;  %v8122_v10 = vld [vmem:[%s11336_s19 + $0x60] sm:$0xff]  ;;  %v15762_v31 = vld [vmem:[#allocation92_spill] sm:$0xff]  ;;  %v15146_v16 = vpop.f32.mrf.mxu0 }
 0x3fe   : > { %8182 = vst [vmem:[%s15012_s22 + $0x40] sm:$0xff] %v8150_v34  ;;  %v8153_v53 = vadd.f32 %v8733_v25, %v8121_v60  ;;  %vm7992_vm9 = vcmp.gt.f32.partialorder %v7960_v54, 1.0  ;;  %v7677_v50 = vadd.f32 %v11041_v33, %v7307_v47  ;;  %8088 = vst [vmem:[%s14963_s18 + $0x50] sm:$0xff] %v7960_v54  ;;  %v7309_v9 = vadd.f32 %v14923_v26, %v6939_v39  ;;  %v7573_v58 = vpop.f32.mrf.mxu1  ;;  %v8125_v34 = vld [vmem:[%s11336_s19 + $0x78] sm:$0xff]  ;;  %v15767_v25 = vld [vmem:[#allocation36_spill] sm:$0xff] }
 0x3ff   : > { %v7308_v30 = vadd.f32 %v14956_v6, %v6938_v29  ;;  %v8732_v8 = vsel %vm7992_vm9, 1.0, %v14989_v42  ;;  %v7963_v19 = vsub.f32 %v7931_v17, %v15758_v46  ;;  %v7962_v47 = vsub.f32 %v7930_v12, %v15759_v28  ;;  %v15768_v0 = vld [vmem:[#allocation58_spill] sm:$0xff]  ;;  %v10979_v28 = vpop.f32.mrf.mxu0 }
 0x400   : > { %8185 = vst [vmem:[%s15012_s22 + $0x58] sm:$0xff] %v8153_v53  ;;  %v8152_v32 = vadd.f32 %v8732_v8, %v8120_v41  ;;  %v7933_v26 = vadd.f32 %v14797_v2, %v7677_v50  ;;  %v7676_v39 = vadd.f32 %v7573_v58, %v7306_v3  ;;  %v7311_v6 = vadd.f32 %v15000_v45, %v6941_v52  ;;  %v11044_v48 = vpop.f32.mrf.mxu1  ;;  %v15763_v3 = vld [vmem:[#allocation14_spill] sm:$0xff]  ;;  %v15764_v45 = vld [vmem:[#allocation65_spill] sm:$0xff]  ;;  %v8124_v53 = vld [vmem:[%s11336_s19 + $0x70] sm:$0xff] }
 0x401   : > { %v7310_v62 = vadd.f32 %v15025_v55, %v6940_v1  ;;  %v6943_v36 = vadd.f32 %v15761_v35, %v15760_v38  ;;  %vm7995_vm10 = vcmp.gt.f32.partialorder %v7963_v19, 1.0  ;;  %8091 = vst [vmem:[%s14963_s18 + $0x68] sm:$0xff] %v7963_v19  ;;  %vm7994_vm11 = vcmp.gt.f32.partialorder %v7962_v47, 1.0  ;;  %8090 = vst [vmem:[%s14963_s18 + $0x60] sm:$0xff] %v7962_v47  ;;  %v15765_v55 = vld [vmem:[#allocation34_spill] sm:$0xff]  ;;  %v15766_v52 = vld [vmem:[#allocation93_spill] sm:$0xff] }
 0x402   : > { %8184 = vst [vmem:[%s15012_s22 + $0x50] sm:$0xff] %v8152_v32  ;;  %v8735_v29 = vsel %vm7995_vm10, 1.0, %v14989_v42  ;;  %v7965_v2 = vsub.f32 %v7933_v26, %v15762_v31  ;;  %v7932_v40 = vadd.f32 %v15763_v3, %v7676_v39  ;;  %v6942_v60 = vadd.f32 %v15765_v55, %v15764_v45  ;;  %v7583_v54 = vpop.f32.mrf.mxu1  ;;  %v15769_v56 = vld [vmem:[#allocation22_spill] sm:$0xff]  ;;  %v8127_v26 = vld [vmem:[%s11336_s19 + $0x88] sm:$0xff]  ;;  %v15773_v31 = vld [vmem:[#allocation45_spill] sm:$0xff] }
 0x403   : > { %v8155_v24 = vadd.f32 %v8735_v29, %v8123_v57  ;;  %v8734_v44 = vsel %vm7994_vm11, 1.0, %v14989_v42  ;;  %v7679_v4 = vadd.f32 %v11044_v48, %v7309_v9  ;;  %v7678_v1 = vadd.f32 %v7583_v54, %v7308_v30  ;;  %v15770_v30 = vld [vmem:[#allocation60_spill] sm:$0xff]  ;;  %v15771_v19 = vld [vmem:[#allocation94_spill] sm:$0xff]  ;;  %v15772_v39 = vld [vmem:[#allocation95_spill] sm:$0xff] }
 0x404   : > { %v8154_v49 = vadd.f32 %v8734_v44, %v8122_v10  ;;  %vm7997_vm12 = vcmp.gt.f32.partialorder %v7965_v2, 1.0  ;;  %v7964_v11 = vsub.f32 %v7932_v40, %v15766_v52  ;;  %8093 = vst [vmem:[%s14963_s18 + $0x78] sm:$0xff] %v7965_v2  ;;  %v6945_v41 = vadd.f32 %v15767_v25, %v14836_v51  ;;  %v11047_v50 = vpop.f32.mrf.mxu1  ;;  %v8126_v10 = vld [vmem:[%s11336_s19 + $0x80] sm:$0xff]  ;;  %v15776_v3 = vld [vmem:[#allocation89_spill] sm:$0xff] }
 0x405   : > { %v6944_v17 = vadd.f32 %v15768_v0, %v14851_v14  ;;  %8187 = vst [vmem:[%s15012_s22 + $0x68] sm:$0xff] %v8155_v24  ;;  %v8737_v33 = vsel %vm7997_vm12, 1.0, %v14989_v42  ;;  %v7935_v12 = vadd.f32 %v15769_v56, %v7679_v4  ;;  %v7934_v8 = vadd.f32 %v15770_v30, %v7678_v1  ;;  %v8129_v45 = vld [vmem:[%s11336_s19 + $0x98] sm:$0xff]  ;;  %v7263_v24 = vpop.f32.mrf.mxu0 }
 0x406   : > { %8186 = vst [vmem:[%s15012_s22 + $0x60] sm:$0xff] %v8154_v49  ;;  %v8157_v9 = vadd.f32 %v8737_v33, %v8125_v34  ;;  %vm7996_vm13 = vcmp.gt.f32.partialorder %v7964_v11, 1.0  ;;  %v7681_v46 = vadd.f32 %v11047_v50, %v7311_v6  ;;  %8092 = vst [vmem:[%s14963_s18 + $0x70] sm:$0xff] %v7964_v11  ;;  %v7313_v51 = vadd.f32 %v15044_v23, %v6943_v36  ;;  %v7593_v32 = vpop.f32.mrf.mxu1  ;;  %v15777_v34 = vld [vmem:[#allocation29_spill] sm:$0xff]  ;;  %v15778_v49 = vld [vmem:[#allocation44_spill] sm:$0xff] }
 0x407   : > { %v8736_v14 = vsel %vm7996_vm13, 1.0, %v14989_v42  ;;  %v7967_v58 = vsub.f32 %v7935_v12, %v15771_v19  ;;  %v15167_v57 = vsel %vm7818_vm8, 1.0, %v14989_v42  ;;  %v7966_v23 = vsub.f32 %v7934_v8, %v15772_v39  ;;  %v15779_v11 = vld [vmem:[#allocation13_spill] sm:$0xff]  ;;  %v15782_v50 = vld [vmem:[#allocation46_spill] sm:$0xff]  ;;  %v8131_v19 = vld [vmem:[%s11336_s19 + $0xa8] sm:$0xff] }
 0x408   : > { %8189 = vst [vmem:[%s15012_s22 + $0x78] sm:$0xff] %v8157_v9  ;;  %v8156_v47 = vadd.f32 %v8736_v14, %v8124_v53  ;;  %v7937_v6 = vadd.f32 %v14844_v27, %v7681_v46  ;;  %v7680_v38 = vadd.f32 %v7593_v32, %v7310_v62  ;;  %v7312_v35 = vadd.f32 %v15065_v37, %v6942_v60  ;;  %v11050_v48 = vpop.f32.mrf.mxu1  ;;  %v15774_v27 = vld [vmem:[#allocation47_spill] sm:$0xff]  ;;  %v15775_v37 = vld [vmem:[#allocation48_spill] sm:$0xff]  ;;  %v15780_v53 = vld [vmem:[#allocation62_spill] sm:$0xff] }
 0x409   : > { %v7315_v36 = vadd.f32 %v15084_v7, %v6945_v41  ;;  %v7314_v20 = vadd.f32 %v15105_v5, %v6944_v17  ;;  %vm7999_vm14 = vcmp.gt.f32.partialorder %v7967_v58, 1.0  ;;  %8095 = vst [vmem:[%s14963_s18 + $0x88] sm:$0xff] %v7967_v58  ;;  %vm7998_vm15 = vcmp.gt.f32.partialorder %v7966_v23, 1.0  ;;  %8094 = vst [vmem:[%s14963_s18 + $0x80] sm:$0xff] %v7966_v23  ;;  %v8128_v41 = vld [vmem:[%s11336_s19 + $0x90] sm:$0xff]  ;;  %v15783_v30 = vld [vmem:[#allocation9_spill] sm:$0xff] }
 0x40a   : > { %8188 = vst [vmem:[%s15012_s22 + $0x70] sm:$0xff] %v8156_v47  ;;  %v8739_v29 = vsel %vm7999_vm14, 1.0, %v14989_v42  ;;  %v7969_v2 = vsub.f32 %v7937_v6, %v15773_v31  ;;  %v7936_v62 = vadd.f32 %v15774_v27, %v7680_v38  ;;  %v6947_v7 = vadd.f32 %v15776_v3, %v15775_v37  ;;  %v7603_v60 = vpop.f32.mrf.mxu1  ;;  %v15784_v58 = vld [vmem:[#allocation50_spill] sm:$0xff]  ;;  %v15785_v47 = vld [vmem:[#allocation61_spill] sm:$0xff]  ;;  %v15787_v31 = vld [vmem:[#allocation63_spill] sm:$0xff] }
 0x40b   : > { %v8159_v5 = vadd.f32 %v8739_v29, %v8127_v26  ;;  %v8738_v40 = vsel %vm7998_vm15, 1.0, %v14989_v42  ;;  %v7683_v55 = vadd.f32 %v11050_v48, %v7313_v51  ;;  %v7682_v54 = vadd.f32 %v7603_v60, %v7312_v35  ;;  %v10982_v51 = vpop.f32.mrf.mxu0  ;;  %v8130_v35 = vld [vmem:[%s11336_s19 + $0xa0] sm:$0xff]  ;;  %v15786_v48 = vld [vmem:[#allocation69_spill] sm:$0xff] }
 0x40c   : > { %v8158_v44 = vadd.f32 %v8738_v40, %v8126_v10  ;;  %vm8001_vm0 = vcmp.gt.f32.partialorder %v7969_v2, 1.0  ;;  %v7968_v4 = vsub.f32 %v7936_v62, %v15777_v34  ;;  %8097 = vst [vmem:[%s14963_s18 + $0x98] sm:$0xff] %v7969_v2  ;;  %v6946_v52 = vadd.f32 %v15778_v49, %v14873_v59  ;;  %v11053_v17 = vpop.f32.mrf.mxu1  ;;  %v15781_v59 = vld [vmem:[#allocation37_spill] sm:$0xff] }
 0x40d   : > { %v6949_v1 = vadd.f32 %v15779_v11, %v14881_v61  ;;  %8191 = vst [vmem:[%s15012_s22 + $0x88] sm:$0xff] %v8159_v5  ;;  %v8741_v25 = vsel %vm8001_vm0, 1.0, %v14989_v42  ;;  %v7939_v0 = vadd.f32 %v14866_v13, %v7683_v55  ;;  %v7938_v56 = vadd.f32 %v15780_v53, %v7682_v54  ;;  %v7273_v37 = vpop.f32.mrf.mxu0  ;;  %v15790_v55 = vld [vmem:[#allocation23_spill] sm:$0xff]  ;;  %v8132_v54 = vld [vmem:[%s11336_s19 + $0xb0] sm:$0xff]  ;;  %v15793_v49 = vld [vmem:[#allocation97_spill] sm:$0xff] }
 0x40e   : > { %8190 = vst [vmem:[%s15012_s22 + $0x80] sm:$0xff] %v8158_v44  ;;  %v8161_v33 = vadd.f32 %v8741_v25, %v8129_v45  ;;  %vm8000_vm1 = vcmp.gt.f32.partialorder %v7968_v4, 1.0  ;;  %v7685_v12 = vadd.f32 %v11053_v17, %v7315_v36  ;;  %8096 = vst [vmem:[%s14963_s18 + $0x90] sm:$0xff] %v7968_v4  ;;  %v6948_v9 = vadd.f32 %v15782_v50, %v15781_v59  ;;  %v7613_v46 = vpop.f32.mrf.mxu1  ;;  %v15789_v45 = vld [vmem:[#allocation98_spill] sm:$0xff] }
 0x40f   : > { %v8740_v61 = vsel %vm8000_vm1, 1.0, %v14989_v42  ;;  %v7971_v8 = vsub.f32 %v7939_v0, %v15783_v30  ;;  %v15205_v13 = vmul.f32 0.9, %v14979_v15  ;;  %v7970_v32 = vsub.f32 %v7938_v56, %v15784_v58  ;;  %v15792_v44 = vld [vmem:[#allocation70_spill] sm:$0xff]  ;;  %v8135_v30 = vld [vmem:[%s11336_s19 + $0xc8] sm:$0xff] }
 0x410   : > { %8193 = vst [vmem:[%s15012_s22 + $0x98] sm:$0xff] %v8161_v33  ;;  %v8160_v14 = vadd.f32 %v8740_v61, %v8128_v41  ;;  %v7941_v26 = vadd.f32 %v15785_v47, %v7685_v12  ;;  %v7684_v39 = vadd.f32 %v7613_v46, %v7314_v20  ;;  %v7317_v23 = vadd.f32 %v15125_v63, %v6947_v7  ;;  %v11056_v36 = vpop.f32.mrf.mxu1  ;;  %v15788_v7 = vld [vmem:[#allocation91_spill] sm:$0xff]  ;;  %v15795_v33 = vld [vmem:[#allocation33_spill] sm:$0xff]  ;;  %v15800_v47 = vld [vmem:[#allocation52_spill] sm:$0xff] }
 0x411   : > { %v7316_v6 = vadd.f32 %v15146_v16, %v6946_v52  ;;  %v7319_v38 = vadd.f32 %v10979_v28, %v6949_v1  ;;  %vm8003_vm2 = vcmp.gt.f32.partialorder %v7971_v8, 1.0  ;;  %8099 = vst [vmem:[%s14963_s18 + $0xa8] sm:$0xff] %v7971_v8  ;;  %vm8002_vm3 = vcmp.gt.f32.partialorder %v7970_v32, 1.0  ;;  %8098 = vst [vmem:[%s14963_s18 + $0xa0] sm:$0xff] %v7970_v32  ;;  %v8133_v28 = vld [vmem:[%s11336_s19 + $0xb8] sm:$0xff]  ;;  %v10985_v1 = vpop.f32.mrf.mxu0  ;;  %v15794_v41 = vld [vmem:[#allocation51_spill] sm:$0xff] }
 0x412   : > { %8192 = vst [vmem:[%s15012_s22 + $0x90] sm:$0xff] %v8160_v14  ;;  %v8743_v10 = vsel %vm8003_vm2, 1.0, %v14989_v42  ;;  %v7973_v29 = vsub.f32 %v7941_v26, %v15786_v48  ;;  %v7940_v2 = vadd.f32 %v15787_v31, %v7684_v39  ;;  %v7318_v63 = vadd.f32 %v7263_v24, %v6948_v9  ;;  %v7623_v62 = vpop.f32.mrf.mxu1  ;;  %v15791_v24 = vld [vmem:[#allocation71_spill] sm:$0xff]  ;;  %v15797_v9 = vld [vmem:[#allocation80_spill] sm:$0xff]  ;;  %v15798_v8 = vld [vmem:[#allocation49_spill] sm:$0xff] }
 0x413   : > { %v8163_v20 = vadd.f32 %v8743_v10, %v8131_v19  ;;  %v8742_v16 = vsel %vm8002_vm3, 1.0, %v14989_v42  ;;  %v7687_v27 = vadd.f32 %v11056_v36, %v7317_v23  ;;  %v7686_v40 = vadd.f32 %v7623_v62, %v7316_v6  ;;  %v15796_v12 = vld [vmem:[#allocation43_spill] sm:$0xff]  ;;  %v15799_v14 = vld [vmem:[#allocation73_spill] sm:$0xff]  ;;  %v15801_v26 = vld [vmem:[#allocation64_spill] sm:$0xff] }
 0x414   : > { %v8162_v3 = vadd.f32 %v8742_v16, %v8130_v35  ;;  %vm8005_vm4 = vcmp.gt.f32.partialorder %v7973_v29, 1.0  ;;  %v7972_v5 = vsub.f32 %v7940_v2, %v15788_v7  ;;  %vm7821_vm5 = vcmp.gt.f32.partialorder %v14979_v15, 1.0  ;;  %8101 = vst [vmem:[%s14963_s18 + $0xb8] sm:$0xff] %v7973_v29  ;;  %v11059_v11 = vpop.f32.mrf.mxu1  ;;  %v8134_v23 = vld [vmem:[%s11336_s19 + $0xc0] sm:$0xff]  ;;  %v15803_v48 = vld [vmem:[#allocation75_spill] sm:$0xff] }
 0x415   : > { %v6951_v60 = vadd.f32 %v15790_v55, %v15789_v45  ;;  %v6950_v34 = vadd.f32 %v15792_v44, %v15791_v24  ;;  %8195 = vst [vmem:[%s15012_s22 + $0xa8] sm:$0xff] %v8163_v20  ;;  %v8745_v4 = vsel %vm8005_vm4, 1.0, %v14989_v42  ;;  %v7943_v52 = vadd.f32 %v15793_v49, %v7687_v27  ;;  %v15802_v36 = vld [vmem:[#allocation74_spill] sm:$0xff]  ;;  %v15804_v27 = vld [vmem:[#allocation77_spill] sm:$0xff] }
 0x416   : > { %8194 = vst [vmem:[%s15012_s22 + $0xa0] sm:$0xff] %v8162_v3  ;;  %v8165_v25 = vadd.f32 %v8745_v4, %v8133_v28  ;;  %vm8004_vm6 = vcmp.gt.f32.partialorder %v7972_v5, 1.0  ;;  %v7942_v0 = vadd.f32 %v15794_v41, %v7686_v40  ;;  %v7689_v17 = vadd.f32 %v11059_v11, %v7319_v38  ;;  %8100 = vst [vmem:[%s14963_s18 + $0xb0] sm:$0xff] %v7972_v5  ;;  %v7633_v50 = vpop.f32.mrf.mxu1  ;;  %v7283_v38 = vpop.f32.mrf.mxu0  ;;  %v8136_v5 = vld [vmem:[%s11336_s19 + $0xd0] sm:$0xff] }
 0x417   : > { %v6953_v53 = vadd.f32 %v15795_v33, %v14945_v43  ;;  %v8744_v56 = vsel %vm8004_vm6, 1.0, %v14989_v42  ;;  %v7975_v59 = vsub.f32 %v7943_v52, %v15796_v12  ;;  %vm7820_vm7 = vcmp.gt.f32.partialorder %v15797_v9, 1.0  ;;  %v8139_v52 = vld [vmem:[%s11336_s19 + $0xe8] sm:$0xff]  ;;  %v8140_v12 = vld [vmem:[%s11336_s19 + $0xf0] sm:$0xff] }
 0x418   : > { %8197 = vst [vmem:[%s15012_s22 + $0xb8] sm:$0xff] %v8165_v25  ;;  %v8164_v61 = vadd.f32 %v8744_v56, %v8132_v54  ;;  %v7974_v46 = vsub.f32 %v7942_v0, %v15798_v8  ;;  %v7945_v19 = vadd.f32 %v15799_v14, %v7689_v17  ;;  %v7688_v58 = vadd.f32 %v7633_v50, %v7318_v63  ;;  %v11062_v6 = vpop.f32.mrf.mxu1  ;;  %v8137_v63 = vld [vmem:[%s11336_s19 + $0xd8] sm:$0xff]  ;;  %v8138_v25 = vld [vmem:[%s11336_s19 + $0xe0] sm:$0xff] }
 0x419   : > { %v7321_v32 = vadd.f32 %v10982_v51, %v6951_v60  ;;  %v7320_v43 = vadd.f32 %v7273_v37, %v6950_v34  ;;  %v6952_v39 = vadd.f32 %v15801_v26, %v15800_v47  ;;  %vm8007_vm8 = vcmp.gt.f32.partialorder %v7975_v59, 1.0  ;;  %8103 = vst [vmem:[%s14963_s18 + $0xc8] sm:$0xff] %v7975_v59  ;;  %v8141_v17 = vld [vmem:[%s11336_s19 + $0xf8] sm:$0xff] }
 0x41a   : > { %8196 = vst [vmem:[%s15012_s22 + $0xb0] sm:$0xff] %v8164_v61  ;;  %v8747_v35 = vsel %vm8007_vm8, 1.0, %v14989_v42  ;;  %vm8006_vm9 = vcmp.gt.f32.partialorder %v7974_v46, 1.0  ;;  %v7977_v10 = vsub.f32 %v7945_v19, %v15802_v36  ;;  %v7944_v51 = vadd.f32 %v15803_v48, %v7688_v58  ;;  %8102 = vst [vmem:[%s14963_s18 + $0xc0] sm:$0xff] %v7974_v46  ;;  %v7643_v16 = vpop.f32.mrf.mxu1 }
 0x41b   : > { %v7323_v29 = vadd.f32 %v10985_v1, %v6953_v53  ;;  %v8167_v31 = vadd.f32 %v8747_v35, %v8135_v30  ;;  %v8746_v2 = vsel %vm8006_vm9, 1.0, %v14989_v42  ;;  %v7691_v20 = vadd.f32 %v11062_v6, %v7321_v32 }
 0x41c   : > { %v8166_v28 = vadd.f32 %v8746_v2, %v8134_v23  ;;  %vm8009_vm10 = vcmp.gt.f32.partialorder %v7977_v10, 1.0  ;;  %v7976_v62 = vsub.f32 %v7944_v51, %v15804_v27  ;;  %v7690_v37 = vadd.f32 %v7643_v16, %v7320_v43  ;;  %8105 = vst [vmem:[%s14963_s18 + $0xd8] sm:$0xff] %v7977_v10  ;;  %v11065_v45 = vpop.f32.mrf.mxu1 }
 0x41d   : > { %v7322_v3 = vadd.f32 %v7283_v38, %v6952_v39  ;;  %8199 = vst [vmem:[%s15012_s22 + $0xc8] sm:$0xff] %v8167_v31  ;;  %v8749_v7 = vsel %vm8009_vm10, 1.0, %v14989_v42  ;;  %v7947_v40 = vadd.f32 %v14995_v18, %v7691_v20  ;;  %v7916_v55 = vmul.f32 0.9, %v15797_v9 }
 0x41e   : > { %8198 = vst [vmem:[%s15012_s22 + $0xc0] sm:$0xff] %v8166_v28  ;;  %v8169_v60 = vadd.f32 %v8749_v7, %v8137_v63  ;;  %vm8008_vm11 = vcmp.gt.f32.partialorder %v7976_v62, 1.0  ;;  %v7946_v24 = vadd.f32 %v14998_v21, %v7690_v37  ;;  %v7693_v44 = vadd.f32 %v11065_v45, %v7323_v29  ;;  %8104 = vst [vmem:[%s14963_s18 + $0xd0] sm:$0xff] %v7976_v62  ;;  %v7653_v54 = vpop.f32.mrf.mxu1 }
 0x41f   : > { %v8748_v34 = vsel %vm8008_vm11, 1.0, %v14989_v42  ;;  %v7979_v4 = vsub.f32 %v7947_v40, %v14993_v22  ;;  %v8721_v18 = vsel %vm7821_vm5, 1.0, %v14989_v42  ;;  %v7692_v1 = vadd.f32 %v7653_v54, %v7322_v3 }
 0x420   : > { %8201 = vst [vmem:[%s15012_s22 + $0xd8] sm:$0xff] %v8169_v60  ;;  %v8168_v49 = vadd.f32 %v8748_v34, %v8136_v5  ;;  %v7978_v21 = vsub.f32 %v7946_v24, %v15167_v57  ;;  %v7949_v11 = vadd.f32 %v15205_v13, %v7693_v44  ;;  %v8720_v22 = vsel %vm7820_vm7, 1.0, %v14989_v42 }
 0x421   : > { %vm8011_vm12 = vcmp.gt.f32.partialorder %v7979_v4, 1.0  ;;  %8107 = vst [vmem:[%s14963_s18 + $0xe8] sm:$0xff] %v7979_v4  ;;  %v7948_v57 = vadd.f32 %v7916_v55, %v7692_v1 }
 0x422   : > { %8200 = vst [vmem:[%s15012_s22 + $0xd0] sm:$0xff] %v8168_v49  ;;  %v8751_v15 = vsel %vm8011_vm12, 1.0, %v14989_v42  ;;  %vm8010_vm13 = vcmp.gt.f32.partialorder %v7978_v21, 1.0  ;;  %v7981_v41 = vsub.f32 %v7949_v11, %v8721_v18  ;;  %8106 = vst [vmem:[%s14963_s18 + $0xe0] sm:$0xff] %v7978_v21 }
 0x423   : > { %v8171_v13 = vadd.f32 %v8751_v15, %v8139_v52  ;;  %v8750_v0 = vsel %vm8010_vm13, 1.0, %v14989_v42  ;;  %v7980_v53 = vsub.f32 %v7948_v57, %v8720_v22 }
 0x424   : > { %v8170_v33 = vadd.f32 %v8750_v0, %v8138_v25  ;;  %vm8013_vm14 = vcmp.gt.f32.partialorder %v7981_v41, 1.0  ;;  %8109 = vst [vmem:[%s14963_s18 + $0xf8] sm:$0xff] %v7981_v41 }
 0x425   : > { %8203 = vst [vmem:[%s15012_s22 + $0xe8] sm:$0xff] %v8171_v13  ;;  %v8753_v56 = vsel %vm8013_vm14, 1.0, %v14989_v42  ;;  %vm8012_vm15 = vcmp.gt.f32.partialorder %v7980_v53, 1.0  ;;  %8108 = vst [vmem:[%s14963_s18 + $0xf0] sm:$0xff] %v7980_v53 }
 0x426   : > { %8202 = vst [vmem:[%s15012_s22 + $0xe0] sm:$0xff] %v8170_v33  ;;  %v8173_v59 = vadd.f32 %v8753_v56, %v8141_v17  ;;  %v8752_v50 = vsel %vm8012_vm15, 1.0, %v14989_v42 }
 0x427   : > { %v8172_v9 = vadd.f32 %v8752_v50, %v8140_v12 }
 0x428   : > { %8205 = vst [vmem:[%s15012_s22 + $0xf8] sm:$0xff] %v8173_v59 }
 0x429   : > { %8204 = vst [vmem:[%s15012_s22 + $0xf0] sm:$0xff] %v8172_v9 }
 0x42a PF: > { %s20_s30 = sadd.s32 1, %s11099_s30  }
 0x42b   : > { %p17_p4 = scmp.ge.s32.totalorder %s20_s30, 4  }
 0x42d   :  { %19 = sbr.rel (!%p17_p4) target bundleno = 1 (0x1), region = 128 }

</bundles_post_ra>
